<compile_context>
chip_gen: v7x
topology: tpu7x:2x2x1
jax: 0.10.0
libtpu: 0.0.40
codegen_flags: <defaults>
</compile_context>

<pallas_src>
import jax
import jax.numpy as jnp
from jax.experimental import pallas as pl
from jax.experimental.pallas import tpu as pltpu

FE = 1280            # backbone output channels ("fe" in the module)
FE_FEATURES = 2048   # fc1 output features ("fe_features" in the module)
TF = 1024            # tile width along the fc1 feature dimension
N_SPLIT = 2          # parallel split of the F reduction (v7x: 2 TensorCores)


def encoder_head(feat, w1, b1, wa, ba, wc, bc, *, tf=TF, n_split=N_SPLIT):
    """feat: [B, T, W, C] backbone feature map (f32, channels-last).

    Returns (clipwise [B, K], framewise_max [B, K]); the module's eval-mode
    forward returns framewise_max.
    """
    B, T, W, C = feat.shape
    F = w1.shape[1]
    K = wa.shape[1]
    BT = B * T
    assert C == FE and F == FE_FEATURES
    nf = F // tf
    assert F % tf == 0 and nf % n_split == 0
    nf_per = nf // n_split

    feat2 = feat.reshape(BT, W, C)
    w1_bf = w1.astype(jnp.bfloat16)     # stream the 10 MiB fc1 weight as bf16

    # key[i] encodes (batch, frame) so that |key[i] - key[j]| == 1 iff rows
    # i and j are time-neighbours inside the SAME batch element.  This makes
    # the rolled-neighbour masks independent of roll direction and of the
    # wrap-around rows.
    rows = jnp.arange(BT)
    key = ((rows // T) * (T + 2) + rows % T).astype(jnp.float32).reshape(BT, 1)

    # ---- kernel 1: mean over W, then max_pool + avg_pool (k=3,p=1) over T --
    def pool_kernel(feat_ref, key_ref, x_ref):
        xm = jnp.mean(feat_ref[...], axis=1)              # (BT, C)
        k = key_ref[...]                                  # (BT, 1)
        neg = jnp.float32(-jnp.inf)
        x1 = xm                                           # running max
        x2 = xm                                           # running sum (avg*3)
        for s in (1, BT - 1):                             # +1 / -1 time shift
            xr = pltpu.roll(xm, s, 0)                     # XLU sublane rotate
            kr = pltpu.roll(k, s, 0)
            ok = jnp.abs(kr - k) == 1.0                   # same-batch neighbour
            x1 = jnp.maximum(x1, jnp.where(ok, xr, neg))  # -inf pad for max
            x2 = x2 + jnp.where(ok, xr, 0.0)              # 0 pad for avg
        # count_include_pad=True avg -> always divide by 3
        x_ref[...] = x1 + x2 * (1.0 / 3.0)

    x_pooled = pl.pallas_call(
        pool_kernel,
        out_shape=jax.ShapeDtypeStruct((BT, C), jnp.float32),
    )(feat2, key)

    # ---- kernel 2: fc1 + ReLU + att/cla projections, partials over F -------
    # Grid (n_split, nf_per): outer axis is "parallel" (one half of the F
    # reduction per TensorCore on v7x), inner axis accumulates into the
    # resident (1, BT, K) output blocks.
    def mm_kernel(x_ref, w1_ref, b1_ref, wa_ref, wc_ref, att_ref, cla_ref):
        f = pl.program_id(1)

        @pl.when(f == 0)
        def _init():
            att_ref[...] = jnp.zeros_like(att_ref)
            cla_ref[...] = jnp.zeros_like(cla_ref)

        y = jnp.dot(x_ref[...].astype(jnp.bfloat16), w1_ref[...],
                    preferred_element_type=jnp.float32)   # (BT, tf)
        y = jnp.maximum(y + b1_ref[...], 0.0)             # fc1 bias + ReLU
        att_ref[...] += jnp.dot(y, wa_ref[...],
                                preferred_element_type=jnp.float32)[None]
        cla_ref[...] += jnp.dot(y, wc_ref[...],
                                preferred_element_type=jnp.float32)[None]

    att_part, cla_part = pl.pallas_call(
        mm_kernel,
        out_shape=(jax.ShapeDtypeStruct((n_split, BT, K), jnp.float32),
                   jax.ShapeDtypeStruct((n_split, BT, K), jnp.float32)),
        grid=(n_split, nf_per),
        in_specs=[
            pl.BlockSpec((BT, C), lambda p, f: (0, 0)),              # pooled x
            pl.BlockSpec((C, tf), lambda p, f: (0, p * nf_per + f)),  # w1 (bf16)
            pl.BlockSpec((1, tf), lambda p, f: (0, p * nf_per + f)),  # b1
            pl.BlockSpec((tf, K), lambda p, f: (p * nf_per + f, 0)),  # att w
            pl.BlockSpec((tf, K), lambda p, f: (p * nf_per + f, 0)),  # cla w
        ],
        out_specs=(
            pl.BlockSpec((1, BT, K), lambda p, f: (p, 0, 0)),
            pl.BlockSpec((1, BT, K), lambda p, f: (p, 0, 0)),
        ),
        compiler_params=pltpu.CompilerParams(
            dimension_semantics=("parallel", "arbitrary"),
            vmem_limit_bytes=32 * 1024 * 1024),
    )(x_pooled, w1_bf, b1, wa, wc)

    # ---- kernel 3: combine partials, bias, clamp/softmax/sigmoid, reduce ---
    att4 = att_part.reshape(n_split, B, T, K)   # free XLA reshape in HBM
    cla4 = cla_part.reshape(n_split, B, T, K)

    def fin_kernel(attp_ref, clap_ref, ba_ref, bc_ref, clip_ref, fmax_ref):
        att = jnp.sum(attp_ref[...], axis=0) + ba_ref[...]        # (B, T, K)
        cla = jnp.sum(clap_ref[...], axis=0) + bc_ref[...]        # (B, T, K)
        att = jnp.clip(att, -10.0, 10.0)
        cla = jax.nn.sigmoid(cla)
        m = jnp.max(att, axis=1, keepdims=True)
        e = jnp.exp(att - m)
        norm_att = e / jnp.sum(e, axis=1, keepdims=True)          # softmax over T
        clip_ref[...] = jnp.sum(norm_att * cla, axis=1)           # (B, K)
        fmax_ref[...] = jnp.max(cla, axis=1)                      # (B, K)

    clipwise, framewise_max = pl.pallas_call(
        fin_kernel,
        out_shape=(jax.ShapeDtypeStruct((B, K), jnp.float32),
                   jax.ShapeDtypeStruct((B, K), jnp.float32)),
    )(att4, cla4, ba, bc)
    return clipwise, framewise_max


def _ref_head(feat, w1, b1, wa, ba, wc, bc):
    """Pure-JAX reference of the same head (mirrors the kernel's bf16 fc1)."""
    x = jnp.mean(feat, axis=2)                                    # [B, T, C]
    T = x.shape[1]
    xpm = jnp.pad(x, ((0, 0), (1, 1), (0, 0)), constant_values=-jnp.inf)
    xpa = jnp.pad(x, ((0, 0), (1, 1), (0, 0)))
    x1 = jnp.maximum(jnp.maximum(xpm[:, 0:T], xpm[:, 1:T + 1]), xpm[:, 2:T + 2])
    x2 = (xpa[:, 0:T] + xpa[:, 1:T + 1] + xpa[:, 2:T + 2]) * (1.0 / 3.0)
    x = x1 + x2
    xb = x.astype(jnp.bfloat16).astype(jnp.float32)               # mirror kernel
    w1b = w1.astype(jnp.bfloat16).astype(jnp.float32)
    y = jax.nn.relu(xb @ w1b + b1)                                # [B, T, F]
    att = jnp.clip(y @ wa + ba, -10.0, 10.0)                      # [B, T, K]
    cla = jax.nn.sigmoid(y @ wc + bc)
    norm_att = jax.nn.softmax(att, axis=1)
    clip = jnp.sum(norm_att * cla, axis=1)                        # [B, K]
    maxfw = jnp.max(cla, axis=1)                                  # [B, K]
    return clip, maxfw


if __name__ == "__main__":
    # Small shapes: batch=2, frames T=8, reduced-freq W=4, classes_num=8.
    # fe=1280 and fe_features=2048 are fixed by the module definition.
    B, T, W, K = 2, 8, 4, 8
    rng = jax.random.PRNGKey(0)
    k1, k2, k3, k4, k5, k6, k7 = jax.random.split(rng, 7)

    feat = jax.random.normal(k1, (B, T, W, FE), jnp.float32)           # backbone feature map
    w1 = jax.random.normal(k2, (FE, FE_FEATURES), jnp.float32) * 0.02   # fc1.weight.T
    b1 = jax.random.normal(k3, (1, FE_FEATURES), jnp.float32) * 0.02    # fc1.bias
    wa = jax.random.normal(k4, (FE_FEATURES, K), jnp.float32) * 0.02    # att 1x1 conv weight.T
    ba = jax.random.normal(k5, (1, K), jnp.float32) * 0.02              # att bias
    wc = jax.random.normal(k6, (FE_FEATURES, K), jnp.float32) * 0.02    # cla 1x1 conv weight.T
    bc = jax.random.normal(k7, (1, K), jnp.float32) * 0.02              # cla bias

    clipwise, framewise_max = encoder_head(feat, w1, b1, wa, ba, wc, bc)
    framewise_max = jax.block_until_ready(framewise_max)   # eval-mode return value

    ref_clip, ref_max = _ref_head(feat, w1, b1, wa, ba, wc, bc)
    assert clipwise.shape == (B, K) and framewise_max.shape == (B, K)
    assert jnp.allclose(clipwise, ref_clip, rtol=2e-3, atol=2e-3)
    assert jnp.allclose(framewise_max, ref_max, rtol=2e-3, atol=2e-3)

    print("KERNEL_OK")
</pallas_src>

<mosaic_0001>
module attributes {stable_mosaic.version = 11 : i64} {
  func.func @pool_kernel(%arg0: memref<16x4x1280xf32, #tpu.memory_space<vmem>>, %arg1: memref<16x1xf32, #tpu.memory_space<vmem>>, %arg2: memref<16x1280xf32, #tpu.memory_space<vmem>>) attributes {dimension_semantics = [], scalar_prefetch = 0 : i64, scratch_operands = 0 : i64, tpu.core_type = #tpu.core_type<tc>} {
    %c0 = arith.constant 0 : index
    %c0_0 = arith.constant 0 : index
    %c0_1 = arith.constant 0 : index
    %0 = vector.load %arg0[%c0, %c0_0, %c0_1] : memref<16x4x1280xf32, #tpu.memory_space<vmem>>, vector<16x4x1280xf32>
    %cst = arith.constant dense<0.000000e+00> : vector<16x1280xf32>
    %1 = vector.multi_reduction <add>, %0, %cst [1] : vector<16x4x1280xf32> to vector<16x1280xf32>
    %cst_2 = arith.constant 4.000000e+00 : f32
    %2 = vector.broadcast %cst_2 : f32 to vector<16x1280xf32>
    %3 = arith.divf %1, %2 : vector<16x1280xf32>
    %c0_3 = arith.constant 0 : index
    %c0_4 = arith.constant 0 : index
    %4 = vector.load %arg1[%c0_3, %c0_4] : memref<16x1xf32, #tpu.memory_space<vmem>>, vector<16x1xf32>
    %c1_i32 = arith.constant 1 : i32
    %5 = tpu.dynamic_rotate %3 by %c1_i32 dim 0 : vector<16x1280xf32>, i32 -> vector<16x1280xf32>
    %c1_i32_5 = arith.constant 1 : i32
    %6 = tpu.dynamic_rotate %4 by %c1_i32_5 dim 0 : vector<16x1xf32>, i32 -> vector<16x1xf32>
    %7 = arith.subf %6, %4 : vector<16x1xf32>
    %8 = math.absf %7 : vector<16x1xf32>
    %cst_6 = arith.constant 1.000000e+00 : f32
    %9 = vector.broadcast %cst_6 : f32 to vector<16x1xf32>
    %10 = arith.cmpf oeq, %8, %9 : vector<16x1xf32>
    %cst_7 = arith.constant 0xFF800000 : f32
    %11 = vector.shape_cast %10 : vector<16x1xi1> to vector<16x1xi1>
    %12 = vector.broadcast %11 : vector<16x1xi1> to vector<16x1280xi1>
    %13 = vector.broadcast %cst_7 : f32 to vector<16x1280xf32>
    %14 = arith.select %12, %5, %13 : vector<16x1280xi1>, vector<16x1280xf32>
    %15 = arith.maximumf %3, %14 : vector<16x1280xf32>
    %cst_8 = arith.constant 0.000000e+00 : f32
    %16 = vector.shape_cast %10 : vector<16x1xi1> to vector<16x1xi1>
    %17 = vector.broadcast %16 : vector<16x1xi1> to vector<16x1280xi1>
    %18 = vector.broadcast %cst_8 : f32 to vector<16x1280xf32>
    %19 = arith.select %17, %5, %18 : vector<16x1280xi1>, vector<16x1280xf32>
    %20 = arith.addf %3, %19 : vector<16x1280xf32>
    %c15_i32 = arith.constant 15 : i32
    %21 = tpu.dynamic_rotate %3 by %c15_i32 dim 0 : vector<16x1280xf32>, i32 -> vector<16x1280xf32>
    %c15_i32_9 = arith.constant 15 : i32
    %22 = tpu.dynamic_rotate %4 by %c15_i32_9 dim 0 : vector<16x1xf32>, i32 -> vector<16x1xf32>
    %23 = arith.subf %22, %4 : vector<16x1xf32>
    %24 = math.absf %23 : vector<16x1xf32>
    %cst_10 = arith.constant 1.000000e+00 : f32
    %25 = vector.broadcast %cst_10 : f32 to vector<16x1xf32>
    %26 = arith.cmpf oeq, %24, %25 : vector<16x1xf32>
    %cst_11 = arith.constant 0xFF800000 : f32
    %27 = vector.shape_cast %26 : vector<16x1xi1> to vector<16x1xi1>
    %28 = vector.broadcast %27 : vector<16x1xi1> to vector<16x1280xi1>
    %29 = vector.broadcast %cst_11 : f32 to vector<16x1280xf32>
    %30 = arith.select %28, %21, %29 : vector<16x1280xi1>, vector<16x1280xf32>
    %31 = arith.maximumf %15, %30 : vector<16x1280xf32>
    %cst_12 = arith.constant 0.000000e+00 : f32
    %32 = vector.shape_cast %26 : vector<16x1xi1> to vector<16x1xi1>
    %33 = vector.broadcast %32 : vector<16x1xi1> to vector<16x1280xi1>
    %34 = vector.broadcast %cst_12 : f32 to vector<16x1280xf32>
    %35 = arith.select %33, %21, %34 : vector<16x1280xi1>, vector<16x1280xf32>
    %36 = arith.addf %20, %35 : vector<16x1280xf32>
    %cst_13 = arith.constant 0.333333343 : f32
    %37 = vector.broadcast %cst_13 : f32 to vector<16x1280xf32>
    %38 = arith.mulf %36, %37 : vector<16x1280xf32>
    %39 = arith.addf %31, %38 : vector<16x1280xf32>
    %c0_14 = arith.constant 0 : index
    %c0_15 = arith.constant 0 : index
    %40 = vector.load %arg2[%c0_14, %c0_15] : memref<16x1280xf32, #tpu.memory_space<vmem>>, vector<16x1280xf32>
    tpu.vector_store %arg2[%c0_14, %c0_15], %39 {strides = array<i32>} : memref<16x1280xf32, #tpu.memory_space<vmem>>, vector<16x1280xf32>,
    return
  }
}

</mosaic_0001>

<bundles_post_ra>
// kernel: tpu_custom_call.1
= control target key start
LH: loop header
LB: loop body
LE: loop exit
PB: predicated region body
PF: predicated region fallthrough
CT: control target
= control target key end

     0   :  { %7 = vsyncpa [#allocation3], 0  ;;  %s12708_s0 = inlined_call_operand.hbm [shape: f32[16,4,1280], index: 0, kind: input, shape index: {}]   ;;  %s12709_s1 = inlined_call_operand.vmem [shape: f32[16,1], index: 1, kind: input, shape index: {}]   ;;  %s12710_s2 = inlined_call_operand.hbm [shape: f32[16,1280], index: 2, kind: output, shape index: {}]  }
   0x1   :  { %8 = vsyncpa [#allocation4], 0  ;;  %s5085_s9 = smov [#allocation2]   ;;  %s5037_s13 = scalar_lea.hbm %s12708_s0, 10240 }
   0x2   :  { %s14_s10 = sshll.u32 %s5085_s9, 4  ;;  %p5038_p0 = scmp.ne.s32.totalorder %s12708_s0, %s5037_s13  ;;  %s15_s10 = int_to_ptr.vmem [resolvable:$true] %s14_s10 }
   0x3   :  { %p5041_p1 = scmp.lt.u32.totalorder %s5037_s13, %s12708_s0 }
   0x5   :  { %p5043_p2 = pnand %p5041_p1, %p5038_p0 }
   0x7   :  { %5046 = shalt.err (!%p5043_p2)
}
   0x8   :  { %s5047_s18 = scalar_lea.vmem %s15_s10, 10240  ;;  %p5052_p4 = scmp.lt.s32.totalorder %s15_s10, %s15_s10 }
   0x9   :  { %p5048_p3 = scmp.ne.s32.totalorder %s15_s10, %s5047_s18  ;;  %p5053_p5 = scmp.lt.s32.totalorder %s5047_s18, %s5047_s18 }
   0xb   :  { %p5054_p6 = por %p5053_p5, %p5052_p4 }
   0xd   :  { %p5055_p7 = pnand %p5054_p6, %p5048_p3 }
   0xf   :  { %5058 = shalt.err (!%p5055_p7)
}
  0x10   :  { %s5086_s19 = smov 640   ;;  %s5087_s20 = smov 40  }
  0x11   :  { %20 = dma.hbm_to_vmem [thread:$0]  %s12708_s0, 10240, %s15_s10, [#allocation3], %s5086_s19, %s5086_s19, %s5087_s20  }
  0x12   :  { %5081 = dma.done.wait [#allocation3], 10240  }
  0x13   :  { %5082 = vsyncadd [#allocation3], 4294957056  ;;  %v1977_v0 = vlaneseq  ;;  %v5088_v1 = vmov 0   ;;  %v1628_v3 = vld [vmem:[%s12709_s1] sm:$0xff]  ;;  %v1629_v4 = vld [vmem:[%s12709_s1 + $0x8] sm:$0xff]  ;;  %vm346_vm2 = vcmask 1043456  }
  0x14   :  { %4906 = vset.pattern.permute.xlu1 %v5088_v1  ;;  %4905 = vset.pattern.permute.xlu0 %v5088_v1  ;;  %v3061_v5 = vrot.slane %v1628_v3, 1  ;;  %v3062_v6 = vrot.slane %v1629_v4, 1  ;;  %v2000_v7 = vrot.slane %v1628_v3, 7  ;;  %v2001_v8 = vrot.slane %v1629_v4, 7  ;;  %v5131_v9 = vld [vmem:[#allocation2] sm:$0xff]  ;;  %v5133_v10 = vld [vmem:[#allocation2 + $0x8] sm:$0xff] }
  0x15   :  { %v5121_v2 = vshrl.u32 %v1977_v0, 7  ;;  %v5135_v11 = vld [vmem:[#allocation2 + $0x10] sm:$0xff]  ;;  %v5145_v16 = vld [vmem:[#allocation2 + $0x18] sm:$0xff]  ;;  %v5147_v17 = vld [vmem:[#allocation2 + $0x20] sm:$0xff]  ;;  %v5171_v32 = vsel %vm346_vm2, %v5131_v9, 0.0  ;;  %v13099_v45 = vcombine.high %v5131_v9, %v5131_v9  ;;  %vm1790_vm7 = vcmask 1041409  }
  0x16   :  { %v5149_v18 = vld [vmem:[#allocation2 + $0x28] sm:$0xff]  ;;  %v5151_v23 = vld [vmem:[#allocation2 + $0x30] sm:$0xff]  ;;  %v5153_v24 = vld [vmem:[#allocation2 + $0x38] sm:$0xff]  ;;  %vm1792_vm8 = vcmask 1042434   ;;  %vm1794_vm9 = vcmask 1043459   ;;  %vm1796_vm10 = vcmask 1044484  }
  0x17   :  { %13073 = vst [vmem:[#allocation8_spill] sm:$0xff] %v5121_v2  ;;  %vm3040_vm0 = vcmp.lt.s32.totalorder %v5121_v2, 7  ;;  %vm1979_vm1 = vcmp.lt.s32.totalorder %v5121_v2, 1  ;;  %v5155_v25 = vld [vmem:[#allocation2 + $0x40] sm:$0xff]  ;;  %v5157_v26 = vld [vmem:[#allocation2 + $0x48] sm:$0xff]  ;;  %v5159_v27 = vld [vmem:[#allocation2 + $0x50] sm:$0xff] }
  0x18   :  { %v3063_v12 = vsel %vm3040_vm0, %v3061_v5, %v3062_v6  ;;  %v2003_v13 = vsel %vm1979_vm1, %v2001_v8, %v2000_v7  ;;  %v3064_v14 = vsel %vm3040_vm0, %v3062_v6, %v3061_v5  ;;  %v2002_v15 = vsel %vm1979_vm1, %v2000_v7, %v2001_v8  ;;  %v5161_v28 = vld [vmem:[#allocation2 + $0x58] sm:$0xff]  ;;  %v5173_v36 = vld [vmem:[#allocation2 + $0x60] sm:$0xff]  ;;  %v5175_v37 = vld [vmem:[#allocation2 + $0x68] sm:$0xff]  ;;  %s5089_s0 = smov [#allocation5]  }
  0x19   :  { %v3065_v19 = vsub.f32 %v3063_v12, %v1628_v3  ;;  %v2004_v20 = vsub.f32 %v2003_v13, %v1628_v3  ;;  %v3066_v21 = vsub.f32 %v3064_v14, %v1629_v4  ;;  %v2005_v22 = vsub.f32 %v2002_v15, %v1629_v4  ;;  %v5179_v40 = vld [vmem:[#allocation2 + $0x70] sm:$0xff]  ;;  %v5181_v41 = vld [vmem:[#allocation2 + $0x78] sm:$0xff]  ;;  %v5183_v42 = vld [vmem:[#allocation2 + $0x80] sm:$0xff]  ;;  %s4886_s1 = sshll.u32 %s5089_s0, 4  ;;  %s4887_s1 = int_to_ptr.vmem [resolvable:$true] %s4886_s1 }
  0x1a   :  { %v5191_v46 = vld [vmem:[#allocation2 + $0x88] sm:$0xff]  ;;  %v5193_v47 = vld [vmem:[#allocation2 + $0x90] sm:$0xff]  ;;  %v5195_v48 = vld [vmem:[#allocation2 + $0x98] sm:$0xff]  ;;  %vm1798_vm11 = vcmask 1045509   ;;  %vm1800_vm12 = vcmask 1046534   ;;  %vm1802_vm13 = vcmask 1047559   ;;  %p5064_p9 = scmp.lt.s32.totalorder %s4887_s1, %s4887_s1 }
  0x1b   :  { %v3067_v33 = vand.u32 2147483647, %v3065_v19  ;;  %v2006_v34 = vand.u32 2147483647, %v2004_v20  ;;  %v3068_v35 = vand.u32 2147483647, %v3066_v21 }
  0x1c   :  { %v2007_v39 = vand.u32 2147483647, %v2005_v22  ;;  %v5201_v52 = vld [vmem:[#allocation2 + $0xa0] sm:$0xff]  ;;  %v5203_v53 = vld [vmem:[#allocation2 + $0xa8] sm:$0xff]  ;;  %v5205_v54 = vld [vmem:[#allocation2 + $0xb0] sm:$0xff]  ;;  %s5059_s27 = scalar_lea.vmem %s4887_s1, 2560 }
  0x1d   :  { %vm3069_vm3 = vcmp.eq.f32.partialorder %v3067_v33, 1.0  ;;  %vm2008_vm4 = vcmp.eq.f32.partialorder %v2006_v34, 1.0  ;;  %vm3070_vm5 = vcmp.eq.f32.partialorder %v3068_v35, 1.0  ;;  %v5210_v57 = vld [vmem:[#allocation2 + $0xb8] sm:$0xff]  ;;  %v5212_v58 = vld [vmem:[#allocation2 + $0xc0] sm:$0xff]  ;;  %v5214_v59 = vld [vmem:[#allocation2 + $0xc8] sm:$0xff]  ;;  %p5060_p8 = scmp.ne.s32.totalorder %s4887_s1, %s5059_s27  ;;  %p5065_p10 = scmp.lt.s32.totalorder %s5059_s27, %s5059_s27 }
  0x1e   :  { %v3071_v50 = vsel %vm3069_vm3, 1, %v5088_v1  ;;  %v2010_v51 = vsel %vm2008_vm4, 1, %v5088_v1  ;;  %vm2009_vm6 = vcmp.eq.f32.partialorder %v2007_v39, 1.0  ;;  %v3072_v56 = vsel %vm3070_vm5, 1, %v5088_v1  ;;  %v5223_v0 = vld [vmem:[#allocation2 + $0xd0] sm:$0xff]  ;;  %v5225_v3 = vld [vmem:[#allocation2 + $0xd8] sm:$0xff] }
  0x1f   :  { %3074 = vperm.xlu1 %4906, %v3071_v50   ;;  %2013 = vperm.xlu0 %4905, %v2010_v51   ;;  %v2011_v63 = vsel %vm2009_vm6, 1, %v5088_v1  ;;  %v5227_v4 = vld [vmem:[#allocation2 + $0xe0] sm:$0xff]  ;;  %v5235_v8 = vld [vmem:[#allocation2 + $0xe8] sm:$0xff]  ;;  %v5237_v12 = vld [vmem:[#allocation2 + $0xf0] sm:$0xff]  ;;  %v348_v33 = vrot.slane %v5171_v32, 4  ;;  %p5066_p11 = por %p5065_p10, %p5064_p9 }
  0x20   :  { %v5239_v1 = vld [vmem:[#allocation2 + $0xf8] sm:$0xff]  ;;  %v5249_v20 = vld [vmem:[#allocation2 + $0x100] sm:$0xff]  ;;  %v5251_v21 = vld [vmem:[#allocation2 + $0x108] sm:$0xff] }
  0x21   :  { %v5253_v22 = vld [vmem:[#allocation2 + $0x110] sm:$0xff]  ;;  %v5263_v50 = vld [vmem:[#allocation2 + $0x118] sm:$0xff]  ;;  %v5265_v51 = vld [vmem:[#allocation2 + $0x120] sm:$0xff]  ;;  %v349_v61 = vadd.f32 %v348_v33, %v5171_v32  ;;  %v354_v32 = vsel %vm346_vm2, %v13099_v45, 0.0  ;;  %p5067_p12 = pnand %p5066_p11, %p5060_p8 }
  0x22   :  { %13074 = vst [vmem:[#allocation9_spill] sm:$0xff] %v5253_v22  ;;  %13075 = vst [vmem:[#allocation10_spill] sm:$0xff] %v5263_v50  ;;  %v5267_v19 = vld [vmem:[#allocation2 + $0x128] sm:$0xff]  ;;  %v5275_v15 = vld [vmem:[#allocation2 + $0x130] sm:$0xff]  ;;  %v355_v29 = vrot.slane %v354_v32, 4 }
  0x23   :  { %3077 = vperm.xlu1 %4906, %v3072_v56   ;;  %2016 = vperm.xlu0 %4905, %v2011_v63   ;;  %13076 = vst [vmem:[#allocation11_spill] sm:$0xff] %v5265_v51  ;;  %13077 = vst [vmem:[#allocation12_spill] sm:$0xff] %v5267_v19  ;;  %v5277_v39 = vld [vmem:[#allocation2 + $0x138] sm:$0xff]  ;;  %v5279_v56 = vld [vmem:[#allocation2 + $0x140] sm:$0xff] }
  0x24   :  { %13078 = vst [vmem:[#allocation13_spill] sm:$0xff] %v5275_v15  ;;  %13079 = vst [vmem:[#allocation14_spill] sm:$0xff] %v5277_v39  ;;  %v5289_v13 = vld [vmem:[#allocation2 + $0x148] sm:$0xff]  ;;  %v5291_v35 = vld [vmem:[#allocation2 + $0x150] sm:$0xff] }
  0x25   :  { %13080 = vst [vmem:[#allocation15_spill] sm:$0xff] %v5279_v56  ;;  %13081 = vst [vmem:[#allocation16_spill] sm:$0xff] %v5289_v13  ;;  %v5293_v7 = vld [vmem:[#allocation2 + $0x158] sm:$0xff]  ;;  %v5302_v5 = vld [vmem:[#allocation2 + $0x160] sm:$0xff]  ;;  %v13121_v56 = vcombine.high %v5147_v17, %v5147_v17 }
  0x26   :  { %13082 = vst [vmem:[#allocation17_spill] sm:$0xff] %v5291_v35  ;;  %13083 = vst [vmem:[#allocation18_spill] sm:$0xff] %v5293_v7  ;;  %v5304_v34 = vld [vmem:[#allocation2 + $0x168] sm:$0xff]  ;;  %v5306_v62 = vld [vmem:[#allocation2 + $0x170] sm:$0xff] }
  0x27   :  { %13084 = vst [vmem:[#allocation19_spill] sm:$0xff] %v5302_v5  ;;  %13085 = vst [vmem:[#allocation20_spill] sm:$0xff] %v5304_v34  ;;  %v5316_v60 = vld [vmem:[#allocation2 + $0x178] sm:$0xff]  ;;  %v5318_v55 = vld [vmem:[#allocation2 + $0x180] sm:$0xff] }
  0x28   :  { %13086 = vst [vmem:[#allocation21_spill] sm:$0xff] %v5306_v62  ;;  %13087 = vst [vmem:[#allocation22_spill] sm:$0xff] %v5316_v60  ;;  %v5320_v49 = vld [vmem:[#allocation2 + $0x188] sm:$0xff]  ;;  %v5330_v44 = vld [vmem:[#allocation2 + $0x190] sm:$0xff] }
  0x29   :  { %13088 = vst [vmem:[#allocation23_spill] sm:$0xff] %v5318_v55  ;;  %13089 = vst [vmem:[#allocation24_spill] sm:$0xff] %v5320_v49  ;;  %v5332_v14 = vld [vmem:[#allocation2 + $0x198] sm:$0xff]  ;;  %v5334_v43 = vld [vmem:[#allocation2 + $0x1a0] sm:$0xff] }
  0x2a   :  { %13090 = vst [vmem:[#allocation25_spill] sm:$0xff] %v5330_v44  ;;  %13091 = vst [vmem:[#allocation26_spill] sm:$0xff] %v5332_v14  ;;  %v5344_v31 = vld [vmem:[#allocation2 + $0x1a8] sm:$0xff]  ;;  %v5346_v63 = vld [vmem:[#allocation2 + $0x1b0] sm:$0xff]  ;;  %v350_v44 = vrot.slane %v349_v61, 2  ;;  %v13118_v14 = vcombine.high %v5133_v10, %v5133_v10 }
  0x2b   :  { %13092 = vst [vmem:[#allocation27_spill] sm:$0xff] %v5334_v43  ;;  %13093 = vst [vmem:[#allocation28_spill] sm:$0xff] %v5344_v31  ;;  %v5348_v30 = vld [vmem:[#allocation2 + $0x1b8] sm:$0xff]  ;;  %v5357_v2 = vld [vmem:[#allocation2 + $0x1c0] sm:$0xff] }
  0x2c   :  { %13094 = vst [vmem:[#allocation29_spill] sm:$0xff] %v5346_v63  ;;  %13095 = vst [vmem:[#allocation30_spill] sm:$0xff] %v5348_v30  ;;  %v5359_v6 = vld [vmem:[#allocation2 + $0x1c8] sm:$0xff]  ;;  %v5361_v5 = vld [vmem:[#allocation2 + $0x1d0] sm:$0xff]  ;;  %v5409_v34 = vadd.f32 %v350_v44, %v349_v61  ;;  %v361_v63 = vsel %vm346_vm2, %v5133_v10, 0.0  ;;  %v389_v10 = vsel %vm346_vm2, %v5145_v16, 0.0 }
  0x2d   :  { %13096 = vst [vmem:[#allocation31_spill] sm:$0xff] %v5357_v2  ;;  %13097 = vst [vmem:[#allocation32_spill] sm:$0xff] %v5359_v6  ;;  %v5373_v33 = vld [vmem:[#allocation2 + $0x1d8] sm:$0xff]  ;;  %v5375_v60 = vld [vmem:[#allocation2 + $0x1e0] sm:$0xff] }
  0x2e   :  { %13098 = vst [vmem:[#allocation33_spill] sm:$0xff] %v5361_v5  ;;  %13100 = vst [vmem:[#allocation34_spill] sm:$0xff] %v5373_v33  ;;  %v5377_v62 = vld [vmem:[#allocation2 + $0x1e8] sm:$0xff]  ;;  %v5385_v49 = vld [vmem:[#allocation2 + $0x1f0] sm:$0xff]  ;;  %v356_v5 = vadd.f32 %v355_v29, %v354_v32  ;;  %v352_v32 = vrot.slane %v5409_v34, 1 }
  0x2f   :  { %13101 = vst [vmem:[#allocation35_spill] sm:$0xff] %v5375_v60  ;;  %13102 = vst [vmem:[#allocation36_spill] sm:$0xff] %v5377_v62  ;;  %v5387_v9 = vld [vmem:[#allocation2 + $0x1f8] sm:$0xff]  ;;  %v5389_v45 = vld [vmem:[#allocation2 + $0x200] sm:$0xff] }
  0x30   :  { %13103 = vst [vmem:[#allocation37_spill] sm:$0xff] %v5385_v49  ;;  %13104 = vst [vmem:[#allocation38_spill] sm:$0xff] %v5387_v9  ;;  %v5397_v43 = vld [vmem:[#allocation2 + $0x208] sm:$0xff]  ;;  %v5399_v38 = vld [vmem:[#allocation2 + $0x210] sm:$0xff]  ;;  %v357_v33 = vrot.slane %v356_v5, 2  ;;  %v13119_v49 = vcombine.high %v5135_v11, %v5135_v11 }
  0x31   :  { %13105 = vst [vmem:[#allocation39_spill] sm:$0xff] %v5389_v45  ;;  %13106 = vst [vmem:[#allocation40_spill] sm:$0xff] %v5397_v43  ;;  %v5401_v31 = vld [vmem:[#allocation2 + $0x218] sm:$0xff]  ;;  %v5411_v30 = vld [vmem:[#allocation2 + $0x220] sm:$0xff] }
  0x32   :  { %13107 = vst [vmem:[#allocation41_spill] sm:$0xff] %v5399_v38  ;;  %13108 = vst [vmem:[#allocation42_spill] sm:$0xff] %v5401_v31  ;;  %v5413_v7 = vld [vmem:[#allocation2 + $0x228] sm:$0xff]  ;;  %v5415_v2 = vld [vmem:[#allocation2 + $0x230] sm:$0xff]  ;;  %v368_v38 = vsel %vm346_vm2, %v13118_v14, 0.0  ;;  %v382_v55 = vsel %vm346_vm2, %v13119_v49, 0.0  ;;  %v13120_v14 = vcombine.high %v5145_v16, %v5145_v16 }
  0x33   :  { %13109 = vst [vmem:[#allocation43_spill] sm:$0xff] %v5411_v30  ;;  %13110 = vst [vmem:[#allocation44_spill] sm:$0xff] %v5413_v7  ;;  %v5423_v6 = vld [vmem:[#allocation2 + $0x238] sm:$0xff]  ;;  %v5425_v44 = vld [vmem:[#allocation2 + $0x240] sm:$0xff]  ;;  %v358_v30 = vadd.f32 %v357_v33, %v356_v5  ;;  %v362_v5 = vrot.slane %v361_v63, 4  ;;  %v369_v33 = vrot.slane %v368_v38, 4 }
  0x34   :  { %13111 = vst [vmem:[#allocation45_spill] sm:$0xff] %v5415_v2  ;;  %13112 = vst [vmem:[#allocation46_spill] sm:$0xff] %v5423_v6  ;;  %v5427_v61 = vld [vmem:[#allocation2 + $0x248] sm:$0xff]  ;;  %v5437_v35 = vld [vmem:[#allocation2 + $0x250] sm:$0xff]  ;;  %v410_v16 = vsel %vm346_vm2, %v13121_v56, 0.0  ;;  %v5495_v56 = vadd.f32 %v352_v32, %v5409_v34 }
  0x35   :  { %13113 = vst [vmem:[#allocation47_spill] sm:$0xff] %v5425_v44  ;;  %13114 = vst [vmem:[#allocation48_spill] sm:$0xff] %v5427_v61  ;;  %v5439_v29 = vld [vmem:[#allocation2 + $0x258] sm:$0xff]  ;;  %v5447_v45 = vld [vmem:[#allocation2 + $0x260] sm:$0xff]  ;;  %v375_v44 = vsel %vm346_vm2, %v5135_v11, 0.0  ;;  %v396_v61 = vsel %vm346_vm2, %v13120_v14, 0.0  ;;  %v363_v49 = vadd.f32 %v362_v5, %v361_v63  ;;  %v370_v2 = vadd.f32 %v369_v33, %v368_v38 }
  0x36   :  { %13115 = vst [vmem:[#allocation49_spill] sm:$0xff] %v5437_v35  ;;  %13116 = vst [vmem:[#allocation50_spill] sm:$0xff] %v5439_v29  ;;  %v376_v29 = vrot.slane %v375_v44, 4  ;;  %v383_v35 = vrot.slane %v382_v55, 4  ;;  %v403_v11 = vsel %vm346_vm2, %v5147_v17, 0.0  ;;  %v359_v6 = vrot.slane %v358_v30, 1 }
  0x37   :  { %13117 = vst [vmem:[#allocation51_spill] sm:$0xff] %v5447_v45  ;;  %v390_v45 = vrot.slane %v389_v10, 4  ;;  %v397_v43 = vrot.slane %v396_v61, 4  ;;  %v404_v9 = vrot.slane %v403_v11, 4  ;;  %v364_v62 = vrot.slane %v363_v49, 2  ;;  %v5488_v51 = vld [vmem:[#allocation2 + $0x268] sm:$0xff] }
  0x38   :  { %v377_v31 = vadd.f32 %v376_v29, %v375_v44  ;;  %v384_v7 = vadd.f32 %v383_v35, %v382_v55  ;;  %v371_v60 = vrot.slane %v370_v2, 2  ;;  %13122 = vst [vmem:[#allocation52_spill] sm:$0xff] %v5488_v51  ;;  %v411_v35 = vrot.slane %v410_v16, 4  ;;  %v5490_v44 = vld [vmem:[#allocation2 + $0x270] sm:$0xff]  ;;  %v5492_v29 = vld [vmem:[#allocation2 + $0x278] sm:$0xff]  ;;  %13125 = vst [vmem:[#allocation55_spill] sm:$0xff] %v5495_v56 }
  0x39   :  { %v391_v39 = vadd.f32 %v390_v45, %v389_v10  ;;  %v398_v15 = vadd.f32 %v397_v43, %v396_v61  ;;  %v405_v19 = vadd.f32 %v404_v9, %v403_v11  ;;  %v365_v38 = vadd.f32 %v364_v62, %v363_v49  ;;  %13123 = vst [vmem:[#allocation53_spill] sm:$0xff] %v5490_v44 }
  0x3a   :  { %v378_v13 = vrot.slane %v377_v31, 2  ;;  %v385_v14 = vrot.slane %v384_v7, 2  ;;  %v372_v63 = vadd.f32 %v371_v60, %v370_v2  ;;  %13124 = vst [vmem:[#allocation54_spill] sm:$0xff] %v5492_v29  ;;  %v412_v9 = vadd.f32 %v411_v35, %v410_v16 }
  0x3b   :  { %v392_v33 = vrot.slane %v391_v39, 2  ;;  %v399_v50 = vrot.slane %v398_v15, 2  ;;  %v406_v17 = vrot.slane %v405_v19, 2  ;;  %v366_v45 = vrot.slane %v365_v38, 1 }
  0x3c   :  { %v379_v55 = vadd.f32 %v378_v13, %v377_v31  ;;  %v386_v5 = vadd.f32 %v385_v14, %v384_v7  ;;  %v373_v43 = vrot.slane %v372_v63, 1  ;;  %v413_v10 = vrot.slane %v412_v9, 2 }
  0x3d   :  { %v393_v31 = vadd.f32 %v392_v33, %v391_v39  ;;  %v400_v60 = vadd.f32 %v399_v50, %v398_v15  ;;  %v407_v61 = vadd.f32 %v406_v17, %v405_v19  ;;  %v5503_v11 = vadd.f32 %v359_v6, %v358_v30 }
  0x3e   :  { %v380_v2 = vrot.slane %v379_v55, 1  ;;  %v5505_v34 = vadd.f32 %v366_v45, %v365_v38  ;;  %v5507_v32 = vadd.f32 %v373_v43, %v372_v63  ;;  %v387_v49 = vrot.slane %v386_v5, 1 }
  0x3f   :  { %13126 = vst [vmem:[#allocation56_spill] sm:$0xff] %v5503_v11  ;;  %v414_v16 = vadd.f32 %v413_v10, %v412_v9  ;;  %v417_v39 = vsel %vm346_vm2, %v5149_v18, 0.0  ;;  %v13129_v15 = vcombine.high %v5149_v18, %v5149_v18  ;;  %v431_v19 = vsel %vm346_vm2, %v5151_v23, 0.0 }
  0x40   :  { %13127 = vst [vmem:[#allocation57_spill] sm:$0xff] %v5505_v34  ;;  %13128 = vst [vmem:[#allocation58_spill] sm:$0xff] %v5507_v32  ;;  %v5517_v14 = vadd.f32 %v380_v2, %v379_v55  ;;  %v394_v30 = vrot.slane %v393_v31, 1  ;;  %v401_v6 = vrot.slane %v400_v60, 1  ;;  %v418_v38 = vrot.slane %v417_v39, 4 }
  0x41   :  { %v424_v50 = vsel %vm346_vm2, %v13129_v15, 0.0  ;;  %v408_v63 = vrot.slane %v407_v61, 1  ;;  %v432_v33 = vrot.slane %v431_v19, 4  ;;  %v13131_v17 = vcombine.high %v5151_v23, %v5151_v23 }
  0x42   :  { %13130 = vst [vmem:[#allocation59_spill] sm:$0xff] %v5517_v14  ;;  %v425_v35 = vrot.slane %v424_v50, 4  ;;  %v419_v43 = vadd.f32 %v418_v38, %v417_v39  ;;  %v445_v9 = vsel %vm346_vm2, %v5153_v24, 0.0  ;;  %v13132_v55 = vcombine.high %v5153_v24, %v5153_v24 }
  0x43   :  { %v438_v45 = vsel %vm346_vm2, %v13131_v17, 0.0  ;;  %v415_v10 = vrot.slane %v414_v16, 1  ;;  %v433_v7 = vadd.f32 %v432_v33, %v431_v19  ;;  %v446_v13 = vrot.slane %v445_v9, 4 }
  0x44   :  { %v439_v18 = vrot.slane %v438_v45, 4  ;;  %v452_v2 = vsel %vm346_vm2, %v13132_v55, 0.0  ;;  %v426_v15 = vadd.f32 %v425_v35, %v424_v50  ;;  %v420_v62 = vrot.slane %v419_v43, 2 }
  0x45   :  { %v453_v32 = vrot.slane %v452_v2, 4  ;;  %v459_v23 = vsel %vm346_vm2, %v5155_v25, 0.0  ;;  %v434_v38 = vrot.slane %v433_v7, 2  ;;  %v447_v17 = vadd.f32 %v446_v13, %v445_v9 }
  0x46   :  { %v440_v14 = vadd.f32 %v439_v18, %v438_v45  ;;  %v427_v39 = vrot.slane %v426_v15, 2  ;;  %v460_v34 = vrot.slane %v459_v23, 4  ;;  %v421_v11 = vadd.f32 %v420_v62, %v419_v43 }
  0x47   :  { %v454_v29 = vadd.f32 %v453_v32, %v452_v2  ;;  %v13133_v24 = vcombine.high %v5155_v25, %v5155_v25  ;;  %v435_v35 = vadd.f32 %v434_v38, %v433_v7  ;;  %v448_v33 = vrot.slane %v447_v17, 2 }
  0x48   :  { %v441_v56 = vrot.slane %v440_v14, 2  ;;  %v428_v19 = vadd.f32 %v427_v39, %v426_v15  ;;  %v461_v45 = vadd.f32 %v460_v34, %v459_v23  ;;  %v422_v18 = vrot.slane %v421_v11, 1 }
  0x49   :  { %v466_v50 = vsel %vm346_vm2, %v13133_v24, 0.0  ;;  %v455_v44 = vrot.slane %v454_v29, 2  ;;  %v5535_v22 = vadd.f32 %v387_v49, %v386_v5  ;;  %v436_v9 = vrot.slane %v435_v35, 1 }
  0x4a   :  { %v442_v55 = vadd.f32 %v441_v56, %v440_v14  ;;  %v467_v51 = vrot.slane %v466_v50, 4  ;;  %v429_v13 = vrot.slane %v428_v19, 1  ;;  %v462_v62 = vrot.slane %v461_v45, 2 }
  0x4b   :  { %v5537_v43 = vadd.f32 %v394_v30, %v393_v31  ;;  %v5539_v32 = vadd.f32 %v401_v6, %v400_v60  ;;  %v449_v25 = vadd.f32 %v448_v33, %v447_v17  ;;  %v5541_v24 = vadd.f32 %v408_v63, %v407_v61 }
  0x4c   :  { %v468_v2 = vadd.f32 %v467_v51, %v466_v50  ;;  %v5543_v7 = vadd.f32 %v415_v10, %v414_v16  ;;  %v5545_v34 = vadd.f32 %v422_v18, %v421_v11  ;;  %v456_v56 = vadd.f32 %v455_v44, %v454_v29 }
  0x4d   :  { %v443_v14 = vrot.slane %v442_v55, 1  ;;  %v463_v15 = vadd.f32 %v462_v62, %v461_v45  ;;  %v473_v49 = vsel %vm346_vm2, %v5157_v26, 0.0  ;;  %v5549_v23 = vadd.f32 %v429_v13, %v428_v19 }
  0x4e   :  { %v469_v5 = vrot.slane %v468_v2, 2  ;;  %v5551_v31 = vadd.f32 %v436_v9, %v435_v35  ;;  %v474_v60 = vrot.slane %v473_v49, 4  ;;  %v13136_v51 = vcombine.high %v5157_v26, %v5157_v26 }
  0x4f   :  { %13134 = vst [vmem:[#allocation60_spill] sm:$0xff] %v5549_v23  ;;  %v450_v16 = vrot.slane %v449_v25, 1  ;;  %v487_v44 = vsel %vm346_vm2, %v5159_v27, 0.0  ;;  %v457_v29 = vrot.slane %v456_v56, 1  ;;  %v13137_v10 = vcombine.high %v5159_v27, %v5159_v27 }
  0x50   :  { %13135 = vst [vmem:[#allocation61_spill] sm:$0xff] %v5551_v31  ;;  %v480_v61 = vsel %vm346_vm2, %v13136_v51, 0.0  ;;  %v470_v11 = vadd.f32 %v469_v5, %v468_v2  ;;  %v475_v6 = vadd.f32 %v474_v60, %v473_v49  ;;  %v488_v63 = vrot.slane %v487_v44, 4 }
  0x51   :  { %v481_v30 = vrot.slane %v480_v61, 4  ;;  %v494_v39 = vsel %vm346_vm2, %v13137_v10, 0.0  ;;  %v464_v38 = vrot.slane %v463_v15, 1  ;;  %v501_v26 = vsel %vm346_vm2, %v5161_v28, 0.0 }
  0x52   :  { %v495_v50 = vrot.slane %v494_v39, 4  ;;  %v476_v19 = vrot.slane %v475_v6, 2  ;;  %v489_v35 = vadd.f32 %v488_v63, %v487_v44  ;;  %v502_v33 = vrot.slane %v501_v26, 4 }
  0x53   :  { %v482_v17 = vadd.f32 %v481_v30, %v480_v61  ;;  %v13138_v45 = vcombine.high %v5161_v28, %v5161_v28  ;;  %v471_v13 = vrot.slane %v470_v11, 1  ;;  %v515_v60 = vsel %vm346_vm2, %v5173_v36, 0.0 }
  0x54   :  { %v496_v62 = vadd.f32 %v495_v50, %v494_v39  ;;  %v477_v2 = vadd.f32 %v476_v19, %v475_v6  ;;  %v490_v5 = vrot.slane %v489_v35, 2  ;;  %v503_v49 = vadd.f32 %v502_v33, %v501_v26 }
  0x55   :  { %v508_v18 = vsel %vm346_vm2, %v13138_v45, 0.0  ;;  %v483_v9 = vrot.slane %v482_v17, 2  ;;  %v516_v44 = vrot.slane %v515_v60, 4  ;;  %v13139_v28 = vcombine.high %v5173_v36, %v5173_v36 }
  0x56   :  { %v509_v27 = vrot.slane %v508_v18, 4  ;;  %v497_v61 = vrot.slane %v496_v62, 2  ;;  %v478_v63 = vrot.slane %v477_v2, 1  ;;  %v491_v10 = vadd.f32 %v490_v5, %v489_v35 }
  0x57   :  { %v484_v51 = vadd.f32 %v483_v9, %v482_v17  ;;  %v504_v31 = vrot.slane %v503_v49, 2  ;;  %v522_v45 = vsel %vm346_vm2, %v13139_v28, 0.0  ;;  %v517_v19 = vadd.f32 %v516_v44, %v515_v60 }
  0x58   :  { %v510_v30 = vadd.f32 %v509_v27, %v508_v18  ;;  %v498_v50 = vadd.f32 %v497_v61, %v496_v62  ;;  %v5575_v26 = vadd.f32 %v443_v14, %v442_v55  ;;  %v5577_v33 = vadd.f32 %v450_v16, %v449_v25 }
  0x59   :  { %v485_v39 = vrot.slane %v484_v51, 1  ;;  %v492_v17 = vrot.slane %v491_v10, 1  ;;  %v523_v9 = vrot.slane %v522_v45, 4  ;;  %v5579_v18 = vadd.f32 %v457_v29, %v456_v56 }
  0x5a   :  { %v511_v6 = vrot.slane %v510_v30, 2  ;;  %v5581_v27 = vadd.f32 %v464_v38, %v463_v15  ;;  %v499_v35 = vrot.slane %v498_v50, 1  ;;  %v505_v5 = vadd.f32 %v504_v31, %v503_v49 }
  0x5b   :  { %v5583_v23 = vadd.f32 %v471_v13, %v470_v11  ;;  %v518_v36 = vrot.slane %v517_v19, 2  ;;  %v524_v28 = vadd.f32 %v523_v9, %v522_v45  ;;  %v529_v62 = vsel %vm346_vm2, %v5175_v37, 0.0 }
  0x5c   :  { %v5587_v60 = vadd.f32 %v478_v63, %v477_v2  ;;  %v5589_v55 = vadd.f32 %v485_v39, %v484_v51  ;;  %v512_v25 = vadd.f32 %v511_v6, %v510_v30  ;;  %v530_v14 = vrot.slane %v529_v62, 4 }
  0x5d   :  { %v5591_v16 = vadd.f32 %v492_v17, %v491_v10  ;;  %v525_v56 = vrot.slane %v524_v28, 2  ;;  %v13142_v15 = vcombine.high %v5175_v37, %v5175_v37  ;;  %v543_v11 = vsel %vm346_vm2, %v5179_v40, 0.0 }
  0x5e   :  { %13140 = vst [vmem:[#allocation62_spill] sm:$0xff] %v5589_v55  ;;  %v5599_v29 = vadd.f32 %v499_v35, %v498_v50  ;;  %v506_v38 = vrot.slane %v505_v5, 1  ;;  %v531_v13 = vadd.f32 %v530_v14, %v529_v62  ;;  %v519_v49 = vadd.f32 %v518_v36, %v517_v19 }
  0x5f   :  { %13141 = vst [vmem:[#allocation63_spill] sm:$0xff] %v5591_v16  ;;  %v536_v31 = vsel %vm346_vm2, %v13142_v15, 0.0  ;;  %v544_v51 = vrot.slane %v543_v11, 4  ;;  %v13144_v61 = vcombine.high %v5179_v40, %v5179_v40  ;;  %v557_v37 = vsel %vm346_vm2, %v5181_v41, 0.0 }
  0x60   :  { %13143 = vst [vmem:[#allocation64_spill] sm:$0xff] %v5599_v29  ;;  %v537_v2 = vrot.slane %v536_v31, 4  ;;  %v526_v44 = vadd.f32 %v525_v56, %v524_v28  ;;  %v532_v63 = vrot.slane %v531_v13, 2  ;;  %v513_v39 = vrot.slane %v512_v25, 1 }
  0x61   :  { %v550_v30 = vsel %vm346_vm2, %v13144_v61, 0.0  ;;  %v545_v50 = vadd.f32 %v544_v51, %v543_v11  ;;  %v558_v6 = vrot.slane %v557_v37, 4  ;;  %v13145_v17 = vcombine.high %v5181_v41, %v5181_v41 }
  0x62   :  { %v538_v10 = vadd.f32 %v537_v2, %v536_v31  ;;  %v551_v45 = vrot.slane %v550_v30, 4  ;;  %v533_v9 = vadd.f32 %v532_v63, %v531_v13  ;;  %v520_v62 = vrot.slane %v519_v49, 1 }
  0x63   :  { %v564_v19 = vsel %vm346_vm2, %v13145_v17, 0.0  ;;  %v546_v14 = vrot.slane %v545_v50, 2  ;;  %v559_v15 = vadd.f32 %v558_v6, %v557_v37  ;;  %v571_v28 = vsel %vm346_vm2, %v5183_v42, 0.0 }
  0x64   :  { %v539_v35 = vrot.slane %v538_v10, 2  ;;  %v552_v40 = vadd.f32 %v551_v45, %v550_v30  ;;  %v565_v36 = vrot.slane %v564_v19, 4  ;;  %v527_v56 = vrot.slane %v526_v44, 1 }
  0x65   :  { %v547_v51 = vadd.f32 %v546_v14, %v545_v50  ;;  %v560_v61 = vrot.slane %v559_v15, 2  ;;  %v572_v29 = vrot.slane %v571_v28, 4  ;;  %v13146_v41 = vcombine.high %v5183_v42, %v5183_v42 }
  0x66   :  { %v540_v31 = vadd.f32 %v539_v35, %v538_v10  ;;  %v553_v2 = vrot.slane %v552_v40, 2  ;;  %v566_v11 = vadd.f32 %v565_v36, %v564_v19  ;;  %v5617_v30 = vadd.f32 %v506_v38, %v505_v5 }
  0x67   :  { %v578_v13 = vsel %vm346_vm2, %v13146_v41, 0.0  ;;  %v534_v63 = vrot.slane %v533_v9, 1  ;;  %v548_v6 = vrot.slane %v547_v51, 1  ;;  %v573_v16 = vadd.f32 %v572_v29, %v571_v28 }
  0x68   :  { %v541_v45 = vrot.slane %v540_v31, 1  ;;  %v554_v37 = vadd.f32 %v553_v2, %v552_v40  ;;  %v567_v17 = vrot.slane %v566_v11, 2  ;;  %v579_v55 = vrot.slane %v578_v13, 4 }
  0x69   :  { %v5619_v10 = vadd.f32 %v513_v39, %v512_v25  ;;  %v5621_v19 = vadd.f32 %v520_v62, %v519_v49  ;;  %v561_v50 = vadd.f32 %v560_v61, %v559_v15  ;;  %v585_v35 = vsel %vm346_vm2, %v5191_v46, 0.0 }
  0x6a   :  { %v5625_v42 = vadd.f32 %v527_v56, %v526_v44  ;;  %v555_v36 = vrot.slane %v554_v37, 1  ;;  %v574_v5 = vrot.slane %v573_v16, 2  ;;  %v580_v38 = vadd.f32 %v579_v55, %v578_v13 }
  0x6b   :  { %v5627_v14 = vadd.f32 %v534_v63, %v533_v9  ;;  %v5629_v40 = vadd.f32 %v541_v45, %v540_v31  ;;  %v586_v2 = vrot.slane %v585_v35, 4  ;;  %v13148_v25 = vcombine.high %v5191_v46, %v5191_v46 }
  0x6c   :  { %v5635_v49 = vadd.f32 %v548_v6, %v547_v51  ;;  %v568_v39 = vadd.f32 %v567_v17, %v566_v11  ;;  %v581_v62 = vrot.slane %v580_v38, 2  ;;  %v562_v44 = vrot.slane %v561_v50, 1 }
  0x6d   :  { %13147 = vst [vmem:[#allocation65_spill] sm:$0xff] %v5629_v40  ;;  %v592_v29 = vsel %vm346_vm2, %v13148_v25, 0.0  ;;  %v587_v28 = vadd.f32 %v586_v2, %v585_v35  ;;  %v599_v55 = vsel %vm346_vm2, %v5193_v47, 0.0  ;;  %v13150_v9 = vcombine.high %v5193_v47, %v5193_v47 }
  0x6e   :  { %13149 = vst [vmem:[#allocation66_spill] sm:$0xff] %v5635_v49  ;;  %v593_v15 = vrot.slane %v592_v29, 4  ;;  %v5643_v31 = vadd.f32 %v555_v36, %v554_v37  ;;  %v575_v46 = vadd.f32 %v574_v5, %v573_v16  ;;  %v600_v41 = vrot.slane %v599_v55, 4 }
  0x6f   :  { %v606_v56 = vsel %vm346_vm2, %v13150_v9, 0.0  ;;  %v588_v51 = vrot.slane %v587_v28, 2  ;;  %v613_v11 = vsel %vm346_vm2, %v5195_v48, 0.0  ;;  %v13152_v63 = vcombine.high %v5195_v48, %v5195_v48 }
  0x70   :  { %13151 = vst [vmem:[#allocation67_spill] sm:$0xff] %v5643_v31  ;;  %v594_v61 = vadd.f32 %v593_v15, %v592_v29  ;;  %v607_v13 = vrot.slane %v606_v56, 4  ;;  %v569_v6 = vrot.slane %v568_v39, 1  ;;  %v582_v17 = vadd.f32 %v581_v62, %v580_v38 }
  0x71   :  { %v620_v45 = vsel %vm346_vm2, %v13152_v63, 0.0  ;;  %v601_v35 = vadd.f32 %v600_v41, %v599_v55  ;;  %v589_v2 = vadd.f32 %v588_v51, %v587_v28  ;;  %v614_v36 = vrot.slane %v613_v11, 4 }
  0x72   :  { %v595_v47 = vrot.slane %v594_v61, 2  ;;  %v608_v37 = vadd.f32 %v607_v13, %v606_v56  ;;  %v621_v16 = vrot.slane %v620_v45, 4  ;;  %v5651_v5 = vadd.f32 %v562_v44, %v561_v50 }
  0x73   :  { %v602_v29 = vrot.slane %v601_v35, 2  ;;  %v627_v15 = vsel %vm346_vm2, %v5201_v52, 0.0  ;;  %v576_v9 = vrot.slane %v575_v46, 1  ;;  %v615_v48 = vadd.f32 %v614_v36, %v613_v11 }
  0x74   :  { %v596_v25 = vadd.f32 %v595_v47, %v594_v61  ;;  %v609_v31 = vrot.slane %v608_v37, 2  ;;  %v622_v49 = vadd.f32 %v621_v16, %v620_v45  ;;  %v583_v63 = vrot.slane %v582_v17, 1 }
  0x75   :  { %v603_v40 = vadd.f32 %v602_v29, %v601_v35  ;;  %v628_v38 = vrot.slane %v627_v15, 4  ;;  %v13153_v62 = vcombine.high %v5201_v52, %v5201_v52  ;;  %v590_v55 = vrot.slane %v589_v2, 1 }
  0x76   :  { %v597_v50 = vrot.slane %v596_v25, 1  ;;  %v610_v44 = vadd.f32 %v609_v31, %v608_v37  ;;  %v616_v56 = vrot.slane %v615_v48, 2  ;;  %v5659_v61 = vadd.f32 %v569_v6, %v568_v39 }
  0x77   :  { %v634_v28 = vsel %vm346_vm2, %v13153_v62, 0.0  ;;  %v623_v41 = vrot.slane %v622_v49, 2  ;;  %v629_v51 = vadd.f32 %v628_v38, %v627_v15  ;;  %v5661_v47 = vadd.f32 %v576_v9, %v575_v46 }
  0x78   :  { %v635_v13 = vrot.slane %v634_v28, 4  ;;  %v604_v11 = vrot.slane %v603_v40, 1  ;;  %v611_v45 = vrot.slane %v610_v44, 1  ;;  %v641_v35 = vsel %vm346_vm2, %v5203_v53, 0.0 }
  0x79   :  { %13154 = vst [vmem:[#allocation68_spill] sm:$0xff] %v5661_v47  ;;  %v617_v36 = vadd.f32 %v616_v56, %v615_v48  ;;  %v630_v52 = vrot.slane %v629_v51, 2  ;;  %v642_v29 = vrot.slane %v641_v35, 4  ;;  %v5665_v62 = vadd.f32 %v583_v63, %v582_v17 }
  0x7a   :  { %v636_v16 = vadd.f32 %v635_v13, %v634_v28  ;;  %v5667_v31 = vadd.f32 %v590_v55, %v589_v2  ;;  %v5669_v39 = vadd.f32 %v597_v50, %v596_v25  ;;  %v13156_v6 = vcombine.high %v5203_v53, %v5203_v53 }
  0x7b   :  { %v624_v37 = vadd.f32 %v623_v41, %v622_v49  ;;  %v643_v9 = vadd.f32 %v642_v29, %v641_v35  ;;  %v5675_v47 = vadd.f32 %v604_v11, %v603_v40  ;;  %v5677_v48 = vadd.f32 %v611_v45, %v610_v44 }
  0x7c   :  { %13155 = vst [vmem:[#allocation69_spill] sm:$0xff] %v5669_v39  ;;  %v648_v46 = vsel %vm346_vm2, %v13156_v6, 0.0  ;;  %v637_v15 = vrot.slane %v636_v16, 2  ;;  %v655_v17 = vsel %vm346_vm2, %v5205_v54, 0.0  ;;  %v13159_v2 = vcombine.high %v5205_v54, %v5205_v54 }
  0x7d   :  { %v649_v38 = vrot.slane %v648_v46, 4  ;;  %13157 = vst [vmem:[#allocation70_spill] sm:$0xff] %v5675_v47  ;;  %13158 = vst [vmem:[#allocation71_spill] sm:$0xff] %v5677_v48  ;;  %v618_v63 = vrot.slane %v617_v36, 1  ;;  %v631_v53 = vadd.f32 %v630_v52, %v629_v51  ;;  %v644_v28 = vrot.slane %v643_v9, 2 }
  0x7e   :  { %v662_v25 = vsel %vm346_vm2, %v13159_v2, 0.0  ;;  %v656_v49 = vrot.slane %v655_v17, 4  ;;  %v669_v40 = vsel %vm346_vm2, %v5210_v57, 0.0  ;;  %v13160_v44 = vcombine.high %v5210_v57, %v5210_v57 }
  0x7f   :  { %v650_v55 = vadd.f32 %v649_v38, %v648_v46  ;;  %v663_v50 = vrot.slane %v662_v25, 4  ;;  %v625_v41 = vrot.slane %v624_v37, 1  ;;  %v638_v13 = vadd.f32 %v637_v15, %v636_v16 }
  0x80   :  { %v676_v56 = vsel %vm346_vm2, %v13160_v44, 0.0  ;;  %v645_v11 = vadd.f32 %v644_v28, %v643_v9  ;;  %v657_v45 = vadd.f32 %v656_v49, %v655_v17  ;;  %v670_v29 = vrot.slane %v669_v40, 4 }
  0x81   :  { %v651_v54 = vrot.slane %v650_v55, 2  ;;  %v664_v35 = vadd.f32 %v663_v50, %v662_v25  ;;  %v677_v51 = vrot.slane %v676_v56, 4  ;;  %v5691_v52 = vadd.f32 %v618_v63, %v617_v36 }
  0x82   :  { %v632_v6 = vrot.slane %v631_v53, 1  ;;  %v683_v38 = vsel %vm346_vm2, %v5212_v58, 0.0  ;;  %v658_v2 = vrot.slane %v657_v45, 2  ;;  %v671_v57 = vadd.f32 %v670_v29, %v669_v40 }
  0x83   :  { %13161 = vst [vmem:[#allocation72_spill] sm:$0xff] %v5691_v52  ;;  %v652_v46 = vadd.f32 %v651_v54, %v650_v55  ;;  %v665_v48 = vrot.slane %v664_v35, 2  ;;  %v678_v47 = vadd.f32 %v677_v51, %v676_v56  ;;  %v639_v44 = vrot.slane %v638_v13, 1 }
  0x84   :  { %v646_v39 = vrot.slane %v645_v11, 1  ;;  %v684_v16 = vrot.slane %v683_v38, 4  ;;  %v13162_v15 = vcombine.high %v5212_v58, %v5212_v58  ;;  %v659_v36 = vadd.f32 %v658_v2, %v657_v45 }
  0x85   :  { %v653_v17 = vrot.slane %v652_v46, 1  ;;  %v666_v25 = vadd.f32 %v665_v48, %v664_v35  ;;  %v672_v63 = vrot.slane %v671_v57, 2  ;;  %v679_v28 = vrot.slane %v678_v47, 2 }
  0x86   :  { %v690_v9 = vsel %vm346_vm2, %v13162_v15, 0.0  ;;  %v685_v55 = vadd.f32 %v684_v16, %v683_v38  ;;  %v697_v50 = vsel %vm346_vm2, %v5214_v59, 0.0  ;;  %v5701_v40 = vadd.f32 %v625_v41, %v624_v37 }
  0x87   :  { %v691_v49 = vrot.slane %v690_v9, 4  ;;  %v660_v56 = vrot.slane %v659_v36, 1  ;;  %v667_v54 = vrot.slane %v666_v25, 1  ;;  %v673_v29 = vadd.f32 %v672_v63, %v671_v57 }
  0x88   :  { %v686_v51 = vrot.slane %v685_v55, 2  ;;  %v698_v58 = vrot.slane %v697_v50, 4  ;;  %v13163_v15 = vcombine.high %v5214_v59, %v5214_v59  ;;  %v5707_v45 = vadd.f32 %v632_v6, %v631_v53 }
  0x89   :  { %v692_v52 = vadd.f32 %v691_v49, %v690_v9  ;;  %v5709_v35 = vadd.f32 %v639_v44, %v638_v13  ;;  %v5711_v38 = vadd.f32 %v646_v39, %v645_v11  ;;  %v5713_v2 = vadd.f32 %v653_v17, %v652_v46 }
  0x8a   :  { %v704_v48 = vsel %vm346_vm2, %v13163_v15, 0.0  ;;  %v680_v37 = vadd.f32 %v679_v28, %v678_v47  ;;  %v699_v16 = vadd.f32 %v698_v58, %v697_v50  ;;  %v5715_v63 = vadd.f32 %v660_v56, %v659_v36 }
  0x8b   :  { %13164 = vst [vmem:[#allocation73_spill] sm:$0xff] %v5713_v2  ;;  %v693_v41 = vrot.slane %v692_v52, 2  ;;  %v705_v57 = vrot.slane %v704_v48, 4  ;;  %v5717_v9 = vadd.f32 %v667_v54, %v666_v25  ;;  %v711_v59 = vsel %vm346_vm2, %v5223_v0, 0.0 }
  0x8c   :  { %13165 = vst [vmem:[#allocation74_spill] sm:$0xff] %v5715_v63  ;;  %v13167_v53 = vcombine.high %v5223_v0, %v5223_v0  ;;  %v674_v39 = vrot.slane %v673_v29, 1  ;;  %v687_v11 = vadd.f32 %v686_v51, %v685_v55  ;;  %v700_v6 = vrot.slane %v699_v16, 2 }
  0x8d   :  { %13166 = vst [vmem:[#allocation75_spill] sm:$0xff] %v5717_v9  ;;  %v706_v46 = vadd.f32 %v705_v57, %v704_v48  ;;  %v712_v47 = vrot.slane %v711_v59, 4  ;;  %v725_v17 = vsel %vm346_vm2, %v5225_v3, 0.0  ;;  %v13168_v36 = vcombine.high %v5225_v3, %v5225_v3 }
  0x8e   :  { %v718_v13 = vsel %vm346_vm2, %v13167_v53, 0.0  ;;  %v681_v28 = vrot.slane %v680_v37, 1  ;;  %v694_v49 = vadd.f32 %v693_v41, %v692_v52  ;;  %v701_v50 = vadd.f32 %v700_v6, %v699_v16 }
  0x8f   :  { %v719_v44 = vrot.slane %v718_v13, 4  ;;  %v732_v25 = vsel %vm346_vm2, %v13168_v36, 0.0  ;;  %v707_v0 = vrot.slane %v706_v46, 2  ;;  %v713_v56 = vadd.f32 %v712_v47, %v711_v59 }
  0x90   :  { %v726_v58 = vrot.slane %v725_v17, 4  ;;  %v733_v55 = vrot.slane %v732_v25, 4  ;;  %v5731_v51 = vadd.f32 %v674_v39, %v673_v29  ;;  %v688_v15 = vrot.slane %v687_v11, 1 }
  0x91   :  { %v720_v54 = vadd.f32 %v719_v44, %v718_v13  ;;  %v708_v48 = vadd.f32 %v707_v0, %v706_v46  ;;  %v739_v57 = vsel %vm346_vm2, %v5227_v4, 0.0  ;;  %v714_v53 = vrot.slane %v713_v56, 2 }
  0x92   :  { %13169 = vst [vmem:[#allocation76_spill] sm:$0xff] %v5731_v51  ;;  %v727_v3 = vadd.f32 %v726_v58, %v725_v17  ;;  %v734_v63 = vadd.f32 %v733_v55, %v732_v25  ;;  %v695_v36 = vrot.slane %v694_v49, 1  ;;  %v702_v2 = vrot.slane %v701_v50, 1 }
  0x93   :  { %v721_v9 = vrot.slane %v720_v54, 2  ;;  %v740_v52 = vrot.slane %v739_v57, 4  ;;  %v13170_v41 = vcombine.high %v5227_v4, %v5227_v4  ;;  %v709_v59 = vrot.slane %v708_v48, 1 }
  0x94   :  { %v715_v29 = vadd.f32 %v714_v53, %v713_v56  ;;  %v728_v39 = vrot.slane %v727_v3, 2  ;;  %v735_v6 = vrot.slane %v734_v63, 2  ;;  %v753_v44 = vsel %vm346_vm2, %v5235_v8, 0.0 }
  0x95   :  { %v746_v16 = vsel %vm346_vm2, %v13170_v41, 0.0  ;;  %v722_v13 = vadd.f32 %v721_v9, %v720_v54  ;;  %v741_v46 = vadd.f32 %v740_v52, %v739_v57  ;;  %v5741_v17 = vadd.f32 %v681_v28, %v680_v37 }
  0x96   :  { %v747_v47 = vrot.slane %v746_v16, 4  ;;  %v716_v25 = vrot.slane %v715_v29, 1  ;;  %v729_v58 = vadd.f32 %v728_v39, %v727_v3  ;;  %v754_v4 = vrot.slane %v753_v44, 4 }
  0x97   :  { %v723_v0 = vrot.slane %v722_v13, 1  ;;  %v742_v55 = vrot.slane %v741_v46, 2  ;;  %v13171_v41 = vcombine.high %v5235_v8, %v5235_v8  ;;  %v5747_v56 = vadd.f32 %v688_v15, %v687_v11 }
  0x98   :  { %v748_v51 = vadd.f32 %v747_v47, %v746_v16  ;;  %v5749_v54 = vadd.f32 %v695_v36, %v694_v49  ;;  %v5751_v57 = vadd.f32 %v702_v2, %v701_v50  ;;  %v5753_v53 = vadd.f32 %v709_v59, %v708_v48  ;;  %v4987_v47 = vld [vmem:[#allocation2 + $0xf0] sm:$0xff]  ;;  %v4988_v59 = vld [vmem:[#allocation2 + $0xf8] sm:$0xff] }
  0x99   :  { %v760_v9 = vsel %vm346_vm2, %v13171_v41, 0.0  ;;  %v736_v37 = vadd.f32 %v735_v6, %v734_v63  ;;  %v755_v52 = vadd.f32 %v754_v4, %v753_v44  ;;  %v5755_v39 = vadd.f32 %v716_v25, %v715_v29 }
  0x9a   :  { %13172 = vst [vmem:[#allocation77_spill] sm:$0xff] %v5751_v57  ;;  %13173 = vst [vmem:[#allocation78_spill] sm:$0xff] %v5753_v53  ;;  %v749_v28 = vrot.slane %v748_v51, 2  ;;  %v761_v3 = vrot.slane %v760_v9, 4  ;;  %v5757_v16 = vadd.f32 %v723_v0, %v722_v13  ;;  %v767_v8 = vsel %vm346_vm2, %v4987_v47, 0.0 }
  0x9b   :  { %13174 = vst [vmem:[#allocation79_spill] sm:$0xff] %v5755_v39  ;;  %v13176_v11 = vcombine.high %v5237_v12, %v5237_v12  ;;  %v730_v2 = vrot.slane %v729_v58, 1  ;;  %v743_v50 = vadd.f32 %v742_v55, %v741_v46  ;;  %v756_v15 = vrot.slane %v755_v52, 2 }
  0x9c   :  { %13175 = vst [vmem:[#allocation80_spill] sm:$0xff] %v5757_v16  ;;  %v762_v48 = vadd.f32 %v761_v3, %v760_v9  ;;  %v768_v63 = vrot.slane %v767_v8, 4  ;;  %v781_v29 = vsel %vm346_vm2, %v4988_v59, 0.0  ;;  %v13177_v13 = vcombine.high %v5239_v1, %v5239_v1 }
  0x9d   :  { %v774_v49 = vsel %vm346_vm2, %v13176_v11, 0.0  ;;  %v737_v44 = vrot.slane %v736_v37, 1  ;;  %v750_v25 = vadd.f32 %v749_v28, %v748_v51  ;;  %v757_v0 = vadd.f32 %v756_v15, %v755_v52  ;;  %v4989_v11 = vld [vmem:[#allocation2 + $0x100] sm:$0xff] }
  0x9e   :  { %v775_v36 = vrot.slane %v774_v49, 4  ;;  %v788_v6 = vsel %vm346_vm2, %v13177_v13, 0.0  ;;  %v763_v12 = vrot.slane %v762_v48, 2  ;;  %v769_v4 = vadd.f32 %v768_v63, %v767_v8 }
  0x9f   :  { %v782_v47 = vrot.slane %v781_v29, 4  ;;  %v789_v46 = vrot.slane %v788_v6, 4  ;;  %v5769_v55 = vadd.f32 %v730_v2, %v729_v58  ;;  %v744_v9 = vrot.slane %v743_v50, 1 }
  0xa0   :  { %v776_v41 = vadd.f32 %v775_v36, %v774_v49  ;;  %v764_v3 = vadd.f32 %v763_v12, %v762_v48  ;;  %v795_v59 = vsel %vm346_vm2, %v4989_v11, 0.0  ;;  %v770_v16 = vrot.slane %v769_v4, 2  ;;  %v4990_v36 = vld [vmem:[#allocation2 + $0x108] sm:$0xff] }
  0xa1   :  { %13178 = vst [vmem:[#allocation81_spill] sm:$0xff] %v5769_v55  ;;  %v783_v1 = vadd.f32 %v782_v47, %v781_v29  ;;  %v790_v53 = vadd.f32 %v789_v46, %v788_v6  ;;  %v751_v13 = vrot.slane %v750_v25, 1  ;;  %v758_v57 = vrot.slane %v757_v0, 1 }
  0xa2   :  { %v777_v39 = vrot.slane %v776_v41, 2  ;;  %v796_v51 = vrot.slane %v795_v59, 4  ;;  %v13179_v28 = vcombine.high %v5249_v20, %v5249_v20  ;;  %v765_v8 = vrot.slane %v764_v3, 1 }
  0xa3   :  { %v771_v58 = vadd.f32 %v770_v16, %v769_v4  ;;  %v784_v2 = vrot.slane %v783_v1, 2  ;;  %v791_v15 = vrot.slane %v790_v53, 2  ;;  %v809_v12 = vsel %vm346_vm2, %v4990_v36, 0.0  ;;  %v13188_v36 = vld [vmem:[#allocation9_spill] sm:$0xff] }
  0xa4   :  { %v802_v52 = vsel %vm346_vm2, %v13179_v28, 0.0  ;;  %v778_v49 = vadd.f32 %v777_v39, %v776_v41  ;;  %v797_v48 = vadd.f32 %v796_v51, %v795_v59  ;;  %v5777_v29 = vadd.f32 %v737_v44, %v736_v37 }
  0xa5   :  { %v803_v63 = vrot.slane %v802_v52, 4  ;;  %v772_v6 = vrot.slane %v771_v58, 1  ;;  %v785_v46 = vadd.f32 %v784_v2, %v783_v1  ;;  %v810_v20 = vrot.slane %v809_v12, 4 }
  0xa6   :  { %13180 = vst [vmem:[#allocation82_spill] sm:$0xff] %v5777_v29  ;;  %v779_v47 = vrot.slane %v778_v49, 1  ;;  %v798_v11 = vrot.slane %v797_v48, 2  ;;  %v13181_v28 = vcombine.high %v5251_v21, %v5251_v21  ;;  %v5783_v16 = vadd.f32 %v744_v9, %v743_v50  ;;  %v13196_v29 = vld [vmem:[#allocation12_spill] sm:$0xff] }
  0xa7   :  { %v804_v55 = vadd.f32 %v803_v63, %v802_v52  ;;  %v5785_v4 = vadd.f32 %v751_v13, %v750_v25  ;;  %v5787_v41 = vadd.f32 %v758_v57, %v757_v0  ;;  %v5789_v59 = vadd.f32 %v765_v8, %v764_v3  ;;  %v4991_v63 = vld [vmem:[#allocation2 + $0x110] sm:$0xff]  ;;  %v4992_v8 = vld [vmem:[#allocation2 + $0x118] sm:$0xff] }
  0xa8   :  { %v816_v39 = vsel %vm346_vm2, %v13181_v28, 0.0  ;;  %13182 = vst [vmem:[#allocation83_spill] sm:$0xff] %v5783_v16  ;;  %v792_v37 = vadd.f32 %v791_v15, %v790_v53  ;;  %v811_v51 = vadd.f32 %v810_v20, %v809_v12  ;;  %v5791_v2 = vadd.f32 %v772_v6, %v771_v58  ;;  %v13190_v15 = vld [vmem:[#allocation10_spill] sm:$0xff] }
  0xa9   :  { %13183 = vst [vmem:[#allocation84_spill] sm:$0xff] %v5785_v4  ;;  %13184 = vst [vmem:[#allocation85_spill] sm:$0xff] %v5787_v41  ;;  %v805_v44 = vrot.slane %v804_v55, 2  ;;  %v817_v1 = vrot.slane %v816_v39, 4  ;;  %v5793_v52 = vadd.f32 %v779_v47, %v778_v49  ;;  %v823_v21 = vsel %vm346_vm2, %v4991_v63, 0.0 }
  0xaa   :  { %13185 = vst [vmem:[#allocation86_spill] sm:$0xff] %v5789_v59  ;;  %13186 = vst [vmem:[#allocation87_spill] sm:$0xff] %v5791_v2  ;;  %v13189_v50 = vcombine.high %v13188_v36, %v13188_v36  ;;  %v786_v57 = vrot.slane %v785_v46, 1  ;;  %v799_v0 = vadd.f32 %v798_v11, %v797_v48  ;;  %v812_v9 = vrot.slane %v811_v51, 2 }
  0xab   :  { %13187 = vst [vmem:[#allocation88_spill] sm:$0xff] %v5793_v52  ;;  %v818_v3 = vadd.f32 %v817_v1, %v816_v39  ;;  %v824_v53 = vrot.slane %v823_v21, 4  ;;  %v837_v58 = vsel %vm346_vm2, %v4992_v8, 0.0  ;;  %v13191_v49 = vcombine.high %v13190_v15, %v13190_v15  ;;  %v4993_v52 = vld [vmem:[#allocation2 + $0x120] sm:$0xff] }
  0xac   :  { %v830_v25 = vsel %vm346_vm2, %v13189_v50, 0.0  ;;  %v793_v6 = vrot.slane %v792_v37, 1  ;;  %v806_v47 = vadd.f32 %v805_v44, %v804_v55  ;;  %v813_v20 = vadd.f32 %v812_v9, %v811_v51  ;;  %v13193_v44 = vld [vmem:[#allocation11_spill] sm:$0xff] }
  0xad   :  { %v831_v13 = vrot.slane %v830_v25, 4  ;;  %v844_v12 = vsel %vm346_vm2, %v13191_v49, 0.0  ;;  %v819_v28 = vrot.slane %v818_v3, 2  ;;  %v825_v63 = vadd.f32 %v824_v53, %v823_v21 }
  0xae   :  { %v838_v50 = vrot.slane %v837_v58, 4  ;;  %v845_v48 = vrot.slane %v844_v12, 4  ;;  %v5805_v11 = vadd.f32 %v786_v57, %v785_v46  ;;  %v800_v39 = vrot.slane %v799_v0, 1 }
  0xaf   :  { %v832_v36 = vadd.f32 %v831_v13, %v830_v25  ;;  %v820_v1 = vadd.f32 %v819_v28, %v818_v3  ;;  %v851_v8 = vsel %vm346_vm2, %v4993_v52, 0.0  ;;  %v826_v2 = vrot.slane %v825_v63, 2  ;;  %v4994_v52 = vld [vmem:[#allocation2 + $0x128] sm:$0xff] }
  0xb0   :  { %13192 = vst [vmem:[#allocation9_spill] sm:$0xff] %v5805_v11  ;;  %v839_v15 = vadd.f32 %v838_v50, %v837_v58  ;;  %v846_v41 = vadd.f32 %v845_v48, %v844_v12  ;;  %v807_v49 = vrot.slane %v806_v47, 1  ;;  %v814_v4 = vrot.slane %v813_v20, 1 }
  0xb1   :  { %v833_v59 = vrot.slane %v832_v36, 2  ;;  %v852_v55 = vrot.slane %v851_v8, 4  ;;  %v13194_v51 = vcombine.high %v13193_v44, %v13193_v44  ;;  %v821_v25 = vrot.slane %v820_v1, 1 }
  0xb2   :  { %v827_v46 = vadd.f32 %v826_v2, %v825_v63  ;;  %v840_v9 = vrot.slane %v839_v15, 2  ;;  %v847_v3 = vrot.slane %v846_v41, 2  ;;  %v865_v28 = vsel %vm346_vm2, %v4994_v52, 0.0  ;;  %v13204_v52 = vld [vmem:[#allocation13_spill] sm:$0xff] }
  0xb3   :  { %v858_v21 = vsel %vm346_vm2, %v13194_v51, 0.0  ;;  %v834_v57 = vadd.f32 %v833_v59, %v832_v36  ;;  %v853_v53 = vadd.f32 %v852_v55, %v851_v8  ;;  %v5813_v58 = vadd.f32 %v793_v6, %v792_v37 }
  0xb4   :  { %v859_v13 = vrot.slane %v858_v21, 4  ;;  %v828_v12 = vrot.slane %v827_v46, 1  ;;  %v841_v48 = vadd.f32 %v840_v9, %v839_v15  ;;  %v866_v44 = vrot.slane %v865_v28, 4 }
  0xb5   :  { %13195 = vst [vmem:[#allocation10_spill] sm:$0xff] %v5813_v58  ;;  %v835_v50 = vrot.slane %v834_v57, 1  ;;  %v854_v11 = vrot.slane %v853_v53, 2  ;;  %v13197_v51 = vcombine.high %v13196_v29, %v13196_v29  ;;  %v5819_v2 = vadd.f32 %v800_v39, %v799_v0  ;;  %v13212_v58 = vld [vmem:[#allocation16_spill] sm:$0xff] }
  0xb6   :  { %v860_v16 = vadd.f32 %v859_v13, %v858_v21  ;;  %v5821_v63 = vadd.f32 %v807_v49, %v806_v47  ;;  %v5823_v36 = vadd.f32 %v814_v4, %v813_v20  ;;  %v5825_v8 = vadd.f32 %v821_v25, %v820_v1  ;;  %v4995_v13 = vld [vmem:[#allocation2 + $0x130] sm:$0xff]  ;;  %v4996_v25 = vld [vmem:[#allocation2 + $0x138] sm:$0xff] }
  0xb7   :  { %v872_v59 = vsel %vm346_vm2, %v13197_v51, 0.0  ;;  %13198 = vst [vmem:[#allocation11_spill] sm:$0xff] %v5819_v2  ;;  %v848_v37 = vadd.f32 %v847_v3, %v846_v41  ;;  %v867_v55 = vadd.f32 %v866_v44, %v865_v28  ;;  %v5827_v9 = vadd.f32 %v828_v12, %v827_v46  ;;  %v13206_v3 = vld [vmem:[#allocation14_spill] sm:$0xff] }
  0xb8   :  { %13199 = vst [vmem:[#allocation12_spill] sm:$0xff] %v5821_v63  ;;  %13200 = vst [vmem:[#allocation89_spill] sm:$0xff] %v5823_v36  ;;  %v861_v6 = vrot.slane %v860_v16, 2  ;;  %v873_v15 = vrot.slane %v872_v59, 4  ;;  %v5829_v21 = vadd.f32 %v835_v50, %v834_v57  ;;  %v879_v29 = vsel %vm346_vm2, %v4995_v13, 0.0 }
  0xb9   :  { %13201 = vst [vmem:[#allocation90_spill] sm:$0xff] %v5825_v8  ;;  %13202 = vst [vmem:[#allocation91_spill] sm:$0xff] %v5827_v9  ;;  %v13205_v0 = vcombine.high %v13204_v52, %v13204_v52  ;;  %v842_v4 = vrot.slane %v841_v48, 1  ;;  %v855_v20 = vadd.f32 %v854_v11, %v853_v53  ;;  %v868_v39 = vrot.slane %v867_v55, 2 }
  0xba   :  { %13203 = vst [vmem:[#allocation92_spill] sm:$0xff] %v5829_v21  ;;  %v874_v1 = vadd.f32 %v873_v15, %v872_v59  ;;  %v880_v41 = vrot.slane %v879_v29, 4  ;;  %v893_v46 = vsel %vm346_vm2, %v4996_v25, 0.0  ;;  %v13207_v57 = vcombine.high %v13206_v3, %v13206_v3  ;;  %v4997_v21 = vld [vmem:[#allocation2 + $0x140] sm:$0xff] }
  0xbb   :  { %v886_v47 = vsel %vm346_vm2, %v13205_v0, 0.0  ;;  %v849_v12 = vrot.slane %v848_v37, 1  ;;  %v862_v50 = vadd.f32 %v861_v6, %v860_v16  ;;  %v869_v44 = vadd.f32 %v868_v39, %v867_v55  ;;  %v13209_v6 = vld [vmem:[#allocation15_spill] sm:$0xff] }
  0xbc   :  { %v887_v49 = vrot.slane %v886_v47, 4  ;;  %v900_v28 = vsel %vm346_vm2, %v13207_v57, 0.0  ;;  %v875_v51 = vrot.slane %v874_v1, 2  ;;  %v881_v13 = vadd.f32 %v880_v41, %v879_v29 }
  0xbd   :  { %v894_v0 = vrot.slane %v893_v46, 4  ;;  %v901_v11 = vrot.slane %v900_v28, 4  ;;  %v5841_v53 = vadd.f32 %v842_v4, %v841_v48  ;;  %v856_v59 = vrot.slane %v855_v20, 1 }
  0xbe   :  { %v888_v52 = vadd.f32 %v887_v49, %v886_v47  ;;  %v876_v15 = vadd.f32 %v875_v51, %v874_v1  ;;  %v907_v25 = vsel %vm346_vm2, %v4997_v21, 0.0  ;;  %v882_v9 = vrot.slane %v881_v13, 2  ;;  %v4998_v21 = vld [vmem:[#allocation2 + $0x148] sm:$0xff] }
  0xbf   :  { %13208 = vst [vmem:[#allocation13_spill] sm:$0xff] %v5841_v53  ;;  %v895_v3 = vadd.f32 %v894_v0, %v893_v46  ;;  %v902_v36 = vadd.f32 %v901_v11, %v900_v28  ;;  %v863_v57 = vrot.slane %v862_v50, 1  ;;  %v870_v63 = vrot.slane %v869_v44, 1 }
  0xc0   :  { %v889_v8 = vrot.slane %v888_v52, 2  ;;  %v908_v16 = vrot.slane %v907_v25, 4  ;;  %v13210_v55 = vcombine.high %v13209_v6, %v13209_v6  ;;  %v877_v47 = vrot.slane %v876_v15, 1 }
  0xc1   :  { %v883_v48 = vadd.f32 %v882_v9, %v881_v13  ;;  %v896_v39 = vrot.slane %v895_v3, 2  ;;  %v903_v1 = vrot.slane %v902_v36, 2  ;;  %v921_v51 = vsel %vm346_vm2, %v4998_v21, 0.0  ;;  %v13220_v21 = vld [vmem:[#allocation17_spill] sm:$0xff] }
  0xc2   :  { %v914_v29 = vsel %vm346_vm2, %v13210_v55, 0.0  ;;  %v890_v4 = vadd.f32 %v889_v8, %v888_v52  ;;  %v909_v41 = vadd.f32 %v908_v16, %v907_v25  ;;  %v5849_v46 = vadd.f32 %v849_v12, %v848_v37 }
  0xc3   :  { %v915_v49 = vrot.slane %v914_v29, 4  ;;  %v884_v28 = vrot.slane %v883_v48, 1  ;;  %v897_v11 = vadd.f32 %v896_v39, %v895_v3  ;;  %v922_v6 = vrot.slane %v921_v51, 4 }
  0xc4   :  { %13211 = vst [vmem:[#allocation14_spill] sm:$0xff] %v5849_v46  ;;  %v891_v0 = vrot.slane %v890_v4, 1  ;;  %v910_v53 = vrot.slane %v909_v41, 2  ;;  %v13213_v55 = vcombine.high %v13212_v58, %v13212_v58  ;;  %v5855_v9 = vadd.f32 %v856_v59, %v855_v20  ;;  %v13228_v46 = vld [vmem:[#allocation20_spill] sm:$0xff] }
  0xc5   :  { %v916_v2 = vadd.f32 %v915_v49, %v914_v29  ;;  %v5857_v13 = vadd.f32 %v863_v57, %v862_v50  ;;  %v5859_v52 = vadd.f32 %v870_v63, %v869_v44  ;;  %v5861_v25 = vadd.f32 %v877_v47, %v876_v15  ;;  %v4999_v49 = vld [vmem:[#allocation2 + $0x150] sm:$0xff]  ;;  %v5000_v47 = vld [vmem:[#allocation2 + $0x158] sm:$0xff] }
  0xc6   :  { %v928_v8 = vsel %vm346_vm2, %v13213_v55, 0.0  ;;  %13214 = vst [vmem:[#allocation15_spill] sm:$0xff] %v5855_v9  ;;  %v904_v37 = vadd.f32 %v903_v1, %v902_v36  ;;  %v923_v16 = vadd.f32 %v922_v6, %v921_v51  ;;  %v5863_v39 = vadd.f32 %v884_v28, %v883_v48  ;;  %v13222_v1 = vld [vmem:[#allocation18_spill] sm:$0xff] }
  0xc7   :  { %13215 = vst [vmem:[#allocation16_spill] sm:$0xff] %v5857_v13  ;;  %13216 = vst [vmem:[#allocation93_spill] sm:$0xff] %v5859_v52  ;;  %v917_v12 = vrot.slane %v916_v2, 2  ;;  %v929_v3 = vrot.slane %v928_v8, 4  ;;  %v5865_v29 = vadd.f32 %v891_v0, %v890_v4  ;;  %v935_v58 = vsel %vm346_vm2, %v4999_v49, 0.0 }
  0xc8   :  { %13217 = vst [vmem:[#allocation94_spill] sm:$0xff] %v5861_v25  ;;  %13218 = vst [vmem:[#allocation95_spill] sm:$0xff] %v5863_v39  ;;  %v13221_v20 = vcombine.high %v13220_v21, %v13220_v21  ;;  %v898_v63 = vrot.slane %v897_v11, 1  ;;  %v911_v44 = vadd.f32 %v910_v53, %v909_v41  ;;  %v924_v59 = vrot.slane %v923_v16, 2 }
  0xc9   :  { %13219 = vst [vmem:[#allocation96_spill] sm:$0xff] %v5865_v29  ;;  %v930_v15 = vadd.f32 %v929_v3, %v928_v8  ;;  %v936_v36 = vrot.slane %v935_v58, 4  ;;  %v949_v48 = vsel %vm346_vm2, %v5000_v47, 0.0  ;;  %v13223_v4 = vcombine.high %v13222_v1, %v13222_v1  ;;  %v5001_v29 = vld [vmem:[#allocation2 + $0x160] sm:$0xff] }
  0xca   :  { %v942_v50 = vsel %vm346_vm2, %v13221_v20, 0.0  ;;  %v905_v28 = vrot.slane %v904_v37, 1  ;;  %v918_v0 = vadd.f32 %v917_v12, %v916_v2  ;;  %v925_v6 = vadd.f32 %v924_v59, %v923_v16  ;;  %v13225_v12 = vld [vmem:[#allocation19_spill] sm:$0xff] }
  0xcb   :  { %v943_v57 = vrot.slane %v942_v50, 4  ;;  %v956_v51 = vsel %vm346_vm2, %v13223_v4, 0.0  ;;  %v931_v55 = vrot.slane %v930_v15, 2  ;;  %v937_v49 = vadd.f32 %v936_v36, %v935_v58 }
  0xcc   :  { %v950_v20 = vrot.slane %v949_v48, 4  ;;  %v957_v53 = vrot.slane %v956_v51, 4  ;;  %v5877_v41 = vadd.f32 %v898_v63, %v897_v11  ;;  %v912_v8 = vrot.slane %v911_v44, 1 }
  0xcd   :  { %v944_v21 = vadd.f32 %v943_v57, %v942_v50  ;;  %v932_v3 = vadd.f32 %v931_v55, %v930_v15  ;;  %v963_v47 = vsel %vm346_vm2, %v5001_v29, 0.0  ;;  %v938_v39 = vrot.slane %v937_v49, 2  ;;  %v5002_v29 = vld [vmem:[#allocation2 + $0x168] sm:$0xff] }
  0xce   :  { %13224 = vst [vmem:[#allocation17_spill] sm:$0xff] %v5877_v41  ;;  %v951_v1 = vadd.f32 %v950_v20, %v949_v48  ;;  %v958_v52 = vadd.f32 %v957_v53, %v956_v51  ;;  %v919_v4 = vrot.slane %v918_v0, 1  ;;  %v926_v13 = vrot.slane %v925_v6, 1 }
  0xcf   :  { %v945_v25 = vrot.slane %v944_v21, 2  ;;  %v964_v2 = vrot.slane %v963_v47, 4  ;;  %v13226_v16 = vcombine.high %v13225_v12, %v13225_v12  ;;  %v933_v50 = vrot.slane %v932_v3, 1 }
  0xd0   :  { %v939_v11 = vadd.f32 %v938_v39, %v937_v49  ;;  %v952_v59 = vrot.slane %v951_v1, 2  ;;  %v959_v15 = vrot.slane %v958_v52, 2  ;;  %v977_v55 = vsel %vm346_vm2, %v5002_v29, 0.0  ;;  %v13236_v29 = vld [vmem:[#allocation21_spill] sm:$0xff] }
  0xd1   :  { %v970_v58 = vsel %vm346_vm2, %v13226_v16, 0.0  ;;  %v946_v63 = vadd.f32 %v945_v25, %v944_v21  ;;  %v965_v36 = vadd.f32 %v964_v2, %v963_v47  ;;  %v5885_v48 = vadd.f32 %v905_v28, %v904_v37 }
  0xd2   :  { %v971_v57 = vrot.slane %v970_v58, 4  ;;  %v940_v51 = vrot.slane %v939_v11, 1  ;;  %v953_v53 = vadd.f32 %v952_v59, %v951_v1  ;;  %v978_v12 = vrot.slane %v977_v55, 4 }
  0xd3   :  { %13227 = vst [vmem:[#allocation18_spill] sm:$0xff] %v5885_v48  ;;  %v947_v20 = vrot.slane %v946_v63, 1  ;;  %v966_v41 = vrot.slane %v965_v36, 2  ;;  %v13229_v16 = vcombine.high %v13228_v46, %v13228_v46  ;;  %v5891_v39 = vadd.f32 %v912_v8, %v911_v44  ;;  %v13244_v48 = vld [vmem:[#allocation24_spill] sm:$0xff] }
  0xd4   :  { %v972_v9 = vadd.f32 %v971_v57, %v970_v58  ;;  %v5893_v49 = vadd.f32 %v919_v4, %v918_v0  ;;  %v5895_v21 = vadd.f32 %v926_v13, %v925_v6  ;;  %v5897_v47 = vadd.f32 %v933_v50, %v932_v3  ;;  %v5003_v57 = vld [vmem:[#allocation2 + $0x170] sm:$0xff]  ;;  %v5004_v50 = vld [vmem:[#allocation2 + $0x178] sm:$0xff] }
  0xd5   :  { %v984_v25 = vsel %vm346_vm2, %v13229_v16, 0.0  ;;  %13230 = vst [vmem:[#allocation19_spill] sm:$0xff] %v5891_v39  ;;  %v960_v37 = vadd.f32 %v959_v15, %v958_v52  ;;  %v979_v2 = vadd.f32 %v978_v12, %v977_v55  ;;  %v5899_v59 = vadd.f32 %v940_v51, %v939_v11  ;;  %v13238_v15 = vld [vmem:[#allocation22_spill] sm:$0xff] }
  0xd6   :  { %13231 = vst [vmem:[#allocation20_spill] sm:$0xff] %v5893_v49  ;;  %13232 = vst [vmem:[#allocation97_spill] sm:$0xff] %v5895_v21  ;;  %v973_v28 = vrot.slane %v972_v9, 2  ;;  %v985_v1 = vrot.slane %v984_v25, 4  ;;  %v5901_v58 = vadd.f32 %v947_v20, %v946_v63  ;;  %v991_v46 = vsel %vm346_vm2, %v5003_v57, 0.0 }
  0xd7   :  { %13233 = vst [vmem:[#allocation98_spill] sm:$0xff] %v5897_v47  ;;  %13234 = vst [vmem:[#allocation99_spill] sm:$0xff] %v5899_v59  ;;  %v13237_v44 = vcombine.high %v13236_v29, %v13236_v29  ;;  %v954_v13 = vrot.slane %v953_v53, 1  ;;  %v967_v6 = vadd.f32 %v966_v41, %v965_v36  ;;  %v980_v8 = vrot.slane %v979_v2, 2 }
  0xd8   :  { %13235 = vst [vmem:[#allocation100_spill] sm:$0xff] %v5901_v58  ;;  %v986_v3 = vadd.f32 %v985_v1, %v984_v25  ;;  %v992_v52 = vrot.slane %v991_v46, 4  ;;  %v1005_v11 = vsel %vm346_vm2, %v5004_v50, 0.0  ;;  %v13239_v63 = vcombine.high %v13238_v15, %v13238_v15  ;;  %v5005_v58 = vld [vmem:[#allocation2 + $0x180] sm:$0xff] }
  0xd9   :  { %v998_v0 = vsel %vm346_vm2, %v13237_v44, 0.0  ;;  %v961_v51 = vrot.slane %v960_v37, 1  ;;  %v974_v20 = vadd.f32 %v973_v28, %v972_v9  ;;  %v981_v12 = vadd.f32 %v980_v8, %v979_v2  ;;  %v13241_v28 = vld [vmem:[#allocation23_spill] sm:$0xff] }
  0xda   :  { %v999_v4 = vrot.slane %v998_v0, 4  ;;  %v1012_v55 = vsel %vm346_vm2, %v13239_v63, 0.0  ;;  %v987_v16 = vrot.slane %v986_v3, 2  ;;  %v993_v57 = vadd.f32 %v992_v52, %v991_v46 }
  0xdb   :  { %v1006_v44 = vrot.slane %v1005_v11, 4  ;;  %v1013_v41 = vrot.slane %v1012_v55, 4  ;;  %v5913_v36 = vadd.f32 %v954_v13, %v953_v53  ;;  %v968_v25 = vrot.slane %v967_v6, 1 }
  0xdc   :  { %v1000_v29 = vadd.f32 %v999_v4, %v998_v0  ;;  %v988_v1 = vadd.f32 %v987_v16, %v986_v3  ;;  %v1019_v50 = vsel %vm346_vm2, %v5005_v58, 0.0  ;;  %v994_v59 = vrot.slane %v993_v57, 2  ;;  %v5006_v58 = vld [vmem:[#allocation2 + $0x188] sm:$0xff] }
  0xdd   :  { %13240 = vst [vmem:[#allocation21_spill] sm:$0xff] %v5913_v36  ;;  %v1007_v15 = vadd.f32 %v1006_v44, %v1005_v11  ;;  %v1014_v21 = vadd.f32 %v1013_v41, %v1012_v55  ;;  %v975_v63 = vrot.slane %v974_v20, 1  ;;  %v982_v49 = vrot.slane %v981_v12, 1 }
  0xde   :  { %v1001_v47 = vrot.slane %v1000_v29, 2  ;;  %v1020_v9 = vrot.slane %v1019_v50, 4  ;;  %v13242_v2 = vcombine.high %v13241_v28, %v13241_v28  ;;  %v989_v0 = vrot.slane %v988_v1, 1 }
  0xdf   :  { %v995_v53 = vadd.f32 %v994_v59, %v993_v57  ;;  %v1008_v8 = vrot.slane %v1007_v15, 2  ;;  %v1015_v3 = vrot.slane %v1014_v21, 2  ;;  %v1033_v16 = vsel %vm346_vm2, %v5006_v58, 0.0  ;;  %v13252_v58 = vld [vmem:[#allocation25_spill] sm:$0xff] }
  0xe0   :  { %v1026_v46 = vsel %vm346_vm2, %v13242_v2, 0.0  ;;  %v1002_v13 = vadd.f32 %v1001_v47, %v1000_v29  ;;  %v1021_v52 = vadd.f32 %v1020_v9, %v1019_v50  ;;  %v5921_v11 = vadd.f32 %v961_v51, %v960_v37 }
  0xe1   :  { %v1027_v4 = vrot.slane %v1026_v46, 4  ;;  %v996_v55 = vrot.slane %v995_v53, 1  ;;  %v1009_v41 = vadd.f32 %v1008_v8, %v1007_v15  ;;  %v1034_v28 = vrot.slane %v1033_v16, 4 }
  0xe2   :  { %13243 = vst [vmem:[#allocation22_spill] sm:$0xff] %v5921_v11  ;;  %v1003_v44 = vrot.slane %v1002_v13, 1  ;;  %v1022_v36 = vrot.slane %v1021_v52, 2  ;;  %v13245_v2 = vcombine.high %v13244_v48, %v13244_v48  ;;  %v5927_v59 = vadd.f32 %v968_v25, %v967_v6  ;;  %v13260_v11 = vld [vmem:[#allocation28_spill] sm:$0xff] }
  0xe3   :  { %v1028_v39 = vadd.f32 %v1027_v4, %v1026_v46  ;;  %v5929_v57 = vadd.f32 %v975_v63, %v974_v20  ;;  %v5931_v29 = vadd.f32 %v982_v49, %v981_v12  ;;  %v5933_v50 = vadd.f32 %v989_v0, %v988_v1  ;;  %v5007_v4 = vld [vmem:[#allocation2 + $0x190] sm:$0xff]  ;;  %v5008_v0 = vld [vmem:[#allocation2 + $0x198] sm:$0xff] }
  0xe4   :  { %v1040_v47 = vsel %vm346_vm2, %v13245_v2, 0.0  ;;  %13246 = vst [vmem:[#allocation23_spill] sm:$0xff] %v5927_v59  ;;  %v1016_v37 = vadd.f32 %v1015_v3, %v1014_v21  ;;  %v1035_v9 = vadd.f32 %v1034_v28, %v1033_v16  ;;  %v5935_v8 = vadd.f32 %v996_v55, %v995_v53  ;;  %v13254_v3 = vld [vmem:[#allocation26_spill] sm:$0xff] }
  0xe5   :  { %13247 = vst [vmem:[#allocation24_spill] sm:$0xff] %v5929_v57  ;;  %13248 = vst [vmem:[#allocation101_spill] sm:$0xff] %v5931_v29  ;;  %v1029_v51 = vrot.slane %v1028_v39, 2  ;;  %v1041_v15 = vrot.slane %v1040_v47, 4  ;;  %v5937_v46 = vadd.f32 %v1003_v44, %v1002_v13  ;;  %v1047_v48 = vsel %vm346_vm2, %v5007_v4, 0.0 }
  0xe6   :  { %13249 = vst [vmem:[#allocation102_spill] sm:$0xff] %v5933_v50  ;;  %13250 = vst [vmem:[#allocation103_spill] sm:$0xff] %v5935_v8  ;;  %v13253_v6 = vcombine.high %v13252_v58, %v13252_v58  ;;  %v1010_v49 = vrot.slane %v1009_v41, 1  ;;  %v1023_v12 = vadd.f32 %v1022_v36, %v1021_v52  ;;  %v1036_v25 = vrot.slane %v1035_v9, 2 }
  0xe7   :  { %13251 = vst [vmem:[#allocation104_spill] sm:$0xff] %v5937_v46  ;;  %v1042_v1 = vadd.f32 %v1041_v15, %v1040_v47  ;;  %v1048_v21 = vrot.slane %v1047_v48, 4  ;;  %v1061_v53 = vsel %vm346_vm2, %v5008_v0, 0.0  ;;  %v13255_v13 = vcombine.high %v13254_v3, %v13254_v3  ;;  %v5009_v46 = vld [vmem:[#allocation2 + $0x1a0] sm:$0xff] }
  0xe8   :  { %v1054_v20 = vsel %vm346_vm2, %v13253_v6, 0.0  ;;  %v1017_v55 = vrot.slane %v1016_v37, 1  ;;  %v1030_v44 = vadd.f32 %v1029_v51, %v1028_v39  ;;  %v1037_v28 = vadd.f32 %v1036_v25, %v1035_v9  ;;  %v13257_v51 = vld [vmem:[#allocation27_spill] sm:$0xff] }
  0xe9   :  { %v1055_v63 = vrot.slane %v1054_v20, 4  ;;  %v1068_v16 = vsel %vm346_vm2, %v13255_v13, 0.0  ;;  %v1043_v2 = vrot.slane %v1042_v1, 2  ;;  %v1049_v4 = vadd.f32 %v1048_v21, %v1047_v48 }
  0xea   :  { %v1062_v6 = vrot.slane %v1061_v53, 4  ;;  %v1069_v36 = vrot.slane %v1068_v16, 4  ;;  %v5949_v52 = vadd.f32 %v1010_v49, %v1009_v41  ;;  %v1024_v47 = vrot.slane %v1023_v12, 1 }
  0xeb   :  { %v1056_v58 = vadd.f32 %v1055_v63, %v1054_v20  ;;  %v1044_v15 = vadd.f32 %v1043_v2, %v1042_v1  ;;  %v1075_v0 = vsel %vm346_vm2, %v5009_v46, 0.0  ;;  %v1050_v8 = vrot.slane %v1049_v4, 2  ;;  %v5010_v46 = vld [vmem:[#allocation2 + $0x1a8] sm:$0xff] }
  0xec   :  { %13256 = vst [vmem:[#allocation25_spill] sm:$0xff] %v5949_v52  ;;  %v1063_v3 = vadd.f32 %v1062_v6, %v1061_v53  ;;  %v1070_v29 = vadd.f32 %v1069_v36, %v1068_v16  ;;  %v1031_v13 = vrot.slane %v1030_v44, 1  ;;  %v1038_v57 = vrot.slane %v1037_v28, 1 }
  0xed   :  { %v1057_v50 = vrot.slane %v1056_v58, 2  ;;  %v1076_v39 = vrot.slane %v1075_v0, 4  ;;  %v13258_v9 = vcombine.high %v13257_v51, %v13257_v51  ;;  %v1045_v20 = vrot.slane %v1044_v15, 1 }
  0xee   :  { %v1051_v41 = vadd.f32 %v1050_v8, %v1049_v4  ;;  %v1064_v25 = vrot.slane %v1063_v3, 2  ;;  %v1071_v1 = vrot.slane %v1070_v29, 2  ;;  %v1089_v2 = vsel %vm346_vm2, %v5010_v46, 0.0  ;;  %v13268_v46 = vld [vmem:[#allocation29_spill] sm:$0xff] }
  0xef   :  { %v1082_v48 = vsel %vm346_vm2, %v13258_v9, 0.0  ;;  %v1058_v49 = vadd.f32 %v1057_v50, %v1056_v58  ;;  %v1077_v21 = vadd.f32 %v1076_v39, %v1075_v0  ;;  %v5957_v53 = vadd.f32 %v1017_v55, %v1016_v37 }
  0xf0   :  { %v1083_v63 = vrot.slane %v1082_v48, 4  ;;  %v1052_v16 = vrot.slane %v1051_v41, 1  ;;  %v1065_v36 = vadd.f32 %v1064_v25, %v1063_v3  ;;  %v1090_v51 = vrot.slane %v1089_v2, 4 }
  0xf1   :  { %13259 = vst [vmem:[#allocation26_spill] sm:$0xff] %v5957_v53  ;;  %v1059_v6 = vrot.slane %v1058_v49, 1  ;;  %v1078_v52 = vrot.slane %v1077_v21, 2  ;;  %v13261_v9 = vcombine.high %v13260_v11, %v13260_v11  ;;  %v5963_v8 = vadd.f32 %v1024_v47, %v1023_v12  ;;  %v13276_v53 = vld [vmem:[#allocation32_spill] sm:$0xff] }
  0xf2   :  { %v1084_v59 = vadd.f32 %v1083_v63, %v1082_v48  ;;  %v5965_v4 = vadd.f32 %v1031_v13, %v1030_v44  ;;  %v5967_v58 = vadd.f32 %v1038_v57, %v1037_v28  ;;  %v5969_v0 = vadd.f32 %v1045_v20, %v1044_v15  ;;  %v5011_v63 = vld [vmem:[#allocation2 + $0x1b0] sm:$0xff]  ;;  %v5012_v20 = vld [vmem:[#allocation2 + $0x1b8] sm:$0xff] }
  0xf3   :  { %v1096_v50 = vsel %vm346_vm2, %v13261_v9, 0.0  ;;  %13262 = vst [vmem:[#allocation27_spill] sm:$0xff] %v5963_v8  ;;  %v1072_v37 = vadd.f32 %v1071_v1, %v1070_v29  ;;  %v1091_v39 = vadd.f32 %v1090_v51, %v1089_v2  ;;  %v5971_v25 = vadd.f32 %v1052_v16, %v1051_v41  ;;  %v13270_v1 = vld [vmem:[#allocation30_spill] sm:$0xff] }
  0xf4   :  { %13263 = vst [vmem:[#allocation28_spill] sm:$0xff] %v5965_v4  ;;  %13264 = vst [vmem:[#allocation105_spill] sm:$0xff] %v5967_v58  ;;  %v1085_v55 = vrot.slane %v1084_v59, 2  ;;  %v1097_v3 = vrot.slane %v1096_v50, 4  ;;  %v5973_v48 = vadd.f32 %v1059_v6, %v1058_v49  ;;  %v1103_v11 = vsel %vm346_vm2, %v5011_v63, 0.0 }
  0xf5   :  { %13265 = vst [vmem:[#allocation106_spill] sm:$0xff] %v5969_v0  ;;  %13266 = vst [vmem:[#allocation107_spill] sm:$0xff] %v5971_v25  ;;  %v13269_v12 = vcombine.high %v13268_v46, %v13268_v46  ;;  %v1066_v57 = vrot.slane %v1065_v36, 1  ;;  %v1079_v28 = vadd.f32 %v1078_v52, %v1077_v21  ;;  %v1092_v47 = vrot.slane %v1091_v39, 2 }
  0xf6   :  { %13267 = vst [vmem:[#allocation108_spill] sm:$0xff] %v5973_v48  ;;  %v1098_v15 = vadd.f32 %v1097_v3, %v1096_v50  ;;  %v1104_v29 = vrot.slane %v1103_v11, 4  ;;  %v1117_v41 = vsel %vm346_vm2, %v5012_v20, 0.0  ;;  %v13271_v49 = vcombine.high %v13270_v1, %v13270_v1  ;;  %v5013_v48 = vld [vmem:[#allocation2 + $0x1c0] sm:$0xff] }
  0xf7   :  { %v1110_v44 = vsel %vm346_vm2, %v13269_v12, 0.0  ;;  %v1073_v16 = vrot.slane %v1072_v37, 1  ;;  %v1086_v6 = vadd.f32 %v1085_v55, %v1084_v59  ;;  %v1093_v51 = vadd.f32 %v1092_v47, %v1091_v39  ;;  %v13273_v55 = vld [vmem:[#allocation31_spill] sm:$0xff] }
  0xf8   :  { %v1111_v13 = vrot.slane %v1110_v44, 4  ;;  %v1124_v2 = vsel %vm346_vm2, %v13271_v49, 0.0  ;;  %v1099_v9 = vrot.slane %v1098_v15, 2  ;;  %v1105_v63 = vadd.f32 %v1104_v29, %v1103_v11 }
  0xf9   :  { %v1118_v12 = vrot.slane %v1117_v41, 4  ;;  %v1125_v52 = vrot.slane %v1124_v2, 4  ;;  %v5985_v21 = vadd.f32 %v1066_v57, %v1065_v36  ;;  %v1080_v50 = vrot.slane %v1079_v28, 1 }
  0xfa   :  { %v1112_v46 = vadd.f32 %v1111_v13, %v1110_v44  ;;  %v1100_v3 = vadd.f32 %v1099_v9, %v1098_v15  ;;  %v1131_v20 = vsel %vm346_vm2, %v5013_v48, 0.0  ;;  %v1106_v25 = vrot.slane %v1105_v63, 2  ;;  %v5014_v48 = vld [vmem:[#allocation2 + $0x1c8] sm:$0xff] }
  0xfb   :  { %13272 = vst [vmem:[#allocation29_spill] sm:$0xff] %v5985_v21  ;;  %v1119_v1 = vadd.f32 %v1118_v12, %v1117_v41  ;;  %v1126_v58 = vadd.f32 %v1125_v52, %v1124_v2  ;;  %v1087_v49 = vrot.slane %v1086_v6, 1  ;;  %v1094_v4 = vrot.slane %v1093_v51, 1 }
  0xfc   :  { %v1113_v0 = vrot.slane %v1112_v46, 2  ;;  %v1132_v59 = vrot.slane %v1131_v20, 4  ;;  %v13274_v39 = vcombine.high %v13273_v55, %v13273_v55  ;;  %v1101_v44 = vrot.slane %v1100_v3, 1 }
  0xfd   :  { %v1107_v36 = vadd.f32 %v1106_v25, %v1105_v63  ;;  %v1120_v47 = vrot.slane %v1119_v1, 2  ;;  %v1127_v15 = vrot.slane %v1126_v58, 2  ;;  %v1145_v9 = vsel %vm346_vm2, %v5014_v48, 0.0  ;;  %v13284_v48 = vld [vmem:[#allocation33_spill] sm:$0xff] }
  0xfe   :  { %v1138_v11 = vsel %vm346_vm2, %v13274_v39, 0.0  ;;  %v1114_v57 = vadd.f32 %v1113_v0, %v1112_v46  ;;  %v1133_v29 = vadd.f32 %v1132_v59, %v1131_v20  ;;  %v5993_v41 = vadd.f32 %v1073_v16, %v1072_v37 }
  0xff   :  { %v1139_v13 = vrot.slane %v1138_v11, 4  ;;  %v1108_v2 = vrot.slane %v1107_v36, 1  ;;  %v1121_v52 = vadd.f32 %v1120_v47, %v1119_v1  ;;  %v1146_v55 = vrot.slane %v1145_v9, 4 }
 0x100   :  { %13275 = vst [vmem:[#allocation30_spill] sm:$0xff] %v5993_v41  ;;  %v1115_v12 = vrot.slane %v1114_v57, 1  ;;  %v1134_v21 = vrot.slane %v1133_v29, 2  ;;  %v13277_v39 = vcombine.high %v13276_v53, %v13276_v53  ;;  %v5999_v25 = vadd.f32 %v1080_v50, %v1079_v28  ;;  %v13292_v41 = vld [vmem:[#allocation36_spill] sm:$0xff] }
 0x101   :  { %v1140_v8 = vadd.f32 %v1139_v13, %v1138_v11  ;;  %v6001_v63 = vadd.f32 %v1087_v49, %v1086_v6  ;;  %v6003_v46 = vadd.f32 %v1094_v4, %v1093_v51  ;;  %v6005_v20 = vadd.f32 %v1101_v44, %v1100_v3  ;;  %v5015_v13 = vld [vmem:[#allocation2 + $0x1d0] sm:$0xff]  ;;  %v5016_v44 = vld [vmem:[#allocation2 + $0x1d8] sm:$0xff] }
 0x102   :  { %v1152_v0 = vsel %vm346_vm2, %v13277_v39, 0.0  ;;  %13278 = vst [vmem:[#allocation31_spill] sm:$0xff] %v5999_v25  ;;  %v1128_v37 = vadd.f32 %v1127_v15, %v1126_v58  ;;  %v1147_v59 = vadd.f32 %v1146_v55, %v1145_v9  ;;  %v6007_v47 = vadd.f32 %v1108_v2, %v1107_v36  ;;  %v13286_v15 = vld [vmem:[#allocation34_spill] sm:$0xff] }
 0x103   :  { %13279 = vst [vmem:[#allocation32_spill] sm:$0xff] %v6001_v63  ;;  %13280 = vst [vmem:[#allocation109_spill] sm:$0xff] %v6003_v46  ;;  %v1141_v16 = vrot.slane %v1140_v8, 2  ;;  %v1153_v1 = vrot.slane %v1152_v0, 4  ;;  %v6009_v11 = vadd.f32 %v1115_v12, %v1114_v57  ;;  %v1159_v53 = vsel %vm346_vm2, %v5015_v13, 0.0 }
 0x104   :  { %13281 = vst [vmem:[#allocation110_spill] sm:$0xff] %v6005_v20  ;;  %13282 = vst [vmem:[#allocation111_spill] sm:$0xff] %v6007_v47  ;;  %v13285_v28 = vcombine.high %v13284_v48, %v13284_v48  ;;  %v1122_v4 = vrot.slane %v1121_v52, 1  ;;  %v1135_v51 = vadd.f32 %v1134_v21, %v1133_v29  ;;  %v1148_v50 = vrot.slane %v1147_v59, 2 }
 0x105   :  { %13283 = vst [vmem:[#allocation112_spill] sm:$0xff] %v6009_v11  ;;  %v1154_v3 = vadd.f32 %v1153_v1, %v1152_v0  ;;  %v1160_v58 = vrot.slane %v1159_v53, 4  ;;  %v1173_v36 = vsel %vm346_vm2, %v5016_v44, 0.0  ;;  %v13287_v57 = vcombine.high %v13286_v15, %v13286_v15  ;;  %v5017_v11 = vld [vmem:[#allocation2 + $0x1e0] sm:$0xff] }
 0x106   :  { %v1166_v6 = vsel %vm346_vm2, %v13285_v28, 0.0  ;;  %v1129_v2 = vrot.slane %v1128_v37, 1  ;;  %v1142_v12 = vadd.f32 %v1141_v16, %v1140_v8  ;;  %v1149_v55 = vadd.f32 %v1148_v50, %v1147_v59  ;;  %v13289_v16 = vld [vmem:[#allocation35_spill] sm:$0xff] }
 0x107   :  { %v1167_v49 = vrot.slane %v1166_v6, 4  ;;  %v1180_v9 = vsel %vm346_vm2, %v13287_v57, 0.0  ;;  %v1155_v39 = vrot.slane %v1154_v3, 2  ;;  %v1161_v13 = vadd.f32 %v1160_v58, %v1159_v53 }
 0x108   :  { %v1174_v28 = vrot.slane %v1173_v36, 4  ;;  %v1181_v21 = vrot.slane %v1180_v9, 4  ;;  %v6021_v29 = vadd.f32 %v1122_v4, %v1121_v52  ;;  %v1136_v0 = vrot.slane %v1135_v51, 1 }
 0x109   :  { %v1168_v48 = vadd.f32 %v1167_v49, %v1166_v6  ;;  %v1156_v1 = vadd.f32 %v1155_v39, %v1154_v3  ;;  %v1187_v44 = vsel %vm346_vm2, %v5017_v11, 0.0  ;;  %v1162_v47 = vrot.slane %v1161_v13, 2  ;;  %v5018_v11 = vld [vmem:[#allocation2 + $0x1e8] sm:$0xff] }
 0x10a   :  { %13288 = vst [vmem:[#allocation33_spill] sm:$0xff] %v6021_v29  ;;  %v1175_v15 = vadd.f32 %v1174_v28, %v1173_v36  ;;  %v1182_v46 = vadd.f32 %v1181_v21, %v1180_v9  ;;  %v1143_v57 = vrot.slane %v1142_v12, 1  ;;  %v1150_v63 = vrot.slane %v1149_v55, 1 }
 0x10b   :  { %v1169_v20 = vrot.slane %v1168_v48, 2  ;;  %v1188_v8 = vrot.slane %v1187_v44, 4  ;;  %v13290_v59 = vcombine.high %v13289_v16, %v13289_v16  ;;  %v1157_v6 = vrot.slane %v1156_v1, 1 }
 0x10c   :  { %v1163_v52 = vadd.f32 %v1162_v47, %v1161_v13  ;;  %v1176_v50 = vrot.slane %v1175_v15, 2  ;;  %v1183_v3 = vrot.slane %v1182_v46, 2  ;;  %v1201_v39 = vsel %vm346_vm2, %v5018_v11, 0.0  ;;  %v13300_v11 = vld [vmem:[#allocation37_spill] sm:$0xff] }
 0x10d   :  { %v1194_v53 = vsel %vm346_vm2, %v13290_v59, 0.0  ;;  %v1170_v4 = vadd.f32 %v1169_v20, %v1168_v48  ;;  %v1189_v58 = vadd.f32 %v1188_v8, %v1187_v44  ;;  %v6029_v36 = vadd.f32 %v1129_v2, %v1128_v37 }
 0x10e   :  { %v1195_v49 = vrot.slane %v1194_v53, 4  ;;  %v1164_v9 = vrot.slane %v1163_v52, 1  ;;  %v1177_v21 = vadd.f32 %v1176_v50, %v1175_v15  ;;  %v1202_v16 = vrot.slane %v1201_v39, 4 }
 0x10f   :  { %13291 = vst [vmem:[#allocation34_spill] sm:$0xff] %v6029_v36  ;;  %v1171_v28 = vrot.slane %v1170_v4, 1  ;;  %v1190_v29 = vrot.slane %v1189_v58, 2  ;;  %v13293_v59 = vcombine.high %v13292_v41, %v13292_v41  ;;  %v6035_v47 = vadd.f32 %v1136_v0, %v1135_v51  ;;  %v13308_v36 = vld [vmem:[#allocation40_spill] sm:$0xff] }
 0x110   :  { %v1196_v25 = vadd.f32 %v1195_v49, %v1194_v53  ;;  %v6037_v13 = vadd.f32 %v1143_v57, %v1142_v12  ;;  %v6039_v48 = vadd.f32 %v1150_v63, %v1149_v55  ;;  %v6041_v44 = vadd.f32 %v1157_v6, %v1156_v1  ;;  %v5019_v49 = vld [vmem:[#allocation2 + $0x1f0] sm:$0xff]  ;;  %v5020_v6 = vld [vmem:[#allocation2 + $0x1f8] sm:$0xff] }
 0x111   :  { %v1208_v20 = vsel %vm346_vm2, %v13293_v59, 0.0  ;;  %13294 = vst [vmem:[#allocation35_spill] sm:$0xff] %v6035_v47  ;;  %v1184_v37 = vadd.f32 %v1183_v3, %v1182_v46  ;;  %v1203_v8 = vadd.f32 %v1202_v16, %v1201_v39  ;;  %v6043_v50 = vadd.f32 %v1164_v9, %v1163_v52  ;;  %v13302_v3 = vld [vmem:[#allocation38_spill] sm:$0xff] }
 0x112   :  { %13295 = vst [vmem:[#allocation36_spill] sm:$0xff] %v6037_v13  ;;  %13296 = vst [vmem:[#allocation113_spill] sm:$0xff] %v6039_v48  ;;  %v1197_v2 = vrot.slane %v1196_v25, 2  ;;  %v1209_v15 = vrot.slane %v1208_v20, 4  ;;  %v6045_v53 = vadd.f32 %v1171_v28, %v1170_v4  ;;  %v1215_v41 = vsel %vm346_vm2, %v5019_v49, 0.0 }
 0x113   :  { %13297 = vst [vmem:[#allocation114_spill] sm:$0xff] %v6041_v44  ;;  %13298 = vst [vmem:[#allocation115_spill] sm:$0xff] %v6043_v50  ;;  %v13301_v51 = vcombine.high %v13300_v11, %v13300_v11  ;;  %v1178_v63 = vrot.slane %v1177_v21, 1  ;;  %v1191_v55 = vadd.f32 %v1190_v29, %v1189_v58  ;;  %v1204_v0 = vrot.slane %v1203_v8, 2 }
 0x114   :  { %13299 = vst [vmem:[#allocation116_spill] sm:$0xff] %v6045_v53  ;;  %v1210_v1 = vadd.f32 %v1209_v15, %v1208_v20  ;;  %v1216_v46 = vrot.slane %v1215_v41, 4  ;;  %v1229_v52 = vsel %vm346_vm2, %v5020_v6, 0.0  ;;  %v13303_v4 = vcombine.high %v13302_v3, %v13302_v3  ;;  %v5021_v53 = vld [vmem:[#allocation2 + $0x200] sm:$0xff] }
 0x115   :  { %v1222_v12 = vsel %vm346_vm2, %v13301_v51, 0.0  ;;  %v1185_v9 = vrot.slane %v1184_v37, 1  ;;  %v1198_v28 = vadd.f32 %v1197_v2, %v1196_v25  ;;  %v1205_v16 = vadd.f32 %v1204_v0, %v1203_v8  ;;  %v13305_v2 = vld [vmem:[#allocation39_spill] sm:$0xff] }
 0x116   :  { %v1223_v57 = vrot.slane %v1222_v12, 4  ;;  %v1236_v39 = vsel %vm346_vm2, %v13303_v4, 0.0  ;;  %v1211_v59 = vrot.slane %v1210_v1, 2  ;;  %v1217_v49 = vadd.f32 %v1216_v46, %v1215_v41 }
 0x117   :  { %v1230_v51 = vrot.slane %v1229_v52, 4  ;;  %v1237_v29 = vrot.slane %v1236_v39, 4  ;;  %v6057_v58 = vadd.f32 %v1178_v63, %v1177_v21  ;;  %v1192_v20 = vrot.slane %v1191_v55, 1 }
 0x118   :  { %v1224_v11 = vadd.f32 %v1223_v57, %v1222_v12  ;;  %v1212_v15 = vadd.f32 %v1211_v59, %v1210_v1  ;;  %v1243_v6 = vsel %vm346_vm2, %v5021_v53, 0.0  ;;  %v1218_v50 = vrot.slane %v1217_v49, 2  ;;  %v5022_v53 = vld [vmem:[#allocation2 + $0x208] sm:$0xff] }
 0x119   :  { %13304 = vst [vmem:[#allocation37_spill] sm:$0xff] %v6057_v58  ;;  %v1231_v3 = vadd.f32 %v1230_v51, %v1229_v52  ;;  %v1238_v48 = vadd.f32 %v1237_v29, %v1236_v39  ;;  %v1199_v4 = vrot.slane %v1198_v28, 1  ;;  %v1206_v13 = vrot.slane %v1205_v16, 1 }
 0x11a   :  { %v1225_v44 = vrot.slane %v1224_v11, 2  ;;  %v1244_v25 = vrot.slane %v1243_v6, 4  ;;  %v13306_v8 = vcombine.high %v13305_v2, %v13305_v2  ;;  %v1213_v12 = vrot.slane %v1212_v15, 1 }
 0x11b   :  { %v1219_v21 = vadd.f32 %v1218_v50, %v1217_v49  ;;  %v1232_v0 = vrot.slane %v1231_v3, 2  ;;  %v1239_v1 = vrot.slane %v1238_v48, 2  ;;  %v1257_v59 = vsel %vm346_vm2, %v5022_v53, 0.0  ;;  %v13316_v53 = vld [vmem:[#allocation41_spill] sm:$0xff] }
 0x11c   :  { %v1250_v41 = vsel %vm346_vm2, %v13306_v8, 0.0  ;;  %v1226_v63 = vadd.f32 %v1225_v44, %v1224_v11  ;;  %v1245_v46 = vadd.f32 %v1244_v25, %v1243_v6  ;;  %v6065_v52 = vadd.f32 %v1185_v9, %v1184_v37 }
 0x11d   :  { %v1251_v57 = vrot.slane %v1250_v41, 4  ;;  %v1220_v39 = vrot.slane %v1219_v21, 1  ;;  %v1233_v29 = vadd.f32 %v1232_v0, %v1231_v3  ;;  %v1258_v2 = vrot.slane %v1257_v59, 4 }
 0x11e   :  { %13307 = vst [vmem:[#allocation38_spill] sm:$0xff] %v6065_v52  ;;  %v1227_v51 = vrot.slane %v1226_v63, 1  ;;  %v1246_v58 = vrot.slane %v1245_v46, 2  ;;  %v13309_v8 = vcombine.high %v13308_v36, %v13308_v36  ;;  %v6071_v50 = vadd.f32 %v1192_v20, %v1191_v55  ;;  %v13324_v52 = vld [vmem:[#allocation44_spill] sm:$0xff] }
 0x11f   :  { %v1252_v47 = vadd.f32 %v1251_v57, %v1250_v41  ;;  %v6073_v49 = vadd.f32 %v1199_v4, %v1198_v28  ;;  %v6075_v11 = vadd.f32 %v1206_v13, %v1205_v16  ;;  %v6077_v6 = vadd.f32 %v1213_v12, %v1212_v15  ;;  %v5023_v57 = vld [vmem:[#allocation2 + $0x210] sm:$0xff]  ;;  %v5024_v12 = vld [vmem:[#allocation2 + $0x218] sm:$0xff] }
 0x120   :  { %v1264_v44 = vsel %vm346_vm2, %v13309_v8, 0.0  ;;  %13310 = vst [vmem:[#allocation39_spill] sm:$0xff] %v6071_v50  ;;  %v1240_v37 = vadd.f32 %v1239_v1, %v1238_v48  ;;  %v1259_v25 = vadd.f32 %v1258_v2, %v1257_v59  ;;  %v6079_v0 = vadd.f32 %v1220_v39, %v1219_v21  ;;  %v13318_v1 = vld [vmem:[#allocation42_spill] sm:$0xff] }
 0x121   :  { %13311 = vst [vmem:[#allocation40_spill] sm:$0xff] %v6073_v49  ;;  %13312 = vst [vmem:[#allocation117_spill] sm:$0xff] %v6075_v11  ;;  %v1253_v9 = vrot.slane %v1252_v47, 2  ;;  %v1265_v3 = vrot.slane %v1264_v44, 4  ;;  %v6081_v41 = vadd.f32 %v1227_v51, %v1226_v63  ;;  %v1271_v36 = vsel %vm346_vm2, %v5023_v57, 0.0 }
 0x122   :  { %13313 = vst [vmem:[#allocation118_spill] sm:$0xff] %v6077_v6  ;;  %13314 = vst [vmem:[#allocation119_spill] sm:$0xff] %v6079_v0  ;;  %v13317_v55 = vcombine.high %v13316_v53, %v13316_v53  ;;  %v1234_v13 = vrot.slane %v1233_v29, 1  ;;  %v1247_v16 = vadd.f32 %v1246_v58, %v1245_v46  ;;  %v1260_v20 = vrot.slane %v1259_v25, 2 }
 0x123   :  { %13315 = vst [vmem:[#allocation120_spill] sm:$0xff] %v6081_v41  ;;  %v1266_v15 = vadd.f32 %v1265_v3, %v1264_v44  ;;  %v1272_v48 = vrot.slane %v1271_v36, 4  ;;  %v1285_v21 = vsel %vm346_vm2, %v5024_v12, 0.0  ;;  %v13319_v63 = vcombine.high %v13318_v1, %v13318_v1  ;;  %v5025_v41 = vld [vmem:[#allocation2 + $0x220] sm:$0xff] }
 0x124   :  { %v1278_v28 = vsel %vm346_vm2, %v13317_v55, 0.0  ;;  %v1241_v39 = vrot.slane %v1240_v37, 1  ;;  %v1254_v51 = vadd.f32 %v1253_v9, %v1252_v47  ;;  %v1261_v2 = vadd.f32 %v1260_v20, %v1259_v25  ;;  %v13321_v9 = vld [vmem:[#allocation43_spill] sm:$0xff] }
 0x125   :  { %v1279_v4 = vrot.slane %v1278_v28, 4  ;;  %v1292_v59 = vsel %vm346_vm2, %v13319_v63, 0.0  ;;  %v1267_v8 = vrot.slane %v1266_v15, 2  ;;  %v1273_v57 = vadd.f32 %v1272_v48, %v1271_v36 }
 0x126   :  { %v1286_v55 = vrot.slane %v1285_v21, 4  ;;  %v1293_v58 = vrot.slane %v1292_v59, 4  ;;  %v6093_v46 = vadd.f32 %v1234_v13, %v1233_v29  ;;  %v1248_v44 = vrot.slane %v1247_v16, 1 }
 0x127   :  { %v1280_v53 = vadd.f32 %v1279_v4, %v1278_v28  ;;  %v1268_v3 = vadd.f32 %v1267_v8, %v1266_v15  ;;  %v1299_v12 = vsel %vm346_vm2, %v5025_v41, 0.0  ;;  %v1274_v0 = vrot.slane %v1273_v57, 2  ;;  %v5026_v41 = vld [vmem:[#allocation2 + $0x228] sm:$0xff] }
 0x128   :  { %13320 = vst [vmem:[#allocation41_spill] sm:$0xff] %v6093_v46  ;;  %v1287_v1 = vadd.f32 %v1286_v55, %v1285_v21  ;;  %v1294_v11 = vadd.f32 %v1293_v58, %v1292_v59  ;;  %v1255_v63 = vrot.slane %v1254_v51, 1  ;;  %v1262_v49 = vrot.slane %v1261_v2, 1 }
 0x129   :  { %v1281_v6 = vrot.slane %v1280_v53, 2  ;;  %v1300_v47 = vrot.slane %v1299_v12, 4  ;;  %v13322_v25 = vcombine.high %v13321_v9, %v13321_v9  ;;  %v1269_v28 = vrot.slane %v1268_v3, 1 }
 0x12a   :  { %v1275_v29 = vadd.f32 %v1274_v0, %v1273_v57  ;;  %v1288_v20 = vrot.slane %v1287_v1, 2  ;;  %v1295_v15 = vrot.slane %v1294_v11, 2  ;;  %v1313_v8 = vsel %vm346_vm2, %v5026_v41, 0.0  ;;  %v13332_v41 = vld [vmem:[#allocation45_spill] sm:$0xff] }
 0x12b   :  { %v1306_v36 = vsel %vm346_vm2, %v13322_v25, 0.0  ;;  %v1282_v13 = vadd.f32 %v1281_v6, %v1280_v53  ;;  %v1301_v48 = vadd.f32 %v1300_v47, %v1299_v12  ;;  %v6101_v21 = vadd.f32 %v1241_v39, %v1240_v37 }
 0x12c   :  { %v1307_v4 = vrot.slane %v1306_v36, 4  ;;  %v1276_v59 = vrot.slane %v1275_v29, 1  ;;  %v1289_v58 = vadd.f32 %v1288_v20, %v1287_v1  ;;  %v1314_v9 = vrot.slane %v1313_v8, 4 }
 0x12d   :  { %13323 = vst [vmem:[#allocation42_spill] sm:$0xff] %v6101_v21  ;;  %v1283_v55 = vrot.slane %v1282_v13, 1  ;;  %v1302_v46 = vrot.slane %v1301_v48, 2  ;;  %v13325_v25 = vcombine.high %v13324_v52, %v13324_v52  ;;  %v6107_v0 = vadd.f32 %v1248_v44, %v1247_v16  ;;  %v13339_v21 = vld [vmem:[#allocation48_spill] sm:$0xff] }
 0x12e   :  { %v1308_v50 = vadd.f32 %v1307_v4, %v1306_v36  ;;  %v6109_v57 = vadd.f32 %v1255_v63, %v1254_v51  ;;  %v6111_v53 = vadd.f32 %v1262_v49, %v1261_v2  ;;  %v6113_v12 = vadd.f32 %v1269_v28, %v1268_v3  ;;  %v5027_v4 = vld [vmem:[#allocation2 + $0x230] sm:$0xff]  ;;  %v5028_v28 = vld [vmem:[#allocation2 + $0x238] sm:$0xff] }
 0x12f   :  { %v1320_v6 = vsel %vm346_vm2, %v13325_v25, 0.0  ;;  %13326 = vst [vmem:[#allocation43_spill] sm:$0xff] %v6107_v0  ;;  %v1296_v37 = vadd.f32 %v1295_v15, %v1294_v11  ;;  %v1315_v47 = vadd.f32 %v1314_v9, %v1313_v8  ;;  %v6115_v20 = vadd.f32 %v1276_v59, %v1275_v29  ;;  %v13334_v15 = vld [vmem:[#allocation46_spill] sm:$0xff] }
 0x130   :  { %13327 = vst [vmem:[#allocation44_spill] sm:$0xff] %v6109_v57  ;;  %13328 = vst [vmem:[#allocation121_spill] sm:$0xff] %v6111_v53  ;;  %v1309_v39 = vrot.slane %v1308_v50, 2  ;;  %v1321_v1 = vrot.slane %v1320_v6, 4  ;;  %v6117_v36 = vadd.f32 %v1283_v55, %v1282_v13  ;;  %v1327_v52 = vsel %vm346_vm2, %v5027_v4, 0.0 }
 0x131   :  { %13329 = vst [vmem:[#allocation122_spill] sm:$0xff] %v6113_v12  ;;  %13330 = vst [vmem:[#allocation123_spill] sm:$0xff] %v6115_v20  ;;  %v13333_v16 = vcombine.high %v13332_v41, %v13332_v41  ;;  %v1290_v49 = vrot.slane %v1289_v58, 1  ;;  %v1303_v2 = vadd.f32 %v1302_v46, %v1301_v48  ;;  %v1316_v44 = vrot.slane %v1315_v47, 2 }
 0x132   :  { %13331 = vst [vmem:[#allocation124_spill] sm:$0xff] %v6117_v36  ;;  %v1322_v3 = vadd.f32 %v1321_v1, %v1320_v6  ;;  %v1328_v11 = vrot.slane %v1327_v52, 4  ;;  %v1341_v29 = vsel %vm346_vm2, %v5028_v28, 0.0  ;;  %v13335_v13 = vcombine.high %v13334_v15, %v13334_v15  ;;  %v5029_v36 = vld [vmem:[#allocation2 + $0x240] sm:$0xff] }
 0x133   :  { %v1334_v51 = vsel %vm346_vm2, %v13333_v16, 0.0  ;;  %v1297_v59 = vrot.slane %v1296_v37, 1  ;;  %v1310_v55 = vadd.f32 %v1309_v39, %v1308_v50  ;;  %v1317_v9 = vadd.f32 %v1316_v44, %v1315_v47  ;;  %v13337_v39 = vld [vmem:[#allocation47_spill] sm:$0xff] }
 0x134   :  { %v1335_v63 = vrot.slane %v1334_v51, 4  ;;  %v1348_v8 = vsel %vm346_vm2, %v13335_v13, 0.0  ;;  %v1323_v25 = vrot.slane %v1322_v3, 2  ;;  %v1329_v4 = vadd.f32 %v1328_v11, %v1327_v52 }
 0x135   :  { %v1342_v16 = vrot.slane %v1341_v29, 4  ;;  %v1349_v46 = vrot.slane %v1348_v8, 4  ;;  %v6129_v48 = vadd.f32 %v1290_v49, %v1289_v58  ;;  %v1304_v6 = vrot.slane %v1303_v2, 1 }
 0x136   :  { %v1336_v41 = vadd.f32 %v1335_v63, %v1334_v51  ;;  %v1324_v1 = vadd.f32 %v1323_v25, %v1322_v3  ;;  %v1355_v28 = vsel %vm346_vm2, %v5029_v36, 0.0  ;;  %v1330_v20 = vrot.slane %v1329_v4, 2  ;;  %v5030_v36 = vld [vmem:[#allocation2 + $0x248] sm:$0xff] }
 0x137   :  { %13336 = vst [vmem:[#allocation45_spill] sm:$0xff] %v6129_v48  ;;  %v1343_v15 = vadd.f32 %v1342_v16, %v1341_v29  ;;  %v1350_v53 = vadd.f32 %v1349_v46, %v1348_v8  ;;  %v1311_v13 = vrot.slane %v1310_v55, 1  ;;  %v1318_v57 = vrot.slane %v1317_v9, 1 }
 0x138   :  { %v1337_v12 = vrot.slane %v1336_v41, 2  ;;  %v1356_v50 = vrot.slane %v1355_v28, 4  ;;  %v13338_v47 = vcombine.high %v13337_v39, %v13337_v39  ;;  %v1325_v51 = vrot.slane %v1324_v1, 1 }
 0x139   :  { %v1331_v58 = vadd.f32 %v1330_v20, %v1329_v4  ;;  %v1344_v44 = vrot.slane %v1343_v15, 2  ;;  %v1351_v3 = vrot.slane %v1350_v53, 2  ;;  %v1369_v25 = vsel %vm346_vm2, %v5030_v36, 0.0  ;;  %v13347_v36 = vld [vmem:[#allocation49_spill] sm:$0xff] }
 0x13a   :  { %v1362_v52 = vsel %vm346_vm2, %v13338_v47, 0.0  ;;  %v1338_v49 = vadd.f32 %v1337_v12, %v1336_v41  ;;  %v1357_v11 = vadd.f32 %v1356_v50, %v1355_v28  ;;  %v6137_v29 = vadd.f32 %v1297_v59, %v1296_v37 }
 0x13b   :  { %v1363_v63 = vrot.slane %v1362_v52, 4  ;;  %v1332_v8 = vrot.slane %v1331_v58, 1  ;;  %v1345_v46 = vadd.f32 %v1344_v44, %v1343_v15  ;;  %v1370_v39 = vrot.slane %v1369_v25, 4 }
 0x13c   :  { %v1339_v16 = vrot.slane %v1338_v49, 1  ;;  %v1358_v48 = vrot.slane %v1357_v11, 2  ;;  %v13340_v47 = vcombine.high %v13339_v21, %v13339_v21  ;;  %v6143_v20 = vadd.f32 %v1304_v6, %v1303_v2 }
 0x13d   :  { %v1364_v0 = vadd.f32 %v1363_v63, %v1362_v52  ;;  %v6145_v4 = vadd.f32 %v1311_v13, %v1310_v55  ;;  %v6147_v41 = vadd.f32 %v1318_v57, %v1317_v9  ;;  %v6149_v28 = vadd.f32 %v1325_v51, %v1324_v1  ;;  %v5031_v63 = vld [vmem:[#allocation2 + $0x250] sm:$0xff]  ;;  %v5032_v51 = vld [vmem:[#allocation2 + $0x258] sm:$0xff] }
 0x13e   :  { %v1376_v12 = vsel %vm346_vm2, %v13340_v47, 0.0  ;;  %13341 = vst [vmem:[#allocation46_spill] sm:$0xff] %v6143_v20  ;;  %v1352_v37 = vadd.f32 %v1351_v3, %v1350_v53  ;;  %v1371_v50 = vadd.f32 %v1370_v39, %v1369_v25  ;;  %v6151_v44 = vadd.f32 %v1332_v8, %v1331_v58  ;;  %v13349_v3 = vld [vmem:[#allocation50_spill] sm:$0xff] }
 0x13f   :  { %13342 = vst [vmem:[#allocation47_spill] sm:$0xff] %v6145_v4  ;;  %13343 = vst [vmem:[#allocation48_spill] sm:$0xff] %v6147_v41  ;;  %v1365_v59 = vrot.slane %v1364_v0, 2  ;;  %v1377_v15 = vrot.slane %v1376_v12, 4  ;;  %v6153_v52 = vadd.f32 %v1339_v16, %v1338_v49  ;;  %v1383_v21 = vsel %vm346_vm2, %v5031_v63, 0.0 }
 0x140   :  { %13344 = vst [vmem:[#allocation125_spill] sm:$0xff] %v6149_v28  ;;  %13345 = vst [vmem:[#allocation126_spill] sm:$0xff] %v6151_v44  ;;  %v13348_v2 = vcombine.high %v13347_v36, %v13347_v36  ;;  %v1346_v57 = vrot.slane %v1345_v46, 1  ;;  %v1359_v9 = vadd.f32 %v1358_v48, %v1357_v11  ;;  %v1372_v6 = vrot.slane %v1371_v50, 2 }
 0x141   :  { %13346 = vst [vmem:[#allocation127_spill] sm:$0xff] %v6153_v52  ;;  %v1378_v1 = vadd.f32 %v1377_v15, %v1376_v12  ;;  %v1384_v53 = vrot.slane %v1383_v21, 4  ;;  %v1397_v58 = vsel %vm346_vm2, %v5032_v51, 0.0  ;;  %v13350_v49 = vcombine.high %v13349_v3, %v13349_v3  ;;  %v5033_v52 = vld [vmem:[#allocation2 + $0x260] sm:$0xff] }
 0x142   :  { %v1390_v55 = vsel %vm346_vm2, %v13348_v2, 0.0  ;;  %v1353_v8 = vrot.slane %v1352_v37, 1  ;;  %v1366_v16 = vadd.f32 %v1365_v59, %v1364_v0  ;;  %v1373_v39 = vadd.f32 %v1372_v6, %v1371_v50  ;;  %v13352_v59 = vld [vmem:[#allocation51_spill] sm:$0xff] }
 0x143   :  { %v1391_v13 = vrot.slane %v1390_v55, 4  ;;  %v1404_v25 = vsel %vm346_vm2, %v13350_v49, 0.0  ;;  %v1379_v47 = vrot.slane %v1378_v1, 2  ;;  %v1385_v63 = vadd.f32 %v1384_v53, %v1383_v21 }
 0x144   :  { %v1398_v2 = vrot.slane %v1397_v58, 4  ;;  %v1405_v48 = vrot.slane %v1404_v25, 4  ;;  %v6165_v11 = vadd.f32 %v1346_v57, %v1345_v46  ;;  %v1360_v12 = vrot.slane %v1359_v9, 1 }
 0x145   :  { %v1392_v36 = vadd.f32 %v1391_v13, %v1390_v55  ;;  %v1380_v15 = vadd.f32 %v1379_v47, %v1378_v1  ;;  %v1411_v51 = vsel %vm346_vm2, %v5033_v52, 0.0  ;;  %v1386_v44 = vrot.slane %v1385_v63, 2  ;;  %v5034_v13 = vld [vmem:[#allocation2 + $0x268] sm:$0xff] }
 0x146   :  { %13351 = vst [vmem:[#allocation49_spill] sm:$0xff] %v6165_v11  ;;  %v1399_v3 = vadd.f32 %v1398_v2, %v1397_v58  ;;  %v1406_v41 = vadd.f32 %v1405_v48, %v1404_v25  ;;  %v1367_v49 = vrot.slane %v1366_v16, 1  ;;  %v1374_v4 = vrot.slane %v1373_v39, 1 }
 0x147   :  { %v1393_v28 = vrot.slane %v1392_v36, 2  ;;  %v1412_v0 = vrot.slane %v1411_v51, 4  ;;  %v13353_v50 = vcombine.high %v13352_v59, %v13352_v59  ;;  %v1381_v55 = vrot.slane %v1380_v15, 1 }
 0x148   :  { %v1387_v46 = vadd.f32 %v1386_v44, %v1385_v63  ;;  %v1400_v57 = vrot.slane %v1399_v3, 2  ;;  %v1407_v6 = vrot.slane %v1406_v41, 2  ;;  %v6172_v1 = vadd.f32 %v1353_v8, %v1352_v37 }
 0x149   :  { %v1418_v21 = vsel %vm346_vm2, %v13353_v50, 0.0  ;;  %v1413_v53 = vadd.f32 %v1412_v0, %v1411_v51  ;;  %v1425_v58 = vsel %vm346_vm2, %v5034_v13, 0.0  ;;  %v6175_v25 = vadd.f32 %v1360_v12, %v1359_v9  ;;  %v13356_v50 = vld [vmem:[#allocation52_spill] sm:$0xff] }
 0x14a   :  { %13354 = vst [vmem:[#allocation50_spill] sm:$0xff] %v6172_v1  ;;  %v1419_v52 = vrot.slane %v1418_v21, 4  ;;  %v1388_v47 = vrot.slane %v1387_v46, 1  ;;  %v1394_v2 = vadd.f32 %v1393_v28, %v1392_v36  ;;  %v1401_v48 = vadd.f32 %v1400_v57, %v1399_v3 }
 0x14b   :  { %13355 = vst [vmem:[#allocation51_spill] sm:$0xff] %v6175_v25  ;;  %v1414_v11 = vrot.slane %v1413_v53, 2  ;;  %v1426_v20 = vrot.slane %v1425_v58, 4  ;;  %v13357_v44 = vcombine.high %v13356_v50, %v13356_v50  ;;  %v6181_v37 = vadd.f32 %v1367_v49, %v1366_v16 }
 0x14c   :  { %v1420_v59 = vadd.f32 %v1419_v52, %v1418_v21  ;;  %v6183_v8 = vadd.f32 %v1374_v4, %v1373_v39  ;;  %v6185_v51 = vadd.f32 %v1381_v55, %v1380_v15  ;;  %v1408_v0 = vadd.f32 %v1407_v6, %v1406_v41  ;;  %v5035_v21 = vld [vmem:[#allocation2 + $0x270] sm:$0xff]  ;;  %v13362_v52 = vld [vmem:[#allocation53_spill] sm:$0xff]  ;;  %v5036_v55 = vld [vmem:[#allocation2 + $0x278] sm:$0xff] }
 0x14d   :  { %v1432_v63 = vsel %vm346_vm2, %v13357_v44, 0.0  ;;  %13358 = vst [vmem:[#allocation52_spill] sm:$0xff] %v6181_v37  ;;  %v1415_v9 = vadd.f32 %v1414_v11, %v1413_v53  ;;  %v1427_v13 = vadd.f32 %v1426_v20, %v1425_v58  ;;  %v6187_v36 = vadd.f32 %v1388_v47, %v1387_v46  ;;  %v13364_v46 = vld [vmem:[#allocation54_spill] sm:$0xff] }
 0x14e   :  { %13359 = vst [vmem:[#allocation128_spill] sm:$0xff] %v6183_v8  ;;  %13360 = vst [vmem:[#allocation129_spill] sm:$0xff] %v6185_v51  ;;  %v1421_v12 = vrot.slane %v1420_v59, 2  ;;  %v1433_v28 = vrot.slane %v1432_v63, 4  ;;  %v1395_v3 = vrot.slane %v1394_v2, 1  ;;  %v1439_v57 = vsel %vm346_vm2, %v5035_v21, 0.0 }
 0x14f   :  { %13361 = vst [vmem:[#allocation130_spill] sm:$0xff] %v6187_v36  ;;  %v13363_v50 = vcombine.high %v13362_v52, %v13362_v52  ;;  %v1402_v4 = vrot.slane %v1401_v48, 1  ;;  %v1428_v15 = vrot.slane %v1427_v13, 2  ;;  %v1440_v41 = vrot.slane %v1439_v57, 4 }
 0x150   :  { %v1422_v39 = vadd.f32 %v1421_v12, %v1420_v59  ;;  %v1434_v49 = vadd.f32 %v1433_v28, %v1432_v63  ;;  %v1453_v20 = vsel %vm346_vm2, %v5036_v55, 0.0  ;;  %v13365_v6 = vcombine.high %v13364_v46, %v13364_v46 }
 0x151   :  { %v1446_v16 = vsel %vm346_vm2, %v13363_v50, 0.0  ;;  %v1409_v58 = vrot.slane %v1408_v0, 1  ;;  %v1416_v47 = vrot.slane %v1415_v9, 1  ;;  %v1429_v44 = vadd.f32 %v1428_v15, %v1427_v13 }
 0x152   :  { %v1447_v11 = vrot.slane %v1446_v16, 4  ;;  %v1460_v53 = vsel %vm346_vm2, %v13365_v6, 0.0  ;;  %v1435_v21 = vrot.slane %v1434_v49, 2  ;;  %v1441_v52 = vadd.f32 %v1440_v41, %v1439_v57 }
 0x153   :  { %v1454_v36 = vrot.slane %v1453_v20, 4  ;;  %v1461_v59 = vrot.slane %v1460_v53, 4  ;;  %v6199_v12 = vadd.f32 %v1395_v3, %v1394_v2  ;;  %v1423_v63 = vrot.slane %v1422_v39, 1 }
 0x154   :  { %v1448_v50 = vadd.f32 %v1447_v11, %v1446_v16  ;;  %v1430_v28 = vrot.slane %v1429_v44, 1  ;;  %v1436_v51 = vadd.f32 %v1435_v21, %v1434_v49  ;;  %v1442_v8 = vrot.slane %v1441_v52, 2  ;;  %v13366_v49 = vld [vmem:[#allocation55_spill] sm:$0xff] }
 0x155   :  { %v1455_v37 = vadd.f32 %v1454_v36, %v1453_v20  ;;  %v1462_v25 = vadd.f32 %v1461_v59, %v1460_v53  ;;  %v6201_v46 = vadd.f32 %v1402_v4, %v1401_v48  ;;  %v6203_v6 = vadd.f32 %v1409_v58, %v1408_v0  ;;  %v13367_v36 = vld [vmem:[#allocation56_spill] sm:$0xff] }
 0x156   :  { %v1449_v55 = vrot.slane %v1448_v50, 2  ;;  %v6205_v1 = vadd.f32 %v1416_v47, %v1415_v9  ;;  %v1437_v13 = vrot.slane %v1436_v51, 1  ;;  %v1443_v57 = vadd.f32 %v1442_v8, %v1441_v52  ;;  %v13368_v8 = vld [vmem:[#allocation57_spill] sm:$0xff]  ;;  %v13369_v47 = vld [vmem:[#allocation58_spill] sm:$0xff] }
 0x157   :  { %v1456_v15 = vrot.slane %v1455_v37, 2  ;;  %v1463_v41 = vrot.slane %v1462_v25, 2  ;;  %v6207_v2 = vadd.f32 %v1423_v63, %v1422_v39  ;;  %v6209_v3 = vadd.f32 %v1430_v28, %v1429_v44  ;;  %v13370_v44 = vld [vmem:[#allocation59_spill] sm:$0xff] }
 0x158   :  { %v1450_v16 = vadd.f32 %v1449_v55, %v1448_v50  ;;  %v6212_v11 = vmul.f32 0.25, %v13366_v49  ;;  %v6215_v20 = vmul.f32 0.25, %v13367_v36  ;;  %v1444_v48 = vrot.slane %v1443_v57, 1 }
 0x159   :  { %v1457_v4 = vadd.f32 %v1456_v15, %v1455_v37  ;;  %v1464_v9 = vadd.f32 %v1463_v41, %v1462_v25  ;;  %v6217_v53 = vadd.f32 %v1437_v13, %v1436_v51  ;;  %v6220_v58 = vmul.f32 0.25, %v13368_v8 }
 0x15a   :  { %v1451_v0 = vrot.slane %v1450_v16, 1  ;;  %v6223_v39 = vmul.f32 0.25, %v13369_v47  ;;  %v6226_v21 = vmul.f32 0.25, %v13370_v44  ;;  %v6229_v59 = vmul.f32 0.25, %v5535_v22  ;;  %v13374_v22 = vld [vmem:[#allocation60_spill] sm:$0xff]  ;;  %v13395_v47 = vld [vmem:[#allocation65_spill] sm:$0xff] }
 0x15b   :  { %v1458_v52 = vrot.slane %v1457_v4, 1  ;;  %v1465_v50 = vrot.slane %v1464_v9, 1  ;;  %v6232_v63 = vmul.f32 0.25, %v5537_v43  ;;  %v6234_v25 = vadd.f32 %v1444_v48, %v1443_v57  ;;  %v13376_v43 = vld [vmem:[#allocation61_spill] sm:$0xff]  ;;  %v13384_v48 = vld [vmem:[#allocation62_spill] sm:$0xff] }
 0x15c   :  { %v6237_v37 = vmul.f32 0.25, %v5539_v32  ;;  %v6240_v51 = vmul.f32 0.25, %v5541_v24  ;;  %v6243_v28 = vmul.f32 0.25, %v5543_v7  ;;  %v6245_v55 = vadd.f32 %v1451_v0, %v1450_v16 }
 0x15d   :  { %v6248_v13 = vmul.f32 0.25, %v5545_v34  ;;  %v6251_v15 = vmul.f32 0.25, %v13374_v22  ;;  %v6254_v57 = vmul.f32 0.25, %v13376_v43  ;;  %v6256_v41 = vadd.f32 %v1458_v52, %v1457_v4  ;;  %v13397_v52 = vld [vmem:[#allocation66_spill] sm:$0xff] }
 0x15e   :  { %13371 = vst [vmem:[#allocation53_spill] sm:$0xff] %v6237_v37  ;;  %13372 = vst [vmem:[#allocation54_spill] sm:$0xff] %v6240_v51  ;;  %v6258_v32 = vadd.f32 %v1465_v50, %v1464_v9  ;;  %v6261_v24 = vmul.f32 0.25, %v5575_v26  ;;  %v6264_v7 = vmul.f32 0.25, %v5577_v33  ;;  %v6267_v16 = vmul.f32 0.25, %v5579_v18  ;;  %v13386_v26 = vld [vmem:[#allocation63_spill] sm:$0xff] }
 0x15f   :  { %13373 = vst [vmem:[#allocation55_spill] sm:$0xff] %v6243_v28  ;;  %13375 = vst [vmem:[#allocation56_spill] sm:$0xff] %v6251_v15  ;;  %v6270_v34 = vmul.f32 0.25, %v5581_v27  ;;  %v6273_v49 = vmul.f32 0.25, %v5583_v23  ;;  %v6276_v36 = vmul.f32 0.25, %v5587_v60  ;;  %v6279_v0 = vmul.f32 0.25, %v13384_v48 }
 0x160   :  { %13377 = vst [vmem:[#allocation57_spill] sm:$0xff] %v6254_v57  ;;  %13378 = vst [vmem:[#allocation58_spill] sm:$0xff] %v6261_v24  ;;  %v6282_v4 = vmul.f32 0.25, %v13386_v26  ;;  %v13388_v33 = vld [vmem:[#allocation64_spill] sm:$0xff]  ;;  %v6288_v18 = vmul.f32 0.25, %v5617_v30  ;;  %v6291_v27 = vmul.f32 0.25, %v5619_v10 }
 0x161   :  { %13379 = vst [vmem:[#allocation59_spill] sm:$0xff] %v6264_v7  ;;  %13380 = vst [vmem:[#allocation60_spill] sm:$0xff] %v6267_v16  ;;  %v6285_v9 = vmul.f32 0.25, %v13388_v33  ;;  %v6294_v23 = vmul.f32 0.25, %v5621_v19  ;;  %v6297_v60 = vmul.f32 0.25, %v5625_v42  ;;  %v6300_v8 = vmul.f32 0.25, %v5627_v14 }
 0x162   :  { %13381 = vst [vmem:[#allocation61_spill] sm:$0xff] %v6270_v34  ;;  %13382 = vst [vmem:[#allocation131_spill] sm:$0xff] %v6273_v49  ;;  %v6303_v44 = vmul.f32 0.25, %v13395_v47  ;;  %v6306_v50 = vmul.f32 0.25, %v13397_v52  ;;  %v13399_v30 = vld [vmem:[#allocation67_spill] sm:$0xff]  ;;  %v6312_v10 = vmul.f32 0.25, %v5651_v5 }
 0x163   :  { %13383 = vst [vmem:[#allocation132_spill] sm:$0xff] %v6276_v36  ;;  %13385 = vst [vmem:[#allocation62_spill] sm:$0xff] %v6279_v0  ;;  %v6309_v22 = vmul.f32 0.25, %v13399_v30  ;;  %v6315_v19 = vmul.f32 0.25, %v5659_v61  ;;  %v13403_v42 = vld [vmem:[#allocation68_spill] sm:$0xff]  ;;  %v6321_v14 = vmul.f32 0.25, %v5665_v62 }
 0x164   :  { %13387 = vst [vmem:[#allocation63_spill] sm:$0xff] %v6282_v4  ;;  %13389 = vst [vmem:[#allocation64_spill] sm:$0xff] %v6285_v9  ;;  %v6318_v43 = vmul.f32 0.25, %v13403_v42  ;;  %v6324_v48 = vmul.f32 0.25, %v5667_v31  ;;  %v13407_v26 = vld [vmem:[#allocation69_spill] sm:$0xff]  ;;  %v13409_v47 = vld [vmem:[#allocation70_spill] sm:$0xff] }
 0x165   :  { %13390 = vst [vmem:[#allocation133_spill] sm:$0xff] %v6288_v18  ;;  %13391 = vst [vmem:[#allocation134_spill] sm:$0xff] %v6291_v27  ;;  %v6327_v33 = vmul.f32 0.25, %v13407_v26  ;;  %v6330_v52 = vmul.f32 0.25, %v13409_v47  ;;  %v13411_v5 = vld [vmem:[#allocation71_spill] sm:$0xff]  ;;  %v13413_v61 = vld [vmem:[#allocation72_spill] sm:$0xff] }
 0x166   :  { %13392 = vst [vmem:[#allocation135_spill] sm:$0xff] %v6294_v23  ;;  %13393 = vst [vmem:[#allocation136_spill] sm:$0xff] %v6297_v60  ;;  %v6333_v30 = vmul.f32 0.25, %v13411_v5  ;;  %v6339_v42 = vmul.f32 0.25, %v5701_v40  ;;  %v6342_v62 = vmul.f32 0.25, %v5707_v45  ;;  %v6345_v31 = vmul.f32 0.25, %v5709_v35 }
 0x167   :  { %13394 = vst [vmem:[#allocation137_spill] sm:$0xff] %v6300_v8  ;;  %13396 = vst [vmem:[#allocation65_spill] sm:$0xff] %v6303_v44  ;;  %v6348_v26 = vmul.f32 0.25, %v5711_v38  ;;  %v13419_v47 = vld [vmem:[#allocation73_spill] sm:$0xff]  ;;  %v13421_v5 = vld [vmem:[#allocation74_spill] sm:$0xff]  ;;  %v6363_v45 = vmul.f32 0.25, %v5741_v17 }
 0x168   :  { %13398 = vst [vmem:[#allocation66_spill] sm:$0xff] %v6306_v50  ;;  %13400 = vst [vmem:[#allocation67_spill] sm:$0xff] %v6309_v22  ;;  %v6336_v22 = vmul.f32 0.25, %v13413_v61  ;;  %v6351_v0 = vmul.f32 0.25, %v13419_v47  ;;  %v6354_v28 = vmul.f32 0.25, %v13421_v5  ;;  %v13423_v61 = vld [vmem:[#allocation75_spill] sm:$0xff] }
 0x169   :  { %13401 = vst [vmem:[#allocation138_spill] sm:$0xff] %v6312_v10  ;;  %13402 = vst [vmem:[#allocation139_spill] sm:$0xff] %v6315_v19  ;;  %v13425_v40 = vld [vmem:[#allocation76_spill] sm:$0xff]  ;;  %v6366_v35 = vmul.f32 0.25, %v5747_v56  ;;  %v6369_v38 = vmul.f32 0.25, %v5749_v54  ;;  %v13430_v47 = vld [vmem:[#allocation77_spill] sm:$0xff] }
 0x16a   :  { %13404 = vst [vmem:[#allocation68_spill] sm:$0xff] %v6318_v43  ;;  %13405 = vst [vmem:[#allocation140_spill] sm:$0xff] %v6321_v14  ;;  %v6372_v50 = vmul.f32 0.25, %v13430_v47  ;;  %v13432_v5 = vld [vmem:[#allocation78_spill] sm:$0xff]  ;;  %v13438_v17 = vld [vmem:[#allocation81_spill] sm:$0xff] }
 0x16b   :  { %13406 = vst [vmem:[#allocation141_spill] sm:$0xff] %v6324_v48  ;;  %13408 = vst [vmem:[#allocation69_spill] sm:$0xff] %v6327_v33  ;;  %v6375_v36 = vmul.f32 0.25, %v13432_v5  ;;  %v13440_v56 = vld [vmem:[#allocation82_spill] sm:$0xff]  ;;  %v13442_v54 = vld [vmem:[#allocation83_spill] sm:$0xff] }
 0x16c   :  { %13410 = vst [vmem:[#allocation70_spill] sm:$0xff] %v6330_v52  ;;  %13412 = vst [vmem:[#allocation71_spill] sm:$0xff] %v6333_v30  ;;  %v13444_v47 = vld [vmem:[#allocation84_spill] sm:$0xff]  ;;  %v13446_v5 = vld [vmem:[#allocation85_spill] sm:$0xff] }
 0x16d   :  { %13414 = vst [vmem:[#allocation72_spill] sm:$0xff] %v6336_v22  ;;  %13415 = vst [vmem:[#allocation142_spill] sm:$0xff] %v6339_v42  ;;  %v6357_v22 = vmul.f32 0.25, %v13423_v61  ;;  %v6360_v42 = vmul.f32 0.25, %v13425_v40  ;;  %v13434_v61 = vld [vmem:[#allocation79_spill] sm:$0xff]  ;;  %v13436_v40 = vld [vmem:[#allocation80_spill] sm:$0xff] }
 0x16e   :  { %13416 = vst [vmem:[#allocation143_spill] sm:$0xff] %v6342_v62  ;;  %13417 = vst [vmem:[#allocation144_spill] sm:$0xff] %v6345_v31  ;;  %v6378_v51 = vmul.f32 0.25, %v13434_v61  ;;  %v6396_v30 = vmul.f32 0.25, %v13446_v5  ;;  %v13448_v61 = vld [vmem:[#allocation86_spill] sm:$0xff]  ;;  %v13460_v5 = vld [vmem:[#allocation12_spill] sm:$0xff] }
 0x16f   :  { %13418 = vst [vmem:[#allocation145_spill] sm:$0xff] %v6348_v26  ;;  %13420 = vst [vmem:[#allocation73_spill] sm:$0xff] %v6351_v0  ;;  %v6399_v52 = vmul.f32 0.25, %v13448_v61  ;;  %v13462_v61 = vld [vmem:[#allocation89_spill] sm:$0xff] }
 0x170   :  { %13422 = vst [vmem:[#allocation74_spill] sm:$0xff] %v6354_v28  ;;  %13424 = vst [vmem:[#allocation75_spill] sm:$0xff] %v6357_v22  ;;  %v6393_v22 = vmul.f32 0.25, %v13444_v47  ;;  %v13458_v47 = vld [vmem:[#allocation11_spill] sm:$0xff] }
 0x171   :  { %13426 = vst [vmem:[#allocation76_spill] sm:$0xff] %v6360_v42  ;;  %13427 = vst [vmem:[#allocation146_spill] sm:$0xff] %v6363_v45  ;;  %v6381_v42 = vmul.f32 0.25, %v13436_v40  ;;  %v6384_v45 = vmul.f32 0.25, %v13438_v17  ;;  %v13450_v40 = vld [vmem:[#allocation87_spill] sm:$0xff]  ;;  %v13452_v17 = vld [vmem:[#allocation88_spill] sm:$0xff] }
 0x172   :  { %13428 = vst [vmem:[#allocation147_spill] sm:$0xff] %v6366_v35  ;;  %13429 = vst [vmem:[#allocation148_spill] sm:$0xff] %v6369_v38  ;;  %v6387_v35 = vmul.f32 0.25, %v13440_v56  ;;  %v6390_v38 = vmul.f32 0.25, %v13442_v54  ;;  %v6402_v33 = vmul.f32 0.25, %v13450_v40  ;;  %v13454_v56 = vld [vmem:[#allocation9_spill] sm:$0xff] }
 0x173   :  { %13431 = vst [vmem:[#allocation77_spill] sm:$0xff] %v6372_v50  ;;  %13433 = vst [vmem:[#allocation78_spill] sm:$0xff] %v6375_v36  ;;  %v13456_v54 = vld [vmem:[#allocation10_spill] sm:$0xff] }
 0x174   :  { %13435 = vst [vmem:[#allocation79_spill] sm:$0xff] %v6378_v51  ;;  %13437 = vst [vmem:[#allocation80_spill] sm:$0xff] %v6381_v42  ;;  %v13464_v40 = vld [vmem:[#allocation90_spill] sm:$0xff] }
 0x175   :  { %13439 = vst [vmem:[#allocation81_spill] sm:$0xff] %v6384_v45  ;;  %13441 = vst [vmem:[#allocation82_spill] sm:$0xff] %v6387_v35  ;;  %v6405_v45 = vmul.f32 0.25, %v13452_v17  ;;  %v6408_v35 = vmul.f32 0.25, %v13454_v56  ;;  %v6423_v28 = vmul.f32 0.25, %v13464_v40  ;;  %v13466_v17 = vld [vmem:[#allocation91_spill] sm:$0xff] }
 0x176   :  { %13443 = vst [vmem:[#allocation83_spill] sm:$0xff] %v6390_v38  ;;  %13445 = vst [vmem:[#allocation84_spill] sm:$0xff] %v6393_v22  ;;  %v6411_v38 = vmul.f32 0.25, %v13456_v54  ;;  %v6414_v22 = vmul.f32 0.25, %v13458_v47  ;;  %v6426_v44 = vmul.f32 0.25, %v13466_v17  ;;  %v13468_v56 = vld [vmem:[#allocation92_spill] sm:$0xff] }
 0x177   :  { %13447 = vst [vmem:[#allocation85_spill] sm:$0xff] %v6396_v30  ;;  %13449 = vst [vmem:[#allocation86_spill] sm:$0xff] %v6399_v52  ;;  %v6417_v30 = vmul.f32 0.25, %v13460_v5  ;;  %v6420_v52 = vmul.f32 0.25, %v13462_v61  ;;  %v6429_v8 = vmul.f32 0.25, %v13468_v56  ;;  %v13470_v54 = vld [vmem:[#allocation13_spill] sm:$0xff] }
 0x178   :  { %13451 = vst [vmem:[#allocation87_spill] sm:$0xff] %v6402_v33  ;;  %13453 = vst [vmem:[#allocation88_spill] sm:$0xff] %v6405_v45  ;;  %v13472_v47 = vld [vmem:[#allocation14_spill] sm:$0xff]  ;;  %v13474_v5 = vld [vmem:[#allocation15_spill] sm:$0xff] }
 0x179   :  { %13455 = vst [vmem:[#allocation9_spill] sm:$0xff] %v6408_v35  ;;  %13457 = vst [vmem:[#allocation10_spill] sm:$0xff] %v6411_v38  ;;  %v6432_v38 = vmul.f32 0.25, %v13470_v54  ;;  %v13476_v61 = vld [vmem:[#allocation16_spill] sm:$0xff]  ;;  %v13478_v40 = vld [vmem:[#allocation93_spill] sm:$0xff] }
 0x17a   :  { %13459 = vst [vmem:[#allocation11_spill] sm:$0xff] %v6414_v22  ;;  %13461 = vst [vmem:[#allocation12_spill] sm:$0xff] %v6417_v30  ;;  %v6435_v22 = vmul.f32 0.25, %v13472_v47  ;;  %v6438_v30 = vmul.f32 0.25, %v13474_v5  ;;  %v13480_v17 = vld [vmem:[#allocation94_spill] sm:$0xff]  ;;  %v13482_v56 = vld [vmem:[#allocation95_spill] sm:$0xff] }
 0x17b   :  { %13463 = vst [vmem:[#allocation89_spill] sm:$0xff] %v6420_v52  ;;  %13465 = vst [vmem:[#allocation90_spill] sm:$0xff] %v6423_v28  ;;  %v6441_v52 = vmul.f32 0.25, %v13476_v61  ;;  %v6444_v28 = vmul.f32 0.25, %v13478_v40  ;;  %v13484_v54 = vld [vmem:[#allocation96_spill] sm:$0xff]  ;;  %v13486_v47 = vld [vmem:[#allocation17_spill] sm:$0xff] }
 0x17c   :  { %13467 = vst [vmem:[#allocation91_spill] sm:$0xff] %v6426_v44  ;;  %13469 = vst [vmem:[#allocation92_spill] sm:$0xff] %v6429_v8  ;;  %v6447_v44 = vmul.f32 0.25, %v13480_v17  ;;  %v6450_v8 = vmul.f32 0.25, %v13482_v56  ;;  %v13488_v5 = vld [vmem:[#allocation18_spill] sm:$0xff]  ;;  %v13490_v61 = vld [vmem:[#allocation19_spill] sm:$0xff] }
 0x17d   :  { %13471 = vst [vmem:[#allocation13_spill] sm:$0xff] %v6432_v38  ;;  %13473 = vst [vmem:[#allocation14_spill] sm:$0xff] %v6435_v22  ;;  %v6453_v38 = vmul.f32 0.25, %v13484_v54  ;;  %v6456_v22 = vmul.f32 0.25, %v13486_v47  ;;  %v13492_v40 = vld [vmem:[#allocation20_spill] sm:$0xff]  ;;  %v13494_v17 = vld [vmem:[#allocation97_spill] sm:$0xff] }
 0x17e   :  { %13475 = vst [vmem:[#allocation15_spill] sm:$0xff] %v6438_v30  ;;  %13477 = vst [vmem:[#allocation16_spill] sm:$0xff] %v6441_v52  ;;  %v6459_v30 = vmul.f32 0.25, %v13488_v5  ;;  %v6462_v52 = vmul.f32 0.25, %v13490_v61  ;;  %v13496_v56 = vld [vmem:[#allocation98_spill] sm:$0xff]  ;;  %v13498_v54 = vld [vmem:[#allocation99_spill] sm:$0xff] }
 0x17f   :  { %13479 = vst [vmem:[#allocation93_spill] sm:$0xff] %v6444_v28  ;;  %13481 = vst [vmem:[#allocation94_spill] sm:$0xff] %v6447_v44  ;;  %v6465_v28 = vmul.f32 0.25, %v13492_v40  ;;  %v6468_v44 = vmul.f32 0.25, %v13494_v17  ;;  %v13500_v47 = vld [vmem:[#allocation100_spill] sm:$0xff]  ;;  %v13502_v5 = vld [vmem:[#allocation21_spill] sm:$0xff] }
 0x180   :  { %13483 = vst [vmem:[#allocation95_spill] sm:$0xff] %v6450_v8  ;;  %13485 = vst [vmem:[#allocation96_spill] sm:$0xff] %v6453_v38  ;;  %v6471_v8 = vmul.f32 0.25, %v13496_v56  ;;  %v6474_v38 = vmul.f32 0.25, %v13498_v54  ;;  %v13504_v61 = vld [vmem:[#allocation22_spill] sm:$0xff]  ;;  %v13506_v40 = vld [vmem:[#allocation23_spill] sm:$0xff] }
 0x181   :  { %13487 = vst [vmem:[#allocation17_spill] sm:$0xff] %v6456_v22  ;;  %13489 = vst [vmem:[#allocation18_spill] sm:$0xff] %v6459_v30  ;;  %v6477_v22 = vmul.f32 0.25, %v13500_v47  ;;  %v6480_v30 = vmul.f32 0.25, %v13502_v5  ;;  %v13508_v17 = vld [vmem:[#allocation24_spill] sm:$0xff]  ;;  %v13510_v56 = vld [vmem:[#allocation101_spill] sm:$0xff] }
 0x182   :  { %13491 = vst [vmem:[#allocation19_spill] sm:$0xff] %v6462_v52  ;;  %13493 = vst [vmem:[#allocation20_spill] sm:$0xff] %v6465_v28  ;;  %v6483_v52 = vmul.f32 0.25, %v13504_v61  ;;  %v6486_v28 = vmul.f32 0.25, %v13506_v40  ;;  %v13512_v54 = vld [vmem:[#allocation102_spill] sm:$0xff]  ;;  %v13514_v47 = vld [vmem:[#allocation103_spill] sm:$0xff] }
 0x183   :  { %13495 = vst [vmem:[#allocation97_spill] sm:$0xff] %v6468_v44  ;;  %13497 = vst [vmem:[#allocation98_spill] sm:$0xff] %v6471_v8  ;;  %v6489_v44 = vmul.f32 0.25, %v13508_v17  ;;  %v6492_v8 = vmul.f32 0.25, %v13510_v56  ;;  %v13516_v5 = vld [vmem:[#allocation104_spill] sm:$0xff]  ;;  %v13518_v61 = vld [vmem:[#allocation25_spill] sm:$0xff] }
 0x184   :  { %13499 = vst [vmem:[#allocation99_spill] sm:$0xff] %v6474_v38  ;;  %13501 = vst [vmem:[#allocation100_spill] sm:$0xff] %v6477_v22  ;;  %v6495_v38 = vmul.f32 0.25, %v13512_v54  ;;  %v6498_v22 = vmul.f32 0.25, %v13514_v47  ;;  %v13520_v40 = vld [vmem:[#allocation26_spill] sm:$0xff]  ;;  %v13522_v17 = vld [vmem:[#allocation27_spill] sm:$0xff] }
 0x185   :  { %13503 = vst [vmem:[#allocation21_spill] sm:$0xff] %v6480_v30  ;;  %13505 = vst [vmem:[#allocation22_spill] sm:$0xff] %v6483_v52  ;;  %v6501_v30 = vmul.f32 0.25, %v13516_v5  ;;  %v6504_v52 = vmul.f32 0.25, %v13518_v61  ;;  %v13524_v56 = vld [vmem:[#allocation28_spill] sm:$0xff]  ;;  %v13526_v54 = vld [vmem:[#allocation105_spill] sm:$0xff] }
 0x186   :  { %13507 = vst [vmem:[#allocation23_spill] sm:$0xff] %v6486_v28  ;;  %13509 = vst [vmem:[#allocation24_spill] sm:$0xff] %v6489_v44  ;;  %v6507_v28 = vmul.f32 0.25, %v13520_v40  ;;  %v6510_v44 = vmul.f32 0.25, %v13522_v17  ;;  %v13528_v47 = vld [vmem:[#allocation106_spill] sm:$0xff]  ;;  %v13530_v5 = vld [vmem:[#allocation107_spill] sm:$0xff] }
 0x187   :  { %13511 = vst [vmem:[#allocation101_spill] sm:$0xff] %v6492_v8  ;;  %13513 = vst [vmem:[#allocation102_spill] sm:$0xff] %v6495_v38  ;;  %v6513_v8 = vmul.f32 0.25, %v13524_v56  ;;  %v6516_v38 = vmul.f32 0.25, %v13526_v54  ;;  %v13532_v61 = vld [vmem:[#allocation108_spill] sm:$0xff]  ;;  %v13534_v40 = vld [vmem:[#allocation29_spill] sm:$0xff] }
 0x188   :  { %13515 = vst [vmem:[#allocation103_spill] sm:$0xff] %v6498_v22  ;;  %13517 = vst [vmem:[#allocation104_spill] sm:$0xff] %v6501_v30  ;;  %v6519_v22 = vmul.f32 0.25, %v13528_v47  ;;  %v6522_v30 = vmul.f32 0.25, %v13530_v5  ;;  %v13536_v17 = vld [vmem:[#allocation30_spill] sm:$0xff]  ;;  %v13538_v56 = vld [vmem:[#allocation31_spill] sm:$0xff] }
 0x189   :  { %13519 = vst [vmem:[#allocation25_spill] sm:$0xff] %v6504_v52  ;;  %13521 = vst [vmem:[#allocation26_spill] sm:$0xff] %v6507_v28  ;;  %v6525_v52 = vmul.f32 0.25, %v13532_v61  ;;  %v6528_v28 = vmul.f32 0.25, %v13534_v40  ;;  %v13540_v54 = vld [vmem:[#allocation32_spill] sm:$0xff]  ;;  %v13542_v47 = vld [vmem:[#allocation109_spill] sm:$0xff] }
 0x18a   :  { %13523 = vst [vmem:[#allocation27_spill] sm:$0xff] %v6510_v44  ;;  %13525 = vst [vmem:[#allocation28_spill] sm:$0xff] %v6513_v8  ;;  %v6531_v44 = vmul.f32 0.25, %v13536_v17  ;;  %v6534_v8 = vmul.f32 0.25, %v13538_v56  ;;  %v13544_v5 = vld [vmem:[#allocation110_spill] sm:$0xff]  ;;  %v13546_v61 = vld [vmem:[#allocation111_spill] sm:$0xff] }
 0x18b   :  { %13527 = vst [vmem:[#allocation105_spill] sm:$0xff] %v6516_v38  ;;  %13529 = vst [vmem:[#allocation106_spill] sm:$0xff] %v6519_v22  ;;  %v6537_v38 = vmul.f32 0.25, %v13540_v54  ;;  %v6540_v22 = vmul.f32 0.25, %v13542_v47  ;;  %v13548_v40 = vld [vmem:[#allocation112_spill] sm:$0xff]  ;;  %v13550_v17 = vld [vmem:[#allocation33_spill] sm:$0xff] }
 0x18c   :  { %13531 = vst [vmem:[#allocation107_spill] sm:$0xff] %v6522_v30  ;;  %13533 = vst [vmem:[#allocation108_spill] sm:$0xff] %v6525_v52  ;;  %v6543_v30 = vmul.f32 0.25, %v13544_v5  ;;  %v6546_v52 = vmul.f32 0.25, %v13546_v61  ;;  %v13552_v56 = vld [vmem:[#allocation34_spill] sm:$0xff]  ;;  %v13554_v54 = vld [vmem:[#allocation35_spill] sm:$0xff] }
 0x18d   :  { %13535 = vst [vmem:[#allocation29_spill] sm:$0xff] %v6528_v28  ;;  %13537 = vst [vmem:[#allocation30_spill] sm:$0xff] %v6531_v44  ;;  %v6549_v28 = vmul.f32 0.25, %v13548_v40  ;;  %v6552_v44 = vmul.f32 0.25, %v13550_v17  ;;  %v13556_v47 = vld [vmem:[#allocation36_spill] sm:$0xff]  ;;  %v13558_v5 = vld [vmem:[#allocation113_spill] sm:$0xff] }
 0x18e   :  { %13539 = vst [vmem:[#allocation31_spill] sm:$0xff] %v6534_v8  ;;  %13541 = vst [vmem:[#allocation32_spill] sm:$0xff] %v6537_v38  ;;  %v6555_v8 = vmul.f32 0.25, %v13552_v56  ;;  %v6558_v38 = vmul.f32 0.25, %v13554_v54  ;;  %v13560_v61 = vld [vmem:[#allocation114_spill] sm:$0xff]  ;;  %v13562_v40 = vld [vmem:[#allocation115_spill] sm:$0xff] }
 0x18f   :  { %13543 = vst [vmem:[#allocation109_spill] sm:$0xff] %v6540_v22  ;;  %13545 = vst [vmem:[#allocation110_spill] sm:$0xff] %v6543_v30  ;;  %v6561_v22 = vmul.f32 0.25, %v13556_v47  ;;  %v6564_v30 = vmul.f32 0.25, %v13558_v5  ;;  %v13564_v17 = vld [vmem:[#allocation116_spill] sm:$0xff]  ;;  %v13566_v56 = vld [vmem:[#allocation37_spill] sm:$0xff] }
 0x190   :  { %13547 = vst [vmem:[#allocation111_spill] sm:$0xff] %v6546_v52  ;;  %13549 = vst [vmem:[#allocation112_spill] sm:$0xff] %v6549_v28  ;;  %v6567_v52 = vmul.f32 0.25, %v13560_v61  ;;  %v6570_v28 = vmul.f32 0.25, %v13562_v40  ;;  %v13568_v54 = vld [vmem:[#allocation38_spill] sm:$0xff]  ;;  %v13570_v47 = vld [vmem:[#allocation39_spill] sm:$0xff] }
 0x191   :  { %13551 = vst [vmem:[#allocation33_spill] sm:$0xff] %v6552_v44  ;;  %13553 = vst [vmem:[#allocation34_spill] sm:$0xff] %v6555_v8  ;;  %v6573_v44 = vmul.f32 0.25, %v13564_v17  ;;  %v6576_v8 = vmul.f32 0.25, %v13566_v56  ;;  %v13572_v5 = vld [vmem:[#allocation40_spill] sm:$0xff]  ;;  %v13574_v61 = vld [vmem:[#allocation117_spill] sm:$0xff] }
 0x192   :  { %13555 = vst [vmem:[#allocation35_spill] sm:$0xff] %v6558_v38  ;;  %13557 = vst [vmem:[#allocation36_spill] sm:$0xff] %v6561_v22  ;;  %v6579_v38 = vmul.f32 0.25, %v13568_v54  ;;  %v6582_v22 = vmul.f32 0.25, %v13570_v47  ;;  %v13576_v40 = vld [vmem:[#allocation118_spill] sm:$0xff]  ;;  %v13578_v17 = vld [vmem:[#allocation119_spill] sm:$0xff] }
 0x193   :  { %13559 = vst [vmem:[#allocation113_spill] sm:$0xff] %v6564_v30  ;;  %13561 = vst [vmem:[#allocation114_spill] sm:$0xff] %v6567_v52  ;;  %v6585_v30 = vmul.f32 0.25, %v13572_v5  ;;  %v6588_v52 = vmul.f32 0.25, %v13574_v61  ;;  %v13580_v56 = vld [vmem:[#allocation120_spill] sm:$0xff]  ;;  %v13582_v54 = vld [vmem:[#allocation41_spill] sm:$0xff] }
 0x194   :  { %13563 = vst [vmem:[#allocation115_spill] sm:$0xff] %v6570_v28  ;;  %13565 = vst [vmem:[#allocation116_spill] sm:$0xff] %v6573_v44  ;;  %v6591_v28 = vmul.f32 0.25, %v13576_v40  ;;  %v6594_v44 = vmul.f32 0.25, %v13578_v17  ;;  %v13584_v47 = vld [vmem:[#allocation42_spill] sm:$0xff]  ;;  %v13586_v5 = vld [vmem:[#allocation43_spill] sm:$0xff] }
 0x195   :  { %13567 = vst [vmem:[#allocation37_spill] sm:$0xff] %v6576_v8  ;;  %13569 = vst [vmem:[#allocation38_spill] sm:$0xff] %v6579_v38  ;;  %v6597_v8 = vmul.f32 0.25, %v13580_v56  ;;  %v6600_v38 = vmul.f32 0.25, %v13582_v54  ;;  %v13588_v61 = vld [vmem:[#allocation44_spill] sm:$0xff]  ;;  %v13590_v40 = vld [vmem:[#allocation121_spill] sm:$0xff] }
 0x196   :  { %13571 = vst [vmem:[#allocation39_spill] sm:$0xff] %v6582_v22  ;;  %13573 = vst [vmem:[#allocation40_spill] sm:$0xff] %v6585_v30  ;;  %v6603_v22 = vmul.f32 0.25, %v13584_v47  ;;  %v6606_v30 = vmul.f32 0.25, %v13586_v5  ;;  %v13592_v17 = vld [vmem:[#allocation122_spill] sm:$0xff]  ;;  %v13594_v56 = vld [vmem:[#allocation123_spill] sm:$0xff] }
 0x197   :  { %13575 = vst [vmem:[#allocation117_spill] sm:$0xff] %v6588_v52  ;;  %13577 = vst [vmem:[#allocation118_spill] sm:$0xff] %v6591_v28  ;;  %v6609_v52 = vmul.f32 0.25, %v13588_v61  ;;  %v6612_v28 = vmul.f32 0.25, %v13590_v40  ;;  %v13596_v54 = vld [vmem:[#allocation124_spill] sm:$0xff]  ;;  %v13598_v47 = vld [vmem:[#allocation45_spill] sm:$0xff] }
 0x198   :  { %13579 = vst [vmem:[#allocation119_spill] sm:$0xff] %v6594_v44  ;;  %13581 = vst [vmem:[#allocation120_spill] sm:$0xff] %v6597_v8  ;;  %v6615_v44 = vmul.f32 0.25, %v13592_v17  ;;  %v6618_v8 = vmul.f32 0.25, %v13594_v56  ;;  %v6627_v5 = vmul.f32 0.25, %v6137_v29  ;;  %v13601_v61 = vld [vmem:[#allocation46_spill] sm:$0xff] }
 0x199   :  { %13583 = vst [vmem:[#allocation41_spill] sm:$0xff] %v6600_v38  ;;  %13585 = vst [vmem:[#allocation42_spill] sm:$0xff] %v6603_v22  ;;  %v6621_v38 = vmul.f32 0.25, %v13596_v54  ;;  %v6624_v22 = vmul.f32 0.25, %v13598_v47  ;;  %v13603_v40 = vld [vmem:[#allocation47_spill] sm:$0xff]  ;;  %v13605_v17 = vld [vmem:[#allocation48_spill] sm:$0xff] }
 0x19a   :  { %13587 = vst [vmem:[#allocation43_spill] sm:$0xff] %v6606_v30  ;;  %13589 = vst [vmem:[#allocation44_spill] sm:$0xff] %v6609_v52  ;;  %v6630_v52 = vmul.f32 0.25, %v13601_v61  ;;  %v6633_v30 = vmul.f32 0.25, %v13603_v40  ;;  %v13607_v56 = vld [vmem:[#allocation125_spill] sm:$0xff]  ;;  %v13609_v54 = vld [vmem:[#allocation126_spill] sm:$0xff] }
 0x19b   :  { %13591 = vst [vmem:[#allocation121_spill] sm:$0xff] %v6612_v28  ;;  %13593 = vst [vmem:[#allocation122_spill] sm:$0xff] %v6615_v44  ;;  %v6636_v44 = vmul.f32 0.25, %v13605_v17  ;;  %v13611_v47 = vld [vmem:[#allocation127_spill] sm:$0xff]  ;;  %v13613_v29 = vld [vmem:[#allocation49_spill] sm:$0xff] }
 0x19c   :  { %13595 = vst [vmem:[#allocation123_spill] sm:$0xff] %v6618_v8  ;;  %13597 = vst [vmem:[#allocation124_spill] sm:$0xff] %v6621_v38  ;;  %v6639_v8 = vmul.f32 0.25, %v13607_v56  ;;  %v6642_v38 = vmul.f32 0.25, %v13609_v54  ;;  %v13615_v61 = vld [vmem:[#allocation50_spill] sm:$0xff]  ;;  %v13617_v40 = vld [vmem:[#allocation51_spill] sm:$0xff] }
 0x19d   :  { %13599 = vst [vmem:[#allocation45_spill] sm:$0xff] %v6624_v22  ;;  %13600 = vst [vmem:[#allocation149_spill] sm:$0xff] %v6627_v5  ;;  %v6645_v22 = vmul.f32 0.25, %v13611_v47  ;;  %v6648_v5 = vmul.f32 0.25, %v13613_v29  ;;  %v13619_v17 = vld [vmem:[#allocation52_spill] sm:$0xff]  ;;  %v13623_v54 = vld [vmem:[#allocation129_spill] sm:$0xff] }
 0x19e   :  { %13602 = vst [vmem:[#allocation46_spill] sm:$0xff] %v6630_v52  ;;  %13604 = vst [vmem:[#allocation47_spill] sm:$0xff] %v6633_v30  ;;  %v6651_v52 = vmul.f32 0.25, %v13615_v61  ;;  %v6654_v30 = vmul.f32 0.25, %v13617_v40  ;;  %v13621_v56 = vld [vmem:[#allocation128_spill] sm:$0xff]  ;;  %v13625_v47 = vld [vmem:[#allocation130_spill] sm:$0xff] }
 0x19f   :  { %13606 = vst [vmem:[#allocation48_spill] sm:$0xff] %v6636_v44  ;;  %13608 = vst [vmem:[#allocation125_spill] sm:$0xff] %v6639_v8  ;;  %v6657_v44 = vmul.f32 0.25, %v13619_v17  ;;  %v6660_v8 = vmul.f32 0.25, %v13621_v56  ;;  %v6669_v29 = vmul.f32 0.25, %v6199_v12  ;;  %v6672_v61 = vmul.f32 0.25, %v6201_v46 }
 0x1a0   :  { %13610 = vst [vmem:[#allocation126_spill] sm:$0xff] %v6642_v38  ;;  %13612 = vst [vmem:[#allocation127_spill] sm:$0xff] %v6645_v22  ;;  %v6663_v38 = vmul.f32 0.25, %v13623_v54  ;;  %v6666_v22 = vmul.f32 0.25, %v13625_v47  ;;  %v6675_v40 = vmul.f32 0.25, %v6203_v6  ;;  %v6678_v17 = vmul.f32 0.25, %v6205_v1 }
 0x1a1   :  { %13614 = vst [vmem:[#allocation49_spill] sm:$0xff] %v6648_v5  ;;  %13616 = vst [vmem:[#allocation50_spill] sm:$0xff] %v6651_v52  ;;  %v6681_v56 = vmul.f32 0.25, %v6207_v2  ;;  %v6684_v54 = vmul.f32 0.25, %v6209_v3  ;;  %v6687_v47 = vmul.f32 0.25, %v6217_v53  ;;  %v1791_v12 = vsel %vm1790_vm7, %v6248_v13, %v6212_v11 }
 0x1a2   :  { %13618 = vst [vmem:[#allocation51_spill] sm:$0xff] %v6654_v30  ;;  %13620 = vst [vmem:[#allocation52_spill] sm:$0xff] %v6657_v44  ;;  %v1793_v1 = vsel %vm1792_vm8, %v6282_v4, %v1791_v12  ;;  %v1804_v46 = vsel %vm1790_vm7, %v6251_v15, %v6215_v20  ;;  %v1811_v6 = vsel %vm1790_vm7, %v6254_v57, %v6220_v58 }
 0x1a3   :  { %13622 = vst [vmem:[#allocation128_spill] sm:$0xff] %v6660_v8  ;;  %13624 = vst [vmem:[#allocation129_spill] sm:$0xff] %v6663_v38  ;;  %v1818_v2 = vsel %vm1790_vm7, %v6261_v24, %v6223_v39  ;;  %v1795_v3 = vsel %vm1794_vm9, %v6312_v10, %v1793_v1  ;;  %v1805_v53 = vsel %vm1792_vm8, %v6285_v9, %v1804_v46  ;;  %v13672_v10 = vld [vmem:[#allocation67_spill] sm:$0xff]  ;;  %v13708_v9 = vld [vmem:[#allocation30_spill] sm:$0xff] }
 0x1a4   :  { %13626 = vst [vmem:[#allocation130_spill] sm:$0xff] %v6666_v22  ;;  %13627 = vst [vmem:[#allocation150_spill] sm:$0xff] %v6669_v29  ;;  %v1812_v12 = vsel %vm1792_vm8, %v6288_v18, %v1811_v6  ;;  %v1819_v4 = vsel %vm1792_vm8, %v6291_v27, %v1818_v2  ;;  %v1797_v15 = vsel %vm1796_vm10, %v6342_v62, %v1795_v3  ;;  %v13644_v62 = vld [vmem:[#allocation81_spill] sm:$0xff] }
 0x1a5   :  { %13628 = vst [vmem:[#allocation151_spill] sm:$0xff] %v6672_v61  ;;  %13629 = vst [vmem:[#allocation152_spill] sm:$0xff] %v6675_v40  ;;  %v1806_v57 = vsel %vm1794_vm9, %v6315_v19, %v1805_v53  ;;  %v1813_v24 = vsel %vm1794_vm9, %v6318_v43, %v1812_v12  ;;  %v1820_v1 = vsel %vm1794_vm9, %v6321_v14, %v1819_v4  ;;  %v6728_v53 = vmul.f32 0.25, %v6234_v25  ;;  %v13646_v14 = vld [vmem:[#allocation76_spill] sm:$0xff]  ;;  %v13647_v43 = vld [vmem:[#allocation146_spill] sm:$0xff] }
 0x1a6   :  { %13630 = vst [vmem:[#allocation153_spill] sm:$0xff] %v6678_v17  ;;  %13631 = vst [vmem:[#allocation154_spill] sm:$0xff] %v6681_v56  ;;  %v1799_v46 = vsel %vm1798_vm11, %v6372_v50, %v1797_v15  ;;  %v1807_v6 = vsel %vm1796_vm10, %v6345_v31, %v1806_v57  ;;  %v1814_v2 = vsel %vm1796_vm10, %v6348_v26, %v1813_v24  ;;  %v6731_v12 = vmul.f32 0.25, %v6245_v55  ;;  %v13643_v31 = vld [vmem:[#allocation71_spill] sm:$0xff]  ;;  %v13668_v19 = vld [vmem:[#allocation101_spill] sm:$0xff] }
 0x1a7   :  { %13632 = vst [vmem:[#allocation155_spill] sm:$0xff] %v6684_v54  ;;  %13633 = vst [vmem:[#allocation156_spill] sm:$0xff] %v6687_v47  ;;  %v1821_v3 = vsel %vm1796_vm10, %v6351_v0, %v1820_v1  ;;  %v1808_v4 = vsel %vm1798_vm11, %v6375_v36, %v1807_v6  ;;  %v1815_v15 = vsel %vm1798_vm11, %v6378_v51, %v1814_v2  ;;  %v6738_v57 = vmul.f32 0.25, %v6256_v41  ;;  %v13641_v36 = vld [vmem:[#allocation69_spill] sm:$0xff]  ;;  %v13642_v0 = vld [vmem:[#allocation70_spill] sm:$0xff] }
 0x1a8   :  { %13634 = vst [vmem:[#allocation157_spill] sm:$0xff] %v6728_v53  ;;  %13635 = vst [vmem:[#allocation158_spill] sm:$0xff] %v6731_v12  ;;  %v6741_v24 = vmul.f32 0.25, %v6258_v32  ;;  %v1801_v1 = vsel %vm1800_vm12, %v6402_v33, %v1799_v46  ;;  %v1809_v25 = vsel %vm1800_vm12, %v6405_v45, %v1808_v4  ;;  %v1816_v55 = vsel %vm1800_vm12, %v6408_v35, %v1815_v15  ;;  %v13638_v35 = vld [vmem:[#allocation137_spill] sm:$0xff] }
 0x1a9   :  { %13636 = vst [vmem:[#allocation159_spill] sm:$0xff] %v6738_v57  ;;  %v1822_v6 = vsel %vm1798_vm11, %v6381_v42, %v1821_v3  ;;  %v1825_v41 = vsel %vm1790_vm7, %v6264_v7, %v6226_v21  ;;  %v1832_v46 = vsel %vm1790_vm7, %v6267_v16, %v6229_v59  ;;  %v1839_v2 = vsel %vm1790_vm7, %v6270_v34, %v6232_v63  ;;  %v13639_v45 = vld [vmem:[#allocation65_spill] sm:$0xff]  ;;  %v13640_v42 = vld [vmem:[#allocation74_spill] sm:$0xff] }
 0x1aa   :  { %13637 = vst [vmem:[#allocation160_spill] sm:$0xff] %v6741_v24  ;;  %v1826_v32 = vsel %vm1792_vm8, %v6294_v23, %v1825_v41  ;;  %v1846_v4 = vsel %vm1790_vm7, %v6273_v49, %v6237_v37  ;;  %v1833_v15 = vsel %vm1792_vm8, %v6297_v60, %v1832_v46  ;;  %v1840_v41 = vsel %vm1792_vm8, %v13638_v35, %v1839_v2  ;;  %v13673_v35 = vld [vmem:[#allocation107_spill] sm:$0xff]  ;;  %v13677_v18 = vld [vmem:[#allocation33_spill] sm:$0xff] }
 0x1ab   :  { %v1827_v3 = vsel %vm1794_vm9, %v6324_v48, %v1826_v32  ;;  %v1847_v33 = vsel %vm1792_vm8, %v13639_v45, %v1846_v4  ;;  %v1834_v50 = vsel %vm1794_vm9, %v13641_v36, %v1833_v15  ;;  %v1841_v26 = vsel %vm1794_vm9, %v13642_v0, %v1840_v41  ;;  %v13645_v48 = vld [vmem:[#allocation75_spill] sm:$0xff]  ;;  %v13650_v41 = vld [vmem:[#allocation82_spill] sm:$0xff] }
 0x1ac   :  { %v1828_v51 = vsel %vm1796_vm10, %v13640_v42, %v1827_v3  ;;  %v1848_v32 = vsel %vm1794_vm9, %v13643_v31, %v1847_v33  ;;  %v1835_v2 = vsel %vm1796_vm10, %v13645_v48, %v1834_v50  ;;  %v1842_v4 = vsel %vm1796_vm10, %v13646_v14, %v1841_v26  ;;  %v13648_v42 = vld [vmem:[#allocation13_spill] sm:$0xff]  ;;  %v13651_v33 = vld [vmem:[#allocation83_spill] sm:$0xff]  ;;  %v13653_v50 = vld [vmem:[#allocation14_spill] sm:$0xff] }
 0x1ad   :  { %v1829_v46 = vsel %vm1798_vm11, %v13644_v62, %v1828_v51  ;;  %v1849_v3 = vsel %vm1796_vm10, %v13647_v43, %v1848_v32  ;;  %v6791_v15 = vsel %vm1802_vm13, %v13648_v42, %v1801_v1  ;;  %v1836_v0 = vsel %vm1798_vm11, %v13650_v41, %v1835_v2  ;;  %v13652_v51 = vld [vmem:[#allocation84_spill] sm:$0xff]  ;;  %v13655_v26 = vld [vmem:[#allocation15_spill] sm:$0xff]  ;;  %v13657_v43 = vld [vmem:[#allocation10_spill] sm:$0xff] }
 0x1ae   :  { %13649 = vst [vmem:[#allocation161_spill] sm:$0xff] %v6791_v15  ;;  %v1843_v31 = vsel %vm1798_vm11, %v13651_v33, %v1842_v4  ;;  %v1850_v62 = vsel %vm1798_vm11, %v13652_v51, %v1849_v3  ;;  %v6801_v48 = vsel %vm1802_vm13, %v13653_v50, %v1809_v25  ;;  %v6805_v32 = vsel %vm1802_vm13, %v13655_v26, %v1816_v55  ;;  %v13658_v42 = vld [vmem:[#allocation11_spill] sm:$0xff]  ;;  %v13659_v41 = vld [vmem:[#allocation12_spill] sm:$0xff]  ;;  %v13660_v33 = vld [vmem:[#allocation89_spill] sm:$0xff] }
 0x1af   :  { %13654 = vst [vmem:[#allocation162_spill] sm:$0xff] %v6801_v48  ;;  %13656 = vst [vmem:[#allocation163_spill] sm:$0xff] %v6805_v32  ;;  %v1823_v1 = vsel %vm1800_vm12, %v13657_v43, %v1822_v6  ;;  %v1830_v2 = vsel %vm1800_vm12, %v13658_v42, %v1829_v46  ;;  %v1837_v4 = vsel %vm1800_vm12, %v13659_v41, %v1836_v0  ;;  %v13661_v51 = vld [vmem:[#allocation90_spill] sm:$0xff]  ;;  %v13663_v14 = vld [vmem:[#allocation132_spill] sm:$0xff] }
 0x1b0   :  { %v1844_v3 = vsel %vm1800_vm12, %v13660_v33, %v1843_v31  ;;  %v1851_v25 = vsel %vm1800_vm12, %v13661_v51, %v1850_v62  ;;  %v13662_v50 = vld [vmem:[#allocation54_spill] sm:$0xff]  ;;  %v13665_v6 = vld [vmem:[#allocation55_spill] sm:$0xff]  ;;  %v13669_v41 = vld [vmem:[#allocation20_spill] sm:$0xff] }
 0x1b1   :  { %v1853_v55 = vsel %vm1790_vm7, %v13663_v14, %v13662_v50  ;;  %v13664_v26 = vld [vmem:[#allocation66_spill] sm:$0xff]  ;;  %v13667_v42 = vld [vmem:[#allocation19_spill] sm:$0xff]  ;;  %v13671_v62 = vld [vmem:[#allocation72_spill] sm:$0xff] }
 0x1b2   :  { %v1854_v36 = vsel %vm1792_vm8, %v13664_v26, %v1853_v55  ;;  %v13666_v43 = vld [vmem:[#allocation62_spill] sm:$0xff]  ;;  %v1867_v0 = vsel %vm1790_vm7, %v13668_v19, %v13667_v42  ;;  %v13674_v26 = vld [vmem:[#allocation108_spill] sm:$0xff]  ;;  %v13675_v23 = vld [vmem:[#allocation147_spill] sm:$0xff] }
 0x1b3   :  { %v1860_v46 = vsel %vm1790_vm7, %v13666_v43, %v13665_v6  ;;  %v13670_v31 = vld [vmem:[#allocation102_spill] sm:$0xff]  ;;  %v1855_v51 = vsel %vm1794_vm9, %v13671_v62, %v1854_v36  ;;  %v1868_v55 = vsel %vm1792_vm8, %v13673_v35, %v1867_v0  ;;  %v13679_v62 = vld [vmem:[#allocation85_spill] sm:$0xff]  ;;  %v13681_v35 = vld [vmem:[#allocation39_spill] sm:$0xff] }
 0x1b4   :  { %v1874_v33 = vsel %vm1790_vm7, %v13670_v31, %v13669_v41  ;;  %v1861_v45 = vsel %vm1792_vm8, %v13672_v10, %v1860_v46  ;;  %v1856_v27 = vsel %vm1796_vm10, %v13675_v23, %v1855_v51  ;;  %v13676_v19 = vld [vmem:[#allocation142_spill] sm:$0xff]  ;;  %v1869_v31 = vsel %vm1794_vm9, %v13677_v18, %v1868_v55  ;;  %v13680_v10 = vld [vmem:[#allocation148_spill] sm:$0xff]  ;;  %v13685_v55 = vld [vmem:[#allocation93_spill] sm:$0xff] }
 0x1b5   :  { %v1875_v60 = vsel %vm1792_vm8, %v13674_v26, %v1874_v33  ;;  %v1862_v42 = vsel %vm1794_vm9, %v13676_v19, %v1861_v45  ;;  %v13678_v41 = vld [vmem:[#allocation34_spill] sm:$0xff]  ;;  %v1857_v46 = vsel %vm1798_vm11, %v13679_v62, %v1856_v27  ;;  %v1870_v33 = vsel %vm1796_vm10, %v13681_v35, %v1869_v31  ;;  %v13682_v26 = vld [vmem:[#allocation40_spill] sm:$0xff]  ;;  %v13690_v35 = vld [vmem:[#allocation95_spill] sm:$0xff] }
 0x1b6   :  { %v1876_v36 = vsel %vm1794_vm9, %v13678_v41, %v1875_v60  ;;  %v1863_v0 = vsel %vm1796_vm10, %v13680_v10, %v1862_v42  ;;  %v13683_v23 = vld [vmem:[#allocation16_spill] sm:$0xff]  ;;  %v6861_v18 = vsel %vm1802_vm13, %v13685_v55, %v1830_v2  ;;  %v13687_v60 = vld [vmem:[#allocation86_spill] sm:$0xff]  ;;  %v1871_v42 = vsel %vm1798_vm11, %v6612_v28, %v1870_v33  ;;  %v13694_v2 = vld [vmem:[#allocation91_spill] sm:$0xff] }
 0x1b7   :  { %v1877_v51 = vsel %vm1796_vm10, %v13682_v26, %v1876_v36  ;;  %v6857_v45 = vsel %vm1802_vm13, %v13683_v23, %v1823_v1  ;;  %13686 = vst [vmem:[#allocation165_spill] sm:$0xff] %v6861_v18  ;;  %v1864_v27 = vsel %vm1798_vm11, %v13687_v60, %v1863_v0  ;;  %v13688_v41 = vld [vmem:[#allocation94_spill] sm:$0xff]  ;;  %v6873_v36 = vsel %vm1802_vm13, %v13690_v35, %v1844_v3  ;;  %v13692_v1 = vld [vmem:[#allocation96_spill] sm:$0xff]  ;;  %v13699_v62 = vld [vmem:[#allocation103_spill] sm:$0xff] }
 0x1b8   :  { %13684 = vst [vmem:[#allocation164_spill] sm:$0xff] %v6857_v45  ;;  %v6869_v31 = vsel %vm1802_vm13, %v13688_v41, %v1837_v4  ;;  %13691 = vst [vmem:[#allocation167_spill] sm:$0xff] %v6873_v36  ;;  %v6877_v26 = vsel %vm1802_vm13, %v13692_v1, %v1851_v25  ;;  %v1858_v55 = vsel %vm1800_vm12, %v13694_v2, %v1857_v46  ;;  %v13695_v23 = vld [vmem:[#allocation92_spill] sm:$0xff]  ;;  %v13696_v60 = vld [vmem:[#allocation126_spill] sm:$0xff] }
 0x1b9   :  { %13689 = vst [vmem:[#allocation166_spill] sm:$0xff] %v6869_v31  ;;  %13693 = vst [vmem:[#allocation168_spill] sm:$0xff] %v6877_v26  ;;  %v1865_v0 = vsel %vm1800_vm12, %v13695_v23, %v1864_v27  ;;  %v1872_v33 = vsel %vm1800_vm12, %v13696_v60, %v1871_v42  ;;  %v13697_v28 = vld [vmem:[#allocation122_spill] sm:$0xff]  ;;  %v13698_v41 = vld [vmem:[#allocation97_spill] sm:$0xff] }
 0x1ba   :  { %v1878_v4 = vsel %vm1798_vm11, %v13697_v28, %v1877_v51  ;;  %v1881_v3 = vsel %vm1790_vm7, %v13699_v62, %v13698_v41  ;;  %v13700_v35 = vld [vmem:[#allocation29_spill] sm:$0xff]  ;;  %v13701_v1 = vld [vmem:[#allocation98_spill] sm:$0xff]  ;;  %v13702_v10 = vld [vmem:[#allocation104_spill] sm:$0xff] }
 0x1bb   :  { %v1882_v25 = vsel %vm1792_vm8, %v13700_v35, %v1881_v3  ;;  %v1888_v46 = vsel %vm1790_vm7, %v13702_v10, %v13701_v1  ;;  %v13703_v2 = vld [vmem:[#allocation99_spill] sm:$0xff]  ;;  %v13704_v19 = vld [vmem:[#allocation25_spill] sm:$0xff]  ;;  %v13705_v23 = vld [vmem:[#allocation100_spill] sm:$0xff] }
 0x1bc   :  { %v1895_v27 = vsel %vm1790_vm7, %v13704_v19, %v13703_v2  ;;  %v13706_v42 = vld [vmem:[#allocation26_spill] sm:$0xff]  ;;  %v13707_v51 = vld [vmem:[#allocation35_spill] sm:$0xff]  ;;  %v1889_v62 = vsel %vm1792_vm8, %v13708_v9, %v1888_v46  ;;  %v13710_v35 = vld [vmem:[#allocation32_spill] sm:$0xff] }
 0x1bd   :  { %v1902_v60 = vsel %vm1790_vm7, %v13706_v42, %v13705_v23  ;;  %v1883_v28 = vsel %vm1794_vm9, %v13707_v51, %v1882_v25  ;;  %v13709_v41 = vld [vmem:[#allocation31_spill] sm:$0xff]  ;;  %v13711_v1 = vld [vmem:[#allocation117_spill] sm:$0xff]  ;;  %v13712_v19 = vld [vmem:[#allocation36_spill] sm:$0xff] }
 0x1be   :  { %v1896_v3 = vsel %vm1792_vm8, %v13709_v41, %v1895_v27  ;;  %v1903_v10 = vsel %vm1792_vm8, %v13710_v35, %v1902_v60  ;;  %v1884_v43 = vsel %vm1796_vm10, %v13711_v1, %v1883_v28  ;;  %v1890_v2 = vsel %vm1794_vm9, %v13712_v19, %v1889_v62  ;;  %v13713_v14 = vld [vmem:[#allocation113_spill] sm:$0xff]  ;;  %v13714_v23 = vld [vmem:[#allocation114_spill] sm:$0xff]  ;;  %v13715_v51 = vld [vmem:[#allocation123_spill] sm:$0xff] }
 0x1bf   :  { %v1897_v42 = vsel %vm1794_vm9, %v13713_v14, %v1896_v3  ;;  %v1904_v25 = vsel %vm1794_vm9, %v13714_v23, %v1903_v10  ;;  %v1885_v46 = vsel %vm1798_vm11, %v13715_v51, %v1884_v43  ;;  %v13716_v9 = vld [vmem:[#allocation118_spill] sm:$0xff]  ;;  %v13717_v41 = vld [vmem:[#allocation119_spill] sm:$0xff]  ;;  %v13718_v35 = vld [vmem:[#allocation120_spill] sm:$0xff] }
 0x1c0   :  { %v1891_v27 = vsel %vm1796_vm10, %v13716_v9, %v1890_v2  ;;  %v1898_v60 = vsel %vm1796_vm10, %v13717_v41, %v1897_v42  ;;  %v1905_v28 = vsel %vm1796_vm10, %v13718_v35, %v1904_v25  ;;  %v13719_v1 = vld [vmem:[#allocation17_spill] sm:$0xff]  ;;  %v13721_v3 = vld [vmem:[#allocation124_spill] sm:$0xff]  ;;  %v13724_v2 = vld [vmem:[#allocation18_spill] sm:$0xff]  ;;  %v6941_v42 = vsel %vm1802_vm13, %v6672_v61, %v1872_v33 }
 0x1c1   :  { %v6927_v62 = vsel %vm1802_vm13, %v13719_v1, %v1858_v55  ;;  %v1892_v14 = vsel %vm1798_vm11, %v13721_v3, %v1891_v27  ;;  %v13722_v10 = vld [vmem:[#allocation45_spill] sm:$0xff]  ;;  %v6937_v9 = vsel %vm1802_vm13, %v13724_v2, %v1865_v0  ;;  %13726 = vst [vmem:[#allocation170_spill] sm:$0xff] %v6941_v42  ;;  %v13727_v25 = vld [vmem:[#allocation127_spill] sm:$0xff]  ;;  %v1886_v27 = vsel %vm1800_vm12, %v6648_v5, %v1885_v46  ;;  %v13738_v41 = vld [vmem:[#allocation110_spill] sm:$0xff] }
 0x1c2   :  { %13720 = vst [vmem:[#allocation17_spill] sm:$0xff] %v6927_v62  ;;  %v1899_v23 = vsel %vm1798_vm11, %v13722_v10, %v1898_v60  ;;  %v13723_v43 = vld [vmem:[#allocation149_spill] sm:$0xff]  ;;  %13725 = vst [vmem:[#allocation169_spill] sm:$0xff] %v6937_v9  ;;  %v1879_v55 = vsel %vm1800_vm12, %v13727_v25, %v1878_v4  ;;  %v1893_v60 = vsel %vm1800_vm12, %v6651_v52, %v1892_v14  ;;  %v13729_v10 = vld [vmem:[#allocation27_spill] sm:$0xff] }
 0x1c3   :  { %v1906_v51 = vsel %vm1798_vm11, %v13723_v43, %v1905_v28  ;;  %v1900_v28 = vsel %vm1800_vm12, %v6654_v30, %v1899_v23  ;;  %v13728_v43 = vld [vmem:[#allocation21_spill] sm:$0xff]  ;;  %v13731_v4 = vld [vmem:[#allocation22_spill] sm:$0xff]  ;;  %v13732_v25 = vld [vmem:[#allocation28_spill] sm:$0xff] }
 0x1c4   :  { %v1907_v0 = vsel %vm1800_vm12, %v6657_v44, %v1906_v51  ;;  %v1909_v33 = vsel %vm1790_vm7, %v13729_v10, %v13728_v43  ;;  %v13730_v61 = vld [vmem:[#allocation109_spill] sm:$0xff]  ;;  %v1916_v46 = vsel %vm1790_vm7, %v13732_v25, %v13731_v4  ;;  %v13733_v5 = vld [vmem:[#allocation23_spill] sm:$0xff]  ;;  %v13735_v52 = vld [vmem:[#allocation24_spill] sm:$0xff] }
 0x1c5   :  { %v1910_v3 = vsel %vm1792_vm8, %v13730_v61, %v1909_v33  ;;  %v13734_v35 = vld [vmem:[#allocation105_spill] sm:$0xff]  ;;  %v13736_v23 = vld [vmem:[#allocation106_spill] sm:$0xff]  ;;  %v13737_v51 = vld [vmem:[#allocation115_spill] sm:$0xff]  ;;  %v1917_v19 = vsel %vm1792_vm8, %v13738_v41, %v1916_v46 }
 0x1c6   :  { %v1923_v14 = vsel %vm1790_vm7, %v13734_v35, %v13733_v5  ;;  %v1930_v30 = vsel %vm1790_vm7, %v13736_v23, %v13735_v52  ;;  %v1911_v44 = vsel %vm1794_vm9, %v13737_v51, %v1910_v3  ;;  %v13739_v10 = vld [vmem:[#allocation111_spill] sm:$0xff]  ;;  %v13740_v61 = vld [vmem:[#allocation112_spill] sm:$0xff]  ;;  %v13741_v4 = vld [vmem:[#allocation41_spill] sm:$0xff] }
 0x1c7   :  { %v1924_v33 = vsel %vm1792_vm8, %v13739_v10, %v1923_v14  ;;  %v1931_v25 = vsel %vm1792_vm8, %v13740_v61, %v1930_v30  ;;  %v1912_v43 = vsel %vm1796_vm10, %v13741_v4, %v1911_v44  ;;  %v13742_v35 = vld [vmem:[#allocation116_spill] sm:$0xff]  ;;  %v13743_v2 = vld [vmem:[#allocation37_spill] sm:$0xff]  ;;  %v13744_v52 = vld [vmem:[#allocation38_spill] sm:$0xff] }
 0x1c8   :  { %v1918_v5 = vsel %vm1794_vm9, %v13742_v35, %v1917_v19  ;;  %v1925_v23 = vsel %vm1794_vm9, %v13743_v2, %v1924_v33  ;;  %v1932_v3 = vsel %vm1794_vm9, %v13744_v52, %v1931_v25  ;;  %v13745_v51 = vld [vmem:[#allocation46_spill] sm:$0xff]  ;;  %v13747_v10 = vld [vmem:[#allocation43_spill] sm:$0xff]  ;;  %v13748_v61 = vld [vmem:[#allocation44_spill] sm:$0xff] }
 0x1c9   :  { %v1913_v46 = vsel %vm1798_vm11, %v13745_v51, %v1912_v43  ;;  %v13746_v41 = vld [vmem:[#allocation42_spill] sm:$0xff]  ;;  %v1926_v30 = vsel %vm1796_vm10, %v13747_v10, %v1925_v23  ;;  %v1933_v44 = vsel %vm1796_vm10, %v13748_v61, %v1932_v3  ;;  %v13749_v4 = vld [vmem:[#allocation47_spill] sm:$0xff]  ;;  %v13750_v2 = vld [vmem:[#allocation48_spill] sm:$0xff] }
 0x1ca   :  { %v1919_v14 = vsel %vm1796_vm10, %v13746_v41, %v1918_v5  ;;  %v1914_v19 = vsel %vm1800_vm12, %v6660_v8, %v1913_v46  ;;  %v1927_v25 = vsel %vm1798_vm11, %v13750_v2, %v1926_v30  ;;  %v13751_v52 = vld [vmem:[#allocation125_spill] sm:$0xff]  ;;  %v7001_v5 = vsel %vm1802_vm13, %v6675_v40, %v1879_v55  ;;  %v13806_v50 = vld [vmem:[#allocation58_spill] sm:$0xff] }
 0x1cb   :  { %v1920_v33 = vsel %vm1798_vm11, %v13749_v4, %v1919_v14  ;;  %v1934_v43 = vsel %vm1798_vm11, %v13751_v52, %v1933_v44  ;;  %13752 = vst [vmem:[#allocation171_spill] sm:$0xff] %v7001_v5  ;;  %v1928_v3 = vsel %vm1800_vm12, %v6666_v22, %v1927_v25  ;;  %v7011_v14 = vsel %vm1802_vm13, %v6678_v17, %v1886_v27 }
 0x1cc   :  { %v1921_v23 = vsel %vm1800_vm12, %v6663_v38, %v1920_v33  ;;  %v1935_v46 = vsel %vm1800_vm12, %v6669_v29, %v1934_v43  ;;  %13753 = vst [vmem:[#allocation172_spill] sm:$0xff] %v7011_v14  ;;  %v7015_v30 = vsel %vm1802_vm13, %v6681_v56, %v1893_v60  ;;  %v7019_v55 = vsel %vm1802_vm13, %v6684_v54, %v1900_v28 }
 0x1cd   :  { %13754 = vst [vmem:[#allocation173_spill] sm:$0xff] %v7015_v30  ;;  %13755 = vst [vmem:[#allocation174_spill] sm:$0xff] %v7019_v55  ;;  %v7023_v44 = vsel %vm1802_vm13, %v6687_v47, %v1907_v0  ;;  %v7027_v33 = vsel %vm1802_vm13, %v6728_v53, %v1914_v19  ;;  %v7031_v27 = vsel %vm1802_vm13, %v6731_v12, %v1921_v23  ;;  %v1957_v25 = vrot.slane %v6791_v15, 7  ;;  %v7045_v53 = vpop.permute.xlu0 %2013 }
 0x1ce   :  { %13756 = vst [vmem:[#allocation175_spill] sm:$0xff] %v7023_v44  ;;  %13757 = vst [vmem:[#allocation176_spill] sm:$0xff] %v7027_v33  ;;  %v7035_v60 = vsel %vm1802_vm13, %v6738_v57, %v1928_v3  ;;  %v7039_v28 = vsel %vm1802_vm13, %v6741_v24, %v1935_v46  ;;  %v1958_v0 = vrot.slane %v6801_v48, 7  ;;  %v1959_v43 = vrot.slane %v6805_v32, 7 }
 0x1cf   :  { %13758 = vst [vmem:[#allocation177_spill] sm:$0xff] %v7031_v27  ;;  %13759 = vst [vmem:[#allocation178_spill] sm:$0xff] %v7035_v60  ;;  %v1960_v19 = vrot.slane %v6857_v45, 7  ;;  %v1961_v23 = vrot.slane %v6861_v18, 7  ;;  %v1962_v12 = vrot.slane %v6869_v31, 7  ;;  %v1963_v3 = vrot.slane %v6873_v36, 7 }
 0x1d0   :  { %13760 = vst [vmem:[#allocation179_spill] sm:$0xff] %v7039_v28  ;;  %v1964_v57 = vrot.slane %v6877_v26, 7  ;;  %v1965_v46 = vrot.slane %v6927_v62, 7  ;;  %v1966_v15 = vrot.slane %v6937_v9, 7  ;;  %v1967_v48 = vrot.slane %v6941_v42, 7 }
 0x1d1   :  { %v1968_v32 = vrot.slane %v7001_v5, 7  ;;  %v1969_v45 = vrot.slane %v7011_v14, 7  ;;  %v1970_v24 = vrot.slane %v7015_v30, 7  ;;  %v1971_v18 = vrot.slane %v7019_v55, 7  ;;  %v7095_v30 = vpop.permute.xlu0 %2016 }
 0x1d2   :  { %v1972_v31 = vrot.slane %v7023_v44, 7  ;;  %v1973_v36 = vrot.slane %v7027_v33, 7  ;;  %v1974_v26 = vrot.slane %v7031_v27, 7  ;;  %v1975_v62 = vrot.slane %v7035_v60, 7  ;;  %13770 = vst [vmem:[#allocation188_spill] sm:$0xff] %v7095_v30 }
 0x1d3   :  { %v1976_v9 = vrot.slane %v7039_v28, 7  ;;  %v7065_v42 = vsel %vm1979_vm1, %v1957_v25, %v1967_v48  ;;  %v7069_v14 = vsel %vm1979_vm1, %v1958_v0, %v1968_v32  ;;  %v7073_v55 = vsel %vm1979_vm1, %v1959_v43, %v1969_v45 }
 0x1d4   :  { %13762 = vst [vmem:[#allocation180_spill] sm:$0xff] %v7065_v42  ;;  %13763 = vst [vmem:[#allocation181_spill] sm:$0xff] %v7069_v14  ;;  %v7077_v33 = vsel %vm1979_vm1, %v1960_v19, %v1970_v24  ;;  %v7081_v60 = vsel %vm1979_vm1, %v1961_v23, %v1971_v18  ;;  %v7085_v28 = vsel %vm1979_vm1, %v1962_v12, %v1972_v31  ;;  %vm2018_vm14 = vcmp.eq.s32.totalorder %v7045_v53, 1 }
 0x1d5   :  { %13764 = vst [vmem:[#allocation182_spill] sm:$0xff] %v7073_v55  ;;  %13765 = vst [vmem:[#allocation183_spill] sm:$0xff] %v7077_v33  ;;  %v7089_v27 = vsel %vm1979_vm1, %v1963_v3, %v1973_v36  ;;  %v7093_v44 = vsel %vm1979_vm1, %v1964_v57, %v1974_v26  ;;  %v7099_v5 = vsel %vm1979_vm1, %v1965_v46, %v1975_v62  ;;  %vm2019_vm15 = vcmp.eq.s32.totalorder %v7095_v30, 1  ;;  %v13800_v30 = vld [vmem:[#allocation56_spill] sm:$0xff] }
 0x1d6   :  { %13766 = vst [vmem:[#allocation184_spill] sm:$0xff] %v7081_v60  ;;  %13767 = vst [vmem:[#allocation185_spill] sm:$0xff] %v7085_v28  ;;  %v7103_v54 = vsel %vm1979_vm1, %v1967_v48, %v1957_v25  ;;  %v7107_v56 = vsel %vm1979_vm1, %v1968_v32, %v1958_v0  ;;  %v7111_v17 = vsel %vm1979_vm1, %v1969_v45, %v1959_v43  ;;  %v7220_v47 = vsel %vm2019_vm15, %v7081_v60, -inf }
 0x1d7   :  { %13768 = vst [vmem:[#allocation186_spill] sm:$0xff] %v7089_v27  ;;  %13769 = vst [vmem:[#allocation187_spill] sm:$0xff] %v7093_v44  ;;  %v7115_v40 = vsel %vm1979_vm1, %v1970_v24, %v1960_v19  ;;  %v7119_v29 = vsel %vm1979_vm1, %v1971_v18, %v1961_v23  ;;  %v7123_v48 = vsel %vm1979_vm1, %v1972_v31, %v1962_v12  ;;  %v7150_v31 = vsel %vm2018_vm14, %v7103_v54, -inf }
 0x1d8   :  { %13771 = vst [vmem:[#allocation189_spill] sm:$0xff] %v7099_v5  ;;  %v7128_v32 = vsel %vm1979_vm1, %v1973_v36, %v1963_v3  ;;  %v7132_v45 = vsel %vm1979_vm1, %v1974_v26, %v1964_v57  ;;  %v7136_v24 = vsel %vm1979_vm1, %v1975_v62, %v1965_v46  ;;  %v7140_v18 = vsel %vm1979_vm1, %v1976_v9, %v1966_v15 }
 0x1d9   :  { %13772 = vst [vmem:[#allocation190_spill] sm:$0xff] %v7128_v32  ;;  %13773 = vst [vmem:[#allocation191_spill] sm:$0xff] %v7132_v45  ;;  %v7144_v12 = vsel %vm1979_vm1, %v1966_v15, %v1976_v9  ;;  %v7155_v57 = vsel %vm2018_vm14, %v7107_v56, -inf  ;;  %v7160_v26 = vsel %vm2018_vm14, %v7111_v17, -inf  ;;  %v7165_v9 = vsel %vm2018_vm14, %v7115_v40, -inf }
 0x1da   :  { %13774 = vst [vmem:[#allocation192_spill] sm:$0xff] %v7136_v24  ;;  %13775 = vst [vmem:[#allocation193_spill] sm:$0xff] %v7140_v18  ;;  %v7170_v15 = vsel %vm2018_vm14, %v7119_v29, -inf  ;;  %v7175_v36 = vsel %vm2018_vm14, %v7123_v48, -inf  ;;  %v7180_v62 = vsel %vm2018_vm14, %v7128_v32, -inf  ;;  %v7185_v25 = vsel %vm2018_vm14, %v7132_v45, -inf }
 0x1db   :  { %13776 = vst [vmem:[#allocation194_spill] sm:$0xff] %v7144_v12  ;;  %13777 = vst [vmem:[#allocation195_spill] sm:$0xff] %v7150_v31  ;;  %v7190_v0 = vsel %vm2018_vm14, %v7136_v24, -inf  ;;  %v7195_v43 = vsel %vm2018_vm14, %v7140_v18, -inf  ;;  %v7200_v19 = vsel %vm2019_vm15, %v7065_v42, -inf  ;;  %v7205_v23 = vsel %vm2019_vm15, %v7069_v14, -inf }
 0x1dc   :  { %13778 = vst [vmem:[#allocation196_spill] sm:$0xff] %v7155_v57  ;;  %13779 = vst [vmem:[#allocation197_spill] sm:$0xff] %v7160_v26  ;;  %v7210_v3 = vsel %vm2019_vm15, %v7073_v55, -inf  ;;  %v7215_v46 = vsel %vm2019_vm15, %v7077_v33, -inf  ;;  %v7225_v14 = vsel %vm2019_vm15, %v7085_v28, -inf  ;;  %v7230_v55 = vsel %vm2019_vm15, %v7089_v27, -inf }
 0x1dd   :  { %13780 = vst [vmem:[#allocation198_spill] sm:$0xff] %v7165_v9  ;;  %13781 = vst [vmem:[#allocation199_spill] sm:$0xff] %v7170_v15  ;;  %v7235_v33 = vsel %vm2019_vm15, %v7093_v44, -inf  ;;  %v7240_v60 = vsel %vm2019_vm15, %v7099_v5, -inf  ;;  %v7245_v28 = vsel %vm2019_vm15, %v7144_v12, -inf  ;;  %v13797_v45 = vrot.slane %v7150_v31, 1 }
 0x1de   :  { %13782 = vst [vmem:[#allocation200_spill] sm:$0xff] %v7175_v36  ;;  %13783 = vst [vmem:[#allocation201_spill] sm:$0xff] %v7180_v62  ;;  %v13799_v5 = vrot.slane %v7155_v57, 1  ;;  %v13802_v12 = vrot.slane %v7160_v26, 1  ;;  %v13803_v27 = vld [vmem:[#allocation57_spill] sm:$0xff]  ;;  %v13805_v18 = vrot.slane %v7165_v9, 1 }
 0x1df   :  { %13784 = vst [vmem:[#allocation202_spill] sm:$0xff] %v7185_v25  ;;  %13785 = vst [vmem:[#allocation203_spill] sm:$0xff] %v7190_v0  ;;  %v7410_v32 = vmax.f32 %v6248_v13, %v13797_v45  ;;  %v13808_v24 = vrot.slane %v7170_v15, 1 }
 0x1e0   :  { %13786 = vst [vmem:[#allocation204_spill] sm:$0xff] %v7195_v43  ;;  %13787 = vst [vmem:[#allocation205_spill] sm:$0xff] %v7200_v19  ;;  %v7415_v44 = vmax.f32 %v13800_v30, %v13799_v5  ;;  %v7420_v42 = vmax.f32 %v13803_v27, %v13802_v12  ;;  %v7425_v37 = vmax.f32 %v13806_v50, %v13805_v18  ;;  %v13817_v50 = vld [vmem:[#allocation132_spill] sm:$0xff] }
 0x1e1   :  { %13788 = vst [vmem:[#allocation206_spill] sm:$0xff] %v7205_v23  ;;  %13789 = vst [vmem:[#allocation207_spill] sm:$0xff] %v7210_v3  ;;  %v7430_v45 = vmax.f32 %v6264_v7, %v13808_v24  ;;  %v13820_v7 = vld [vmem:[#allocation62_spill] sm:$0xff] }
 0x1e2   :  { %13790 = vst [vmem:[#allocation208_spill] sm:$0xff] %v7215_v46  ;;  %13791 = vst [vmem:[#allocation209_spill] sm:$0xff] %v7220_v47 }
 0x1e3   :  { %13792 = vst [vmem:[#allocation210_spill] sm:$0xff] %v7225_v14  ;;  %13793 = vst [vmem:[#allocation211_spill] sm:$0xff] %v7230_v55 }
 0x1e4   :  { %13794 = vst [vmem:[#allocation212_spill] sm:$0xff] %v7235_v33  ;;  %13795 = vst [vmem:[#allocation213_spill] sm:$0xff] %v7240_v60 }
 0x1e5   :  { %13796 = vst [vmem:[#allocation214_spill] sm:$0xff] %v7245_v28  ;;  %13798 = vst [vmem:[#allocation215_spill] sm:$0xff] %v7410_v32  ;;  %v13810_v32 = vrot.slane %v7175_v36, 1 }
 0x1e6   :  { %13801 = vst [vmem:[#allocation56_spill] sm:$0xff] %v7415_v44  ;;  %13804 = vst [vmem:[#allocation57_spill] sm:$0xff] %v7420_v42  ;;  %v13812_v44 = vrot.slane %v7180_v62, 1  ;;  %v13814_v42 = vrot.slane %v7185_v25, 1 }
 0x1e7   :  { %13807 = vst [vmem:[#allocation216_spill] sm:$0xff] %v7425_v37  ;;  %13809 = vst [vmem:[#allocation217_spill] sm:$0xff] %v7430_v45  ;;  %v7435_v5 = vmax.f32 %v6267_v16, %v13810_v32  ;;  %v13816_v37 = vrot.slane %v7190_v0, 1  ;;  %v13819_v45 = vrot.slane %v7195_v43, 1  ;;  %v13823_v16 = vld [vmem:[#allocation63_spill] sm:$0xff] }
 0x1e8   :  { %v7440_v12 = vmax.f32 %v6270_v34, %v13812_v44  ;;  %v7445_v18 = vmax.f32 %v6273_v49, %v13814_v42  ;;  %v13826_v34 = vld [vmem:[#allocation64_spill] sm:$0xff]  ;;  %v13829_v49 = vld [vmem:[#allocation133_spill] sm:$0xff] }
 0x1e9   :  { %13811 = vst [vmem:[#allocation218_spill] sm:$0xff] %v7435_v5  ;;  %v7450_v24 = vmax.f32 %v13817_v50, %v13816_v37  ;;  %v7455_v32 = vmax.f32 %v13820_v7, %v13819_v45  ;;  %v13822_v5 = vrot.slane %v7150_v31, 2  ;;  %v13832_v50 = vld [vmem:[#allocation134_spill] sm:$0xff]  ;;  %v13835_v7 = vld [vmem:[#allocation135_spill] sm:$0xff] }
 0x1ea   :  { %13813 = vst [vmem:[#allocation219_spill] sm:$0xff] %v7440_v12  ;;  %13815 = vst [vmem:[#allocation220_spill] sm:$0xff] %v7445_v18  ;;  %v13825_v12 = vrot.slane %v7155_v57, 2  ;;  %v13828_v18 = vrot.slane %v7160_v26, 2 }
 0x1eb   :  { %13818 = vst [vmem:[#allocation221_spill] sm:$0xff] %v7450_v24  ;;  %13821 = vst [vmem:[#allocation222_spill] sm:$0xff] %v7455_v32  ;;  %v7460_v44 = vmax.f32 %v13823_v16, %v13822_v5  ;;  %v13831_v24 = vrot.slane %v7165_v9, 2  ;;  %v13834_v32 = vrot.slane %v7170_v15, 2  ;;  %v13838_v16 = vld [vmem:[#allocation136_spill] sm:$0xff] }
 0x1ec   :  { %v7465_v42 = vmax.f32 %v13826_v34, %v13825_v12  ;;  %v7470_v37 = vmax.f32 %v13829_v49, %v13828_v18  ;;  %v13841_v34 = vld [vmem:[#allocation137_spill] sm:$0xff] }
 0x1ed   :  { %13824 = vst [vmem:[#allocation223_spill] sm:$0xff] %v7460_v44  ;;  %v7475_v45 = vmax.f32 %v13832_v50, %v13831_v24  ;;  %v7480_v5 = vmax.f32 %v13835_v7, %v13834_v32  ;;  %v13837_v44 = vrot.slane %v7175_v36, 2  ;;  %v13844_v49 = vld [vmem:[#allocation65_spill] sm:$0xff]  ;;  %v13847_v50 = vld [vmem:[#allocation66_spill] sm:$0xff]  ;;  %v13850_v7 = vld [vmem:[#allocation67_spill] sm:$0xff] }
 0x1ee   :  { %13827 = vst [vmem:[#allocation224_spill] sm:$0xff] %v7465_v42  ;;  %13830 = vst [vmem:[#allocation225_spill] sm:$0xff] %v7470_v37  ;;  %v13840_v42 = vrot.slane %v7180_v62, 2  ;;  %v13843_v37 = vrot.slane %v7185_v25, 2 }
 0x1ef   :  { %13833 = vst [vmem:[#allocation226_spill] sm:$0xff] %v7475_v45  ;;  %13836 = vst [vmem:[#allocation227_spill] sm:$0xff] %v7480_v5  ;;  %v7485_v12 = vmax.f32 %v13838_v16, %v13837_v44  ;;  %v13846_v45 = vrot.slane %v7190_v0, 2  ;;  %v13849_v5 = vrot.slane %v7195_v43, 2  ;;  %v13853_v16 = vld [vmem:[#allocation138_spill] sm:$0xff] }
 0x1f0   :  { %v7490_v18 = vmax.f32 %v13841_v34, %v13840_v42  ;;  %v7495_v24 = vmax.f32 %v13844_v49, %v13843_v37  ;;  %v13856_v34 = vld [vmem:[#allocation139_spill] sm:$0xff]  ;;  %v13859_v49 = vld [vmem:[#allocation68_spill] sm:$0xff] }
 0x1f1   :  { %13839 = vst [vmem:[#allocation228_spill] sm:$0xff] %v7485_v12  ;;  %v7500_v32 = vmax.f32 %v13847_v50, %v13846_v45  ;;  %v7505_v44 = vmax.f32 %v13850_v7, %v13849_v5  ;;  %v13852_v12 = vrot.slane %v7150_v31, 3  ;;  %v13862_v50 = vld [vmem:[#allocation140_spill] sm:$0xff]  ;;  %v13865_v7 = vld [vmem:[#allocation141_spill] sm:$0xff] }
 0x1f2   :  { %13842 = vst [vmem:[#allocation229_spill] sm:$0xff] %v7490_v18  ;;  %13845 = vst [vmem:[#allocation230_spill] sm:$0xff] %v7495_v24  ;;  %v13855_v18 = vrot.slane %v7155_v57, 3  ;;  %v13858_v24 = vrot.slane %v7160_v26, 3 }
 0x1f3   :  { %13848 = vst [vmem:[#allocation231_spill] sm:$0xff] %v7500_v32  ;;  %13851 = vst [vmem:[#allocation232_spill] sm:$0xff] %v7505_v44  ;;  %v7510_v42 = vmax.f32 %v13853_v16, %v13852_v12  ;;  %v13861_v32 = vrot.slane %v7165_v9, 3  ;;  %v13864_v44 = vrot.slane %v7170_v15, 3  ;;  %v13868_v16 = vld [vmem:[#allocation69_spill] sm:$0xff] }
 0x1f4   :  { %v7515_v37 = vmax.f32 %v13856_v34, %v13855_v18  ;;  %v7520_v45 = vmax.f32 %v13859_v49, %v13858_v24  ;;  %v13871_v34 = vld [vmem:[#allocation70_spill] sm:$0xff]  ;;  %v13874_v49 = vld [vmem:[#allocation71_spill] sm:$0xff] }
 0x1f5   :  { %13854 = vst [vmem:[#allocation233_spill] sm:$0xff] %v7510_v42  ;;  %v7525_v5 = vmax.f32 %v13862_v50, %v13861_v32  ;;  %v7530_v12 = vmax.f32 %v13865_v7, %v13864_v44  ;;  %v13867_v42 = vrot.slane %v7175_v36, 3  ;;  %v13877_v50 = vld [vmem:[#allocation72_spill] sm:$0xff]  ;;  %v13880_v7 = vld [vmem:[#allocation142_spill] sm:$0xff] }
 0x1f6   :  { %13857 = vst [vmem:[#allocation234_spill] sm:$0xff] %v7515_v37  ;;  %13860 = vst [vmem:[#allocation235_spill] sm:$0xff] %v7520_v45  ;;  %v13870_v37 = vrot.slane %v7180_v62, 3  ;;  %v13873_v45 = vrot.slane %v7185_v25, 3 }
 0x1f7   :  { %13863 = vst [vmem:[#allocation236_spill] sm:$0xff] %v7525_v5  ;;  %13866 = vst [vmem:[#allocation237_spill] sm:$0xff] %v7530_v12  ;;  %v7535_v18 = vmax.f32 %v13868_v16, %v13867_v42  ;;  %v13876_v5 = vrot.slane %v7190_v0, 3  ;;  %v13879_v12 = vrot.slane %v7195_v43, 3  ;;  %v13883_v16 = vld [vmem:[#allocation143_spill] sm:$0xff] }
 0x1f8   :  { %v7540_v24 = vmax.f32 %v13871_v34, %v13870_v37  ;;  %v7545_v32 = vmax.f32 %v13874_v49, %v13873_v45  ;;  %v13886_v34 = vld [vmem:[#allocation144_spill] sm:$0xff]  ;;  %v13889_v49 = vld [vmem:[#allocation145_spill] sm:$0xff] }
 0x1f9   :  { %13869 = vst [vmem:[#allocation238_spill] sm:$0xff] %v7535_v18  ;;  %v7550_v44 = vmax.f32 %v13877_v50, %v13876_v5  ;;  %v7555_v42 = vmax.f32 %v13880_v7, %v13879_v12  ;;  %v13882_v18 = vrot.slane %v7150_v31, 4  ;;  %v13892_v50 = vld [vmem:[#allocation73_spill] sm:$0xff]  ;;  %v13895_v7 = vld [vmem:[#allocation74_spill] sm:$0xff] }
 0x1fa   :  { %13872 = vst [vmem:[#allocation239_spill] sm:$0xff] %v7540_v24  ;;  %13875 = vst [vmem:[#allocation240_spill] sm:$0xff] %v7545_v32  ;;  %v13885_v24 = vrot.slane %v7155_v57, 4  ;;  %v13888_v32 = vrot.slane %v7160_v26, 4 }
 0x1fb   :  { %13878 = vst [vmem:[#allocation241_spill] sm:$0xff] %v7550_v44  ;;  %13881 = vst [vmem:[#allocation242_spill] sm:$0xff] %v7555_v42  ;;  %v7560_v37 = vmax.f32 %v13883_v16, %v13882_v18  ;;  %v13891_v44 = vrot.slane %v7165_v9, 4  ;;  %v13894_v42 = vrot.slane %v7170_v15, 4  ;;  %v13898_v16 = vld [vmem:[#allocation75_spill] sm:$0xff] }
 0x1fc   :  { %v7565_v45 = vmax.f32 %v13886_v34, %v13885_v24  ;;  %v7570_v5 = vmax.f32 %v13889_v49, %v13888_v32  ;;  %v13901_v34 = vld [vmem:[#allocation76_spill] sm:$0xff]  ;;  %v13904_v49 = vld [vmem:[#allocation146_spill] sm:$0xff] }
 0x1fd   :  { %13884 = vst [vmem:[#allocation243_spill] sm:$0xff] %v7560_v37  ;;  %v7575_v12 = vmax.f32 %v13892_v50, %v13891_v44  ;;  %v7580_v18 = vmax.f32 %v13895_v7, %v13894_v42  ;;  %v13897_v37 = vrot.slane %v7175_v36, 4  ;;  %v13907_v50 = vld [vmem:[#allocation147_spill] sm:$0xff]  ;;  %v13910_v7 = vld [vmem:[#allocation148_spill] sm:$0xff] }
 0x1fe   :  { %13887 = vst [vmem:[#allocation244_spill] sm:$0xff] %v7565_v45  ;;  %13890 = vst [vmem:[#allocation245_spill] sm:$0xff] %v7570_v5  ;;  %v13900_v45 = vrot.slane %v7180_v62, 4  ;;  %v13903_v5 = vrot.slane %v7185_v25, 4 }
 0x1ff   :  { %13893 = vst [vmem:[#allocation246_spill] sm:$0xff] %v7575_v12  ;;  %13896 = vst [vmem:[#allocation247_spill] sm:$0xff] %v7580_v18  ;;  %v7585_v24 = vmax.f32 %v13898_v16, %v13897_v37  ;;  %v13906_v12 = vrot.slane %v7190_v0, 4  ;;  %v13909_v18 = vrot.slane %v7195_v43, 4  ;;  %v13913_v16 = vld [vmem:[#allocation77_spill] sm:$0xff] }
 0x200   :  { %v7590_v32 = vmax.f32 %v13901_v34, %v13900_v45  ;;  %v7595_v44 = vmax.f32 %v13904_v49, %v13903_v5  ;;  %v13916_v34 = vld [vmem:[#allocation78_spill] sm:$0xff]  ;;  %v13919_v49 = vld [vmem:[#allocation79_spill] sm:$0xff] }
 0x201   :  { %13899 = vst [vmem:[#allocation248_spill] sm:$0xff] %v7585_v24  ;;  %v7600_v42 = vmax.f32 %v13907_v50, %v13906_v12  ;;  %v7605_v37 = vmax.f32 %v13910_v7, %v13909_v18  ;;  %v13912_v24 = vrot.slane %v7150_v31, 5  ;;  %v13922_v50 = vld [vmem:[#allocation80_spill] sm:$0xff]  ;;  %v13925_v7 = vld [vmem:[#allocation81_spill] sm:$0xff] }
 0x202   :  { %13902 = vst [vmem:[#allocation249_spill] sm:$0xff] %v7590_v32  ;;  %13905 = vst [vmem:[#allocation250_spill] sm:$0xff] %v7595_v44  ;;  %v13915_v32 = vrot.slane %v7155_v57, 5  ;;  %v13918_v44 = vrot.slane %v7160_v26, 5 }
 0x203   :  { %13908 = vst [vmem:[#allocation251_spill] sm:$0xff] %v7600_v42  ;;  %13911 = vst [vmem:[#allocation252_spill] sm:$0xff] %v7605_v37  ;;  %v7610_v45 = vmax.f32 %v13913_v16, %v13912_v24  ;;  %v13921_v42 = vrot.slane %v7165_v9, 5  ;;  %v13924_v37 = vrot.slane %v7170_v15, 5  ;;  %v13928_v16 = vld [vmem:[#allocation82_spill] sm:$0xff] }
 0x204   :  { %v7615_v5 = vmax.f32 %v13916_v34, %v13915_v32  ;;  %v7620_v12 = vmax.f32 %v13919_v49, %v13918_v44  ;;  %v13931_v34 = vld [vmem:[#allocation83_spill] sm:$0xff]  ;;  %v13934_v49 = vld [vmem:[#allocation84_spill] sm:$0xff] }
 0x205   :  { %13914 = vst [vmem:[#allocation253_spill] sm:$0xff] %v7610_v45  ;;  %v7625_v18 = vmax.f32 %v13922_v50, %v13921_v42  ;;  %v7630_v24 = vmax.f32 %v13925_v7, %v13924_v37  ;;  %v13927_v45 = vrot.slane %v7175_v36, 5  ;;  %v13937_v50 = vld [vmem:[#allocation85_spill] sm:$0xff]  ;;  %v13940_v7 = vld [vmem:[#allocation86_spill] sm:$0xff] }
 0x206   :  { %13917 = vst [vmem:[#allocation254_spill] sm:$0xff] %v7615_v5  ;;  %13920 = vst [vmem:[#allocation255_spill] sm:$0xff] %v7620_v12  ;;  %v13930_v5 = vrot.slane %v7180_v62, 5  ;;  %v13933_v12 = vrot.slane %v7185_v25, 5 }
 0x207   :  { %13923 = vst [vmem:[#allocation256_spill] sm:$0xff] %v7625_v18  ;;  %13926 = vst [vmem:[#allocation257_spill] sm:$0xff] %v7630_v24  ;;  %v7635_v32 = vmax.f32 %v13928_v16, %v13927_v45  ;;  %v13936_v18 = vrot.slane %v7190_v0, 5  ;;  %v13939_v24 = vrot.slane %v7195_v43, 5  ;;  %v13943_v16 = vld [vmem:[#allocation87_spill] sm:$0xff] }
 0x208   :  { %v7640_v44 = vmax.f32 %v13931_v34, %v13930_v5  ;;  %v7645_v42 = vmax.f32 %v13934_v49, %v13933_v12  ;;  %v13946_v34 = vld [vmem:[#allocation88_spill] sm:$0xff]  ;;  %v13949_v49 = vld [vmem:[#allocation9_spill] sm:$0xff] }
 0x209   :  { %13929 = vst [vmem:[#allocation258_spill] sm:$0xff] %v7635_v32  ;;  %v7650_v37 = vmax.f32 %v13937_v50, %v13936_v18  ;;  %v7655_v45 = vmax.f32 %v13940_v7, %v13939_v24  ;;  %v13942_v32 = vrot.slane %v7150_v31, 6  ;;  %v13952_v50 = vld [vmem:[#allocation10_spill] sm:$0xff]  ;;  %v13955_v7 = vld [vmem:[#allocation11_spill] sm:$0xff] }
 0x20a   :  { %13932 = vst [vmem:[#allocation259_spill] sm:$0xff] %v7640_v44  ;;  %13935 = vst [vmem:[#allocation260_spill] sm:$0xff] %v7645_v42  ;;  %v13945_v44 = vrot.slane %v7155_v57, 6  ;;  %v13948_v42 = vrot.slane %v7160_v26, 6 }
 0x20b   :  { %13938 = vst [vmem:[#allocation261_spill] sm:$0xff] %v7650_v37  ;;  %13941 = vst [vmem:[#allocation262_spill] sm:$0xff] %v7655_v45  ;;  %v7660_v5 = vmax.f32 %v13943_v16, %v13942_v32  ;;  %v13951_v37 = vrot.slane %v7165_v9, 6  ;;  %v13954_v45 = vrot.slane %v7170_v15, 6  ;;  %v13958_v16 = vld [vmem:[#allocation12_spill] sm:$0xff] }
 0x20c   :  { %v7665_v12 = vmax.f32 %v13946_v34, %v13945_v44  ;;  %v7670_v18 = vmax.f32 %v13949_v49, %v13948_v42  ;;  %v13961_v34 = vld [vmem:[#allocation89_spill] sm:$0xff]  ;;  %v13964_v49 = vld [vmem:[#allocation90_spill] sm:$0xff] }
 0x20d   :  { %13944 = vst [vmem:[#allocation263_spill] sm:$0xff] %v7660_v5  ;;  %v7675_v24 = vmax.f32 %v13952_v50, %v13951_v37  ;;  %v7680_v32 = vmax.f32 %v13955_v7, %v13954_v45  ;;  %v13957_v5 = vrot.slane %v7175_v36, 6  ;;  %v13967_v50 = vld [vmem:[#allocation91_spill] sm:$0xff]  ;;  %v13970_v7 = vld [vmem:[#allocation92_spill] sm:$0xff] }
 0x20e   :  { %13947 = vst [vmem:[#allocation264_spill] sm:$0xff] %v7665_v12  ;;  %13950 = vst [vmem:[#allocation265_spill] sm:$0xff] %v7670_v18  ;;  %v13960_v12 = vrot.slane %v7180_v62, 6  ;;  %v13963_v18 = vrot.slane %v7185_v25, 6 }
 0x20f   :  { %13953 = vst [vmem:[#allocation266_spill] sm:$0xff] %v7675_v24  ;;  %13956 = vst [vmem:[#allocation267_spill] sm:$0xff] %v7680_v32  ;;  %v7685_v44 = vmax.f32 %v13958_v16, %v13957_v5  ;;  %v13966_v24 = vrot.slane %v7190_v0, 6  ;;  %v13969_v32 = vrot.slane %v7195_v43, 6  ;;  %v13973_v16 = vld [vmem:[#allocation13_spill] sm:$0xff] }
 0x210   :  { %v7690_v42 = vmax.f32 %v13961_v34, %v13960_v12  ;;  %v7695_v37 = vmax.f32 %v13964_v49, %v13963_v18  ;;  %v13976_v34 = vld [vmem:[#allocation14_spill] sm:$0xff]  ;;  %v13979_v49 = vld [vmem:[#allocation15_spill] sm:$0xff] }
 0x211   :  { %13959 = vst [vmem:[#allocation268_spill] sm:$0xff] %v7685_v44  ;;  %v7700_v45 = vmax.f32 %v13967_v50, %v13966_v24  ;;  %v7705_v5 = vmax.f32 %v13970_v7, %v13969_v32  ;;  %v13972_v44 = vrot.slane %v7150_v31, 7  ;;  %v13982_v50 = vld [vmem:[#allocation16_spill] sm:$0xff]  ;;  %v13985_v31 = vld [vmem:[#allocation93_spill] sm:$0xff] }
 0x212   :  { %13962 = vst [vmem:[#allocation269_spill] sm:$0xff] %v7690_v42  ;;  %13965 = vst [vmem:[#allocation270_spill] sm:$0xff] %v7695_v37  ;;  %v13975_v42 = vrot.slane %v7155_v57, 7  ;;  %v13978_v37 = vrot.slane %v7160_v26, 7  ;;  %v13988_v57 = vld [vmem:[#allocation94_spill] sm:$0xff]  ;;  %v13991_v26 = vld [vmem:[#allocation95_spill] sm:$0xff] }
 0x213   :  { %13968 = vst [vmem:[#allocation271_spill] sm:$0xff] %v7700_v45  ;;  %13971 = vst [vmem:[#allocation92_spill] sm:$0xff] %v7705_v5  ;;  %v7710_v12 = vmax.f32 %v13973_v16, %v13972_v44  ;;  %v13981_v45 = vrot.slane %v7165_v9, 7  ;;  %v13984_v5 = vrot.slane %v7170_v15, 7  ;;  %v13994_v9 = vld [vmem:[#allocation96_spill] sm:$0xff]  ;;  %v14015_v15 = vld [vmem:[#allocation102_spill] sm:$0xff] }
 0x214   :  { %v7715_v18 = vmax.f32 %v13976_v34, %v13975_v42  ;;  %v7720_v24 = vmax.f32 %v13979_v49, %v13978_v37 }
 0x215   :  { %13974 = vst [vmem:[#allocation13_spill] sm:$0xff] %v7710_v12  ;;  %v7725_v32 = vmax.f32 %v13982_v50, %v13981_v45  ;;  %v7730_v44 = vmax.f32 %v13985_v31, %v13984_v5  ;;  %v13987_v12 = vrot.slane %v7175_v36, 7  ;;  %v13999_v36 = vld [vmem:[#allocation18_spill] sm:$0xff] }
 0x216   :  { %13977 = vst [vmem:[#allocation14_spill] sm:$0xff] %v7715_v18  ;;  %13980 = vst [vmem:[#allocation15_spill] sm:$0xff] %v7720_v24  ;;  %v13990_v18 = vrot.slane %v7180_v62, 7  ;;  %v13993_v24 = vrot.slane %v7185_v25, 7  ;;  %v14023_v25 = vrot.slane %v7220_v47, 1 }
 0x217   :  { %13983 = vst [vmem:[#allocation16_spill] sm:$0xff] %v7725_v32  ;;  %13986 = vst [vmem:[#allocation93_spill] sm:$0xff] %v7730_v44  ;;  %v7735_v42 = vmax.f32 %v13988_v57, %v13987_v12  ;;  %v13996_v32 = vrot.slane %v7190_v0, 7  ;;  %v13998_v44 = vrot.slane %v7195_v43, 7  ;;  %v14011_v0 = vrot.slane %v7200_v19, 1 }
 0x218   :  { %v7740_v37 = vmax.f32 %v13991_v26, %v13990_v18  ;;  %v7745_v45 = vmax.f32 %v13994_v9, %v13993_v24  ;;  %v14020_v18 = vrot.slane %v7215_v46, 1  ;;  %v14024_v24 = vld [vmem:[#allocation25_spill] sm:$0xff] }
 0x219   :  { %13989 = vst [vmem:[#allocation94_spill] sm:$0xff] %v7735_v42  ;;  %v7750_v5 = vmax.f32 %v13719_v1, %v13996_v32  ;;  %v7755_v12 = vmax.f32 %v13999_v36, %v13998_v44  ;;  %v14005_v32 = vld [vmem:[#allocation99_spill] sm:$0xff] }
 0x21a   :  { %13992 = vst [vmem:[#allocation95_spill] sm:$0xff] %v7740_v37  ;;  %13995 = vst [vmem:[#allocation96_spill] sm:$0xff] %v7745_v45  ;;  %v14012_v45 = vld [vmem:[#allocation101_spill] sm:$0xff]  ;;  %v14018_v44 = vld [vmem:[#allocation103_spill] sm:$0xff] }
 0x21b   :  { %13997 = vst [vmem:[#allocation272_spill] sm:$0xff] %v7750_v5  ;;  %14000 = vst [vmem:[#allocation273_spill] sm:$0xff] %v7755_v12  ;;  %v7780_v36 = vmax.f32 %v14012_v45, %v14011_v0  ;;  %v14014_v5 = vrot.slane %v7205_v23, 1  ;;  %v14017_v12 = vrot.slane %v7210_v3, 1  ;;  %v14021_v37 = vld [vmem:[#allocation104_spill] sm:$0xff]  ;;  %v7800_v0 = vmax.f32 %v14024_v24, %v14023_v25  ;;  %v14027_v45 = vld [vmem:[#allocation26_spill] sm:$0xff] }
 0x21c   :  { %v7795_v62 = vmax.f32 %v14021_v37, %v14020_v18  ;;  %v14036_v37 = vld [vmem:[#allocation105_spill] sm:$0xff]  ;;  %v14039_v24 = vld [vmem:[#allocation106_spill] sm:$0xff] }
 0x21d   :  { %14013 = vst [vmem:[#allocation99_spill] sm:$0xff] %v7780_v36  ;;  %v7785_v43 = vmax.f32 %v14015_v15, %v14014_v5  ;;  %v7790_v42 = vmax.f32 %v14018_v44, %v14017_v12  ;;  %14025 = vst [vmem:[#allocation277_spill] sm:$0xff] %v7800_v0  ;;  %v14026_v36 = vrot.slane %v7225_v14, 1  ;;  %v14030_v15 = vld [vmem:[#allocation27_spill] sm:$0xff]  ;;  %v14033_v44 = vld [vmem:[#allocation28_spill] sm:$0xff]  ;;  %v14038_v0 = vrot.slane %v7245_v28, 1 }
 0x21e   :  { %14022 = vst [vmem:[#allocation276_spill] sm:$0xff] %v7795_v62  ;;  %v14035_v62 = vrot.slane %v7240_v60, 1 }
 0x21f   :  { %14016 = vst [vmem:[#allocation274_spill] sm:$0xff] %v7785_v43  ;;  %14019 = vst [vmem:[#allocation275_spill] sm:$0xff] %v7790_v42  ;;  %v7805_v5 = vmax.f32 %v14027_v45, %v14026_v36  ;;  %v14029_v43 = vrot.slane %v7230_v55, 1  ;;  %v14032_v42 = vrot.slane %v7235_v33, 1  ;;  %v7825_v36 = vmax.f32 %v14039_v24, %v14038_v0  ;;  %v14042_v45 = vld [vmem:[#allocation107_spill] sm:$0xff] }
 0x220   :  { %v7820_v25 = vmax.f32 %v14036_v37, %v14035_v62  ;;  %v14051_v37 = vld [vmem:[#allocation30_spill] sm:$0xff]  ;;  %v14054_v24 = vld [vmem:[#allocation31_spill] sm:$0xff] }
 0x221   :  { %14028 = vst [vmem:[#allocation278_spill] sm:$0xff] %v7805_v5  ;;  %v7810_v12 = vmax.f32 %v14030_v15, %v14029_v43  ;;  %v7815_v18 = vmax.f32 %v14033_v44, %v14032_v42  ;;  %14040 = vst [vmem:[#allocation282_spill] sm:$0xff] %v7825_v36  ;;  %v14041_v5 = vrot.slane %v7200_v19, 2  ;;  %v14045_v15 = vld [vmem:[#allocation108_spill] sm:$0xff]  ;;  %v14048_v44 = vld [vmem:[#allocation29_spill] sm:$0xff]  ;;  %v14053_v36 = vrot.slane %v7220_v47, 2 }
 0x222   :  { %14037 = vst [vmem:[#allocation281_spill] sm:$0xff] %v7820_v25  ;;  %v14050_v25 = vrot.slane %v7215_v46, 2 }
 0x223   :  { %14031 = vst [vmem:[#allocation279_spill] sm:$0xff] %v7810_v12  ;;  %14034 = vst [vmem:[#allocation280_spill] sm:$0xff] %v7815_v18  ;;  %v7830_v43 = vmax.f32 %v14042_v45, %v14041_v5  ;;  %v14044_v12 = vrot.slane %v7205_v23, 2  ;;  %v14047_v18 = vrot.slane %v7210_v3, 2  ;;  %v7850_v5 = vmax.f32 %v14054_v24, %v14053_v36  ;;  %v14057_v45 = vld [vmem:[#allocation32_spill] sm:$0xff] }
 0x224   :  { %v7845_v0 = vmax.f32 %v14051_v37, %v14050_v25  ;;  %v14066_v37 = vld [vmem:[#allocation111_spill] sm:$0xff]  ;;  %v14069_v24 = vld [vmem:[#allocation112_spill] sm:$0xff] }
 0x225   :  { %14043 = vst [vmem:[#allocation283_spill] sm:$0xff] %v7830_v43  ;;  %v7835_v42 = vmax.f32 %v14045_v15, %v14044_v12  ;;  %v7840_v62 = vmax.f32 %v14048_v44, %v14047_v18  ;;  %14055 = vst [vmem:[#allocation287_spill] sm:$0xff] %v7850_v5  ;;  %v14056_v43 = vrot.slane %v7225_v14, 2  ;;  %v14060_v15 = vld [vmem:[#allocation109_spill] sm:$0xff]  ;;  %v14063_v44 = vld [vmem:[#allocation110_spill] sm:$0xff]  ;;  %v14068_v5 = vrot.slane %v7245_v28, 2 }
 0x226   :  { %14052 = vst [vmem:[#allocation286_spill] sm:$0xff] %v7845_v0  ;;  %v14065_v0 = vrot.slane %v7240_v60, 2 }
 0x227   :  { %14046 = vst [vmem:[#allocation284_spill] sm:$0xff] %v7835_v42  ;;  %14049 = vst [vmem:[#allocation285_spill] sm:$0xff] %v7840_v62  ;;  %v7855_v12 = vmax.f32 %v14057_v45, %v14056_v43  ;;  %v14059_v42 = vrot.slane %v7230_v55, 2  ;;  %v14062_v62 = vrot.slane %v7235_v33, 2  ;;  %v7875_v43 = vmax.f32 %v14069_v24, %v14068_v5  ;;  %v14072_v45 = vld [vmem:[#allocation33_spill] sm:$0xff] }
 0x228   :  { %v7870_v36 = vmax.f32 %v14066_v37, %v14065_v0  ;;  %v14081_v37 = vld [vmem:[#allocation36_spill] sm:$0xff]  ;;  %v14084_v24 = vld [vmem:[#allocation113_spill] sm:$0xff] }
 0x229   :  { %14058 = vst [vmem:[#allocation288_spill] sm:$0xff] %v7855_v12  ;;  %v7860_v18 = vmax.f32 %v14060_v15, %v14059_v42  ;;  %v7865_v25 = vmax.f32 %v14063_v44, %v14062_v62  ;;  %14070 = vst [vmem:[#allocation292_spill] sm:$0xff] %v7875_v43  ;;  %v14071_v12 = vrot.slane %v7200_v19, 3  ;;  %v14075_v15 = vld [vmem:[#allocation34_spill] sm:$0xff]  ;;  %v14078_v44 = vld [vmem:[#allocation35_spill] sm:$0xff]  ;;  %v14083_v43 = vrot.slane %v7220_v47, 3 }
 0x22a   :  { %14067 = vst [vmem:[#allocation291_spill] sm:$0xff] %v7870_v36  ;;  %v14080_v36 = vrot.slane %v7215_v46, 3 }
 0x22b   :  { %14061 = vst [vmem:[#allocation289_spill] sm:$0xff] %v7860_v18  ;;  %14064 = vst [vmem:[#allocation290_spill] sm:$0xff] %v7865_v25  ;;  %v7880_v42 = vmax.f32 %v14072_v45, %v14071_v12  ;;  %v14074_v18 = vrot.slane %v7205_v23, 3  ;;  %v14077_v25 = vrot.slane %v7210_v3, 3  ;;  %v7900_v12 = vmax.f32 %v14084_v24, %v14083_v43  ;;  %v14087_v45 = vld [vmem:[#allocation114_spill] sm:$0xff] }
 0x22c   :  { %v7895_v5 = vmax.f32 %v14081_v37, %v14080_v36  ;;  %v14095_v37 = vld [vmem:[#allocation37_spill] sm:$0xff]  ;;  %v14098_v24 = vld [vmem:[#allocation38_spill] sm:$0xff] }
 0x22d   :  { %14073 = vst [vmem:[#allocation293_spill] sm:$0xff] %v7880_v42  ;;  %v7885_v62 = vmax.f32 %v14075_v15, %v14074_v18  ;;  %v7890_v0 = vmax.f32 %v14078_v44, %v14077_v25  ;;  %14085 = vst [vmem:[#allocation296_spill] sm:$0xff] %v7900_v12  ;;  %v14086_v42 = vrot.slane %v7225_v14, 3  ;;  %v14090_v15 = vld [vmem:[#allocation115_spill] sm:$0xff]  ;;  %v14097_v12 = vrot.slane %v7245_v28, 3 }
 0x22e   :  { %14082 = vst [vmem:[#allocation295_spill] sm:$0xff] %v7895_v5  ;;  %v14094_v5 = vrot.slane %v7240_v60, 3 }
 0x22f   :  { %14076 = vst [vmem:[#allocation294_spill] sm:$0xff] %v7885_v62  ;;  %14079 = vst [vmem:[#allocation35_spill] sm:$0xff] %v7890_v0  ;;  %v7905_v18 = vmax.f32 %v14087_v45, %v14086_v42  ;;  %v14089_v62 = vrot.slane %v7230_v55, 3  ;;  %v14092_v0 = vrot.slane %v7235_v33, 3  ;;  %v7925_v42 = vmax.f32 %v14098_v24, %v14097_v12  ;;  %v14101_v45 = vld [vmem:[#allocation39_spill] sm:$0xff] }
 0x230   :  { %v7920_v43 = vmax.f32 %v14095_v37, %v14094_v5  ;;  %v14110_v37 = vld [vmem:[#allocation118_spill] sm:$0xff]  ;;  %v14113_v24 = vld [vmem:[#allocation119_spill] sm:$0xff] }
 0x231   :  { %14088 = vst [vmem:[#allocation297_spill] sm:$0xff] %v7905_v18  ;;  %v7910_v25 = vmax.f32 %v14090_v15, %v14089_v62  ;;  %v7915_v36 = vmax.f32 %v13742_v35, %v14092_v0  ;;  %14099 = vst [vmem:[#allocation301_spill] sm:$0xff] %v7925_v42  ;;  %v14100_v18 = vrot.slane %v7200_v19, 4  ;;  %v14104_v15 = vld [vmem:[#allocation40_spill] sm:$0xff]  ;;  %v14107_v35 = vld [vmem:[#allocation117_spill] sm:$0xff]  ;;  %v14112_v42 = vrot.slane %v7220_v47, 4 }
 0x232   :  { %14096 = vst [vmem:[#allocation300_spill] sm:$0xff] %v7920_v43  ;;  %v14109_v43 = vrot.slane %v7215_v46, 4 }
 0x233   :  { %14091 = vst [vmem:[#allocation298_spill] sm:$0xff] %v7910_v25  ;;  %14093 = vst [vmem:[#allocation299_spill] sm:$0xff] %v7915_v36  ;;  %v7930_v62 = vmax.f32 %v14101_v45, %v14100_v18  ;;  %v14103_v25 = vrot.slane %v7205_v23, 4  ;;  %v14106_v36 = vrot.slane %v7210_v3, 4  ;;  %v7950_v18 = vmax.f32 %v14113_v24, %v14112_v42  ;;  %v14116_v45 = vld [vmem:[#allocation120_spill] sm:$0xff] }
 0x234   :  { %v7945_v12 = vmax.f32 %v14110_v37, %v14109_v43 }
 0x235   :  { %14102 = vst [vmem:[#allocation302_spill] sm:$0xff] %v7930_v62  ;;  %v7935_v0 = vmax.f32 %v14104_v15, %v14103_v25  ;;  %v7940_v5 = vmax.f32 %v14107_v35, %v14106_v36  ;;  %14114 = vst [vmem:[#allocation119_spill] sm:$0xff] %v7950_v18  ;;  %v14115_v62 = vrot.slane %v7225_v14, 4  ;;  %v14119_v15 = vld [vmem:[#allocation41_spill] sm:$0xff]  ;;  %v14125_v18 = vrot.slane %v7245_v28, 4 }
 0x236   :  { %14111 = vst [vmem:[#allocation118_spill] sm:$0xff] %v7945_v12  ;;  %v14123_v12 = vrot.slane %v7240_v60, 4 }
 0x237   :  { %14105 = vst [vmem:[#allocation303_spill] sm:$0xff] %v7935_v0  ;;  %14108 = vst [vmem:[#allocation117_spill] sm:$0xff] %v7940_v5  ;;  %v7955_v25 = vmax.f32 %v14116_v45, %v14115_v62  ;;  %v14118_v0 = vrot.slane %v7230_v55, 4  ;;  %v14121_v5 = vrot.slane %v7235_v33, 4  ;;  %v7975_v62 = vmax.f32 %v13748_v61, %v14125_v18  ;;  %v14128_v45 = vld [vmem:[#allocation121_spill] sm:$0xff] }
 0x238   :  { %v7970_v42 = vmax.f32 %v13747_v10, %v14123_v12  ;;  %v14137_v10 = vld [vmem:[#allocation124_spill] sm:$0xff]  ;;  %v14140_v61 = vld [vmem:[#allocation45_spill] sm:$0xff] }
 0x239   :  { %14117 = vst [vmem:[#allocation304_spill] sm:$0xff] %v7955_v25  ;;  %v7960_v36 = vmax.f32 %v14119_v15, %v14118_v0  ;;  %v7965_v43 = vmax.f32 %v13746_v41, %v14121_v5  ;;  %14126 = vst [vmem:[#allocation308_spill] sm:$0xff] %v7975_v62  ;;  %v14127_v25 = vrot.slane %v7200_v19, 5  ;;  %v14131_v15 = vld [vmem:[#allocation122_spill] sm:$0xff]  ;;  %v14134_v41 = vld [vmem:[#allocation123_spill] sm:$0xff]  ;;  %v14139_v62 = vrot.slane %v7220_v47, 5 }
 0x23a   :  { %14124 = vst [vmem:[#allocation307_spill] sm:$0xff] %v7970_v42  ;;  %v14136_v42 = vrot.slane %v7215_v46, 5 }
 0x23b   :  { %14120 = vst [vmem:[#allocation305_spill] sm:$0xff] %v7960_v36  ;;  %14122 = vst [vmem:[#allocation306_spill] sm:$0xff] %v7965_v43  ;;  %v7980_v0 = vmax.f32 %v14128_v45, %v14127_v25  ;;  %v14130_v36 = vrot.slane %v7205_v23, 5  ;;  %v14133_v43 = vrot.slane %v7210_v3, 5  ;;  %v8000_v25 = vmax.f32 %v14140_v61, %v14139_v62  ;;  %v14143_v45 = vld [vmem:[#allocation149_spill] sm:$0xff] }
 0x23c   :  { %v7995_v18 = vmax.f32 %v14137_v10, %v14136_v42 }
 0x23d   :  { %14129 = vst [vmem:[#allocation309_spill] sm:$0xff] %v7980_v0  ;;  %v7985_v5 = vmax.f32 %v14131_v15, %v14130_v36  ;;  %v7990_v12 = vmax.f32 %v14134_v41, %v14133_v43  ;;  %14141 = vst [vmem:[#allocation45_spill] sm:$0xff] %v8000_v25  ;;  %v14142_v0 = vrot.slane %v7225_v14, 5  ;;  %v14151_v25 = vrot.slane %v7245_v28, 5 }
 0x23e   :  { %14138 = vst [vmem:[#allocation124_spill] sm:$0xff] %v7995_v18  ;;  %v14149_v18 = vrot.slane %v7240_v60, 5 }
 0x23f   :  { %14132 = vst [vmem:[#allocation122_spill] sm:$0xff] %v7985_v5  ;;  %14135 = vst [vmem:[#allocation123_spill] sm:$0xff] %v7990_v12  ;;  %v8005_v36 = vmax.f32 %v14143_v45, %v14142_v0  ;;  %v14145_v5 = vrot.slane %v7230_v55, 5  ;;  %v14147_v12 = vrot.slane %v7235_v33, 5  ;;  %v8025_v0 = vmax.f32 %v13751_v52, %v14151_v25  ;;  %v14154_v45 = vld [vmem:[#allocation126_spill] sm:$0xff]  ;;  %v14166_v52 = vld [vmem:[#allocation51_spill] sm:$0xff] }
 0x240   :  { %v8020_v62 = vmax.f32 %v13750_v2, %v14149_v18  ;;  %v14163_v2 = vld [vmem:[#allocation50_spill] sm:$0xff] }
 0x241   :  { %14144 = vst [vmem:[#allocation310_spill] sm:$0xff] %v8005_v36  ;;  %v8010_v43 = vmax.f32 %v13745_v51, %v14145_v5  ;;  %v8015_v42 = vmax.f32 %v13749_v4, %v14147_v12  ;;  %14152 = vst [vmem:[#allocation314_spill] sm:$0xff] %v8025_v0  ;;  %v14153_v36 = vrot.slane %v7200_v19, 6  ;;  %v14157_v51 = vld [vmem:[#allocation127_spill] sm:$0xff]  ;;  %v14160_v4 = vld [vmem:[#allocation49_spill] sm:$0xff]  ;;  %v14165_v0 = vrot.slane %v7220_v47, 6 }
 0x242   :  { %14150 = vst [vmem:[#allocation313_spill] sm:$0xff] %v8020_v62  ;;  %v14162_v62 = vrot.slane %v7215_v46, 6 }
 0x243   :  { %14146 = vst [vmem:[#allocation311_spill] sm:$0xff] %v8010_v43  ;;  %14148 = vst [vmem:[#allocation312_spill] sm:$0xff] %v8015_v42  ;;  %v8030_v5 = vmax.f32 %v14154_v45, %v14153_v36  ;;  %v14156_v43 = vrot.slane %v7205_v23, 6  ;;  %v14159_v42 = vrot.slane %v7210_v3, 6  ;;  %v8050_v36 = vmax.f32 %v14166_v52, %v14165_v0  ;;  %v14169_v45 = vld [vmem:[#allocation52_spill] sm:$0xff]  ;;  %v14178_v52 = vld [vmem:[#allocation150_spill] sm:$0xff] }
 0x244   :  { %v8045_v25 = vmax.f32 %v14163_v2, %v14162_v62 }
 0x245   :  { %14155 = vst [vmem:[#allocation315_spill] sm:$0xff] %v8030_v5  ;;  %v8035_v12 = vmax.f32 %v14157_v51, %v14156_v43  ;;  %v8040_v18 = vmax.f32 %v14160_v4, %v14159_v42  ;;  %14167 = vst [vmem:[#allocation316_spill] sm:$0xff] %v8050_v36  ;;  %v14168_v5 = vrot.slane %v7225_v14, 6  ;;  %v14177_v36 = vrot.slane %v7245_v28, 6 }
 0x246   :  { %14164 = vst [vmem:[#allocation50_spill] sm:$0xff] %v8045_v25  ;;  %v14175_v25 = vrot.slane %v7240_v60, 6 }
 0x247   :  { %14158 = vst [vmem:[#allocation127_spill] sm:$0xff] %v8035_v12  ;;  %14161 = vst [vmem:[#allocation49_spill] sm:$0xff] %v8040_v18  ;;  %v8055_v43 = vmax.f32 %v14169_v45, %v14168_v5  ;;  %v14171_v12 = vrot.slane %v7230_v55, 6  ;;  %v14173_v18 = vrot.slane %v7235_v33, 6  ;;  %v8075_v5 = vmax.f32 %v14178_v52, %v14177_v36  ;;  %v14181_v45 = vld [vmem:[#allocation151_spill] sm:$0xff] }
 0x248   :  { %v8070_v0 = vmax.f32 %v6666_v22, %v14175_v25  ;;  %v14190_v22 = vld [vmem:[#allocation154_spill] sm:$0xff] }
 0x249   :  { %14170 = vst [vmem:[#allocation317_spill] sm:$0xff] %v8055_v43  ;;  %v8060_v42 = vmax.f32 %v6660_v8, %v14171_v12  ;;  %v8065_v62 = vmax.f32 %v6663_v38, %v14173_v18  ;;  %14179 = vst [vmem:[#allocation150_spill] sm:$0xff] %v8075_v5  ;;  %v14180_v43 = vrot.slane %v7200_v19, 7  ;;  %v14184_v8 = vld [vmem:[#allocation152_spill] sm:$0xff]  ;;  %v14187_v38 = vld [vmem:[#allocation153_spill] sm:$0xff]  ;;  %v14192_v5 = vrot.slane %v7220_v47, 7 }
 0x24a   :  { %14176 = vst [vmem:[#allocation320_spill] sm:$0xff] %v8070_v0  ;;  %v14189_v0 = vrot.slane %v7215_v46, 7  ;;  %v14193_v19 = vld [vmem:[#allocation155_spill] sm:$0xff]  ;;  %v14202_v46 = vld [vmem:[#allocation158_spill] sm:$0xff] }
 0x24b   :  { %14172 = vst [vmem:[#allocation318_spill] sm:$0xff] %v8060_v42  ;;  %14174 = vst [vmem:[#allocation319_spill] sm:$0xff] %v8065_v62  ;;  %v8080_v12 = vmax.f32 %v14181_v45, %v14180_v43  ;;  %v14183_v42 = vrot.slane %v7205_v23, 7  ;;  %v14186_v62 = vrot.slane %v7210_v3, 7  ;;  %v8100_v43 = vmax.f32 %v14193_v19, %v14192_v5  ;;  %v14196_v23 = vld [vmem:[#allocation156_spill] sm:$0xff]  ;;  %v14199_v3 = vld [vmem:[#allocation157_spill] sm:$0xff] }
 0x24c   :  { %v8095_v36 = vmax.f32 %v14190_v22, %v14189_v0  ;;  %v14205_v47 = vld [vmem:[#allocation159_spill] sm:$0xff] }
 0x24d   :  { %14182 = vst [vmem:[#allocation321_spill] sm:$0xff] %v8080_v12  ;;  %v8085_v18 = vmax.f32 %v14184_v8, %v14183_v42  ;;  %v8090_v25 = vmax.f32 %v14187_v38, %v14186_v62  ;;  %14194 = vst [vmem:[#allocation325_spill] sm:$0xff] %v8100_v43  ;;  %v14195_v12 = vrot.slane %v7225_v14, 7  ;;  %v14207_v43 = vrot.slane %v7245_v28, 7  ;;  %v14208_v14 = vld [vmem:[#allocation160_spill] sm:$0xff]  ;;  %v14232_v8 = vld [vmem:[#allocation53_spill] sm:$0xff] }
 0x24e   :  { %14191 = vst [vmem:[#allocation324_spill] sm:$0xff] %v8095_v36  ;;  %v14204_v36 = vrot.slane %v7240_v60, 7  ;;  %v14216_v60 = vld [vmem:[#allocation181_spill] sm:$0xff] }
 0x24f   :  { %14185 = vst [vmem:[#allocation322_spill] sm:$0xff] %v8085_v18  ;;  %14188 = vst [vmem:[#allocation323_spill] sm:$0xff] %v8090_v25  ;;  %v8105_v42 = vmax.f32 %v14196_v23, %v14195_v12  ;;  %v14198_v18 = vrot.slane %v7230_v55, 7  ;;  %v14201_v25 = vrot.slane %v7235_v33, 7  ;;  %v8125_v12 = vmax.f32 %v14208_v14, %v14207_v43  ;;  %v14217_v33 = vld [vmem:[#allocation182_spill] sm:$0xff]  ;;  %v14218_v55 = vld [vmem:[#allocation183_spill] sm:$0xff] }
 0x250   :  { %v8120_v5 = vmax.f32 %v14205_v47, %v14204_v36  ;;  %v8140_v36 = vsel %vm2018_vm14, %v7111_v17, 0.0  ;;  %v8145_v43 = vsel %vm2018_vm14, %v7115_v40, 0.0  ;;  %v8195_v53 = vsel %vm2019_vm15, %v14218_v55, 0.0  ;;  %v14220_v14 = vld [vmem:[#allocation185_spill] sm:$0xff]  ;;  %v14221_v47 = vld [vmem:[#allocation186_spill] sm:$0xff] }
 0x251   :  { %14197 = vst [vmem:[#allocation326_spill] sm:$0xff] %v8105_v42  ;;  %v8110_v62 = vmax.f32 %v14199_v3, %v14198_v18  ;;  %v8115_v0 = vmax.f32 %v14202_v46, %v14201_v25  ;;  %14209 = vst [vmem:[#allocation330_spill] sm:$0xff] %v8125_v12  ;;  %v8130_v18 = vsel %vm2018_vm14, %v7103_v54, 0.0  ;;  %v8135_v25 = vsel %vm2018_vm14, %v7107_v56, 0.0  ;;  %v14210_v12 = vld [vmem:[#allocation190_spill] sm:$0xff]  ;;  %v14214_v42 = vld [vmem:[#allocation180_spill] sm:$0xff] }
 0x252   :  { %14206 = vst [vmem:[#allocation329_spill] sm:$0xff] %v8120_v5  ;;  %v8150_v54 = vsel %vm2018_vm14, %v7119_v29, 0.0  ;;  %v8155_v56 = vsel %vm2018_vm14, %v7123_v48, 0.0  ;;  %v8160_v17 = vsel %vm2018_vm14, %v14210_v12, 0.0  ;;  %v14211_v5 = vld [vmem:[#allocation191_spill] sm:$0xff]  ;;  %v8180_v12 = vsel %vm2019_vm15, %v14214_v42, 0.0 }
 0x253   :  { %14200 = vst [vmem:[#allocation327_spill] sm:$0xff] %v8110_v62  ;;  %14203 = vst [vmem:[#allocation328_spill] sm:$0xff] %v8115_v0  ;;  %v8165_v40 = vsel %vm2018_vm14, %v14211_v5, 0.0  ;;  %v14212_v0 = vld [vmem:[#allocation192_spill] sm:$0xff]  ;;  %v14213_v62 = vld [vmem:[#allocation193_spill] sm:$0xff]  ;;  %v8185_v5 = vsel %vm2019_vm15, %v14216_v60, 0.0  ;;  %v8369_v19 = vadd.f32 %v8130_v18, %v6212_v11  ;;  %v8373_v22 = vadd.f32 %v8135_v25, %v6215_v20 }
 0x254   :  { %v8170_v29 = vsel %vm2018_vm14, %v14212_v0, 0.0  ;;  %v8175_v48 = vsel %vm2018_vm14, %v14213_v62, 0.0  ;;  %v8190_v0 = vsel %vm2019_vm15, %v14217_v33, 0.0  ;;  %v14219_v62 = vld [vmem:[#allocation184_spill] sm:$0xff]  ;;  %v8205_v60 = vsel %vm2019_vm15, %v14220_v14, 0.0  ;;  %v14222_v46 = vld [vmem:[#allocation187_spill] sm:$0xff] }
 0x255   :  { %v8200_v42 = vsel %vm2019_vm15, %v14219_v62, 0.0  ;;  %v8210_v33 = vsel %vm2019_vm15, %v14221_v47, 0.0  ;;  %v8215_v55 = vsel %vm2019_vm15, %v14222_v46, 0.0  ;;  %v14223_v3 = vld [vmem:[#allocation189_spill] sm:$0xff]  ;;  %v14224_v23 = vld [vmem:[#allocation194_spill] sm:$0xff]  ;;  %14225 = vst [vmem:[#allocation190_spill] sm:$0xff] %v8369_v19  ;;  %v8377_v46 = vadd.f32 %v8140_v36, %v6220_v58 }
 0x256   :  { %v8220_v62 = vsel %vm2019_vm15, %v14223_v3, 0.0  ;;  %v8225_v14 = vsel %vm2019_vm15, %v14224_v23, 0.0  ;;  %14226 = vst [vmem:[#allocation191_spill] sm:$0xff] %v8373_v22  ;;  %v8381_v3 = vadd.f32 %v8145_v43, %v6223_v39  ;;  %v8385_v28 = vadd.f32 %v8150_v54, %v6226_v21  ;;  %v14234_v47 = vld [vmem:[#allocation54_spill] sm:$0xff] }
 0x257   :  { %14227 = vst [vmem:[#allocation192_spill] sm:$0xff] %v8377_v46  ;;  %v8389_v23 = vadd.f32 %v8155_v56, %v6229_v59  ;;  %v8393_v45 = vadd.f32 %v8160_v17, %v6232_v63  ;;  %v8397_v38 = vadd.f32 %v8165_v40, %v14232_v8  ;;  %v8401_v46 = vadd.f32 %v8170_v29, %v14234_v47 }
 0x258   :  { %14228 = vst [vmem:[#allocation193_spill] sm:$0xff] %v8381_v3  ;;  %14229 = vst [vmem:[#allocation180_spill] sm:$0xff] %v8385_v28  ;;  %v8405_v3 = vadd.f32 %v8175_v48, %v13665_v6  ;;  %v14237_v28 = vrot.slane %v8130_v18, 1  ;;  %v14244_v47 = vrot.slane %v8145_v43, 1  ;;  %v14247_v8 = vrot.slane %v8150_v54, 1 }
 0x259   :  { %14230 = vst [vmem:[#allocation188_spill] sm:$0xff] %v8389_v23  ;;  %14231 = vst [vmem:[#allocation181_spill] sm:$0xff] %v8393_v45  ;;  %v14239_v45 = vrot.slane %v8135_v25, 1 }
 0x25a   :  { %14233 = vst [vmem:[#allocation182_spill] sm:$0xff] %v8397_v38  ;;  %14235 = vst [vmem:[#allocation183_spill] sm:$0xff] %v8401_v46  ;;  %v8410_v23 = vadd.f32 %v14237_v28, %v6248_v13  ;;  %v14241_v38 = vrot.slane %v8140_v36, 1  ;;  %v14243_v46 = vld [vmem:[#allocation58_spill] sm:$0xff]  ;;  %v14249_v28 = vld [vmem:[#allocation60_spill] sm:$0xff] }
 0x25b   :  { %14236 = vst [vmem:[#allocation184_spill] sm:$0xff] %v8405_v3  ;;  %v8415_v22 = vadd.f32 %v14239_v45, %v13800_v30  ;;  %v8425_v6 = vadd.f32 %v14244_v47, %v14243_v46  ;;  %v14246_v3 = vld [vmem:[#allocation59_spill] sm:$0xff]  ;;  %v14252_v45 = vld [vmem:[#allocation61_spill] sm:$0xff]  ;;  %v14258_v46 = vld [vmem:[#allocation132_spill] sm:$0xff] }
 0x25c   :  { %14238 = vst [vmem:[#allocation185_spill] sm:$0xff] %v8410_v23  ;;  %v8420_v19 = vadd.f32 %v14241_v38, %v13803_v27  ;;  %v8430_v13 = vadd.f32 %v14247_v8, %v14246_v3  ;;  %v14250_v23 = vrot.slane %v8155_v56, 1  ;;  %v14255_v27 = vld [vmem:[#allocation131_spill] sm:$0xff]  ;;  %v14261_v3 = vld [vmem:[#allocation62_spill] sm:$0xff] }
 0x25d   :  { %14240 = vst [vmem:[#allocation186_spill] sm:$0xff] %v8415_v22  ;;  %14245 = vst [vmem:[#allocation189_spill] sm:$0xff] %v8425_v6  ;;  %v14253_v22 = vrot.slane %v8160_v17, 1  ;;  %v14259_v6 = vrot.slane %v8170_v29, 1 }
 0x25e   :  { %14242 = vst [vmem:[#allocation187_spill] sm:$0xff] %v8420_v19  ;;  %14248 = vst [vmem:[#allocation194_spill] sm:$0xff] %v8430_v13  ;;  %v8435_v30 = vadd.f32 %v14250_v23, %v14249_v28  ;;  %v14256_v19 = vrot.slane %v8165_v40, 1  ;;  %v14262_v13 = vrot.slane %v8175_v48, 1  ;;  %v14264_v28 = vld [vmem:[#allocation63_spill] sm:$0xff] }
 0x25f   :  { %v8440_v38 = vadd.f32 %v14253_v22, %v14252_v45  ;;  %v8450_v8 = vadd.f32 %v14259_v6, %v14258_v46  ;;  %v14267_v45 = vld [vmem:[#allocation64_spill] sm:$0xff]  ;;  %v14273_v46 = vld [vmem:[#allocation134_spill] sm:$0xff] }
 0x260   :  { %14251 = vst [vmem:[#allocation58_spill] sm:$0xff] %v8435_v30  ;;  %v8445_v47 = vadd.f32 %v14256_v19, %v14255_v27  ;;  %v8455_v23 = vadd.f32 %v14262_v13, %v14261_v3  ;;  %v14265_v30 = vrot.slane %v8130_v18, 2  ;;  %v14270_v27 = vld [vmem:[#allocation133_spill] sm:$0xff]  ;;  %v14276_v3 = vld [vmem:[#allocation135_spill] sm:$0xff] }
 0x261   :  { %14254 = vst [vmem:[#allocation59_spill] sm:$0xff] %v8440_v38  ;;  %14260 = vst [vmem:[#allocation61_spill] sm:$0xff] %v8450_v8  ;;  %v14268_v38 = vrot.slane %v8135_v25, 2  ;;  %v14274_v8 = vrot.slane %v8145_v43, 2 }
 0x262   :  { %14257 = vst [vmem:[#allocation60_spill] sm:$0xff] %v8445_v47  ;;  %14263 = vst [vmem:[#allocation131_spill] sm:$0xff] %v8455_v23  ;;  %v8460_v22 = vadd.f32 %v14265_v30, %v14264_v28  ;;  %v14271_v47 = vrot.slane %v8140_v36, 2  ;;  %v14277_v23 = vrot.slane %v8150_v54, 2  ;;  %v14279_v28 = vld [vmem:[#allocation136_spill] sm:$0xff] }
 0x263   :  { %v8465_v19 = vadd.f32 %v14268_v38, %v14267_v45  ;;  %v8475_v13 = vadd.f32 %v14274_v8, %v14273_v46  ;;  %v14282_v45 = vld [vmem:[#allocation137_spill] sm:$0xff]  ;;  %v14288_v46 = vld [vmem:[#allocation66_spill] sm:$0xff] }
 0x264   :  { %14266 = vst [vmem:[#allocation132_spill] sm:$0xff] %v8460_v22  ;;  %v8470_v6 = vadd.f32 %v14271_v47, %v14270_v27  ;;  %v8480_v30 = vadd.f32 %v14277_v23, %v14276_v3  ;;  %v14280_v22 = vrot.slane %v8155_v56, 2  ;;  %v14285_v27 = vld [vmem:[#allocation65_spill] sm:$0xff]  ;;  %v14291_v3 = vld [vmem:[#allocation67_spill] sm:$0xff] }
 0x265   :  { %14269 = vst [vmem:[#allocation62_spill] sm:$0xff] %v8465_v19  ;;  %14275 = vst [vmem:[#allocation64_spill] sm:$0xff] %v8475_v13  ;;  %v14283_v19 = vrot.slane %v8160_v17, 2  ;;  %v14289_v13 = vrot.slane %v8170_v29, 2 }
 0x266   :  { %14272 = vst [vmem:[#allocation63_spill] sm:$0xff] %v8470_v6  ;;  %14278 = vst [vmem:[#allocation133_spill] sm:$0xff] %v8480_v30  ;;  %v8485_v38 = vadd.f32 %v14280_v22, %v14279_v28  ;;  %v14286_v6 = vrot.slane %v8165_v40, 2  ;;  %v14292_v30 = vrot.slane %v8175_v48, 2  ;;  %v14294_v28 = vld [vmem:[#allocation138_spill] sm:$0xff] }
 0x267   :  { %v8490_v47 = vadd.f32 %v14283_v19, %v14282_v45  ;;  %v8500_v23 = vadd.f32 %v14289_v13, %v14288_v46  ;;  %v14297_v45 = vld [vmem:[#allocation139_spill] sm:$0xff]  ;;  %v14303_v46 = vld [vmem:[#allocation140_spill] sm:$0xff] }
 0x268   :  { %14281 = vst [vmem:[#allocation134_spill] sm:$0xff] %v8485_v38  ;;  %v8495_v8 = vadd.f32 %v14286_v6, %v14285_v27  ;;  %v8505_v22 = vadd.f32 %v14292_v30, %v14291_v3  ;;  %v14295_v38 = vrot.slane %v8130_v18, 3  ;;  %v14300_v27 = vld [vmem:[#allocation68_spill] sm:$0xff]  ;;  %v14306_v3 = vld [vmem:[#allocation141_spill] sm:$0xff] }
 0x269   :  { %14284 = vst [vmem:[#allocation135_spill] sm:$0xff] %v8490_v47  ;;  %14290 = vst [vmem:[#allocation137_spill] sm:$0xff] %v8500_v23  ;;  %v14298_v47 = vrot.slane %v8135_v25, 3  ;;  %v14304_v23 = vrot.slane %v8145_v43, 3 }
 0x26a   :  { %14287 = vst [vmem:[#allocation136_spill] sm:$0xff] %v8495_v8  ;;  %14293 = vst [vmem:[#allocation65_spill] sm:$0xff] %v8505_v22  ;;  %v8510_v19 = vadd.f32 %v14295_v38, %v14294_v28  ;;  %v14301_v8 = vrot.slane %v8140_v36, 3  ;;  %v14307_v22 = vrot.slane %v8150_v54, 3  ;;  %v14309_v28 = vld [vmem:[#allocation69_spill] sm:$0xff] }
 0x26b   :  { %v8515_v6 = vadd.f32 %v14298_v47, %v14297_v45  ;;  %v8525_v30 = vadd.f32 %v14304_v23, %v14303_v46  ;;  %v14312_v45 = vld [vmem:[#allocation70_spill] sm:$0xff]  ;;  %v14318_v46 = vld [vmem:[#allocation72_spill] sm:$0xff] }
 0x26c   :  { %14296 = vst [vmem:[#allocation66_spill] sm:$0xff] %v8510_v19  ;;  %v8520_v13 = vadd.f32 %v14301_v8, %v14300_v27  ;;  %v8530_v38 = vadd.f32 %v14307_v22, %v14306_v3  ;;  %v14310_v19 = vrot.slane %v8155_v56, 3  ;;  %v14315_v27 = vld [vmem:[#allocation71_spill] sm:$0xff]  ;;  %v14321_v3 = vld [vmem:[#allocation142_spill] sm:$0xff] }
 0x26d   :  { %14299 = vst [vmem:[#allocation67_spill] sm:$0xff] %v8515_v6  ;;  %14305 = vst [vmem:[#allocation139_spill] sm:$0xff] %v8525_v30  ;;  %v14313_v6 = vrot.slane %v8160_v17, 3  ;;  %v14319_v30 = vrot.slane %v8170_v29, 3 }
 0x26e   :  { %14302 = vst [vmem:[#allocation138_spill] sm:$0xff] %v8520_v13  ;;  %14308 = vst [vmem:[#allocation68_spill] sm:$0xff] %v8530_v38  ;;  %v8535_v47 = vadd.f32 %v14310_v19, %v14309_v28  ;;  %v14316_v13 = vrot.slane %v8165_v40, 3  ;;  %v14322_v38 = vrot.slane %v8175_v48, 3  ;;  %v14324_v28 = vld [vmem:[#allocation143_spill] sm:$0xff] }
 0x26f   :  { %v8540_v8 = vadd.f32 %v14313_v6, %v14312_v45  ;;  %v8550_v22 = vadd.f32 %v14319_v30, %v14318_v46  ;;  %v14327_v45 = vld [vmem:[#allocation144_spill] sm:$0xff]  ;;  %v14333_v46 = vld [vmem:[#allocation73_spill] sm:$0xff] }
 0x270   :  { %14311 = vst [vmem:[#allocation140_spill] sm:$0xff] %v8535_v47  ;;  %v8545_v23 = vadd.f32 %v14316_v13, %v14315_v27  ;;  %v8555_v19 = vadd.f32 %v14322_v38, %v14321_v3  ;;  %v14325_v47 = vrot.slane %v8130_v18, 4  ;;  %v14330_v27 = vld [vmem:[#allocation145_spill] sm:$0xff]  ;;  %v14336_v3 = vld [vmem:[#allocation74_spill] sm:$0xff] }
 0x271   :  { %14314 = vst [vmem:[#allocation141_spill] sm:$0xff] %v8540_v8  ;;  %14320 = vst [vmem:[#allocation70_spill] sm:$0xff] %v8550_v22  ;;  %v14328_v8 = vrot.slane %v8135_v25, 4  ;;  %v14334_v22 = vrot.slane %v8145_v43, 4 }
 0x272   :  { %14317 = vst [vmem:[#allocation69_spill] sm:$0xff] %v8545_v23  ;;  %14323 = vst [vmem:[#allocation71_spill] sm:$0xff] %v8555_v19  ;;  %v8560_v6 = vadd.f32 %v14325_v47, %v14324_v28  ;;  %v14331_v23 = vrot.slane %v8140_v36, 4  ;;  %v14337_v19 = vrot.slane %v8150_v54, 4  ;;  %v14339_v28 = vld [vmem:[#allocation75_spill] sm:$0xff] }
 0x273   :  { %v8565_v13 = vadd.f32 %v14328_v8, %v14327_v45  ;;  %v8575_v38 = vadd.f32 %v14334_v22, %v14333_v46  ;;  %v14342_v45 = vld [vmem:[#allocation76_spill] sm:$0xff]  ;;  %v14348_v46 = vld [vmem:[#allocation147_spill] sm:$0xff] }
 0x274   :  { %14326 = vst [vmem:[#allocation72_spill] sm:$0xff] %v8560_v6  ;;  %v8570_v30 = vadd.f32 %v14331_v23, %v14330_v27  ;;  %v8580_v47 = vadd.f32 %v14337_v19, %v14336_v3  ;;  %v14340_v6 = vrot.slane %v8155_v56, 4  ;;  %v14345_v27 = vld [vmem:[#allocation146_spill] sm:$0xff]  ;;  %v14351_v3 = vld [vmem:[#allocation148_spill] sm:$0xff] }
 0x275   :  { %14329 = vst [vmem:[#allocation142_spill] sm:$0xff] %v8565_v13  ;;  %14335 = vst [vmem:[#allocation144_spill] sm:$0xff] %v8575_v38  ;;  %v14343_v13 = vrot.slane %v8160_v17, 4  ;;  %v14349_v38 = vrot.slane %v8170_v29, 4 }
 0x276   :  { %14332 = vst [vmem:[#allocation143_spill] sm:$0xff] %v8570_v30  ;;  %14338 = vst [vmem:[#allocation145_spill] sm:$0xff] %v8580_v47  ;;  %v8585_v8 = vadd.f32 %v14340_v6, %v14339_v28  ;;  %v14346_v30 = vrot.slane %v8165_v40, 4  ;;  %v14352_v47 = vrot.slane %v8175_v48, 4  ;;  %v14354_v28 = vld [vmem:[#allocation77_spill] sm:$0xff] }
 0x277   :  { %v8590_v23 = vadd.f32 %v14343_v13, %v14342_v45  ;;  %v8600_v19 = vadd.f32 %v14349_v38, %v14348_v46  ;;  %v14357_v45 = vld [vmem:[#allocation78_spill] sm:$0xff]  ;;  %v14363_v46 = vld [vmem:[#allocation80_spill] sm:$0xff] }
 0x278   :  { %14341 = vst [vmem:[#allocation73_spill] sm:$0xff] %v8585_v8  ;;  %v8595_v22 = vadd.f32 %v14346_v30, %v14345_v27  ;;  %v8605_v6 = vadd.f32 %v14352_v47, %v14351_v3  ;;  %v14355_v8 = vrot.slane %v8130_v18, 5  ;;  %v14360_v27 = vld [vmem:[#allocation79_spill] sm:$0xff]  ;;  %v14366_v3 = vld [vmem:[#allocation81_spill] sm:$0xff] }
 0x279   :  { %14344 = vst [vmem:[#allocation74_spill] sm:$0xff] %v8590_v23  ;;  %14350 = vst [vmem:[#allocation76_spill] sm:$0xff] %v8600_v19  ;;  %v14358_v23 = vrot.slane %v8135_v25, 5  ;;  %v14364_v19 = vrot.slane %v8145_v43, 5 }
 0x27a   :  { %14347 = vst [vmem:[#allocation75_spill] sm:$0xff] %v8595_v22  ;;  %14353 = vst [vmem:[#allocation146_spill] sm:$0xff] %v8605_v6  ;;  %v8610_v13 = vadd.f32 %v14355_v8, %v14354_v28  ;;  %v14361_v22 = vrot.slane %v8140_v36, 5  ;;  %v14367_v6 = vrot.slane %v8150_v54, 5  ;;  %v14369_v28 = vld [vmem:[#allocation82_spill] sm:$0xff] }
 0x27b   :  { %v8615_v30 = vadd.f32 %v14358_v23, %v14357_v45  ;;  %v8625_v47 = vadd.f32 %v14364_v19, %v14363_v46  ;;  %v14372_v45 = vld [vmem:[#allocation83_spill] sm:$0xff]  ;;  %v14378_v46 = vld [vmem:[#allocation85_spill] sm:$0xff] }
 0x27c   :  { %14356 = vst [vmem:[#allocation147_spill] sm:$0xff] %v8610_v13  ;;  %v8620_v38 = vadd.f32 %v14361_v22, %v14360_v27  ;;  %v8630_v8 = vadd.f32 %v14367_v6, %v14366_v3  ;;  %v14370_v13 = vrot.slane %v8155_v56, 5  ;;  %v14375_v27 = vld [vmem:[#allocation84_spill] sm:$0xff]  ;;  %v14381_v3 = vld [vmem:[#allocation86_spill] sm:$0xff] }
 0x27d   :  { %14359 = vst [vmem:[#allocation148_spill] sm:$0xff] %v8615_v30  ;;  %14365 = vst [vmem:[#allocation78_spill] sm:$0xff] %v8625_v47  ;;  %v14373_v30 = vrot.slane %v8160_v17, 5  ;;  %v14379_v47 = vrot.slane %v8170_v29, 5 }
 0x27e   :  { %14362 = vst [vmem:[#allocation77_spill] sm:$0xff] %v8620_v38  ;;  %14368 = vst [vmem:[#allocation79_spill] sm:$0xff] %v8630_v8  ;;  %v8635_v23 = vadd.f32 %v14370_v13, %v14369_v28  ;;  %v14376_v38 = vrot.slane %v8165_v40, 5  ;;  %v14382_v8 = vrot.slane %v8175_v48, 5  ;;  %v14384_v28 = vld [vmem:[#allocation87_spill] sm:$0xff] }
 0x27f   :  { %v8640_v22 = vadd.f32 %v14373_v30, %v14372_v45  ;;  %v8650_v6 = vadd.f32 %v14379_v47, %v14378_v46  ;;  %v14387_v45 = vld [vmem:[#allocation88_spill] sm:$0xff]  ;;  %v14393_v46 = vld [vmem:[#allocation10_spill] sm:$0xff] }
 0x280   :  { %14371 = vst [vmem:[#allocation80_spill] sm:$0xff] %v8635_v23  ;;  %v8645_v19 = vadd.f32 %v14376_v38, %v14375_v27  ;;  %v8655_v13 = vadd.f32 %v14382_v8, %v14381_v3  ;;  %v14385_v23 = vrot.slane %v8130_v18, 6  ;;  %v14390_v27 = vld [vmem:[#allocation9_spill] sm:$0xff]  ;;  %v14396_v3 = vld [vmem:[#allocation11_spill] sm:$0xff] }
 0x281   :  { %14374 = vst [vmem:[#allocation81_spill] sm:$0xff] %v8640_v22  ;;  %14380 = vst [vmem:[#allocation83_spill] sm:$0xff] %v8650_v6  ;;  %v14388_v22 = vrot.slane %v8135_v25, 6  ;;  %v14394_v6 = vrot.slane %v8145_v43, 6 }
 0x282   :  { %14377 = vst [vmem:[#allocation82_spill] sm:$0xff] %v8645_v19  ;;  %14383 = vst [vmem:[#allocation84_spill] sm:$0xff] %v8655_v13  ;;  %v8660_v30 = vadd.f32 %v14385_v23, %v14384_v28  ;;  %v14391_v19 = vrot.slane %v8140_v36, 6  ;;  %v14397_v13 = vrot.slane %v8150_v54, 6  ;;  %v14399_v28 = vld [vmem:[#allocation12_spill] sm:$0xff] }
 0x283   :  { %v8665_v38 = vadd.f32 %v14388_v22, %v14387_v45  ;;  %v8675_v8 = vadd.f32 %v14394_v6, %v14393_v46  ;;  %v14402_v45 = vld [vmem:[#allocation89_spill] sm:$0xff]  ;;  %v14408_v46 = vld [vmem:[#allocation91_spill] sm:$0xff] }
 0x284   :  { %14386 = vst [vmem:[#allocation85_spill] sm:$0xff] %v8660_v30  ;;  %v8670_v47 = vadd.f32 %v14391_v19, %v14390_v27  ;;  %v8680_v23 = vadd.f32 %v14397_v13, %v14396_v3  ;;  %v14400_v30 = vrot.slane %v8155_v56, 6  ;;  %v14405_v27 = vld [vmem:[#allocation90_spill] sm:$0xff]  ;;  %v14411_v3 = vrot.slane %v8175_v48, 6 }
 0x285   :  { %14389 = vst [vmem:[#allocation86_spill] sm:$0xff] %v8665_v38  ;;  %14395 = vst [vmem:[#allocation88_spill] sm:$0xff] %v8675_v8  ;;  %v14403_v38 = vrot.slane %v8160_v17, 6  ;;  %v14409_v8 = vrot.slane %v8170_v29, 6 }
 0x286   :  { %14392 = vst [vmem:[#allocation87_spill] sm:$0xff] %v8670_v47  ;;  %14398 = vst [vmem:[#allocation9_spill] sm:$0xff] %v8680_v23  ;;  %v8685_v22 = vadd.f32 %v14400_v30, %v14399_v28  ;;  %v14406_v47 = vrot.slane %v8165_v40, 6  ;;  %v8705_v30 = vadd.f32 %v14411_v3, %v13970_v7  ;;  %v14413_v28 = vrot.slane %v8130_v18, 7  ;;  %v14431_v3 = vld [vmem:[#allocation18_spill] sm:$0xff] }
 0x287   :  { %v8690_v19 = vadd.f32 %v14403_v38, %v14402_v45  ;;  %v8700_v13 = vadd.f32 %v14409_v8, %v14408_v46  ;;  %v14415_v45 = vrot.slane %v8135_v25, 7  ;;  %v14419_v46 = vrot.slane %v8145_v43, 7 }
 0x288   :  { %14401 = vst [vmem:[#allocation10_spill] sm:$0xff] %v8685_v22  ;;  %v8695_v6 = vadd.f32 %v14406_v47, %v14405_v27  ;;  %14412 = vst [vmem:[#allocation90_spill] sm:$0xff] %v8705_v30  ;;  %v8710_v38 = vadd.f32 %v14413_v28, %v13973_v16  ;;  %v14417_v27 = vrot.slane %v8140_v36, 7  ;;  %v14421_v18 = vrot.slane %v8150_v54, 7  ;;  %v14434_v28 = vld [vmem:[#allocation19_spill] sm:$0xff]  ;;  %v14681_v22 = vld [vmem:[#allocation196_spill] sm:$0xff] }
 0x289   :  { %14404 = vst [vmem:[#allocation11_spill] sm:$0xff] %v8690_v19  ;;  %14410 = vst [vmem:[#allocation89_spill] sm:$0xff] %v8700_v13  ;;  %v8715_v47 = vadd.f32 %v14415_v45, %v13976_v34  ;;  %v8725_v7 = vadd.f32 %v14419_v46, %v13982_v50  ;;  %v14423_v25 = vrot.slane %v8155_v56, 7  ;;  %v14425_v36 = vrot.slane %v8160_v17, 7  ;;  %v14679_v13 = vld [vmem:[#allocation195_spill] sm:$0xff] }
 0x28a   :  { %14407 = vst [vmem:[#allocation12_spill] sm:$0xff] %v8695_v6  ;;  %14414 = vst [vmem:[#allocation91_spill] sm:$0xff] %v8710_v38  ;;  %v8720_v8 = vadd.f32 %v14417_v27, %v13979_v49  ;;  %v8730_v16 = vadd.f32 %v14421_v18, %v13985_v31  ;;  %v14427_v43 = vrot.slane %v8165_v40, 7  ;;  %v14429_v54 = vrot.slane %v8170_v29, 7  ;;  %v14440_v29 = vld [vmem:[#allocation98_spill] sm:$0xff]  ;;  %v14443_v27 = vld [vmem:[#allocation100_spill] sm:$0xff] }
 0x28b   :  { %14416 = vst [vmem:[#allocation331_spill] sm:$0xff] %v8715_v47  ;;  %14420 = vst [vmem:[#allocation333_spill] sm:$0xff] %v8725_v7  ;;  %v8735_v34 = vadd.f32 %v14423_v25, %v13988_v57  ;;  %v8740_v49 = vadd.f32 %v14425_v36, %v13991_v26  ;;  %v14432_v56 = vrot.slane %v8175_v48, 7  ;;  %v8759_v17 = vadd.f32 %v8180_v12, %v14434_v28  ;;  %v14436_v26 = vld [vmem:[#allocation20_spill] sm:$0xff]  ;;  %v14445_v18 = vld [vmem:[#allocation21_spill] sm:$0xff] }
 0x28c   :  { %14418 = vst [vmem:[#allocation332_spill] sm:$0xff] %v8720_v8  ;;  %14422 = vst [vmem:[#allocation334_spill] sm:$0xff] %v8730_v16  ;;  %v8745_v50 = vadd.f32 %v14427_v43, %v13994_v9  ;;  %v8750_v31 = vadd.f32 %v14429_v54, %v13719_v1  ;;  %v8763_v45 = vadd.f32 %v8185_v5, %v14436_v26  ;;  %v14438_v9 = vld [vmem:[#allocation97_spill] sm:$0xff]  ;;  %v14447_v36 = vld [vmem:[#allocation22_spill] sm:$0xff] }
 0x28d   :  { %14424 = vst [vmem:[#allocation335_spill] sm:$0xff] %v8735_v34  ;;  %14426 = vst [vmem:[#allocation336_spill] sm:$0xff] %v8740_v49  ;;  %v8755_v57 = vadd.f32 %v14432_v56, %v14431_v3  ;;  %v8767_v40 = vadd.f32 %v8190_v0, %v14438_v9  ;;  %v8771_v1 = vadd.f32 %v8195_v53, %v14440_v29  ;;  %v14449_v54 = vld [vmem:[#allocation23_spill] sm:$0xff]  ;;  %v14451_v56 = vld [vmem:[#allocation24_spill] sm:$0xff]  ;;  %v14466_v34 = vrot.slane %v8200_v42, 1 }
 0x28e   :  { %14428 = vst [vmem:[#allocation337_spill] sm:$0xff] %v8745_v50  ;;  %14430 = vst [vmem:[#allocation338_spill] sm:$0xff] %v8750_v31  ;;  %v8775_v48 = vadd.f32 %v8200_v42, %v14005_v32  ;;  %v8779_v46 = vadd.f32 %v8205_v60, %v14443_v27  ;;  %v8783_v25 = vadd.f32 %v8210_v33, %v14445_v18  ;;  %v14463_v50 = vrot.slane %v8195_v53, 1 }
 0x28f   :  { %14433 = vst [vmem:[#allocation18_spill] sm:$0xff] %v8755_v57  ;;  %14435 = vst [vmem:[#allocation19_spill] sm:$0xff] %v8759_v17  ;;  %v8787_v43 = vadd.f32 %v8215_v55, %v14447_v36  ;;  %v8791_v3 = vadd.f32 %v8220_v62, %v14449_v54  ;;  %v14459_v57 = vld [vmem:[#allocation103_spill] sm:$0xff]  ;;  %v14680_v6 = vmax.f32 %v6212_v11, %v14679_v13 }
 0x290   :  { %14437 = vst [vmem:[#allocation20_spill] sm:$0xff] %v8763_v45  ;;  %14439 = vst [vmem:[#allocation97_spill] sm:$0xff] %v8767_v40  ;;  %v14454_v40 = vrot.slane %v8180_v12, 1  ;;  %v14456_v45 = vld [vmem:[#allocation102_spill] sm:$0xff]  ;;  %v14682_v23 = vmax.f32 %v6215_v20, %v14681_v22  ;;  %v14688_v11 = vld [vmem:[#allocation199_spill] sm:$0xff] }
 0x291   :  { %14441 = vst [vmem:[#allocation98_spill] sm:$0xff] %v8771_v1  ;;  %14442 = vst [vmem:[#allocation339_spill] sm:$0xff] %v8775_v48  ;;  %v8795_v1 = vadd.f32 %v8225_v14, %v14451_v56  ;;  %v14453_v48 = vld [vmem:[#allocation101_spill] sm:$0xff]  ;;  %v14691_v20 = vld [vmem:[#allocation200_spill] sm:$0xff] }
 0x292   :  { %14444 = vst [vmem:[#allocation100_spill] sm:$0xff] %v8779_v46  ;;  %14446 = vst [vmem:[#allocation21_spill] sm:$0xff] %v8783_v25  ;;  %v8800_v46 = vadd.f32 %v14454_v40, %v14453_v48  ;;  %v14457_v25 = vrot.slane %v8185_v5, 1  ;;  %v14468_v48 = vld [vmem:[#allocation26_spill] sm:$0xff] }
 0x293   :  { %14448 = vst [vmem:[#allocation22_spill] sm:$0xff] %v8787_v43  ;;  %14450 = vst [vmem:[#allocation23_spill] sm:$0xff] %v8791_v3  ;;  %v14460_v43 = vrot.slane %v8190_v0, 1  ;;  %v14462_v3 = vld [vmem:[#allocation104_spill] sm:$0xff] }
 0x294   :  { %14452 = vst [vmem:[#allocation24_spill] sm:$0xff] %v8795_v1  ;;  %14455 = vst [vmem:[#allocation101_spill] sm:$0xff] %v8800_v46  ;;  %v8805_v17 = vadd.f32 %v14457_v25, %v14456_v45  ;;  %v8815_v49 = vadd.f32 %v14463_v50, %v14462_v3  ;;  %v14465_v1 = vld [vmem:[#allocation25_spill] sm:$0xff]  ;;  %v14469_v46 = vrot.slane %v8205_v60, 1  ;;  %v14471_v25 = vld [vmem:[#allocation27_spill] sm:$0xff] }
 0x295   :  { %v8810_v31 = vadd.f32 %v14460_v43, %v14459_v57  ;;  %v8820_v40 = vadd.f32 %v14466_v34, %v14465_v1  ;;  %v14474_v43 = vld [vmem:[#allocation28_spill] sm:$0xff]  ;;  %v14477_v3 = vld [vmem:[#allocation105_spill] sm:$0xff]  ;;  %v14480_v1 = vld [vmem:[#allocation106_spill] sm:$0xff] }
 0x296   :  { %14458 = vst [vmem:[#allocation102_spill] sm:$0xff] %v8805_v17  ;;  %14464 = vst [vmem:[#allocation104_spill] sm:$0xff] %v8815_v49  ;;  %v8825_v45 = vadd.f32 %v14469_v46, %v14468_v48  ;;  %v14472_v17 = vrot.slane %v8210_v33, 1  ;;  %v14478_v49 = vrot.slane %v8220_v62, 1  ;;  %v14483_v48 = vld [vmem:[#allocation107_spill] sm:$0xff] }
 0x297   :  { %14461 = vst [vmem:[#allocation103_spill] sm:$0xff] %v8810_v31  ;;  %14467 = vst [vmem:[#allocation25_spill] sm:$0xff] %v8820_v40  ;;  %v14475_v31 = vrot.slane %v8215_v55, 1  ;;  %v14481_v40 = vrot.slane %v8225_v14, 1 }
 0x298   :  { %14470 = vst [vmem:[#allocation26_spill] sm:$0xff] %v8825_v45  ;;  %v8830_v57 = vadd.f32 %v14472_v17, %v14471_v25  ;;  %v8840_v34 = vadd.f32 %v14478_v49, %v14477_v3  ;;  %v14484_v45 = vrot.slane %v8180_v12, 2  ;;  %v14486_v25 = vld [vmem:[#allocation108_spill] sm:$0xff]  ;;  %v14492_v3 = vld [vmem:[#allocation30_spill] sm:$0xff] }
 0x299   :  { %v8835_v50 = vadd.f32 %v14475_v31, %v14474_v43  ;;  %v8845_v46 = vadd.f32 %v14481_v40, %v14480_v1  ;;  %v14489_v43 = vld [vmem:[#allocation29_spill] sm:$0xff]  ;;  %v14495_v1 = vld [vmem:[#allocation31_spill] sm:$0xff] }
 0x29a   :  { %14473 = vst [vmem:[#allocation27_spill] sm:$0xff] %v8830_v57  ;;  %14479 = vst [vmem:[#allocation105_spill] sm:$0xff] %v8840_v34  ;;  %v8850_v17 = vadd.f32 %v14484_v45, %v14483_v48  ;;  %v14487_v57 = vrot.slane %v8185_v5, 2  ;;  %v14493_v34 = vrot.slane %v8195_v53, 2  ;;  %v14498_v48 = vld [vmem:[#allocation32_spill] sm:$0xff] }
 0x29b   :  { %14476 = vst [vmem:[#allocation28_spill] sm:$0xff] %v8835_v50  ;;  %14482 = vst [vmem:[#allocation106_spill] sm:$0xff] %v8845_v46  ;;  %v14490_v50 = vrot.slane %v8190_v0, 2  ;;  %v14496_v46 = vrot.slane %v8200_v42, 2 }
 0x29c   :  { %14485 = vst [vmem:[#allocation107_spill] sm:$0xff] %v8850_v17  ;;  %v8855_v31 = vadd.f32 %v14487_v57, %v14486_v25  ;;  %v8865_v40 = vadd.f32 %v14493_v34, %v14492_v3  ;;  %v14499_v17 = vrot.slane %v8205_v60, 2  ;;  %v14501_v25 = vld [vmem:[#allocation109_spill] sm:$0xff]  ;;  %v14507_v3 = vld [vmem:[#allocation111_spill] sm:$0xff] }
 0x29d   :  { %v8860_v49 = vadd.f32 %v14490_v50, %v14489_v43  ;;  %v8870_v45 = vadd.f32 %v14496_v46, %v14495_v1  ;;  %v14504_v43 = vld [vmem:[#allocation110_spill] sm:$0xff]  ;;  %v14510_v1 = vld [vmem:[#allocation112_spill] sm:$0xff] }
 0x29e   :  { %14488 = vst [vmem:[#allocation108_spill] sm:$0xff] %v8855_v31  ;;  %14494 = vst [vmem:[#allocation30_spill] sm:$0xff] %v8865_v40  ;;  %v8875_v57 = vadd.f32 %v14499_v17, %v14498_v48  ;;  %v14502_v31 = vrot.slane %v8210_v33, 2  ;;  %v14508_v40 = vrot.slane %v8220_v62, 2  ;;  %v14513_v48 = vld [vmem:[#allocation33_spill] sm:$0xff] }
 0x29f   :  { %14491 = vst [vmem:[#allocation29_spill] sm:$0xff] %v8860_v49  ;;  %14497 = vst [vmem:[#allocation31_spill] sm:$0xff] %v8870_v45  ;;  %v14505_v49 = vrot.slane %v8215_v55, 2  ;;  %v14511_v45 = vrot.slane %v8225_v14, 2 }
 0x2a0   :  { %14500 = vst [vmem:[#allocation32_spill] sm:$0xff] %v8875_v57  ;;  %v8880_v50 = vadd.f32 %v14502_v31, %v14501_v25  ;;  %v8890_v46 = vadd.f32 %v14508_v40, %v14507_v3  ;;  %v14514_v57 = vrot.slane %v8180_v12, 3  ;;  %v14516_v25 = vld [vmem:[#allocation34_spill] sm:$0xff]  ;;  %v14521_v3 = vld [vmem:[#allocation36_spill] sm:$0xff] }
 0x2a1   :  { %v8885_v34 = vadd.f32 %v14505_v49, %v14504_v43  ;;  %v8895_v17 = vadd.f32 %v14511_v45, %v14510_v1  ;;  %v14519_v43 = vrot.slane %v8190_v0, 3  ;;  %v14524_v1 = vld [vmem:[#allocation113_spill] sm:$0xff] }
 0x2a2   :  { %14503 = vst [vmem:[#allocation109_spill] sm:$0xff] %v8880_v50  ;;  %14509 = vst [vmem:[#allocation111_spill] sm:$0xff] %v8890_v46  ;;  %v8900_v31 = vadd.f32 %v14514_v57, %v14513_v48  ;;  %v14517_v50 = vrot.slane %v8185_v5, 3  ;;  %v14522_v46 = vrot.slane %v8195_v53, 3  ;;  %v14527_v48 = vld [vmem:[#allocation114_spill] sm:$0xff] }
 0x2a3   :  { %14506 = vst [vmem:[#allocation110_spill] sm:$0xff] %v8885_v34  ;;  %14512 = vst [vmem:[#allocation112_spill] sm:$0xff] %v8895_v17  ;;  %v8910_v40 = vadd.f32 %v14519_v43, %v14078_v44  ;;  %v14525_v17 = vrot.slane %v8200_v42, 3  ;;  %v14533_v43 = vld [vmem:[#allocation116_spill] sm:$0xff] }
 0x2a4   :  { %14515 = vst [vmem:[#allocation33_spill] sm:$0xff] %v8900_v31  ;;  %v8905_v49 = vadd.f32 %v14517_v50, %v14516_v25  ;;  %v8915_v45 = vadd.f32 %v14522_v46, %v14521_v3  ;;  %v14528_v31 = vrot.slane %v8205_v60, 3  ;;  %v14530_v25 = vld [vmem:[#allocation115_spill] sm:$0xff]  ;;  %v14536_v3 = vld [vmem:[#allocation37_spill] sm:$0xff]  ;;  %v14655_v34 = vld [vmem:[#allocation156_spill] sm:$0xff] }
 0x2a5   :  { %14520 = vst [vmem:[#allocation340_spill] sm:$0xff] %v8910_v40  ;;  %v8920_v57 = vadd.f32 %v14525_v17, %v14524_v1  ;;  %v14534_v40 = vrot.slane %v8215_v55, 3  ;;  %v14539_v1 = vld [vmem:[#allocation38_spill] sm:$0xff] }
 0x2a6   :  { %14518 = vst [vmem:[#allocation34_spill] sm:$0xff] %v8905_v49  ;;  %14523 = vst [vmem:[#allocation36_spill] sm:$0xff] %v8915_v45  ;;  %v8925_v50 = vadd.f32 %v14528_v31, %v14527_v48  ;;  %v14531_v49 = vrot.slane %v8210_v33, 3  ;;  %v14537_v45 = vrot.slane %v8220_v62, 3  ;;  %v14542_v48 = vld [vmem:[#allocation39_spill] sm:$0xff] }
 0x2a7   :  { %14526 = vst [vmem:[#allocation113_spill] sm:$0xff] %v8920_v57  ;;  %v8935_v46 = vadd.f32 %v14534_v40, %v14533_v43  ;;  %v14540_v57 = vrot.slane %v8225_v14, 3  ;;  %v14548_v43 = vrot.slane %v8190_v0, 4 }
 0x2a8   :  { %14529 = vst [vmem:[#allocation114_spill] sm:$0xff] %v8925_v50  ;;  %v8930_v44 = vadd.f32 %v14531_v49, %v14530_v25  ;;  %v8940_v17 = vadd.f32 %v14537_v45, %v14536_v3  ;;  %v14543_v50 = vrot.slane %v8180_v12, 4  ;;  %v14545_v25 = vld [vmem:[#allocation40_spill] sm:$0xff]  ;;  %v14550_v3 = vrot.slane %v8195_v53, 4 }
 0x2a9   :  { %14535 = vst [vmem:[#allocation116_spill] sm:$0xff] %v8935_v46  ;;  %v8945_v31 = vadd.f32 %v14540_v57, %v14539_v1  ;;  %v8960_v45 = vadd.f32 %v14548_v43, %v14107_v35  ;;  %v14552_v1 = vrot.slane %v8200_v42, 4  ;;  %v14560_v43 = vld [vmem:[#allocation42_spill] sm:$0xff] }
 0x2aa   :  { %14532 = vst [vmem:[#allocation115_spill] sm:$0xff] %v8930_v44  ;;  %14538 = vst [vmem:[#allocation37_spill] sm:$0xff] %v8940_v17  ;;  %v8950_v49 = vadd.f32 %v14543_v50, %v14542_v48  ;;  %v14546_v44 = vrot.slane %v8185_v5, 4  ;;  %v8965_v57 = vadd.f32 %v14550_v3, %v14110_v37  ;;  %v14554_v48 = vld [vmem:[#allocation120_spill] sm:$0xff]  ;;  %v14563_v3 = vld [vmem:[#allocation43_spill] sm:$0xff] }
 0x2ab   :  { %14541 = vst [vmem:[#allocation38_spill] sm:$0xff] %v8945_v31  ;;  %14549 = vst [vmem:[#allocation341_spill] sm:$0xff] %v8960_v45  ;;  %v8970_v50 = vadd.f32 %v14552_v1, %v14113_v24  ;;  %v14561_v45 = vrot.slane %v8215_v55, 4  ;;  %v14566_v1 = vld [vmem:[#allocation44_spill] sm:$0xff]  ;;  %v14653_v17 = vld [vmem:[#allocation177_spill] sm:$0xff] }
 0x2ac   :  { %14544 = vst [vmem:[#allocation39_spill] sm:$0xff] %v8950_v49  ;;  %v8955_v40 = vadd.f32 %v14546_v44, %v14545_v25  ;;  %14551 = vst [vmem:[#allocation342_spill] sm:$0xff] %v8965_v57  ;;  %v14555_v49 = vrot.slane %v8205_v60, 4  ;;  %v14557_v25 = vld [vmem:[#allocation41_spill] sm:$0xff]  ;;  %v14564_v57 = vrot.slane %v8220_v62, 4  ;;  %v14654_v46 = vld [vmem:[#allocation178_spill] sm:$0xff] }
 0x2ad   :  { %14553 = vst [vmem:[#allocation343_spill] sm:$0xff] %v8970_v50  ;;  %v8985_v37 = vadd.f32 %v14561_v45, %v14560_v43  ;;  %v14567_v50 = vrot.slane %v8225_v14, 4  ;;  %v14574_v43 = vrot.slane %v8190_v0, 5 }
 0x2ae   :  { %14547 = vst [vmem:[#allocation40_spill] sm:$0xff] %v8955_v40  ;;  %v8975_v44 = vadd.f32 %v14555_v49, %v14554_v48  ;;  %v14558_v40 = vrot.slane %v8210_v33, 4  ;;  %v8990_v24 = vadd.f32 %v14564_v57, %v14563_v3  ;;  %v14569_v48 = vld [vmem:[#allocation121_spill] sm:$0xff]  ;;  %v14576_v3 = vrot.slane %v8195_v53, 5 }
 0x2af   :  { %14562 = vst [vmem:[#allocation42_spill] sm:$0xff] %v8985_v37  ;;  %v8995_v49 = vadd.f32 %v14567_v50, %v14566_v1  ;;  %v9010_v57 = vadd.f32 %v14574_v43, %v14134_v41  ;;  %v14578_v1 = vrot.slane %v8200_v42, 5  ;;  %v14586_v43 = vld [vmem:[#allocation47_spill] sm:$0xff] }
 0x2b0   :  { %14556 = vst [vmem:[#allocation120_spill] sm:$0xff] %v8975_v44  ;;  %v8980_v35 = vadd.f32 %v14558_v40, %v14557_v25  ;;  %14565 = vst [vmem:[#allocation43_spill] sm:$0xff] %v8990_v24  ;;  %v14570_v44 = vrot.slane %v8180_v12, 5  ;;  %v14572_v25 = vrot.slane %v8185_v5, 5  ;;  %v9015_v50 = vadd.f32 %v14576_v3, %v14137_v10  ;;  %v14589_v3 = vld [vmem:[#allocation48_spill] sm:$0xff]  ;;  %v14650_v24 = vld [vmem:[#allocation174_spill] sm:$0xff] }
 0x2b1   :  { %14568 = vst [vmem:[#allocation44_spill] sm:$0xff] %v8995_v49  ;;  %14575 = vst [vmem:[#allocation345_spill] sm:$0xff] %v9010_v57  ;;  %v14587_v57 = vrot.slane %v8215_v55, 5  ;;  %v14649_v49 = vld [vmem:[#allocation173_spill] sm:$0xff]  ;;  %v14651_v37 = vld [vmem:[#allocation175_spill] sm:$0xff] }
 0x2b2   :  { %14559 = vst [vmem:[#allocation41_spill] sm:$0xff] %v8980_v35  ;;  %v9000_v40 = vadd.f32 %v14570_v44, %v14569_v48  ;;  %v9005_v45 = vadd.f32 %v14572_v25, %v14131_v15  ;;  %14577 = vst [vmem:[#allocation346_spill] sm:$0xff] %v9015_v50  ;;  %v9020_v44 = vadd.f32 %v14578_v1, %v14140_v61  ;;  %v14580_v48 = vld [vmem:[#allocation149_spill] sm:$0xff]  ;;  %v14583_v25 = vld [vmem:[#allocation46_spill] sm:$0xff]  ;;  %v14590_v50 = vrot.slane %v8220_v62, 5 }
 0x2b3   :  { %v9035_v10 = vadd.f32 %v14587_v57, %v14586_v43  ;;  %v14592_v1 = vld [vmem:[#allocation125_spill] sm:$0xff]  ;;  %v14600_v43 = vrot.slane %v8190_v0, 6  ;;  %v14652_v35 = vld [vmem:[#allocation176_spill] sm:$0xff] }
 0x2b4   :  { %14571 = vst [vmem:[#allocation121_spill] sm:$0xff] %v9000_v40  ;;  %14573 = vst [vmem:[#allocation344_spill] sm:$0xff] %v9005_v45  ;;  %v14581_v40 = vrot.slane %v8205_v60, 5  ;;  %v14584_v45 = vrot.slane %v8210_v33, 5  ;;  %v9040_v61 = vadd.f32 %v14590_v50, %v14589_v3  ;;  %v14602_v3 = vrot.slane %v8195_v53, 6 }
 0x2b5   :  { %14579 = vst [vmem:[#allocation347_spill] sm:$0xff] %v9020_v44  ;;  %14588 = vst [vmem:[#allocation47_spill] sm:$0xff] %v9035_v10  ;;  %v14593_v44 = vrot.slane %v8225_v14, 5  ;;  %v9060_v50 = vadd.f32 %v14600_v43, %v14160_v4  ;;  %v14613_v43 = vld [vmem:[#allocation129_spill] sm:$0xff]  ;;  %v14647_v10 = vld [vmem:[#allocation171_spill] sm:$0xff]  ;;  %v3036_v31 = vrot.slane %v14652_v35, 1 }
 0x2b6   :  { %v9025_v15 = vadd.f32 %v14581_v40, %v14580_v48  ;;  %v9030_v41 = vadd.f32 %v14584_v45, %v14583_v25  ;;  %14591 = vst [vmem:[#allocation48_spill] sm:$0xff] %v9040_v61  ;;  %v14595_v48 = vld [vmem:[#allocation126_spill] sm:$0xff]  ;;  %v14598_v25 = vrot.slane %v8185_v5, 6  ;;  %v14664_v35 = vld [vmem:[#allocation179_spill] sm:$0xff] }
 0x2b7   :  { %v9045_v40 = vadd.f32 %v14593_v44, %v14592_v1  ;;  %14601 = vst [vmem:[#allocation349_spill] sm:$0xff] %v9060_v50  ;;  %v9065_v44 = vadd.f32 %v14602_v3, %v14163_v2  ;;  %v14604_v1 = vld [vmem:[#allocation51_spill] sm:$0xff]  ;;  %v14614_v50 = vrot.slane %v8215_v55, 6  ;;  %v14616_v3 = vld [vmem:[#allocation130_spill] sm:$0xff]  ;;  %v3039_v7 = vrot.slane %v14664_v35, 1 }
 0x2b8   :  { %14582 = vst [vmem:[#allocation149_spill] sm:$0xff] %v9025_v15  ;;  %14585 = vst [vmem:[#allocation46_spill] sm:$0xff] %v9030_v41  ;;  %v14596_v15 = vrot.slane %v8180_v12, 6  ;;  %v9055_v57 = vadd.f32 %v14598_v25, %v14157_v51  ;;  %v14610_v25 = vld [vmem:[#allocation128_spill] sm:$0xff]  ;;  %v14646_v61 = vld [vmem:[#allocation170_spill] sm:$0xff] }
 0x2b9   :  { %14594 = vst [vmem:[#allocation125_spill] sm:$0xff] %v9045_v40  ;;  %14603 = vst [vmem:[#allocation350_spill] sm:$0xff] %v9065_v44  ;;  %v14605_v40 = vrot.slane %v8200_v42, 6  ;;  %v9085_v2 = vadd.f32 %v14614_v50, %v14613_v43  ;;  %v14617_v44 = vrot.slane %v8220_v62, 6  ;;  %v14627_v43 = vld [vmem:[#allocation153_spill] sm:$0xff]  ;;  %v14648_v41 = vld [vmem:[#allocation172_spill] sm:$0xff] }
 0x2ba   :  { %v9050_v45 = vadd.f32 %v14596_v15, %v14595_v48  ;;  %14599 = vst [vmem:[#allocation348_spill] sm:$0xff] %v9055_v57  ;;  %v14607_v48 = vld [vmem:[#allocation52_spill] sm:$0xff]  ;;  %v14611_v57 = vrot.slane %v8210_v33, 6 }
 0x2bb   :  { %v9070_v15 = vadd.f32 %v14605_v40, %v14604_v1  ;;  %14615 = vst [vmem:[#allocation129_spill] sm:$0xff] %v9085_v2  ;;  %v9090_v40 = vadd.f32 %v14617_v44, %v14616_v3  ;;  %v14619_v1 = vrot.slane %v8225_v14, 6  ;;  %v14628_v2 = vrot.slane %v8190_v0, 7  ;;  %v14630_v3 = vld [vmem:[#allocation154_spill] sm:$0xff] }
 0x2bc   :  { %14597 = vst [vmem:[#allocation126_spill] sm:$0xff] %v9050_v45  ;;  %v14608_v45 = vrot.slane %v8205_v60, 6  ;;  %v9080_v4 = vadd.f32 %v14611_v57, %v14610_v25  ;;  %v14624_v25 = vld [vmem:[#allocation152_spill] sm:$0xff] }
 0x2bd   :  { %14606 = vst [vmem:[#allocation51_spill] sm:$0xff] %v9070_v15  ;;  %14618 = vst [vmem:[#allocation130_spill] sm:$0xff] %v9090_v40  ;;  %v9110_v44 = vadd.f32 %v14628_v2, %v14627_v43  ;;  %v14631_v40 = vrot.slane %v8195_v53, 7  ;;  %v14640_v2 = vld [vmem:[#allocation165_spill] sm:$0xff]  ;;  %v14642_v53 = vld [vmem:[#allocation167_spill] sm:$0xff] }
 0x2be   :  { %v9075_v51 = vadd.f32 %v14608_v45, %v14607_v48  ;;  %14612 = vst [vmem:[#allocation128_spill] sm:$0xff] %v9080_v4  ;;  %v9095_v45 = vadd.f32 %v14619_v1, %v14178_v52  ;;  %v14621_v48 = vld [vmem:[#allocation151_spill] sm:$0xff]  ;;  %v14625_v4 = vrot.slane %v8185_v5, 7  ;;  %v14637_v5 = vld [vmem:[#allocation162_spill] sm:$0xff]  ;;  %v3024_v43 = vrot.slane %v14640_v2, 1 }
 0x2bf   :  { %14629 = vst [vmem:[#allocation153_spill] sm:$0xff] %v9110_v44  ;;  %v9115_v52 = vadd.f32 %v14631_v40, %v14630_v3  ;;  %v14633_v1 = vld [vmem:[#allocation155_spill] sm:$0xff]  ;;  %v14641_v44 = vld [vmem:[#allocation166_spill] sm:$0xff]  ;;  %v3026_v40 = vrot.slane %v14642_v53, 1  ;;  %v9129_v3 = vpop.permute.xlu1 %3074  ;;  %v3033_v2 = vrot.slane %v14649_v49, 1  ;;  %v3035_v53 = vrot.slane %v14651_v37, 1 }
 0x2c0   :  { %14609 = vst [vmem:[#allocation52_spill] sm:$0xff] %v9075_v51  ;;  %14620 = vst [vmem:[#allocation351_spill] sm:$0xff] %v9095_v45  ;;  %v14622_v51 = vrot.slane %v8180_v12, 7  ;;  %v9105_v50 = vadd.f32 %v14625_v4, %v14624_v25  ;;  %v14634_v12 = vrot.slane %v8200_v42, 7  ;;  %v3021_v4 = vrot.slane %v14637_v5, 1  ;;  %v14638_v25 = vld [vmem:[#allocation163_spill] sm:$0xff] }
 0x2c1   :  { %14632 = vst [vmem:[#allocation154_spill] sm:$0xff] %v9115_v52  ;;  %v14639_v45 = vld [vmem:[#allocation164_spill] sm:$0xff]  ;;  %v3025_v15 = vrot.slane %v14641_v44, 1  ;;  %v3030_v5 = vrot.slane %v14646_v61, 1  ;;  %v3034_v44 = vrot.slane %v14650_v24, 1  ;;  %v14661_v49 = vld [vmem:[#allocation158_spill] sm:$0xff]  ;;  %v9197_v35 = vsel %vm3040_vm0, %v3026_v40, %v3036_v31 }
 0x2c2   :  { %v9100_v57 = vadd.f32 %v14622_v51, %v14621_v48  ;;  %14626 = vst [vmem:[#allocation152_spill] sm:$0xff] %v9105_v50  ;;  %v9120_v51 = vadd.f32 %v14634_v12, %v14633_v1  ;;  %v14636_v48 = vld [vmem:[#allocation161_spill] sm:$0xff]  ;;  %v3022_v50 = vrot.slane %v14638_v25, 1  ;;  %v3023_v0 = vrot.slane %v14639_v45, 1  ;;  %v14643_v52 = vld [vmem:[#allocation168_spill] sm:$0xff] }
 0x2c3   :  { %v3027_v42 = vrot.slane %v14643_v52, 1  ;;  %v14644_v1 = vld [vmem:[#allocation17_spill] sm:$0xff]  ;;  %v3031_v25 = vrot.slane %v14647_v10, 1  ;;  %v3032_v45 = vrot.slane %v14648_v41, 1  ;;  %v3037_v52 = vrot.slane %v14653_v17, 1  ;;  %v14665_v17 = vld [vmem:[#allocation159_spill] sm:$0xff] }
 0x2c4   :  { %14623 = vst [vmem:[#allocation151_spill] sm:$0xff] %v9100_v57  ;;  %14635 = vst [vmem:[#allocation155_spill] sm:$0xff] %v9120_v51  ;;  %v3020_v57 = vrot.slane %v14636_v48, 1  ;;  %v3028_v12 = vrot.slane %v14644_v1, 1  ;;  %v14645_v51 = vld [vmem:[#allocation169_spill] sm:$0xff]  ;;  %v3038_v1 = vrot.slane %v14654_v46, 1 }
 0x2c5   :  { %v3029_v48 = vrot.slane %v14645_v51, 1  ;;  %v14656_v51 = vrot.slane %v8205_v60, 7  ;;  %v14658_v10 = vld [vmem:[#allocation157_spill] sm:$0xff]  ;;  %v14659_v41 = vrot.slane %v8210_v33, 7  ;;  %v14662_v24 = vrot.slane %v8215_v55, 7  ;;  %v14668_v60 = vld [vmem:[#allocation160_spill] sm:$0xff] }
 0x2c6   :  { %v14666_v46 = vrot.slane %v8220_v62, 7  ;;  %v9175_v55 = vsel %vm3040_vm0, %v3021_v4, %v3031_v25  ;;  %v9183_v62 = vsel %vm3040_vm0, %v3023_v0, %v3033_v2  ;;  %vm3079_vm1 = vcmp.eq.s32.totalorder %v9129_v3, 1 }
 0x2c7   :  { %v9146_v61 = vadd.f32 %v14656_v51, %v14655_v34  ;;  %v9151_v16 = vadd.f32 %v14659_v41, %v14658_v10  ;;  %v9156_v37 = vadd.f32 %v14662_v24, %v14661_v49  ;;  %v14669_v34 = vrot.slane %v8225_v14, 7  ;;  %v9193_v24 = vpop.permute.xlu1 %3077 }
 0x2c8   :  { %v9162_v8 = vadd.f32 %v14666_v46, %v14665_v17  ;;  %v9171_v10 = vsel %vm3040_vm0, %v3020_v57, %v3030_v5  ;;  %v9179_v41 = vsel %vm3040_vm0, %v3022_v50, %v3032_v45  ;;  %v9187_v14 = vsel %vm3040_vm0, %v3024_v43, %v3034_v44 }
 0x2c9   :  { %14657 = vst [vmem:[#allocation161_spill] sm:$0xff] %v9146_v61  ;;  %14660 = vst [vmem:[#allocation162_spill] sm:$0xff] %v9151_v16  ;;  %v9167_v51 = vadd.f32 %v14669_v34, %v14668_v60  ;;  %v9191_v49 = vsel %vm3040_vm0, %v3025_v15, %v3035_v53  ;;  %v9201_v17 = vsel %vm3040_vm0, %v3027_v42, %v3037_v52  ;;  %vm3080_vm2 = vcmp.eq.s32.totalorder %v9193_v24, 1 }
 0x2ca   :  { %14663 = vst [vmem:[#allocation163_spill] sm:$0xff] %v9156_v37  ;;  %14667 = vst [vmem:[#allocation164_spill] sm:$0xff] %v9162_v8  ;;  %v9205_v46 = vsel %vm3040_vm0, %v3028_v12, %v3038_v1  ;;  %v9209_v60 = vsel %vm3040_vm0, %v3029_v48, %v3039_v7  ;;  %v9213_v34 = vsel %vm3040_vm0, %v3030_v5, %v3020_v57  ;;  %v9291_v5 = vsel %vm3079_vm1, %v9201_v17, -inf }
 0x2cb   :  { %14670 = vst [vmem:[#allocation165_spill] sm:$0xff] %v9167_v51  ;;  %v9217_v51 = vsel %vm3040_vm0, %v3031_v25, %v3021_v4  ;;  %v9221_v8 = vsel %vm3040_vm0, %v3032_v45, %v3022_v50  ;;  %v9225_v37 = vsel %vm3040_vm0, %v3033_v2, %v3023_v0  ;;  %v9229_v16 = vsel %vm3040_vm0, %v3034_v44, %v3024_v43 }
 0x2cc   :  { %14672 = vst [vmem:[#allocation166_spill] sm:$0xff] %v9225_v37  ;;  %14673 = vst [vmem:[#allocation167_spill] sm:$0xff] %v9229_v16  ;;  %v9233_v57 = vsel %vm3040_vm0, %v3035_v53, %v3025_v15  ;;  %v9237_v4 = vsel %vm3040_vm0, %v3036_v31, %v3026_v40  ;;  %v9242_v50 = vsel %vm3040_vm0, %v3037_v52, %v3027_v42  ;;  %v9256_v31 = vsel %vm3079_vm1, %v9171_v10, -inf }
 0x2cd   :  { %14674 = vst [vmem:[#allocation168_spill] sm:$0xff] %v9233_v57  ;;  %14675 = vst [vmem:[#allocation17_spill] sm:$0xff] %v9237_v4  ;;  %v9246_v0 = vsel %vm3040_vm0, %v3038_v1, %v3028_v12  ;;  %v9250_v43 = vsel %vm3040_vm0, %v3039_v7, %v3029_v48  ;;  %v9261_v15 = vsel %vm3079_vm1, %v9175_v55, -inf  ;;  %v9266_v40 = vsel %vm3079_vm1, %v9179_v41, -inf }
 0x2ce   :  { %14676 = vst [vmem:[#allocation169_spill] sm:$0xff] %v9242_v50  ;;  %14677 = vst [vmem:[#allocation170_spill] sm:$0xff] %v9246_v0  ;;  %v9271_v7 = vsel %vm3079_vm1, %v9183_v62, -inf  ;;  %v9276_v42 = vsel %vm3079_vm1, %v9187_v14, -inf  ;;  %v9281_v12 = vsel %vm3079_vm1, %v9191_v49, -inf  ;;  %v9286_v48 = vsel %vm3079_vm1, %v9197_v35, -inf }
 0x2cf   :  { %14678 = vst [vmem:[#allocation171_spill] sm:$0xff] %v9250_v43  ;;  %v9296_v25 = vsel %vm3079_vm1, %v9205_v46, -inf  ;;  %v9301_v45 = vsel %vm3079_vm1, %v9209_v60, -inf  ;;  %v9306_v2 = vsel %vm3080_vm2, %v9213_v34, -inf  ;;  %v9311_v44 = vsel %vm3080_vm2, %v9217_v51, -inf }
 0x2d0   :  { %v9316_v53 = vsel %vm3080_vm2, %v9221_v8, -inf  ;;  %v9321_v52 = vsel %vm3080_vm2, %v9225_v37, -inf  ;;  %v9326_v1 = vsel %vm3080_vm2, %v9229_v16, -inf  ;;  %v9331_v33 = vsel %vm3080_vm2, %v9233_v57, -inf }
 0x2d1   :  { %v9336_v61 = vsel %vm3080_vm2, %v9237_v4, -inf  ;;  %v9341_v47 = vsel %vm3080_vm2, %v9242_v50, -inf  ;;  %v9346_v38 = vsel %vm3080_vm2, %v9246_v0, -inf  ;;  %v9351_v30 = vsel %vm3080_vm2, %v9250_v43, -inf  ;;  %v14683_v0 = vld [vmem:[#allocation197_spill] sm:$0xff]  ;;  %v14685_v43 = vld [vmem:[#allocation198_spill] sm:$0xff] }
 0x2d2   :  { %v9497_v16 = vmax.f32 %v14680_v6, %v9256_v31  ;;  %v9503_v19 = vmax.f32 %v14682_v23, %v9261_v15  ;;  %v14684_v4 = vmax.f32 %v6220_v58, %v14683_v0  ;;  %v14686_v57 = vmax.f32 %v6223_v39, %v14685_v43  ;;  %v14694_v58 = vld [vmem:[#allocation201_spill] sm:$0xff] }
 0x2d3   :  { %v14689_v6 = vmax.f32 %v6226_v21, %v14688_v11  ;;  %v14692_v23 = vmax.f32 %v6229_v59, %v14691_v20  ;;  %v14697_v39 = vld [vmem:[#allocation53_spill] sm:$0xff]  ;;  %v14701_v21 = vld [vmem:[#allocation54_spill] sm:$0xff]  ;;  %v14702_v11 = vld [vmem:[#allocation203_spill] sm:$0xff] }
 0x2d4   :  { %v9509_v50 = vmax.f32 %v14684_v4, %v9266_v40  ;;  %v9515_v37 = vmax.f32 %v14686_v57, %v9271_v7  ;;  %v14695_v4 = vmax.f32 %v6232_v63, %v14694_v58  ;;  %v14698_v57 = vld [vmem:[#allocation202_spill] sm:$0xff]  ;;  %v14705_v59 = vld [vmem:[#allocation55_spill] sm:$0xff]  ;;  %v14706_v20 = vld [vmem:[#allocation204_spill] sm:$0xff]  ;;  %v14709_v63 = vrot.slane %v9256_v31, 1 }
 0x2d5   :  { %v9521_v13 = vmax.f32 %v14689_v6, %v9276_v42  ;;  %v9527_v22 = vmax.f32 %v14692_v23, %v9281_v12  ;;  %v14699_v43 = vmax.f32 %v14697_v39, %v14698_v57  ;;  %v14703_v6 = vmax.f32 %v14701_v21, %v14702_v11  ;;  %v14710_v58 = vld [vmem:[#allocation215_spill] sm:$0xff]  ;;  %v14713_v57 = vld [vmem:[#allocation56_spill] sm:$0xff]  ;;  %v14716_v11 = vld [vmem:[#allocation57_spill] sm:$0xff] }
 0x2d6   :  { %14687 = vst [vmem:[#allocation172_spill] sm:$0xff] %v9515_v37  ;;  %v9533_v0 = vmax.f32 %v14695_v4, %v9286_v48  ;;  %v14707_v23 = vmax.f32 %v14705_v59, %v14706_v20  ;;  %v9556_v4 = vmax.f32 %v14710_v58, %v14709_v63  ;;  %v14712_v39 = vrot.slane %v9261_v15, 1  ;;  %v14719_v59 = vld [vmem:[#allocation216_spill] sm:$0xff] }
 0x2d7   :  { %14690 = vst [vmem:[#allocation173_spill] sm:$0xff] %v9521_v13  ;;  %14693 = vst [vmem:[#allocation174_spill] sm:$0xff] %v9527_v22  ;;  %v9539_v37 = vmax.f32 %v14699_v43, %v9291_v5  ;;  %v9545_v13 = vmax.f32 %v14703_v6, %v9296_v25  ;;  %v14715_v21 = vrot.slane %v9266_v40, 1  ;;  %v14724_v58 = vrot.slane %v9281_v12, 1 }
 0x2d8   :  { %14696 = vst [vmem:[#allocation175_spill] sm:$0xff] %v9533_v0  ;;  %v9551_v22 = vmax.f32 %v14707_v23, %v9301_v45  ;;  %14711 = vst [vmem:[#allocation156_spill] sm:$0xff] %v9556_v4  ;;  %v9561_v43 = vmax.f32 %v14713_v57, %v14712_v39  ;;  %v14721_v23 = vrot.slane %v9276_v42, 1  ;;  %v14725_v4 = vld [vmem:[#allocation218_spill] sm:$0xff]  ;;  %v14727_v57 = vrot.slane %v9286_v48, 1 }
 0x2d9   :  { %14700 = vst [vmem:[#allocation176_spill] sm:$0xff] %v9539_v37  ;;  %14704 = vst [vmem:[#allocation177_spill] sm:$0xff] %v9545_v13  ;;  %v9566_v6 = vmax.f32 %v14716_v11, %v14715_v21  ;;  %v14718_v13 = vrot.slane %v9271_v7, 1  ;;  %v9581_v39 = vmax.f32 %v14725_v4, %v14724_v58  ;;  %v14730_v11 = vrot.slane %v9291_v5, 1 }
 0x2da   :  { %14708 = vst [vmem:[#allocation178_spill] sm:$0xff] %v9551_v22  ;;  %14714 = vst [vmem:[#allocation157_spill] sm:$0xff] %v9561_v43  ;;  %v14722_v22 = vld [vmem:[#allocation217_spill] sm:$0xff]  ;;  %v14728_v43 = vld [vmem:[#allocation219_spill] sm:$0xff]  ;;  %v14739_v58 = vrot.slane %v9256_v31, 2 }
 0x2db   :  { %14717 = vst [vmem:[#allocation158_spill] sm:$0xff] %v9566_v6  ;;  %v9571_v20 = vmax.f32 %v14719_v59, %v14718_v13  ;;  %v9576_v63 = vmax.f32 %v14722_v22, %v14721_v23  ;;  %14726 = vst [vmem:[#allocation160_spill] sm:$0xff] %v9581_v39  ;;  %v9586_v21 = vmax.f32 %v14728_v43, %v14727_v57  ;;  %v14731_v6 = vld [vmem:[#allocation220_spill] sm:$0xff]  ;;  %v14733_v59 = vrot.slane %v9296_v25, 1  ;;  %v14740_v39 = vld [vmem:[#allocation223_spill] sm:$0xff] }
 0x2dc   :  { %v9591_v13 = vmax.f32 %v14731_v6, %v14730_v11  ;;  %v14736_v23 = vrot.slane %v9301_v45, 1  ;;  %v9606_v43 = vmax.f32 %v14740_v39, %v14739_v58  ;;  %v14742_v57 = vrot.slane %v9261_v15, 2 }
 0x2dd   :  { %14720 = vst [vmem:[#allocation179_spill] sm:$0xff] %v9571_v20  ;;  %14723 = vst [vmem:[#allocation159_spill] sm:$0xff] %v9576_v63  ;;  %v14734_v20 = vld [vmem:[#allocation221_spill] sm:$0xff]  ;;  %v14737_v63 = vld [vmem:[#allocation222_spill] sm:$0xff]  ;;  %v14745_v11 = vrot.slane %v9266_v40, 2  ;;  %v14754_v58 = vrot.slane %v9281_v12, 2 }
 0x2de   :  { %14729 = vst [vmem:[#allocation8_spill] sm:$0xff] %v9586_v21  ;;  %14732 = vst [vmem:[#allocation195_spill] sm:$0xff] %v9591_v13  ;;  %v9596_v22 = vmax.f32 %v14734_v20, %v14733_v59  ;;  %v9601_v4 = vmax.f32 %v14737_v63, %v14736_v23  ;;  %v14743_v21 = vld [vmem:[#allocation224_spill] sm:$0xff]  ;;  %v14746_v13 = vld [vmem:[#allocation225_spill] sm:$0xff]  ;;  %v14748_v59 = vrot.slane %v9271_v7, 2  ;;  %v14751_v23 = vrot.slane %v9276_v42, 2 }
 0x2df   :  { %14741 = vst [vmem:[#allocation198_spill] sm:$0xff] %v9606_v43  ;;  %v9611_v6 = vmax.f32 %v14743_v21, %v14742_v57  ;;  %v9616_v20 = vmax.f32 %v14746_v13, %v14745_v11  ;;  %v14755_v43 = vld [vmem:[#allocation228_spill] sm:$0xff]  ;;  %v14757_v57 = vrot.slane %v9286_v48, 2  ;;  %v14760_v11 = vrot.slane %v9291_v5, 2 }
 0x2e0   :  { %14735 = vst [vmem:[#allocation196_spill] sm:$0xff] %v9596_v22  ;;  %14738 = vst [vmem:[#allocation197_spill] sm:$0xff] %v9601_v4  ;;  %v14749_v22 = vld [vmem:[#allocation226_spill] sm:$0xff]  ;;  %v14752_v4 = vld [vmem:[#allocation227_spill] sm:$0xff]  ;;  %v9631_v21 = vmax.f32 %v14755_v43, %v14754_v58  ;;  %v14769_v58 = vrot.slane %v9256_v31, 3 }
 0x2e1   :  { %14744 = vst [vmem:[#allocation199_spill] sm:$0xff] %v9611_v6  ;;  %14747 = vst [vmem:[#allocation200_spill] sm:$0xff] %v9616_v20  ;;  %v9621_v63 = vmax.f32 %v14749_v22, %v14748_v59  ;;  %v9626_v39 = vmax.f32 %v14752_v4, %v14751_v23  ;;  %v14758_v6 = vld [vmem:[#allocation229_spill] sm:$0xff]  ;;  %v14761_v20 = vld [vmem:[#allocation230_spill] sm:$0xff]  ;;  %v14763_v59 = vrot.slane %v9296_v25, 2  ;;  %v14766_v23 = vrot.slane %v9301_v45, 2 }
 0x2e2   :  { %14756 = vst [vmem:[#allocation202_spill] sm:$0xff] %v9631_v21  ;;  %v9636_v13 = vmax.f32 %v14758_v6, %v14757_v57  ;;  %v9641_v22 = vmax.f32 %v14761_v20, %v14760_v11  ;;  %v14770_v21 = vld [vmem:[#allocation233_spill] sm:$0xff]  ;;  %v14772_v57 = vrot.slane %v9261_v15, 3  ;;  %v14775_v11 = vrot.slane %v9266_v40, 3 }
 0x2e3   :  { %14750 = vst [vmem:[#allocation201_spill] sm:$0xff] %v9621_v63  ;;  %14753 = vst [vmem:[#allocation53_spill] sm:$0xff] %v9626_v39  ;;  %v14764_v63 = vld [vmem:[#allocation231_spill] sm:$0xff]  ;;  %v14767_v39 = vld [vmem:[#allocation232_spill] sm:$0xff]  ;;  %v9656_v6 = vmax.f32 %v14770_v21, %v14769_v58  ;;  %v14784_v58 = vrot.slane %v9281_v12, 3 }
 0x2e4   :  { %14759 = vst [vmem:[#allocation54_spill] sm:$0xff] %v9636_v13  ;;  %14762 = vst [vmem:[#allocation203_spill] sm:$0xff] %v9641_v22  ;;  %v9646_v4 = vmax.f32 %v14764_v63, %v14763_v59  ;;  %v9651_v43 = vmax.f32 %v14767_v39, %v14766_v23  ;;  %v14773_v13 = vld [vmem:[#allocation234_spill] sm:$0xff]  ;;  %v14776_v22 = vld [vmem:[#allocation235_spill] sm:$0xff]  ;;  %v14778_v59 = vrot.slane %v9271_v7, 3  ;;  %v14781_v23 = vrot.slane %v9276_v42, 3 }
 0x2e5   :  { %14771 = vst [vmem:[#allocation215_spill] sm:$0xff] %v9656_v6  ;;  %v9661_v20 = vmax.f32 %v14773_v13, %v14772_v57  ;;  %v9666_v63 = vmax.f32 %v14776_v22, %v14775_v11  ;;  %v14785_v6 = vld [vmem:[#allocation238_spill] sm:$0xff]  ;;  %v14787_v57 = vrot.slane %v9286_v48, 3  ;;  %v14790_v11 = vrot.slane %v9291_v5, 3 }
 0x2e6   :  { %14765 = vst [vmem:[#allocation55_spill] sm:$0xff] %v9646_v4  ;;  %14768 = vst [vmem:[#allocation204_spill] sm:$0xff] %v9651_v43  ;;  %v14779_v4 = vld [vmem:[#allocation236_spill] sm:$0xff]  ;;  %v14782_v43 = vld [vmem:[#allocation237_spill] sm:$0xff]  ;;  %v9681_v13 = vmax.f32 %v14785_v6, %v14784_v58  ;;  %v14799_v58 = vrot.slane %v9256_v31, 4 }
 0x2e7   :  { %14774 = vst [vmem:[#allocation56_spill] sm:$0xff] %v9661_v20  ;;  %14777 = vst [vmem:[#allocation57_spill] sm:$0xff] %v9666_v63  ;;  %v9671_v39 = vmax.f32 %v14779_v4, %v14778_v59  ;;  %v9676_v21 = vmax.f32 %v14782_v43, %v14781_v23  ;;  %v14788_v20 = vld [vmem:[#allocation239_spill] sm:$0xff]  ;;  %v14791_v63 = vld [vmem:[#allocation240_spill] sm:$0xff]  ;;  %v14793_v59 = vrot.slane %v9296_v25, 3  ;;  %v14796_v23 = vrot.slane %v9301_v45, 3 }
 0x2e8   :  { %14786 = vst [vmem:[#allocation218_spill] sm:$0xff] %v9681_v13  ;;  %v9686_v22 = vmax.f32 %v14788_v20, %v14787_v57  ;;  %v9691_v4 = vmax.f32 %v14791_v63, %v14790_v11  ;;  %v14800_v13 = vld [vmem:[#allocation243_spill] sm:$0xff]  ;;  %v14802_v57 = vrot.slane %v9261_v15, 4  ;;  %v14805_v11 = vrot.slane %v9266_v40, 4 }
 0x2e9   :  { %14780 = vst [vmem:[#allocation216_spill] sm:$0xff] %v9671_v39  ;;  %14783 = vst [vmem:[#allocation217_spill] sm:$0xff] %v9676_v21  ;;  %v14794_v39 = vld [vmem:[#allocation241_spill] sm:$0xff]  ;;  %v14797_v21 = vld [vmem:[#allocation242_spill] sm:$0xff]  ;;  %v9706_v20 = vmax.f32 %v14800_v13, %v14799_v58  ;;  %v14814_v58 = vrot.slane %v9281_v12, 4 }
 0x2ea   :  { %14789 = vst [vmem:[#allocation219_spill] sm:$0xff] %v9686_v22  ;;  %14792 = vst [vmem:[#allocation220_spill] sm:$0xff] %v9691_v4  ;;  %v9696_v43 = vmax.f32 %v14794_v39, %v14793_v59  ;;  %v9701_v6 = vmax.f32 %v14797_v21, %v14796_v23  ;;  %v14803_v22 = vld [vmem:[#allocation244_spill] sm:$0xff]  ;;  %v14806_v4 = vld [vmem:[#allocation245_spill] sm:$0xff]  ;;  %v14808_v59 = vrot.slane %v9271_v7, 4  ;;  %v14811_v23 = vrot.slane %v9276_v42, 4 }
 0x2eb   :  { %14801 = vst [vmem:[#allocation223_spill] sm:$0xff] %v9706_v20  ;;  %v9711_v63 = vmax.f32 %v14803_v22, %v14802_v57  ;;  %v9716_v39 = vmax.f32 %v14806_v4, %v14805_v11  ;;  %v14815_v20 = vld [vmem:[#allocation248_spill] sm:$0xff]  ;;  %v14817_v57 = vrot.slane %v9286_v48, 4  ;;  %v14820_v11 = vrot.slane %v9291_v5, 4 }
 0x2ec   :  { %14795 = vst [vmem:[#allocation221_spill] sm:$0xff] %v9696_v43  ;;  %14798 = vst [vmem:[#allocation222_spill] sm:$0xff] %v9701_v6  ;;  %v14809_v43 = vld [vmem:[#allocation246_spill] sm:$0xff]  ;;  %v14812_v6 = vld [vmem:[#allocation247_spill] sm:$0xff]  ;;  %v9731_v22 = vmax.f32 %v14815_v20, %v14814_v58  ;;  %v14829_v58 = vrot.slane %v9256_v31, 5 }
 0x2ed   :  { %14804 = vst [vmem:[#allocation224_spill] sm:$0xff] %v9711_v63  ;;  %14807 = vst [vmem:[#allocation225_spill] sm:$0xff] %v9716_v39  ;;  %v9721_v21 = vmax.f32 %v14809_v43, %v14808_v59  ;;  %v9726_v13 = vmax.f32 %v14812_v6, %v14811_v23  ;;  %v14818_v63 = vld [vmem:[#allocation249_spill] sm:$0xff]  ;;  %v14821_v39 = vld [vmem:[#allocation250_spill] sm:$0xff]  ;;  %v14823_v59 = vrot.slane %v9296_v25, 4  ;;  %v14826_v23 = vrot.slane %v9301_v45, 4 }
 0x2ee   :  { %14816 = vst [vmem:[#allocation228_spill] sm:$0xff] %v9731_v22  ;;  %v9736_v4 = vmax.f32 %v14818_v63, %v14817_v57  ;;  %v9741_v43 = vmax.f32 %v14821_v39, %v14820_v11  ;;  %v14830_v22 = vld [vmem:[#allocation253_spill] sm:$0xff]  ;;  %v14832_v57 = vrot.slane %v9261_v15, 5  ;;  %v14835_v11 = vrot.slane %v9266_v40, 5 }
 0x2ef   :  { %14810 = vst [vmem:[#allocation226_spill] sm:$0xff] %v9721_v21  ;;  %14813 = vst [vmem:[#allocation227_spill] sm:$0xff] %v9726_v13  ;;  %v14824_v21 = vld [vmem:[#allocation251_spill] sm:$0xff]  ;;  %v14827_v13 = vld [vmem:[#allocation252_spill] sm:$0xff]  ;;  %v9756_v63 = vmax.f32 %v14830_v22, %v14829_v58  ;;  %v14844_v58 = vrot.slane %v9281_v12, 5 }
 0x2f0   :  { %14819 = vst [vmem:[#allocation229_spill] sm:$0xff] %v9736_v4  ;;  %14822 = vst [vmem:[#allocation230_spill] sm:$0xff] %v9741_v43  ;;  %v9746_v6 = vmax.f32 %v14824_v21, %v14823_v59  ;;  %v9751_v20 = vmax.f32 %v14827_v13, %v14826_v23  ;;  %v14833_v4 = vld [vmem:[#allocation254_spill] sm:$0xff]  ;;  %v14836_v43 = vld [vmem:[#allocation255_spill] sm:$0xff]  ;;  %v14838_v59 = vrot.slane %v9271_v7, 5  ;;  %v14841_v23 = vrot.slane %v9276_v42, 5 }
 0x2f1   :  { %14831 = vst [vmem:[#allocation233_spill] sm:$0xff] %v9756_v63  ;;  %v9761_v39 = vmax.f32 %v14833_v4, %v14832_v57  ;;  %v9766_v21 = vmax.f32 %v14836_v43, %v14835_v11  ;;  %v14845_v63 = vld [vmem:[#allocation258_spill] sm:$0xff]  ;;  %v14847_v57 = vrot.slane %v9286_v48, 5  ;;  %v14850_v11 = vrot.slane %v9291_v5, 5 }
 0x2f2   :  { %14825 = vst [vmem:[#allocation231_spill] sm:$0xff] %v9746_v6  ;;  %14828 = vst [vmem:[#allocation232_spill] sm:$0xff] %v9751_v20  ;;  %v14839_v6 = vld [vmem:[#allocation256_spill] sm:$0xff]  ;;  %v14842_v20 = vld [vmem:[#allocation257_spill] sm:$0xff]  ;;  %v9781_v4 = vmax.f32 %v14845_v63, %v14844_v58  ;;  %v14859_v58 = vrot.slane %v9256_v31, 6 }
 0x2f3   :  { %14834 = vst [vmem:[#allocation234_spill] sm:$0xff] %v9761_v39  ;;  %14837 = vst [vmem:[#allocation235_spill] sm:$0xff] %v9766_v21  ;;  %v9771_v13 = vmax.f32 %v14839_v6, %v14838_v59  ;;  %v9776_v22 = vmax.f32 %v14842_v20, %v14841_v23  ;;  %v14848_v39 = vld [vmem:[#allocation259_spill] sm:$0xff]  ;;  %v14851_v21 = vld [vmem:[#allocation260_spill] sm:$0xff]  ;;  %v14853_v59 = vrot.slane %v9296_v25, 5  ;;  %v14856_v23 = vrot.slane %v9301_v45, 5 }
 0x2f4   :  { %14846 = vst [vmem:[#allocation238_spill] sm:$0xff] %v9781_v4  ;;  %v9786_v43 = vmax.f32 %v14848_v39, %v14847_v57  ;;  %v9791_v6 = vmax.f32 %v14851_v21, %v14850_v11  ;;  %v14860_v4 = vld [vmem:[#allocation263_spill] sm:$0xff]  ;;  %v14862_v57 = vrot.slane %v9261_v15, 6  ;;  %v14865_v11 = vrot.slane %v9266_v40, 6 }
 0x2f5   :  { %14840 = vst [vmem:[#allocation236_spill] sm:$0xff] %v9771_v13  ;;  %14843 = vst [vmem:[#allocation237_spill] sm:$0xff] %v9776_v22  ;;  %v14854_v13 = vld [vmem:[#allocation261_spill] sm:$0xff]  ;;  %v14857_v22 = vld [vmem:[#allocation262_spill] sm:$0xff]  ;;  %v9806_v39 = vmax.f32 %v14860_v4, %v14859_v58  ;;  %v14874_v58 = vrot.slane %v9281_v12, 6 }
 0x2f6   :  { %14849 = vst [vmem:[#allocation239_spill] sm:$0xff] %v9786_v43  ;;  %14852 = vst [vmem:[#allocation240_spill] sm:$0xff] %v9791_v6  ;;  %v9796_v20 = vmax.f32 %v14854_v13, %v14853_v59  ;;  %v9801_v63 = vmax.f32 %v14857_v22, %v14856_v23  ;;  %v14863_v43 = vld [vmem:[#allocation264_spill] sm:$0xff]  ;;  %v14866_v6 = vld [vmem:[#allocation265_spill] sm:$0xff]  ;;  %v14868_v59 = vrot.slane %v9271_v7, 6  ;;  %v14871_v23 = vrot.slane %v9276_v42, 6 }
 0x2f7   :  { %14861 = vst [vmem:[#allocation243_spill] sm:$0xff] %v9806_v39  ;;  %v9811_v21 = vmax.f32 %v14863_v43, %v14862_v57  ;;  %v9816_v13 = vmax.f32 %v14866_v6, %v14865_v11  ;;  %v14875_v39 = vld [vmem:[#allocation268_spill] sm:$0xff]  ;;  %v14877_v57 = vrot.slane %v9286_v48, 6  ;;  %v14880_v11 = vrot.slane %v9291_v5, 6 }
 0x2f8   :  { %14855 = vst [vmem:[#allocation241_spill] sm:$0xff] %v9796_v20  ;;  %14858 = vst [vmem:[#allocation242_spill] sm:$0xff] %v9801_v63  ;;  %v14869_v20 = vld [vmem:[#allocation266_spill] sm:$0xff]  ;;  %v14872_v63 = vld [vmem:[#allocation267_spill] sm:$0xff]  ;;  %v9831_v43 = vmax.f32 %v14875_v39, %v14874_v58  ;;  %v14889_v58 = vrot.slane %v9256_v31, 7  ;;  %v14901_v31 = vrot.slane %v9276_v42, 7 }
 0x2f9   :  { %14864 = vst [vmem:[#allocation244_spill] sm:$0xff] %v9811_v21  ;;  %14867 = vst [vmem:[#allocation245_spill] sm:$0xff] %v9816_v13  ;;  %v9821_v22 = vmax.f32 %v14869_v20, %v14868_v59  ;;  %v9826_v4 = vmax.f32 %v14872_v63, %v14871_v23  ;;  %v14878_v21 = vld [vmem:[#allocation269_spill] sm:$0xff]  ;;  %v14881_v13 = vld [vmem:[#allocation270_spill] sm:$0xff]  ;;  %v14883_v59 = vrot.slane %v9296_v25, 6  ;;  %v14886_v23 = vrot.slane %v9301_v45, 6 }
 0x2fa   :  { %14876 = vst [vmem:[#allocation248_spill] sm:$0xff] %v9831_v43  ;;  %v9836_v6 = vmax.f32 %v14878_v21, %v14877_v57  ;;  %v9841_v20 = vmax.f32 %v14881_v13, %v14880_v11  ;;  %v14890_v43 = vld [vmem:[#allocation13_spill] sm:$0xff]  ;;  %v14892_v57 = vrot.slane %v9261_v15, 7  ;;  %v14895_v11 = vrot.slane %v9266_v40, 7 }
 0x2fb   :  { %14870 = vst [vmem:[#allocation246_spill] sm:$0xff] %v9821_v22  ;;  %14873 = vst [vmem:[#allocation247_spill] sm:$0xff] %v9826_v4  ;;  %v14884_v22 = vld [vmem:[#allocation271_spill] sm:$0xff]  ;;  %v14887_v4 = vld [vmem:[#allocation92_spill] sm:$0xff]  ;;  %v9856_v21 = vmax.f32 %v14890_v43, %v14889_v58  ;;  %v14904_v15 = vrot.slane %v9281_v12, 7  ;;  %v14907_v40 = vrot.slane %v9286_v48, 7 }
 0x2fc   :  { %14879 = vst [vmem:[#allocation249_spill] sm:$0xff] %v9836_v6  ;;  %14882 = vst [vmem:[#allocation250_spill] sm:$0xff] %v9841_v20  ;;  %v9846_v63 = vmax.f32 %v14884_v22, %v14883_v59  ;;  %v9851_v39 = vmax.f32 %v14887_v4, %v14886_v23  ;;  %v14893_v6 = vld [vmem:[#allocation14_spill] sm:$0xff]  ;;  %v14896_v20 = vld [vmem:[#allocation15_spill] sm:$0xff]  ;;  %v14898_v59 = vrot.slane %v9271_v7, 7  ;;  %v14910_v7 = vrot.slane %v9291_v5, 7 }
 0x2fd   :  { %14891 = vst [vmem:[#allocation253_spill] sm:$0xff] %v9856_v21  ;;  %v9861_v13 = vmax.f32 %v14893_v6, %v14892_v57  ;;  %v9866_v22 = vmax.f32 %v14896_v20, %v14895_v11  ;;  %v14902_v23 = vld [vmem:[#allocation93_spill] sm:$0xff]  ;;  %v14905_v58 = vld [vmem:[#allocation94_spill] sm:$0xff]  ;;  %v14908_v57 = vld [vmem:[#allocation95_spill] sm:$0xff]  ;;  %v14913_v42 = vrot.slane %v9296_v25, 7  ;;  %v14916_v12 = vrot.slane %v9301_v45, 7 }
 0x2fe   :  { %14885 = vst [vmem:[#allocation251_spill] sm:$0xff] %v9846_v63  ;;  %14888 = vst [vmem:[#allocation252_spill] sm:$0xff] %v9851_v39  ;;  %v14899_v63 = vld [vmem:[#allocation16_spill] sm:$0xff]  ;;  %v9876_v43 = vmax.f32 %v14902_v23, %v14901_v31  ;;  %v9881_v6 = vmax.f32 %v14905_v58, %v14904_v15  ;;  %v9886_v20 = vmax.f32 %v14908_v57, %v14907_v40  ;;  %v14917_v23 = vld [vmem:[#allocation273_spill] sm:$0xff] }
 0x2ff   :  { %14894 = vst [vmem:[#allocation254_spill] sm:$0xff] %v9861_v13  ;;  %14897 = vst [vmem:[#allocation255_spill] sm:$0xff] %v9866_v22  ;;  %v9871_v4 = vmax.f32 %v14899_v63, %v14898_v59  ;;  %v14911_v11 = vld [vmem:[#allocation96_spill] sm:$0xff]  ;;  %v9901_v15 = vmax.f32 %v14917_v23, %v14916_v12  ;;  %v14919_v48 = vld [vmem:[#allocation205_spill] sm:$0xff] }
 0x300   :  { %14903 = vst [vmem:[#allocation257_spill] sm:$0xff] %v9876_v43  ;;  %14906 = vst [vmem:[#allocation258_spill] sm:$0xff] %v9881_v6  ;;  %v9891_v63 = vmax.f32 %v14911_v11, %v14910_v7  ;;  %v14914_v59 = vld [vmem:[#allocation272_spill] sm:$0xff]  ;;  %v14920_v58 = vmax.f32 %v14434_v28, %v14919_v48  ;;  %v14922_v5 = vld [vmem:[#allocation206_spill] sm:$0xff] }
 0x301   :  { %14900 = vst [vmem:[#allocation256_spill] sm:$0xff] %v9871_v4  ;;  %14909 = vst [vmem:[#allocation259_spill] sm:$0xff] %v9886_v20  ;;  %v9896_v31 = vmax.f32 %v14914_v59, %v14913_v42  ;;  %v14923_v57 = vmax.f32 %v14436_v26, %v14922_v5  ;;  %v14925_v25 = vld [vmem:[#allocation207_spill] sm:$0xff]  ;;  %v14928_v42 = vld [vmem:[#allocation208_spill] sm:$0xff] }
 0x302   :  { %14912 = vst [vmem:[#allocation260_spill] sm:$0xff] %v9891_v63  ;;  %14918 = vst [vmem:[#allocation262_spill] sm:$0xff] %v9901_v15  ;;  %v9907_v40 = vmax.f32 %v14920_v58, %v9306_v2  ;;  %v14926_v11 = vmax.f32 %v14438_v9, %v14925_v25  ;;  %v14929_v59 = vmax.f32 %v14440_v29, %v14928_v42  ;;  %v14931_v28 = vld [vmem:[#allocation209_spill] sm:$0xff]  ;;  %v14934_v26 = vld [vmem:[#allocation210_spill] sm:$0xff] }
 0x303   :  { %14915 = vst [vmem:[#allocation261_spill] sm:$0xff] %v9896_v31  ;;  %v9913_v7 = vmax.f32 %v14923_v57, %v9311_v44  ;;  %v14932_v23 = vmax.f32 %v14005_v32, %v14931_v28  ;;  %v14935_v58 = vmax.f32 %v14443_v27, %v14934_v26  ;;  %v14937_v9 = vld [vmem:[#allocation211_spill] sm:$0xff]  ;;  %v14940_v29 = vld [vmem:[#allocation212_spill] sm:$0xff]  ;;  %v14943_v32 = vld [vmem:[#allocation213_spill] sm:$0xff] }
 0x304   :  { %14921 = vst [vmem:[#allocation263_spill] sm:$0xff] %v9907_v40  ;;  %v9919_v45 = vmax.f32 %v14926_v11, %v9316_v53  ;;  %v9925_v12 = vmax.f32 %v14929_v59, %v9321_v52  ;;  %v14938_v57 = vmax.f32 %v14445_v18, %v14937_v9  ;;  %v14941_v11 = vmax.f32 %v14447_v36, %v14940_v29  ;;  %v14946_v27 = vld [vmem:[#allocation214_spill] sm:$0xff] }
 0x305   :  { %14924 = vst [vmem:[#allocation264_spill] sm:$0xff] %v9913_v7  ;;  %v9931_v48 = vmax.f32 %v14932_v23, %v9326_v1  ;;  %v9937_v5 = vmax.f32 %v14935_v58, %v9331_v33  ;;  %v14944_v59 = vmax.f32 %v14449_v54, %v14943_v32  ;;  %v14947_v23 = vmax.f32 %v14451_v56, %v14946_v27  ;;  %v14950_v58 = vld [vmem:[#allocation99_spill] sm:$0xff]  ;;  %v14959_v56 = vld [vmem:[#allocation276_spill] sm:$0xff] }
 0x306   :  { %14927 = vst [vmem:[#allocation265_spill] sm:$0xff] %v9919_v45  ;;  %14930 = vst [vmem:[#allocation266_spill] sm:$0xff] %v9925_v12  ;;  %v9943_v25 = vmax.f32 %v14938_v57, %v9336_v61  ;;  %v9949_v42 = vmax.f32 %v14941_v11, %v9341_v47  ;;  %v14949_v18 = vrot.slane %v9306_v2, 1  ;;  %v14952_v36 = vrot.slane %v9311_v44, 1  ;;  %v14953_v57 = vld [vmem:[#allocation274_spill] sm:$0xff]  ;;  %v14956_v11 = vld [vmem:[#allocation275_spill] sm:$0xff] }
 0x307   :  { %14933 = vst [vmem:[#allocation267_spill] sm:$0xff] %v9931_v48  ;;  %14936 = vst [vmem:[#allocation268_spill] sm:$0xff] %v9937_v5  ;;  %v9955_v28 = vmax.f32 %v14944_v59, %v9346_v38  ;;  %v9961_v26 = vmax.f32 %v14947_v23, %v9351_v30  ;;  %v14955_v54 = vrot.slane %v9316_v53, 1  ;;  %v14958_v59 = vrot.slane %v9321_v52, 1  ;;  %v15184_v5 = vld [vmem:[#allocation194_spill] sm:$0xff] }
 0x308   :  { %14939 = vst [vmem:[#allocation269_spill] sm:$0xff] %v9943_v25  ;;  %14942 = vst [vmem:[#allocation270_spill] sm:$0xff] %v9949_v42  ;;  %v9966_v9 = vmax.f32 %v14950_v58, %v14949_v18  ;;  %v9971_v29 = vmax.f32 %v14953_v57, %v14952_v36  ;;  %v14961_v23 = vrot.slane %v9326_v1, 1  ;;  %v14964_v58 = vrot.slane %v9331_v33, 1 }
 0x309   :  { %14945 = vst [vmem:[#allocation271_spill] sm:$0xff] %v9955_v28  ;;  %14948 = vst [vmem:[#allocation92_spill] sm:$0xff] %v9961_v26  ;;  %v9976_v32 = vmax.f32 %v14956_v11, %v14955_v54  ;;  %v9981_v27 = vmax.f32 %v14959_v56, %v14958_v59  ;;  %v14962_v26 = vld [vmem:[#allocation277_spill] sm:$0xff]  ;;  %v14967_v57 = vrot.slane %v9336_v61, 1  ;;  %v14970_v11 = vrot.slane %v9341_v47, 1 }
 0x30a   :  { %14951 = vst [vmem:[#allocation13_spill] sm:$0xff] %v9966_v9  ;;  %14954 = vst [vmem:[#allocation14_spill] sm:$0xff] %v9971_v29  ;;  %v9986_v18 = vmax.f32 %v14962_v26, %v14961_v23  ;;  %v14965_v9 = vld [vmem:[#allocation278_spill] sm:$0xff]  ;;  %v14968_v29 = vld [vmem:[#allocation279_spill] sm:$0xff]  ;;  %v14973_v56 = vrot.slane %v9346_v38, 1  ;;  %v14976_v23 = vrot.slane %v9351_v30, 1 }
 0x30b   :  { %14957 = vst [vmem:[#allocation15_spill] sm:$0xff] %v9976_v32  ;;  %14960 = vst [vmem:[#allocation16_spill] sm:$0xff] %v9981_v27  ;;  %v9991_v36 = vmax.f32 %v14965_v9, %v14964_v58  ;;  %v9996_v54 = vmax.f32 %v14968_v29, %v14967_v57  ;;  %v14971_v32 = vld [vmem:[#allocation280_spill] sm:$0xff]  ;;  %v14974_v27 = vld [vmem:[#allocation281_spill] sm:$0xff]  ;;  %v14979_v58 = vrot.slane %v9306_v2, 2  ;;  %v14982_v57 = vrot.slane %v9311_v44, 2 }
 0x30c   :  { %14963 = vst [vmem:[#allocation93_spill] sm:$0xff] %v9986_v18  ;;  %v10001_v59 = vmax.f32 %v14971_v32, %v14970_v11  ;;  %v10006_v26 = vmax.f32 %v14974_v27, %v14973_v56  ;;  %v14977_v18 = vld [vmem:[#allocation282_spill] sm:$0xff]  ;;  %v14985_v11 = vrot.slane %v9316_v53, 2  ;;  %v14988_v56 = vrot.slane %v9321_v52, 2 }
 0x30d   :  { %14966 = vst [vmem:[#allocation94_spill] sm:$0xff] %v9991_v36  ;;  %14969 = vst [vmem:[#allocation95_spill] sm:$0xff] %v9996_v54  ;;  %v10011_v9 = vmax.f32 %v14977_v18, %v14976_v23  ;;  %v14980_v36 = vld [vmem:[#allocation283_spill] sm:$0xff]  ;;  %v14983_v54 = vld [vmem:[#allocation284_spill] sm:$0xff]  ;;  %v14991_v23 = vrot.slane %v9326_v1, 2 }
 0x30e   :  { %14972 = vst [vmem:[#allocation96_spill] sm:$0xff] %v10001_v59  ;;  %14975 = vst [vmem:[#allocation272_spill] sm:$0xff] %v10006_v26  ;;  %v10016_v29 = vmax.f32 %v14980_v36, %v14979_v58  ;;  %v10021_v32 = vmax.f32 %v14983_v54, %v14982_v57  ;;  %v14986_v59 = vld [vmem:[#allocation285_spill] sm:$0xff]  ;;  %v14989_v26 = vld [vmem:[#allocation286_spill] sm:$0xff]  ;;  %v14994_v58 = vrot.slane %v9331_v33, 2  ;;  %v14997_v57 = vrot.slane %v9336_v61, 2 }
 0x30f   :  { %14978 = vst [vmem:[#allocation273_spill] sm:$0xff] %v10011_v9  ;;  %v10026_v27 = vmax.f32 %v14986_v59, %v14985_v11  ;;  %v10031_v18 = vmax.f32 %v14989_v26, %v14988_v56  ;;  %v14992_v9 = vld [vmem:[#allocation287_spill] sm:$0xff]  ;;  %v15000_v11 = vrot.slane %v9341_v47, 2  ;;  %v15003_v56 = vrot.slane %v9346_v38, 2 }
 0x310   :  { %14981 = vst [vmem:[#allocation205_spill] sm:$0xff] %v10016_v29  ;;  %14984 = vst [vmem:[#allocation206_spill] sm:$0xff] %v10021_v32  ;;  %v10036_v36 = vmax.f32 %v14992_v9, %v14991_v23  ;;  %v14995_v29 = vld [vmem:[#allocation288_spill] sm:$0xff]  ;;  %v14998_v32 = vld [vmem:[#allocation289_spill] sm:$0xff]  ;;  %v15006_v23 = vrot.slane %v9351_v30, 2 }
 0x311   :  { %14987 = vst [vmem:[#allocation207_spill] sm:$0xff] %v10026_v27  ;;  %14990 = vst [vmem:[#allocation208_spill] sm:$0xff] %v10031_v18  ;;  %v10041_v54 = vmax.f32 %v14995_v29, %v14994_v58  ;;  %v10046_v59 = vmax.f32 %v14998_v32, %v14997_v57  ;;  %v15001_v27 = vld [vmem:[#allocation290_spill] sm:$0xff]  ;;  %v15004_v18 = vld [vmem:[#allocation291_spill] sm:$0xff]  ;;  %v15009_v58 = vrot.slane %v9306_v2, 3  ;;  %v15012_v57 = vrot.slane %v9311_v44, 3 }
 0x312   :  { %14993 = vst [vmem:[#allocation209_spill] sm:$0xff] %v10036_v36  ;;  %v10051_v26 = vmax.f32 %v15001_v27, %v15000_v11  ;;  %v10056_v9 = vmax.f32 %v15004_v18, %v15003_v56  ;;  %v15007_v36 = vld [vmem:[#allocation292_spill] sm:$0xff]  ;;  %v15015_v11 = vrot.slane %v9316_v53, 3  ;;  %v15018_v56 = vrot.slane %v9321_v52, 3 }
 0x313   :  { %14996 = vst [vmem:[#allocation210_spill] sm:$0xff] %v10041_v54  ;;  %14999 = vst [vmem:[#allocation211_spill] sm:$0xff] %v10046_v59  ;;  %v10061_v29 = vmax.f32 %v15007_v36, %v15006_v23  ;;  %v15010_v54 = vld [vmem:[#allocation293_spill] sm:$0xff]  ;;  %v15013_v59 = vld [vmem:[#allocation294_spill] sm:$0xff]  ;;  %v15021_v23 = vrot.slane %v9326_v1, 3 }
 0x314   :  { %15002 = vst [vmem:[#allocation212_spill] sm:$0xff] %v10051_v26  ;;  %15005 = vst [vmem:[#allocation213_spill] sm:$0xff] %v10056_v9  ;;  %v10066_v32 = vmax.f32 %v15010_v54, %v15009_v58  ;;  %v10071_v27 = vmax.f32 %v15013_v59, %v15012_v57  ;;  %v15016_v26 = vld [vmem:[#allocation35_spill] sm:$0xff]  ;;  %v15024_v58 = vrot.slane %v9331_v33, 3  ;;  %v15027_v57 = vrot.slane %v9336_v61, 3 }
 0x315   :  { %15008 = vst [vmem:[#allocation214_spill] sm:$0xff] %v10061_v29  ;;  %v10076_v18 = vmax.f32 %v15016_v26, %v15015_v11  ;;  %v15019_v9 = vld [vmem:[#allocation295_spill] sm:$0xff]  ;;  %v15022_v29 = vld [vmem:[#allocation296_spill] sm:$0xff]  ;;  %v15030_v11 = vrot.slane %v9341_v47, 3 }
 0x316   :  { %15011 = vst [vmem:[#allocation99_spill] sm:$0xff] %v10066_v32  ;;  %15014 = vst [vmem:[#allocation274_spill] sm:$0xff] %v10071_v27  ;;  %v10081_v36 = vmax.f32 %v15019_v9, %v15018_v56  ;;  %v10086_v54 = vmax.f32 %v15022_v29, %v15021_v23  ;;  %v15025_v32 = vld [vmem:[#allocation297_spill] sm:$0xff]  ;;  %v15028_v27 = vld [vmem:[#allocation298_spill] sm:$0xff]  ;;  %v15033_v56 = vrot.slane %v9346_v38, 3  ;;  %v15036_v23 = vrot.slane %v9351_v30, 3 }
 0x317   :  { %15017 = vst [vmem:[#allocation275_spill] sm:$0xff] %v10076_v18  ;;  %v10091_v59 = vmax.f32 %v15025_v32, %v15024_v58  ;;  %v10096_v26 = vmax.f32 %v15028_v27, %v15027_v57  ;;  %v15031_v18 = vld [vmem:[#allocation299_spill] sm:$0xff]  ;;  %v15039_v58 = vrot.slane %v9306_v2, 4  ;;  %v15042_v57 = vrot.slane %v9311_v44, 4 }
 0x318   :  { %15020 = vst [vmem:[#allocation276_spill] sm:$0xff] %v10081_v36  ;;  %15023 = vst [vmem:[#allocation277_spill] sm:$0xff] %v10086_v54  ;;  %v10101_v9 = vmax.f32 %v15031_v18, %v15030_v11  ;;  %v15034_v36 = vld [vmem:[#allocation300_spill] sm:$0xff]  ;;  %v15037_v54 = vld [vmem:[#allocation301_spill] sm:$0xff]  ;;  %v15045_v11 = vrot.slane %v9316_v53, 4 }
 0x319   :  { %15026 = vst [vmem:[#allocation278_spill] sm:$0xff] %v10091_v59  ;;  %15029 = vst [vmem:[#allocation279_spill] sm:$0xff] %v10096_v26  ;;  %v10106_v29 = vmax.f32 %v15034_v36, %v15033_v56  ;;  %v10111_v32 = vmax.f32 %v15037_v54, %v15036_v23  ;;  %v15040_v59 = vld [vmem:[#allocation302_spill] sm:$0xff]  ;;  %v15043_v26 = vld [vmem:[#allocation303_spill] sm:$0xff]  ;;  %v15048_v56 = vrot.slane %v9321_v52, 4  ;;  %v15051_v23 = vrot.slane %v9326_v1, 4 }
 0x31a   :  { %15032 = vst [vmem:[#allocation280_spill] sm:$0xff] %v10101_v9  ;;  %v10116_v27 = vmax.f32 %v15040_v59, %v15039_v58  ;;  %v10121_v18 = vmax.f32 %v15043_v26, %v15042_v57  ;;  %v15046_v9 = vld [vmem:[#allocation117_spill] sm:$0xff]  ;;  %v15054_v58 = vrot.slane %v9331_v33, 4  ;;  %v15057_v57 = vrot.slane %v9336_v61, 4 }
 0x31b   :  { %15035 = vst [vmem:[#allocation281_spill] sm:$0xff] %v10106_v29  ;;  %15038 = vst [vmem:[#allocation282_spill] sm:$0xff] %v10111_v32  ;;  %v10126_v36 = vmax.f32 %v15046_v9, %v15045_v11  ;;  %v15049_v29 = vld [vmem:[#allocation118_spill] sm:$0xff]  ;;  %v15052_v32 = vld [vmem:[#allocation119_spill] sm:$0xff]  ;;  %v15060_v11 = vrot.slane %v9341_v47, 4 }
 0x31c   :  { %15041 = vst [vmem:[#allocation283_spill] sm:$0xff] %v10116_v27  ;;  %15044 = vst [vmem:[#allocation284_spill] sm:$0xff] %v10121_v18  ;;  %v10131_v54 = vmax.f32 %v15049_v29, %v15048_v56  ;;  %v10136_v59 = vmax.f32 %v15052_v32, %v15051_v23  ;;  %v15055_v27 = vld [vmem:[#allocation304_spill] sm:$0xff]  ;;  %v15058_v18 = vld [vmem:[#allocation305_spill] sm:$0xff]  ;;  %v15063_v56 = vrot.slane %v9346_v38, 4  ;;  %v15066_v23 = vrot.slane %v9351_v30, 4 }
 0x31d   :  { %15047 = vst [vmem:[#allocation285_spill] sm:$0xff] %v10126_v36  ;;  %v10141_v26 = vmax.f32 %v15055_v27, %v15054_v58  ;;  %v10146_v9 = vmax.f32 %v15058_v18, %v15057_v57  ;;  %v15061_v36 = vld [vmem:[#allocation306_spill] sm:$0xff]  ;;  %v15069_v58 = vrot.slane %v9306_v2, 5  ;;  %v15072_v57 = vrot.slane %v9311_v44, 5 }
 0x31e   :  { %15050 = vst [vmem:[#allocation286_spill] sm:$0xff] %v10131_v54  ;;  %15053 = vst [vmem:[#allocation287_spill] sm:$0xff] %v10136_v59  ;;  %v10151_v29 = vmax.f32 %v15061_v36, %v15060_v11  ;;  %v15064_v54 = vld [vmem:[#allocation307_spill] sm:$0xff]  ;;  %v15067_v59 = vld [vmem:[#allocation308_spill] sm:$0xff]  ;;  %v15075_v11 = vrot.slane %v9316_v53, 5 }
 0x31f   :  { %15056 = vst [vmem:[#allocation288_spill] sm:$0xff] %v10141_v26  ;;  %15059 = vst [vmem:[#allocation289_spill] sm:$0xff] %v10146_v9  ;;  %v10156_v32 = vmax.f32 %v15064_v54, %v15063_v56  ;;  %v10161_v27 = vmax.f32 %v15067_v59, %v15066_v23  ;;  %v15070_v26 = vld [vmem:[#allocation309_spill] sm:$0xff]  ;;  %v15073_v9 = vld [vmem:[#allocation122_spill] sm:$0xff]  ;;  %v15078_v56 = vrot.slane %v9321_v52, 5  ;;  %v15081_v23 = vrot.slane %v9326_v1, 5 }
 0x320   :  { %15062 = vst [vmem:[#allocation290_spill] sm:$0xff] %v10151_v29  ;;  %v10166_v18 = vmax.f32 %v15070_v26, %v15069_v58  ;;  %v10171_v36 = vmax.f32 %v15073_v9, %v15072_v57  ;;  %v15076_v29 = vld [vmem:[#allocation123_spill] sm:$0xff]  ;;  %v15084_v58 = vrot.slane %v9331_v33, 5  ;;  %v15087_v57 = vrot.slane %v9336_v61, 5 }
 0x321   :  { %15065 = vst [vmem:[#allocation291_spill] sm:$0xff] %v10156_v32  ;;  %15068 = vst [vmem:[#allocation292_spill] sm:$0xff] %v10161_v27  ;;  %v10176_v54 = vmax.f32 %v15076_v29, %v15075_v11  ;;  %v15079_v32 = vld [vmem:[#allocation124_spill] sm:$0xff]  ;;  %v15082_v27 = vld [vmem:[#allocation45_spill] sm:$0xff]  ;;  %v15090_v11 = vrot.slane %v9341_v47, 5 }
 0x322   :  { %15071 = vst [vmem:[#allocation293_spill] sm:$0xff] %v10166_v18  ;;  %15074 = vst [vmem:[#allocation294_spill] sm:$0xff] %v10171_v36  ;;  %v10181_v59 = vmax.f32 %v15079_v32, %v15078_v56  ;;  %v10186_v26 = vmax.f32 %v15082_v27, %v15081_v23  ;;  %v15085_v18 = vld [vmem:[#allocation310_spill] sm:$0xff]  ;;  %v15088_v36 = vld [vmem:[#allocation311_spill] sm:$0xff]  ;;  %v15093_v56 = vrot.slane %v9346_v38, 5  ;;  %v15096_v23 = vrot.slane %v9351_v30, 5 }
 0x323   :  { %15077 = vst [vmem:[#allocation35_spill] sm:$0xff] %v10176_v54  ;;  %v10191_v9 = vmax.f32 %v15085_v18, %v15084_v58  ;;  %v10196_v29 = vmax.f32 %v15088_v36, %v15087_v57  ;;  %v15091_v54 = vld [vmem:[#allocation312_spill] sm:$0xff]  ;;  %v15099_v58 = vrot.slane %v9306_v2, 6  ;;  %v15102_v57 = vrot.slane %v9311_v44, 6 }
 0x324   :  { %15080 = vst [vmem:[#allocation295_spill] sm:$0xff] %v10181_v59  ;;  %15083 = vst [vmem:[#allocation296_spill] sm:$0xff] %v10186_v26  ;;  %v10201_v32 = vmax.f32 %v15091_v54, %v15090_v11  ;;  %v15094_v59 = vld [vmem:[#allocation313_spill] sm:$0xff]  ;;  %v15097_v26 = vld [vmem:[#allocation314_spill] sm:$0xff]  ;;  %v15105_v11 = vrot.slane %v9316_v53, 6 }
 0x325   :  { %15086 = vst [vmem:[#allocation297_spill] sm:$0xff] %v10191_v9  ;;  %15089 = vst [vmem:[#allocation298_spill] sm:$0xff] %v10196_v29  ;;  %v10206_v27 = vmax.f32 %v15094_v59, %v15093_v56  ;;  %v10211_v18 = vmax.f32 %v15097_v26, %v15096_v23  ;;  %v15100_v9 = vld [vmem:[#allocation315_spill] sm:$0xff]  ;;  %v15108_v56 = vrot.slane %v9321_v52, 6  ;;  %v15111_v23 = vrot.slane %v9326_v1, 6 }
 0x326   :  { %15092 = vst [vmem:[#allocation299_spill] sm:$0xff] %v10201_v32  ;;  %v10216_v36 = vmax.f32 %v15100_v9, %v15099_v58  ;;  %v15103_v29 = vld [vmem:[#allocation127_spill] sm:$0xff]  ;;  %v15106_v32 = vld [vmem:[#allocation49_spill] sm:$0xff]  ;;  %v15114_v58 = vrot.slane %v9331_v33, 6 }
 0x327   :  { %15095 = vst [vmem:[#allocation300_spill] sm:$0xff] %v10206_v27  ;;  %15098 = vst [vmem:[#allocation301_spill] sm:$0xff] %v10211_v18  ;;  %v10221_v54 = vmax.f32 %v15103_v29, %v15102_v57  ;;  %v10226_v59 = vmax.f32 %v15106_v32, %v15105_v11  ;;  %v15109_v27 = vld [vmem:[#allocation50_spill] sm:$0xff]  ;;  %v15112_v18 = vld [vmem:[#allocation316_spill] sm:$0xff]  ;;  %v15117_v57 = vrot.slane %v9336_v61, 6  ;;  %v15120_v11 = vrot.slane %v9341_v47, 6 }
 0x328   :  { %15101 = vst [vmem:[#allocation302_spill] sm:$0xff] %v10216_v36  ;;  %v10231_v26 = vmax.f32 %v15109_v27, %v15108_v56  ;;  %v10236_v9 = vmax.f32 %v15112_v18, %v15111_v23  ;;  %v15115_v36 = vld [vmem:[#allocation317_spill] sm:$0xff]  ;;  %v15123_v56 = vrot.slane %v9346_v38, 6  ;;  %v15126_v23 = vrot.slane %v9351_v30, 6 }
 0x329   :  { %15104 = vst [vmem:[#allocation303_spill] sm:$0xff] %v10221_v54  ;;  %15107 = vst [vmem:[#allocation117_spill] sm:$0xff] %v10226_v59  ;;  %v10241_v29 = vmax.f32 %v15115_v36, %v15114_v58  ;;  %v15118_v54 = vld [vmem:[#allocation318_spill] sm:$0xff]  ;;  %v15121_v59 = vld [vmem:[#allocation319_spill] sm:$0xff]  ;;  %v15129_v58 = vrot.slane %v9306_v2, 7  ;;  %v15141_v2 = vrot.slane %v9326_v1, 7 }
 0x32a   :  { %15110 = vst [vmem:[#allocation118_spill] sm:$0xff] %v10231_v26  ;;  %15113 = vst [vmem:[#allocation119_spill] sm:$0xff] %v10236_v9  ;;  %v10246_v32 = vmax.f32 %v15118_v54, %v15117_v57  ;;  %v10251_v27 = vmax.f32 %v15121_v59, %v15120_v11  ;;  %v15124_v26 = vld [vmem:[#allocation320_spill] sm:$0xff]  ;;  %v15127_v9 = vld [vmem:[#allocation150_spill] sm:$0xff]  ;;  %v15132_v57 = vrot.slane %v9311_v44, 7  ;;  %v15135_v11 = vrot.slane %v9316_v53, 7 }
 0x32b   :  { %15116 = vst [vmem:[#allocation304_spill] sm:$0xff] %v10241_v29  ;;  %v10256_v18 = vmax.f32 %v15124_v26, %v15123_v56  ;;  %v10261_v36 = vmax.f32 %v15127_v9, %v15126_v23  ;;  %v15130_v29 = vld [vmem:[#allocation321_spill] sm:$0xff]  ;;  %v15138_v56 = vrot.slane %v9321_v52, 7  ;;  %v15144_v44 = vrot.slane %v9331_v33, 7 }
 0x32c   :  { %15119 = vst [vmem:[#allocation305_spill] sm:$0xff] %v10246_v32  ;;  %15122 = vst [vmem:[#allocation306_spill] sm:$0xff] %v10251_v27  ;;  %v10266_v54 = vmax.f32 %v15130_v29, %v15129_v58  ;;  %v15133_v32 = vld [vmem:[#allocation322_spill] sm:$0xff]  ;;  %v15136_v27 = vld [vmem:[#allocation323_spill] sm:$0xff]  ;;  %v15147_v53 = vrot.slane %v9336_v61, 7  ;;  %v15150_v52 = vrot.slane %v9341_v47, 7 }
 0x32d   :  { %15125 = vst [vmem:[#allocation307_spill] sm:$0xff] %v10256_v18  ;;  %15128 = vst [vmem:[#allocation308_spill] sm:$0xff] %v10261_v36  ;;  %v10271_v59 = vmax.f32 %v15133_v32, %v15132_v57  ;;  %v10276_v26 = vmax.f32 %v15136_v27, %v15135_v11  ;;  %v15139_v18 = vld [vmem:[#allocation324_spill] sm:$0xff]  ;;  %v15142_v23 = vld [vmem:[#allocation325_spill] sm:$0xff]  ;;  %v15153_v1 = vrot.slane %v9346_v38, 7  ;;  %v15156_v33 = vrot.slane %v9351_v30, 7 }
 0x32e   :  { %15131 = vst [vmem:[#allocation309_spill] sm:$0xff] %v10266_v54  ;;  %v10281_v9 = vmax.f32 %v15139_v18, %v15138_v56  ;;  %v10286_v29 = vmax.f32 %v15142_v23, %v15141_v2  ;;  %v15145_v58 = vld [vmem:[#allocation326_spill] sm:$0xff]  ;;  %v15148_v57 = vld [vmem:[#allocation327_spill] sm:$0xff]  ;;  %v15151_v11 = vld [vmem:[#allocation328_spill] sm:$0xff]  ;;  %v10316_v61 = vsel %vm3079_vm1, %v9171_v10, 0.0  ;;  %v10321_v47 = vsel %vm3079_vm1, %v9175_v55, 0.0 }
 0x32f   :  { %15134 = vst [vmem:[#allocation122_spill] sm:$0xff] %v10271_v59  ;;  %15137 = vst [vmem:[#allocation123_spill] sm:$0xff] %v10276_v26  ;;  %v10291_v32 = vmax.f32 %v15145_v58, %v15144_v44  ;;  %v10296_v27 = vmax.f32 %v15148_v57, %v15147_v53  ;;  %v10301_v18 = vmax.f32 %v15151_v11, %v15150_v52  ;;  %v15154_v56 = vld [vmem:[#allocation329_spill] sm:$0xff]  ;;  %v15157_v23 = vld [vmem:[#allocation330_spill] sm:$0xff]  ;;  %v10326_v38 = vsel %vm3079_vm1, %v9179_v41, 0.0 }
 0x330   :  { %15140 = vst [vmem:[#allocation124_spill] sm:$0xff] %v10281_v9  ;;  %15143 = vst [vmem:[#allocation45_spill] sm:$0xff] %v10286_v29  ;;  %v10306_v2 = vmax.f32 %v15154_v56, %v15153_v1  ;;  %v10311_v44 = vmax.f32 %v15157_v23, %v15156_v33  ;;  %v10331_v30 = vsel %vm3079_vm1, %v9183_v62, 0.0  ;;  %v10336_v10 = vsel %vm3079_vm1, %v9187_v14, 0.0  ;;  %v15159_v58 = vld [vmem:[#allocation166_spill] sm:$0xff]  ;;  %v15161_v53 = vld [vmem:[#allocation168_spill] sm:$0xff] }
 0x331   :  { %15146 = vst [vmem:[#allocation310_spill] sm:$0xff] %v10291_v32  ;;  %15149 = vst [vmem:[#allocation311_spill] sm:$0xff] %v10296_v27  ;;  %v10341_v55 = vsel %vm3079_vm1, %v9191_v49, 0.0  ;;  %v10346_v41 = vsel %vm3079_vm1, %v9197_v35, 0.0  ;;  %v10351_v62 = vsel %vm3079_vm1, %v9201_v17, 0.0  ;;  %v10356_v14 = vsel %vm3079_vm1, %v9205_v46, 0.0 }
 0x332   :  { %15152 = vst [vmem:[#allocation312_spill] sm:$0xff] %v10301_v18  ;;  %15155 = vst [vmem:[#allocation313_spill] sm:$0xff] %v10306_v2  ;;  %v10361_v49 = vsel %vm3079_vm1, %v9209_v60, 0.0  ;;  %v10366_v35 = vsel %vm3080_vm2, %v9213_v34, 0.0  ;;  %v10371_v17 = vsel %vm3080_vm2, %v9217_v51, 0.0  ;;  %v10376_v46 = vsel %vm3080_vm2, %v9221_v8, 0.0 }
 0x333   :  { %15158 = vst [vmem:[#allocation314_spill] sm:$0xff] %v10311_v44  ;;  %v10381_v3 = vsel %vm3080_vm2, %v15159_v58, 0.0  ;;  %v15160_v60 = vld [vmem:[#allocation167_spill] sm:$0xff]  ;;  %v10391_v51 = vsel %vm3080_vm2, %v15161_v53, 0.0  ;;  %v15162_v57 = vld [vmem:[#allocation17_spill] sm:$0xff]  ;;  %v15164_v1 = vld [vmem:[#allocation170_spill] sm:$0xff] }
 0x334   :  { %v10386_v34 = vsel %vm3080_vm2, %v15160_v60, 0.0  ;;  %v10396_v8 = vsel %vm3080_vm2, %v15162_v57, 0.0  ;;  %v15163_v52 = vld [vmem:[#allocation169_spill] sm:$0xff]  ;;  %v10406_v56 = vsel %vm3080_vm2, %v15164_v1, 0.0  ;;  %v15165_v33 = vld [vmem:[#allocation171_spill] sm:$0xff]  ;;  %v15166_v18 = vld [vmem:[#allocation190_spill] sm:$0xff] }
 0x335   :  { %v10401_v11 = vsel %vm3080_vm2, %v15163_v52, 0.0  ;;  %v10411_v23 = vsel %vm3080_vm2, %v15165_v33, 0.0  ;;  %v10555_v58 = vadd.f32 %v10316_v61, %v15166_v18  ;;  %v15167_v60 = vld [vmem:[#allocation191_spill] sm:$0xff]  ;;  %v15168_v57 = vld [vmem:[#allocation192_spill] sm:$0xff]  ;;  %v15169_v44 = vld [vmem:[#allocation193_spill] sm:$0xff]  ;;  %v15181_v28 = vrot.slane %v10326_v38, 1 }
 0x336   :  { %v10559_v53 = vadd.f32 %v10321_v47, %v15167_v60  ;;  %v10563_v52 = vadd.f32 %v10326_v38, %v15168_v57  ;;  %v10567_v1 = vadd.f32 %v10331_v30, %v15169_v44  ;;  %v15170_v2 = vld [vmem:[#allocation180_spill] sm:$0xff]  ;;  %v15172_v27 = vld [vmem:[#allocation181_spill] sm:$0xff]  ;;  %v15173_v32 = vld [vmem:[#allocation182_spill] sm:$0xff]  ;;  %v15183_v25 = vrot.slane %v10331_v30, 1 }
 0x337   :  { %v10571_v24 = vadd.f32 %v10336_v10, %v15170_v2  ;;  %v15171_v33 = vld [vmem:[#allocation188_spill] sm:$0xff]  ;;  %v10579_v60 = vadd.f32 %v10346_v41, %v15172_v27  ;;  %v10583_v57 = vadd.f32 %v10351_v62, %v15173_v32  ;;  %v15174_v29 = vld [vmem:[#allocation183_spill] sm:$0xff]  ;;  %v15176_v26 = vld [vmem:[#allocation185_spill] sm:$0xff]  ;;  %v15179_v27 = vrot.slane %v10321_v47, 1 }
 0x338   :  { %v10575_v18 = vadd.f32 %v10341_v55, %v15171_v33  ;;  %v10587_v44 = vadd.f32 %v10356_v14, %v15174_v29  ;;  %v15175_v9 = vld [vmem:[#allocation184_spill] sm:$0xff]  ;;  %v15177_v33 = vrot.slane %v10316_v61, 1  ;;  %v15178_v54 = vld [vmem:[#allocation186_spill] sm:$0xff]  ;;  %v15180_v32 = vld [vmem:[#allocation187_spill] sm:$0xff]  ;;  %v15185_v48 = vrot.slane %v10336_v10, 1 }
 0x339   :  { %v10591_v2 = vadd.f32 %v10361_v49, %v15175_v9  ;;  %v10601_v36 = vadd.f32 %v15179_v27, %v15178_v54  ;;  %v10606_v42 = vadd.f32 %v15181_v28, %v15180_v32  ;;  %v15182_v29 = vld [vmem:[#allocation189_spill] sm:$0xff]  ;;  %v15187_v12 = vrot.slane %v10341_v55, 1  ;;  %v15188_v27 = vld [vmem:[#allocation59_spill] sm:$0xff]  ;;  %v15190_v32 = vld [vmem:[#allocation60_spill] sm:$0xff] }
 0x33a   :  { %v10596_v59 = vadd.f32 %v15177_v33, %v15176_v26  ;;  %v10611_v9 = vadd.f32 %v15183_v25, %v15182_v29  ;;  %v10616_v26 = vadd.f32 %v15185_v48, %v15184_v5  ;;  %v15186_v33 = vld [vmem:[#allocation58_spill] sm:$0xff]  ;;  %v15189_v45 = vrot.slane %v10346_v41, 1  ;;  %v15192_v29 = vld [vmem:[#allocation61_spill] sm:$0xff]  ;;  %v15194_v5 = vld [vmem:[#allocation131_spill] sm:$0xff] }
 0x33b   :  { %v10621_v54 = vadd.f32 %v15187_v12, %v15186_v33  ;;  %v15191_v7 = vrot.slane %v10351_v62, 1  ;;  %v15193_v40 = vrot.slane %v10356_v14, 1  ;;  %v15195_v15 = vrot.slane %v10361_v49, 1  ;;  %v15196_v33 = vld [vmem:[#allocation132_spill] sm:$0xff] }
 0x33c   :  { %v10626_v28 = vadd.f32 %v15189_v45, %v15188_v27  ;;  %v15197_v31 = vrot.slane %v10316_v61, 2  ;;  %v15198_v27 = vld [vmem:[#allocation62_spill] sm:$0xff]  ;;  %v15199_v63 = vrot.slane %v10321_v47, 2  ;;  %v15201_v20 = vrot.slane %v10326_v38, 2 }
 0x33d   :  { %v10631_v25 = vadd.f32 %v15191_v7, %v15190_v32  ;;  %v10636_v48 = vadd.f32 %v15193_v40, %v15192_v29  ;;  %v10641_v12 = vadd.f32 %v15195_v15, %v15194_v5  ;;  %v15200_v32 = vld [vmem:[#allocation63_spill] sm:$0xff]  ;;  %v15202_v29 = vld [vmem:[#allocation64_spill] sm:$0xff]  ;;  %v15203_v6 = vrot.slane %v10331_v30, 2  ;;  %v15204_v5 = vld [vmem:[#allocation133_spill] sm:$0xff] }
 0x33e   :  { %v10646_v45 = vadd.f32 %v15197_v31, %v15196_v33  ;;  %v10651_v7 = vadd.f32 %v15199_v63, %v15198_v27  ;;  %v10656_v40 = vadd.f32 %v15201_v20, %v15200_v32  ;;  %v15205_v43 = vrot.slane %v10336_v10, 2  ;;  %v15206_v33 = vld [vmem:[#allocation134_spill] sm:$0xff]  ;;  %v15208_v27 = vld [vmem:[#allocation135_spill] sm:$0xff]  ;;  %v15210_v32 = vld [vmem:[#allocation136_spill] sm:$0xff] }
 0x33f   :  { %v10661_v15 = vadd.f32 %v15203_v6, %v15202_v29  ;;  %v15207_v4 = vrot.slane %v10341_v55, 2  ;;  %v15209_v22 = vrot.slane %v10346_v41, 2  ;;  %v15211_v13 = vrot.slane %v10351_v62, 2  ;;  %v15213_v29 = vld [vmem:[#allocation137_spill] sm:$0xff] }
 0x340   :  { %v10666_v31 = vadd.f32 %v15205_v43, %v15204_v5  ;;  %v15214_v21 = vrot.slane %v10356_v14, 2  ;;  %v15216_v5 = vld [vmem:[#allocation65_spill] sm:$0xff]  ;;  %v15217_v39 = vrot.slane %v10361_v49, 2  ;;  %v15220_v37 = vrot.slane %v10316_v61, 3 }
 0x341   :  { %v10671_v63 = vadd.f32 %v15207_v4, %v15206_v33  ;;  %v10676_v20 = vadd.f32 %v15209_v22, %v15208_v27  ;;  %v10681_v6 = vadd.f32 %v15211_v13, %v15210_v32  ;;  %v15219_v33 = vld [vmem:[#allocation66_spill] sm:$0xff]  ;;  %v15222_v27 = vld [vmem:[#allocation67_spill] sm:$0xff]  ;;  %v15223_v0 = vrot.slane %v10321_v47, 3 }
 0x342   :  { %v10686_v43 = vadd.f32 %v15214_v21, %v15213_v29  ;;  %v10691_v4 = vadd.f32 %v15217_v39, %v15216_v5  ;;  %v10696_v22 = vadd.f32 %v15220_v37, %v15219_v33  ;;  %v15225_v32 = vld [vmem:[#allocation138_spill] sm:$0xff]  ;;  %v15228_v29 = vld [vmem:[#allocation139_spill] sm:$0xff]  ;;  %v15231_v5 = vld [vmem:[#allocation68_spill] sm:$0xff] }
 0x343   :  { %15212 = vst [vmem:[#allocation315_spill] sm:$0xff] %v10681_v6  ;;  %v10701_v13 = vadd.f32 %v15223_v0, %v15222_v27  ;;  %v15226_v6 = vrot.slane %v10326_v38, 3  ;;  %v15234_v33 = vld [vmem:[#allocation140_spill] sm:$0xff]  ;;  %v15237_v27 = vld [vmem:[#allocation141_spill] sm:$0xff] }
 0x344   :  { %15215 = vst [vmem:[#allocation127_spill] sm:$0xff] %v10686_v43  ;;  %15218 = vst [vmem:[#allocation49_spill] sm:$0xff] %v10691_v4  ;;  %v15229_v43 = vrot.slane %v10331_v30, 3  ;;  %v15232_v4 = vrot.slane %v10336_v10, 3 }
 0x345   :  { %15221 = vst [vmem:[#allocation50_spill] sm:$0xff] %v10696_v22  ;;  %15224 = vst [vmem:[#allocation316_spill] sm:$0xff] %v10701_v13  ;;  %v10706_v21 = vadd.f32 %v15226_v6, %v15225_v32  ;;  %v15235_v22 = vrot.slane %v10341_v55, 3  ;;  %v15238_v13 = vrot.slane %v10346_v41, 3  ;;  %v15240_v32 = vld [vmem:[#allocation69_spill] sm:$0xff] }
 0x346   :  { %v10711_v39 = vadd.f32 %v15229_v43, %v15228_v29  ;;  %v10716_v37 = vadd.f32 %v15232_v4, %v15231_v5  ;;  %v15243_v29 = vld [vmem:[#allocation70_spill] sm:$0xff]  ;;  %v15246_v5 = vld [vmem:[#allocation71_spill] sm:$0xff] }
 0x347   :  { %15227 = vst [vmem:[#allocation317_spill] sm:$0xff] %v10706_v21  ;;  %v10721_v0 = vadd.f32 %v15235_v22, %v15234_v33  ;;  %v10726_v6 = vadd.f32 %v15238_v13, %v15237_v27  ;;  %v15241_v21 = vrot.slane %v10351_v62, 3  ;;  %v15249_v33 = vld [vmem:[#allocation72_spill] sm:$0xff]  ;;  %v15252_v27 = vld [vmem:[#allocation142_spill] sm:$0xff] }
 0x348   :  { %15230 = vst [vmem:[#allocation318_spill] sm:$0xff] %v10711_v39  ;;  %15233 = vst [vmem:[#allocation319_spill] sm:$0xff] %v10716_v37  ;;  %v15244_v39 = vrot.slane %v10356_v14, 3  ;;  %v15247_v37 = vrot.slane %v10361_v49, 3 }
 0x349   :  { %15236 = vst [vmem:[#allocation320_spill] sm:$0xff] %v10721_v0  ;;  %15239 = vst [vmem:[#allocation150_spill] sm:$0xff] %v10726_v6  ;;  %v10731_v43 = vadd.f32 %v15241_v21, %v15240_v32  ;;  %v15250_v0 = vrot.slane %v10316_v61, 4  ;;  %v15253_v6 = vrot.slane %v10321_v47, 4  ;;  %v15255_v32 = vld [vmem:[#allocation143_spill] sm:$0xff] }
 0x34a   :  { %v10736_v4 = vadd.f32 %v15244_v39, %v15243_v29  ;;  %v10741_v22 = vadd.f32 %v15247_v37, %v15246_v5  ;;  %v15258_v29 = vld [vmem:[#allocation144_spill] sm:$0xff]  ;;  %v15261_v5 = vld [vmem:[#allocation145_spill] sm:$0xff] }
 0x34b   :  { %15242 = vst [vmem:[#allocation321_spill] sm:$0xff] %v10731_v43  ;;  %v10746_v13 = vadd.f32 %v15250_v0, %v15249_v33  ;;  %v10751_v21 = vadd.f32 %v15253_v6, %v15252_v27  ;;  %v15256_v43 = vrot.slane %v10326_v38, 4  ;;  %v15264_v33 = vld [vmem:[#allocation73_spill] sm:$0xff]  ;;  %v15267_v27 = vld [vmem:[#allocation74_spill] sm:$0xff] }
 0x34c   :  { %15245 = vst [vmem:[#allocation322_spill] sm:$0xff] %v10736_v4  ;;  %15248 = vst [vmem:[#allocation323_spill] sm:$0xff] %v10741_v22  ;;  %v15259_v4 = vrot.slane %v10331_v30, 4  ;;  %v15262_v22 = vrot.slane %v10336_v10, 4 }
 0x34d   :  { %15251 = vst [vmem:[#allocation324_spill] sm:$0xff] %v10746_v13  ;;  %15254 = vst [vmem:[#allocation325_spill] sm:$0xff] %v10751_v21  ;;  %v10756_v39 = vadd.f32 %v15256_v43, %v15255_v32  ;;  %v15265_v13 = vrot.slane %v10341_v55, 4  ;;  %v15268_v21 = vrot.slane %v10346_v41, 4  ;;  %v15270_v32 = vld [vmem:[#allocation75_spill] sm:$0xff] }
 0x34e   :  { %v10761_v37 = vadd.f32 %v15259_v4, %v15258_v29  ;;  %v10766_v0 = vadd.f32 %v15262_v22, %v15261_v5  ;;  %v15273_v29 = vld [vmem:[#allocation76_spill] sm:$0xff]  ;;  %v15276_v5 = vld [vmem:[#allocation146_spill] sm:$0xff] }
 0x34f   :  { %15257 = vst [vmem:[#allocation326_spill] sm:$0xff] %v10756_v39  ;;  %v10771_v6 = vadd.f32 %v15265_v13, %v15264_v33  ;;  %v10776_v43 = vadd.f32 %v15268_v21, %v15267_v27  ;;  %v15271_v39 = vrot.slane %v10351_v62, 4  ;;  %v15279_v33 = vld [vmem:[#allocation147_spill] sm:$0xff]  ;;  %v15282_v27 = vld [vmem:[#allocation148_spill] sm:$0xff] }
 0x350   :  { %15260 = vst [vmem:[#allocation327_spill] sm:$0xff] %v10761_v37  ;;  %15263 = vst [vmem:[#allocation328_spill] sm:$0xff] %v10766_v0  ;;  %v15274_v37 = vrot.slane %v10356_v14, 4  ;;  %v15277_v0 = vrot.slane %v10361_v49, 4 }
 0x351   :  { %15266 = vst [vmem:[#allocation329_spill] sm:$0xff] %v10771_v6  ;;  %15269 = vst [vmem:[#allocation330_spill] sm:$0xff] %v10776_v43  ;;  %v10781_v4 = vadd.f32 %v15271_v39, %v15270_v32  ;;  %v15280_v6 = vrot.slane %v10316_v61, 5  ;;  %v15283_v43 = vrot.slane %v10321_v47, 5  ;;  %v15285_v32 = vld [vmem:[#allocation77_spill] sm:$0xff] }
 0x352   :  { %v10786_v22 = vadd.f32 %v15274_v37, %v15273_v29  ;;  %v10791_v13 = vadd.f32 %v15277_v0, %v15276_v5  ;;  %v15288_v29 = vld [vmem:[#allocation78_spill] sm:$0xff]  ;;  %v15291_v5 = vld [vmem:[#allocation79_spill] sm:$0xff] }
 0x353   :  { %15272 = vst [vmem:[#allocation166_spill] sm:$0xff] %v10781_v4  ;;  %v10796_v21 = vadd.f32 %v15280_v6, %v15279_v33  ;;  %v10801_v39 = vadd.f32 %v15283_v43, %v15282_v27  ;;  %v15286_v4 = vrot.slane %v10326_v38, 5  ;;  %v15294_v33 = vld [vmem:[#allocation80_spill] sm:$0xff]  ;;  %v15297_v27 = vld [vmem:[#allocation81_spill] sm:$0xff] }
 0x354   :  { %15275 = vst [vmem:[#allocation167_spill] sm:$0xff] %v10786_v22  ;;  %15278 = vst [vmem:[#allocation168_spill] sm:$0xff] %v10791_v13  ;;  %v15289_v22 = vrot.slane %v10331_v30, 5  ;;  %v15292_v13 = vrot.slane %v10336_v10, 5 }
 0x355   :  { %15281 = vst [vmem:[#allocation17_spill] sm:$0xff] %v10796_v21  ;;  %15284 = vst [vmem:[#allocation169_spill] sm:$0xff] %v10801_v39  ;;  %v10806_v37 = vadd.f32 %v15286_v4, %v15285_v32  ;;  %v15295_v21 = vrot.slane %v10341_v55, 5  ;;  %v15298_v39 = vrot.slane %v10346_v41, 5  ;;  %v15300_v32 = vld [vmem:[#allocation82_spill] sm:$0xff] }
 0x356   :  { %v10811_v0 = vadd.f32 %v15289_v22, %v15288_v29  ;;  %v10816_v6 = vadd.f32 %v15292_v13, %v15291_v5  ;;  %v15303_v29 = vld [vmem:[#allocation83_spill] sm:$0xff]  ;;  %v15306_v5 = vld [vmem:[#allocation84_spill] sm:$0xff] }
 0x357   :  { %15287 = vst [vmem:[#allocation170_spill] sm:$0xff] %v10806_v37  ;;  %v10821_v43 = vadd.f32 %v15295_v21, %v15294_v33  ;;  %v10826_v4 = vadd.f32 %v15298_v39, %v15297_v27  ;;  %v15301_v37 = vrot.slane %v10351_v62, 5  ;;  %v15309_v33 = vld [vmem:[#allocation85_spill] sm:$0xff]  ;;  %v15312_v27 = vld [vmem:[#allocation86_spill] sm:$0xff] }
 0x358   :  { %15290 = vst [vmem:[#allocation171_spill] sm:$0xff] %v10811_v0  ;;  %15293 = vst [vmem:[#allocation190_spill] sm:$0xff] %v10816_v6  ;;  %v15304_v0 = vrot.slane %v10356_v14, 5  ;;  %v15307_v6 = vrot.slane %v10361_v49, 5 }
 0x359   :  { %15296 = vst [vmem:[#allocation191_spill] sm:$0xff] %v10821_v43  ;;  %15299 = vst [vmem:[#allocation192_spill] sm:$0xff] %v10826_v4  ;;  %v10831_v22 = vadd.f32 %v15301_v37, %v15300_v32  ;;  %v15310_v43 = vrot.slane %v10316_v61, 6  ;;  %v15313_v4 = vrot.slane %v10321_v47, 6  ;;  %v15315_v32 = vld [vmem:[#allocation87_spill] sm:$0xff] }
 0x35a   :  { %v10836_v13 = vadd.f32 %v15304_v0, %v15303_v29  ;;  %v10841_v21 = vadd.f32 %v15307_v6, %v15306_v5  ;;  %v15318_v29 = vld [vmem:[#allocation88_spill] sm:$0xff]  ;;  %v15321_v5 = vld [vmem:[#allocation9_spill] sm:$0xff] }
 0x35b   :  { %15302 = vst [vmem:[#allocation193_spill] sm:$0xff] %v10831_v22  ;;  %v10846_v39 = vadd.f32 %v15310_v43, %v15309_v33  ;;  %v10851_v37 = vadd.f32 %v15313_v4, %v15312_v27  ;;  %v15316_v22 = vrot.slane %v10326_v38, 6  ;;  %v15324_v33 = vld [vmem:[#allocation10_spill] sm:$0xff]  ;;  %v15327_v27 = vld [vmem:[#allocation11_spill] sm:$0xff] }
 0x35c   :  { %15305 = vst [vmem:[#allocation180_spill] sm:$0xff] %v10836_v13  ;;  %15308 = vst [vmem:[#allocation188_spill] sm:$0xff] %v10841_v21  ;;  %v15319_v13 = vrot.slane %v10331_v30, 6  ;;  %v15322_v21 = vrot.slane %v10336_v10, 6 }
 0x35d   :  { %15311 = vst [vmem:[#allocation181_spill] sm:$0xff] %v10846_v39  ;;  %15314 = vst [vmem:[#allocation182_spill] sm:$0xff] %v10851_v37  ;;  %v10856_v0 = vadd.f32 %v15316_v22, %v15315_v32  ;;  %v15325_v39 = vrot.slane %v10341_v55, 6  ;;  %v15328_v37 = vrot.slane %v10346_v41, 6  ;;  %v15330_v32 = vld [vmem:[#allocation12_spill] sm:$0xff] }
 0x35e   :  { %v10861_v6 = vadd.f32 %v15319_v13, %v15318_v29  ;;  %v10866_v43 = vadd.f32 %v15322_v21, %v15321_v5  ;;  %v15333_v29 = vld [vmem:[#allocation89_spill] sm:$0xff]  ;;  %v15336_v5 = vld [vmem:[#allocation90_spill] sm:$0xff] }
 0x35f   :  { %15317 = vst [vmem:[#allocation183_spill] sm:$0xff] %v10856_v0  ;;  %v10871_v4 = vadd.f32 %v15325_v39, %v15324_v33  ;;  %v10876_v22 = vadd.f32 %v15328_v37, %v15327_v27  ;;  %v15331_v0 = vrot.slane %v10351_v62, 6  ;;  %v15338_v33 = vld [vmem:[#allocation91_spill] sm:$0xff] }
 0x360   :  { %15320 = vst [vmem:[#allocation184_spill] sm:$0xff] %v10861_v6  ;;  %15323 = vst [vmem:[#allocation185_spill] sm:$0xff] %v10866_v43  ;;  %v15334_v6 = vrot.slane %v10356_v14, 6  ;;  %v15337_v43 = vrot.slane %v10361_v49, 6  ;;  %v15340_v27 = vld [vmem:[#allocation331_spill] sm:$0xff] }
 0x361   :  { %15326 = vst [vmem:[#allocation186_spill] sm:$0xff] %v10871_v4  ;;  %15329 = vst [vmem:[#allocation187_spill] sm:$0xff] %v10876_v22  ;;  %v10881_v13 = vadd.f32 %v15331_v0, %v15330_v32  ;;  %v15339_v4 = vrot.slane %v10316_v61, 7  ;;  %v15341_v22 = vrot.slane %v10321_v47, 7  ;;  %v15342_v32 = vld [vmem:[#allocation332_spill] sm:$0xff]  ;;  %v15347_v61 = vrot.slane %v10336_v10, 7 }
 0x362   :  { %v10886_v21 = vadd.f32 %v15334_v6, %v15333_v29  ;;  %v10891_v39 = vadd.f32 %v15337_v43, %v15336_v5  ;;  %v15344_v29 = vld [vmem:[#allocation333_spill] sm:$0xff]  ;;  %v15346_v5 = vld [vmem:[#allocation334_spill] sm:$0xff]  ;;  %v15349_v47 = vrot.slane %v10341_v55, 7  ;;  %v15355_v10 = vrot.slane %v10356_v14, 7 }
 0x363   :  { %15332 = vst [vmem:[#allocation189_spill] sm:$0xff] %v10881_v13  ;;  %v10896_v37 = vadd.f32 %v15339_v4, %v15338_v33  ;;  %v10901_v0 = vadd.f32 %v15341_v22, %v15340_v27  ;;  %v15343_v13 = vrot.slane %v10326_v38, 7  ;;  %v10916_v4 = vadd.f32 %v15347_v61, %v15346_v5  ;;  %v15348_v33 = vld [vmem:[#allocation335_spill] sm:$0xff]  ;;  %v15350_v27 = vld [vmem:[#allocation336_spill] sm:$0xff]  ;;  %v15356_v61 = vld [vmem:[#allocation18_spill] sm:$0xff] }
 0x364   :  { %15335 = vst [vmem:[#allocation194_spill] sm:$0xff] %v10886_v21  ;;  %v15345_v21 = vrot.slane %v10331_v30, 7  ;;  %v10921_v22 = vadd.f32 %v15349_v47, %v15348_v33  ;;  %v15351_v38 = vrot.slane %v10346_v41, 7  ;;  %v15353_v30 = vrot.slane %v10351_v62, 7  ;;  %v15359_v47 = vld [vmem:[#allocation19_spill] sm:$0xff]  ;;  %v15363_v62 = vld [vmem:[#allocation97_spill] sm:$0xff] }
 0x365   :  { %v10906_v6 = vadd.f32 %v15343_v13, %v15342_v32  ;;  %v15352_v32 = vld [vmem:[#allocation337_spill] sm:$0xff]  ;;  %v15357_v55 = vrot.slane %v10361_v49, 7  ;;  %v10945_v41 = vadd.f32 %v10366_v35, %v15359_v47  ;;  %v15365_v14 = vld [vmem:[#allocation98_spill] sm:$0xff] }
 0x366   :  { %v10911_v43 = vadd.f32 %v15345_v21, %v15344_v29  ;;  %v10926_v13 = vadd.f32 %v15351_v38, %v15350_v27  ;;  %v10931_v21 = vadd.f32 %v15353_v30, %v15352_v32  ;;  %v15354_v29 = vld [vmem:[#allocation338_spill] sm:$0xff]  ;;  %v15361_v27 = vld [vmem:[#allocation20_spill] sm:$0xff]  ;;  %v10953_v32 = vadd.f32 %v10376_v46, %v15363_v62 }
 0x367   :  { %v10936_v5 = vadd.f32 %v15355_v10, %v15354_v29  ;;  %v10941_v33 = vadd.f32 %v15357_v55, %v15356_v61  ;;  %15360 = vst [vmem:[#allocation59_spill] sm:$0xff] %v10945_v41  ;;  %v10949_v38 = vadd.f32 %v10371_v17, %v15361_v27  ;;  %v10957_v30 = vadd.f32 %v10381_v3, %v15365_v14  ;;  %v15367_v29 = vld [vmem:[#allocation339_spill] sm:$0xff]  ;;  %v15369_v10 = vld [vmem:[#allocation100_spill] sm:$0xff]  ;;  %v15371_v55 = vld [vmem:[#allocation21_spill] sm:$0xff] }
 0x368   :  { %15364 = vst [vmem:[#allocation61_spill] sm:$0xff] %v10953_v32  ;;  %v10961_v49 = vadd.f32 %v10386_v34, %v15367_v29  ;;  %v10965_v61 = vadd.f32 %v10391_v51, %v15369_v10  ;;  %v10969_v47 = vadd.f32 %v10396_v8, %v15371_v55  ;;  %v15373_v27 = vld [vmem:[#allocation22_spill] sm:$0xff]  ;;  %v15375_v32 = vld [vmem:[#allocation23_spill] sm:$0xff]  ;;  %v15380_v10 = vrot.slane %v10366_v35, 1 }
 0x369   :  { %15358 = vst [vmem:[#allocation58_spill] sm:$0xff] %v10941_v33  ;;  %15362 = vst [vmem:[#allocation60_spill] sm:$0xff] %v10949_v38  ;;  %v10973_v62 = vadd.f32 %v10401_v11, %v15373_v27  ;;  %v10977_v14 = vadd.f32 %v10406_v56, %v15375_v32  ;;  %v15382_v38 = vld [vmem:[#allocation102_spill] sm:$0xff]  ;;  %v15383_v55 = vrot.slane %v10371_v17, 1  ;;  %v15385_v27 = vld [vmem:[#allocation103_spill] sm:$0xff]  ;;  %v15392_v33 = vrot.slane %v10386_v34, 1 }
 0x36a   :  { %15366 = vst [vmem:[#allocation131_spill] sm:$0xff] %v10957_v30  ;;  %15368 = vst [vmem:[#allocation132_spill] sm:$0xff] %v10961_v49  ;;  %v15377_v30 = vld [vmem:[#allocation24_spill] sm:$0xff]  ;;  %v15379_v49 = vld [vmem:[#allocation101_spill] sm:$0xff] }
 0x36b   :  { %15370 = vst [vmem:[#allocation62_spill] sm:$0xff] %v10965_v61  ;;  %15372 = vst [vmem:[#allocation63_spill] sm:$0xff] %v10969_v47  ;;  %v10981_v29 = vadd.f32 %v10411_v23, %v15377_v30  ;;  %v10986_v61 = vadd.f32 %v15380_v10, %v15379_v49  ;;  %v10991_v47 = vadd.f32 %v15383_v55, %v15382_v38  ;;  %v15388_v32 = vld [vmem:[#allocation104_spill] sm:$0xff]  ;;  %v15394_v10 = vld [vmem:[#allocation26_spill] sm:$0xff] }
 0x36c   :  { %15374 = vst [vmem:[#allocation64_spill] sm:$0xff] %v10973_v62  ;;  %15376 = vst [vmem:[#allocation133_spill] sm:$0xff] %v10977_v14  ;;  %v15386_v62 = vrot.slane %v10376_v46, 1  ;;  %v15389_v14 = vrot.slane %v10381_v3, 1  ;;  %v15397_v55 = vld [vmem:[#allocation27_spill] sm:$0xff] }
 0x36d   :  { %15378 = vst [vmem:[#allocation134_spill] sm:$0xff] %v10981_v29  ;;  %15381 = vst [vmem:[#allocation135_spill] sm:$0xff] %v10986_v61  ;;  %v15391_v29 = vld [vmem:[#allocation25_spill] sm:$0xff]  ;;  %v15395_v61 = vrot.slane %v10391_v51, 1 }
 0x36e   :  { %15384 = vst [vmem:[#allocation136_spill] sm:$0xff] %v10991_v47  ;;  %v10996_v41 = vadd.f32 %v15386_v62, %v15385_v27  ;;  %v11001_v30 = vadd.f32 %v15389_v14, %v15388_v32  ;;  %v11006_v49 = vadd.f32 %v15392_v33, %v15391_v29  ;;  %v15398_v47 = vrot.slane %v10396_v8, 1  ;;  %v15400_v27 = vld [vmem:[#allocation28_spill] sm:$0xff]  ;;  %v15403_v32 = vld [vmem:[#allocation105_spill] sm:$0xff]  ;;  %v15406_v29 = vld [vmem:[#allocation106_spill] sm:$0xff] }
 0x36f   :  { %v11011_v38 = vadd.f32 %v15395_v61, %v15394_v10  ;;  %v15409_v10 = vld [vmem:[#allocation107_spill] sm:$0xff] }
 0x370   :  { %15387 = vst [vmem:[#allocation137_spill] sm:$0xff] %v10996_v41  ;;  %15390 = vst [vmem:[#allocation65_spill] sm:$0xff] %v11001_v30  ;;  %v11016_v62 = vadd.f32 %v15398_v47, %v15397_v55  ;;  %v15401_v41 = vrot.slane %v10401_v11, 1  ;;  %v15404_v30 = vrot.slane %v10406_v56, 1  ;;  %v15412_v55 = vld [vmem:[#allocation108_spill] sm:$0xff] }
 0x371   :  { %15393 = vst [vmem:[#allocation66_spill] sm:$0xff] %v11006_v49  ;;  %15396 = vst [vmem:[#allocation67_spill] sm:$0xff] %v11011_v38  ;;  %v15407_v49 = vrot.slane %v10411_v23, 1  ;;  %v15410_v38 = vrot.slane %v10366_v35, 2 }
 0x372   :  { %15399 = vst [vmem:[#allocation138_spill] sm:$0xff] %v11016_v62  ;;  %v11021_v14 = vadd.f32 %v15401_v41, %v15400_v27  ;;  %v11026_v33 = vadd.f32 %v15404_v30, %v15403_v32  ;;  %v15413_v62 = vrot.slane %v10371_v17, 2  ;;  %v15415_v27 = vld [vmem:[#allocation29_spill] sm:$0xff]  ;;  %v15418_v32 = vld [vmem:[#allocation30_spill] sm:$0xff] }
 0x373   :  { %v11031_v61 = vadd.f32 %v15407_v49, %v15406_v29  ;;  %v11036_v47 = vadd.f32 %v15410_v38, %v15409_v10  ;;  %v15421_v29 = vld [vmem:[#allocation31_spill] sm:$0xff]  ;;  %v15424_v10 = vld [vmem:[#allocation32_spill] sm:$0xff] }
 0x374   :  { %15402 = vst [vmem:[#allocation139_spill] sm:$0xff] %v11021_v14  ;;  %15405 = vst [vmem:[#allocation68_spill] sm:$0xff] %v11026_v33  ;;  %v11041_v41 = vadd.f32 %v15413_v62, %v15412_v55  ;;  %v15416_v14 = vrot.slane %v10376_v46, 2  ;;  %v15419_v33 = vrot.slane %v10381_v3, 2  ;;  %v15427_v55 = vld [vmem:[#allocation109_spill] sm:$0xff] }
 0x375   :  { %15408 = vst [vmem:[#allocation140_spill] sm:$0xff] %v11031_v61  ;;  %15411 = vst [vmem:[#allocation141_spill] sm:$0xff] %v11036_v47  ;;  %v15422_v61 = vrot.slane %v10386_v34, 2  ;;  %v15425_v47 = vrot.slane %v10391_v51, 2 }
 0x376   :  { %15414 = vst [vmem:[#allocation69_spill] sm:$0xff] %v11041_v41  ;;  %v11046_v30 = vadd.f32 %v15416_v14, %v15415_v27  ;;  %v11051_v49 = vadd.f32 %v15419_v33, %v15418_v32  ;;  %v15428_v41 = vrot.slane %v10396_v8, 2  ;;  %v15430_v27 = vld [vmem:[#allocation110_spill] sm:$0xff]  ;;  %v15433_v32 = vld [vmem:[#allocation111_spill] sm:$0xff] }
 0x377   :  { %v11056_v38 = vadd.f32 %v15422_v61, %v15421_v29  ;;  %v11061_v62 = vadd.f32 %v15425_v47, %v15424_v10  ;;  %v15436_v29 = vld [vmem:[#allocation112_spill] sm:$0xff]  ;;  %v15439_v10 = vld [vmem:[#allocation33_spill] sm:$0xff] }
 0x378   :  { %15417 = vst [vmem:[#allocation70_spill] sm:$0xff] %v11046_v30  ;;  %15420 = vst [vmem:[#allocation71_spill] sm:$0xff] %v11051_v49  ;;  %v11066_v14 = vadd.f32 %v15428_v41, %v15427_v55  ;;  %v15431_v30 = vrot.slane %v10401_v11, 2  ;;  %v15434_v49 = vrot.slane %v10406_v56, 2  ;;  %v15442_v55 = vld [vmem:[#allocation34_spill] sm:$0xff] }
 0x379   :  { %15423 = vst [vmem:[#allocation72_spill] sm:$0xff] %v11056_v38  ;;  %15426 = vst [vmem:[#allocation142_spill] sm:$0xff] %v11061_v62  ;;  %v15437_v38 = vrot.slane %v10411_v23, 2  ;;  %v15440_v62 = vrot.slane %v10366_v35, 3 }
 0x37a   :  { %15429 = vst [vmem:[#allocation143_spill] sm:$0xff] %v11066_v14  ;;  %v11071_v33 = vadd.f32 %v15431_v30, %v15430_v27  ;;  %v11076_v61 = vadd.f32 %v15434_v49, %v15433_v32  ;;  %v15443_v14 = vrot.slane %v10371_v17, 3  ;;  %v15445_v27 = vld [vmem:[#allocation340_spill] sm:$0xff] }
 0x37b   :  { %v11081_v47 = vadd.f32 %v15437_v38, %v15436_v29  ;;  %v11086_v41 = vadd.f32 %v15440_v62, %v15439_v10  ;;  %v15448_v32 = vld [vmem:[#allocation36_spill] sm:$0xff]  ;;  %v15451_v29 = vld [vmem:[#allocation113_spill] sm:$0xff]  ;;  %v15454_v10 = vld [vmem:[#allocation114_spill] sm:$0xff] }
 0x37c   :  { %15432 = vst [vmem:[#allocation144_spill] sm:$0xff] %v11071_v33  ;;  %15435 = vst [vmem:[#allocation145_spill] sm:$0xff] %v11076_v61  ;;  %v11091_v30 = vadd.f32 %v15443_v14, %v15442_v55  ;;  %v15446_v33 = vrot.slane %v10376_v46, 3  ;;  %v15449_v61 = vrot.slane %v10381_v3, 3  ;;  %v15457_v55 = vld [vmem:[#allocation115_spill] sm:$0xff] }
 0x37d   :  { %15438 = vst [vmem:[#allocation73_spill] sm:$0xff] %v11081_v47  ;;  %15441 = vst [vmem:[#allocation74_spill] sm:$0xff] %v11086_v41  ;;  %v15452_v47 = vrot.slane %v10386_v34, 3  ;;  %v15455_v41 = vrot.slane %v10391_v51, 3 }
 0x37e   :  { %15444 = vst [vmem:[#allocation75_spill] sm:$0xff] %v11091_v30  ;;  %v11096_v49 = vadd.f32 %v15446_v33, %v15445_v27  ;;  %v11101_v38 = vadd.f32 %v15449_v61, %v15448_v32  ;;  %v15458_v30 = vrot.slane %v10396_v8, 3  ;;  %v15460_v27 = vld [vmem:[#allocation116_spill] sm:$0xff]  ;;  %v15463_v32 = vld [vmem:[#allocation37_spill] sm:$0xff] }
 0x37f   :  { %v11106_v62 = vadd.f32 %v15452_v47, %v15451_v29  ;;  %v11111_v14 = vadd.f32 %v15455_v41, %v15454_v10  ;;  %v15466_v29 = vld [vmem:[#allocation38_spill] sm:$0xff]  ;;  %v15469_v10 = vld [vmem:[#allocation39_spill] sm:$0xff] }
 0x380   :  { %15447 = vst [vmem:[#allocation76_spill] sm:$0xff] %v11096_v49  ;;  %15450 = vst [vmem:[#allocation146_spill] sm:$0xff] %v11101_v38  ;;  %v11116_v33 = vadd.f32 %v15458_v30, %v15457_v55  ;;  %v15461_v49 = vrot.slane %v10401_v11, 3  ;;  %v15464_v38 = vrot.slane %v10406_v56, 3  ;;  %v15472_v55 = vld [vmem:[#allocation40_spill] sm:$0xff] }
 0x381   :  { %15453 = vst [vmem:[#allocation147_spill] sm:$0xff] %v11106_v62  ;;  %15456 = vst [vmem:[#allocation148_spill] sm:$0xff] %v11111_v14  ;;  %v15467_v62 = vrot.slane %v10411_v23, 3  ;;  %v15470_v14 = vrot.slane %v10366_v35, 4 }
 0x382   :  { %15459 = vst [vmem:[#allocation77_spill] sm:$0xff] %v11116_v33  ;;  %v11121_v61 = vadd.f32 %v15461_v49, %v15460_v27  ;;  %v11126_v47 = vadd.f32 %v15464_v38, %v15463_v32  ;;  %v15473_v33 = vrot.slane %v10371_v17, 4  ;;  %v15475_v27 = vld [vmem:[#allocation341_spill] sm:$0xff]  ;;  %v15478_v32 = vld [vmem:[#allocation342_spill] sm:$0xff] }
 0x383   :  { %v11131_v41 = vadd.f32 %v15467_v62, %v15466_v29  ;;  %v11136_v30 = vadd.f32 %v15470_v14, %v15469_v10  ;;  %v15481_v29 = vld [vmem:[#allocation343_spill] sm:$0xff]  ;;  %v15484_v10 = vld [vmem:[#allocation120_spill] sm:$0xff] }
 0x384   :  { %15462 = vst [vmem:[#allocation78_spill] sm:$0xff] %v11121_v61  ;;  %15465 = vst [vmem:[#allocation79_spill] sm:$0xff] %v11126_v47  ;;  %v11141_v49 = vadd.f32 %v15473_v33, %v15472_v55  ;;  %v15476_v61 = vrot.slane %v10376_v46, 4  ;;  %v15479_v47 = vrot.slane %v10381_v3, 4  ;;  %v15487_v55 = vld [vmem:[#allocation41_spill] sm:$0xff] }
 0x385   :  { %15468 = vst [vmem:[#allocation80_spill] sm:$0xff] %v11131_v41  ;;  %15471 = vst [vmem:[#allocation81_spill] sm:$0xff] %v11136_v30  ;;  %v15482_v41 = vrot.slane %v10386_v34, 4  ;;  %v15485_v30 = vrot.slane %v10391_v51, 4 }
 0x386   :  { %15474 = vst [vmem:[#allocation82_spill] sm:$0xff] %v11141_v49  ;;  %v11146_v38 = vadd.f32 %v15476_v61, %v15475_v27  ;;  %v11151_v62 = vadd.f32 %v15479_v47, %v15478_v32  ;;  %v15488_v49 = vrot.slane %v10396_v8, 4  ;;  %v15490_v27 = vld [vmem:[#allocation42_spill] sm:$0xff]  ;;  %v15493_v32 = vld [vmem:[#allocation43_spill] sm:$0xff] }
 0x387   :  { %v11156_v14 = vadd.f32 %v15482_v41, %v15481_v29  ;;  %v11161_v33 = vadd.f32 %v15485_v30, %v15484_v10  ;;  %v15496_v29 = vld [vmem:[#allocation44_spill] sm:$0xff]  ;;  %v15499_v10 = vld [vmem:[#allocation121_spill] sm:$0xff] }
 0x388   :  { %15477 = vst [vmem:[#allocation83_spill] sm:$0xff] %v11146_v38  ;;  %15480 = vst [vmem:[#allocation84_spill] sm:$0xff] %v11151_v62  ;;  %v11166_v61 = vadd.f32 %v15488_v49, %v15487_v55  ;;  %v15491_v38 = vrot.slane %v10401_v11, 4  ;;  %v15494_v62 = vrot.slane %v10406_v56, 4  ;;  %v15502_v55 = vld [vmem:[#allocation344_spill] sm:$0xff] }
 0x389   :  { %15483 = vst [vmem:[#allocation85_spill] sm:$0xff] %v11156_v14  ;;  %15486 = vst [vmem:[#allocation86_spill] sm:$0xff] %v11161_v33  ;;  %v15497_v14 = vrot.slane %v10411_v23, 4  ;;  %v15500_v33 = vrot.slane %v10366_v35, 5 }
 0x38a   :  { %15489 = vst [vmem:[#allocation87_spill] sm:$0xff] %v11166_v61  ;;  %v11171_v47 = vadd.f32 %v15491_v38, %v15490_v27  ;;  %v11176_v41 = vadd.f32 %v15494_v62, %v15493_v32  ;;  %v15503_v61 = vrot.slane %v10371_v17, 5  ;;  %v15505_v27 = vld [vmem:[#allocation345_spill] sm:$0xff]  ;;  %v15508_v32 = vld [vmem:[#allocation346_spill] sm:$0xff] }
 0x38b   :  { %v11181_v30 = vadd.f32 %v15497_v14, %v15496_v29  ;;  %v11186_v49 = vadd.f32 %v15500_v33, %v15499_v10  ;;  %v15511_v29 = vld [vmem:[#allocation347_spill] sm:$0xff]  ;;  %v15514_v10 = vld [vmem:[#allocation149_spill] sm:$0xff] }
 0x38c   :  { %15492 = vst [vmem:[#allocation88_spill] sm:$0xff] %v11171_v47  ;;  %15495 = vst [vmem:[#allocation9_spill] sm:$0xff] %v11176_v41  ;;  %v11191_v38 = vadd.f32 %v15503_v61, %v15502_v55  ;;  %v15506_v47 = vrot.slane %v10376_v46, 5  ;;  %v15509_v41 = vrot.slane %v10381_v3, 5  ;;  %v15517_v55 = vld [vmem:[#allocation46_spill] sm:$0xff] }
 0x38d   :  { %15498 = vst [vmem:[#allocation10_spill] sm:$0xff] %v11181_v30  ;;  %15501 = vst [vmem:[#allocation11_spill] sm:$0xff] %v11186_v49  ;;  %v15512_v30 = vrot.slane %v10386_v34, 5  ;;  %v15515_v49 = vrot.slane %v10391_v51, 5 }
 0x38e   :  { %15504 = vst [vmem:[#allocation12_spill] sm:$0xff] %v11191_v38  ;;  %v11196_v62 = vadd.f32 %v15506_v47, %v15505_v27  ;;  %v11201_v14 = vadd.f32 %v15509_v41, %v15508_v32  ;;  %v15518_v38 = vrot.slane %v10396_v8, 5  ;;  %v15520_v27 = vld [vmem:[#allocation47_spill] sm:$0xff]  ;;  %v15523_v32 = vld [vmem:[#allocation48_spill] sm:$0xff] }
 0x38f   :  { %v11206_v33 = vadd.f32 %v15512_v30, %v15511_v29  ;;  %v11211_v61 = vadd.f32 %v15515_v49, %v15514_v10  ;;  %v15526_v29 = vld [vmem:[#allocation125_spill] sm:$0xff]  ;;  %v15529_v10 = vld [vmem:[#allocation126_spill] sm:$0xff] }
 0x390   :  { %15507 = vst [vmem:[#allocation89_spill] sm:$0xff] %v11196_v62  ;;  %15510 = vst [vmem:[#allocation90_spill] sm:$0xff] %v11201_v14  ;;  %v11216_v47 = vadd.f32 %v15518_v38, %v15517_v55  ;;  %v15521_v62 = vrot.slane %v10401_v11, 5  ;;  %v15524_v14 = vrot.slane %v10406_v56, 5  ;;  %v15532_v55 = vld [vmem:[#allocation348_spill] sm:$0xff] }
 0x391   :  { %15513 = vst [vmem:[#allocation91_spill] sm:$0xff] %v11206_v33  ;;  %15516 = vst [vmem:[#allocation331_spill] sm:$0xff] %v11211_v61  ;;  %v15527_v33 = vrot.slane %v10411_v23, 5  ;;  %v15530_v61 = vrot.slane %v10366_v35, 6 }
 0x392   :  { %15519 = vst [vmem:[#allocation332_spill] sm:$0xff] %v11216_v47  ;;  %v11221_v41 = vadd.f32 %v15521_v62, %v15520_v27  ;;  %v11226_v30 = vadd.f32 %v15524_v14, %v15523_v32  ;;  %v15533_v47 = vrot.slane %v10371_v17, 6  ;;  %v15535_v27 = vld [vmem:[#allocation349_spill] sm:$0xff]  ;;  %v15538_v32 = vld [vmem:[#allocation350_spill] sm:$0xff] }
 0x393   :  { %v11231_v49 = vadd.f32 %v15527_v33, %v15526_v29  ;;  %v11236_v38 = vadd.f32 %v15530_v61, %v15529_v10  ;;  %v15541_v29 = vld [vmem:[#allocation51_spill] sm:$0xff]  ;;  %v15544_v10 = vld [vmem:[#allocation52_spill] sm:$0xff] }
 0x394   :  { %15522 = vst [vmem:[#allocation333_spill] sm:$0xff] %v11221_v41  ;;  %15525 = vst [vmem:[#allocation334_spill] sm:$0xff] %v11226_v30  ;;  %v11241_v62 = vadd.f32 %v15533_v47, %v15532_v55  ;;  %v15536_v41 = vrot.slane %v10376_v46, 6  ;;  %v15539_v30 = vrot.slane %v10381_v3, 6  ;;  %v15547_v55 = vld [vmem:[#allocation128_spill] sm:$0xff] }
 0x395   :  { %15528 = vst [vmem:[#allocation335_spill] sm:$0xff] %v11231_v49  ;;  %15531 = vst [vmem:[#allocation336_spill] sm:$0xff] %v11236_v38  ;;  %v15542_v49 = vrot.slane %v10386_v34, 6  ;;  %v15545_v38 = vrot.slane %v10391_v51, 6 }
 0x396   :  { %15534 = vst [vmem:[#allocation337_spill] sm:$0xff] %v11241_v62  ;;  %v11246_v14 = vadd.f32 %v15536_v41, %v15535_v27  ;;  %v11251_v33 = vadd.f32 %v15539_v30, %v15538_v32  ;;  %v15548_v62 = vrot.slane %v10396_v8, 6  ;;  %v15550_v27 = vld [vmem:[#allocation129_spill] sm:$0xff]  ;;  %v15553_v32 = vld [vmem:[#allocation130_spill] sm:$0xff] }
 0x397   :  { %v11256_v61 = vadd.f32 %v15542_v49, %v15541_v29  ;;  %v11261_v47 = vadd.f32 %v15545_v38, %v15544_v10  ;;  %v15556_v29 = vld [vmem:[#allocation351_spill] sm:$0xff] }
 0x398   :  { %15537 = vst [vmem:[#allocation338_spill] sm:$0xff] %v11246_v14  ;;  %15540 = vst [vmem:[#allocation18_spill] sm:$0xff] %v11251_v33  ;;  %v11266_v41 = vadd.f32 %v15548_v62, %v15547_v55  ;;  %v15551_v14 = vrot.slane %v10401_v11, 6  ;;  %v15554_v33 = vrot.slane %v10406_v56, 6  ;;  %v15558_v10 = vld [vmem:[#allocation151_spill] sm:$0xff]  ;;  %v15560_v55 = vld [vmem:[#allocation152_spill] sm:$0xff] }
 0x399   :  { %15543 = vst [vmem:[#allocation19_spill] sm:$0xff] %v11256_v61  ;;  %15546 = vst [vmem:[#allocation20_spill] sm:$0xff] %v11261_v47  ;;  %v15557_v61 = vrot.slane %v10411_v23, 6  ;;  %v15559_v47 = vrot.slane %v10366_v35, 7  ;;  %v15567_v35 = vrot.slane %v10386_v34, 7 }
 0x39a   :  { %15549 = vst [vmem:[#allocation97_spill] sm:$0xff] %v11266_v41  ;;  %v11271_v30 = vadd.f32 %v15551_v14, %v15550_v27  ;;  %v11276_v49 = vadd.f32 %v15554_v33, %v15553_v32  ;;  %v15561_v41 = vrot.slane %v10371_v17, 7  ;;  %v15562_v27 = vld [vmem:[#allocation153_spill] sm:$0xff]  ;;  %v15564_v32 = vld [vmem:[#allocation154_spill] sm:$0xff]  ;;  %v15570_v17 = vrot.slane %v10391_v51, 7 }
 0x39b   :  { %v11281_v38 = vadd.f32 %v15557_v61, %v15556_v29  ;;  %v11286_v62 = vadd.f32 %v15559_v47, %v15558_v10  ;;  %v15566_v29 = vld [vmem:[#allocation155_spill] sm:$0xff]  ;;  %v15569_v10 = vld [vmem:[#allocation161_spill] sm:$0xff]  ;;  %v4082_v34 = vmul.f32 0.33333334, %v10559_v53  ;;  %v4087_v53 = vmul.f32 0.33333334, %v10579_v60 }
 0x39c   :  { %15552 = vst [vmem:[#allocation98_spill] sm:$0xff] %v11271_v30  ;;  %15555 = vst [vmem:[#allocation339_spill] sm:$0xff] %v11276_v49  ;;  %v11291_v14 = vadd.f32 %v15561_v41, %v15560_v55  ;;  %v15563_v30 = vrot.slane %v10376_v46, 7  ;;  %v15565_v49 = vrot.slane %v10381_v3, 7  ;;  %v11306_v47 = vadd.f32 %v15567_v35, %v15566_v29  ;;  %v15572_v55 = vld [vmem:[#allocation162_spill] sm:$0xff]  ;;  %v15578_v29 = vld [vmem:[#allocation164_spill] sm:$0xff] }
 0x39d   :  { %v11311_v41 = vadd.f32 %v15570_v17, %v15569_v10  ;;  %v15573_v46 = vrot.slane %v10396_v8, 7  ;;  %v15576_v3 = vrot.slane %v10401_v11, 7  ;;  %v15579_v35 = vrot.slane %v10406_v56, 7 }
 0x39e   :  { %v11296_v33 = vadd.f32 %v15563_v30, %v15562_v27  ;;  %v11301_v61 = vadd.f32 %v15565_v49, %v15564_v32  ;;  %15568 = vst [vmem:[#allocation100_spill] sm:$0xff] %v11306_v47  ;;  %v15575_v27 = vld [vmem:[#allocation163_spill] sm:$0xff]  ;;  %v4081_v32 = vmul.f32 0.33333334, %v10555_v58  ;;  %v4083_v10 = vmul.f32 0.33333334, %v10563_v52 }
 0x39f   :  { %15571 = vst [vmem:[#allocation21_spill] sm:$0xff] %v11311_v41  ;;  %v11316_v30 = vadd.f32 %v15573_v46, %v15572_v55  ;;  %v11321_v49 = vadd.f32 %v15576_v3, %v15575_v27  ;;  %v11328_v51 = vadd.f32 %v15579_v35, %v15578_v29  ;;  %v4084_v8 = vmul.f32 0.33333334, %v10567_v1  ;;  %v15581_v55 = vld [vmem:[#allocation165_spill] sm:$0xff]  ;;  %v15594_v35 = vld [vmem:[#allocation127_spill] sm:$0xff] }
 0x3a0   :  { %v4085_v17 = vmul.f32 0.33333334, %v10571_v24  ;;  %v15582_v11 = vrot.slane %v10411_v23, 7  ;;  %v4086_v58 = vmul.f32 0.33333334, %v10575_v18  ;;  %v11345_v1 = vadd.f32 %v4081_v32, %v9497_v16 }
 0x3a1   :  { %15574 = vst [vmem:[#allocation22_spill] sm:$0xff] %v11316_v30  ;;  %15577 = vst [vmem:[#allocation23_spill] sm:$0xff] %v11321_v49  ;;  %v4088_v27 = vmul.f32 0.33333334, %v10583_v57  ;;  %v4089_v56 = vmul.f32 0.33333334, %v10587_v44  ;;  %v11351_v18 = vadd.f32 %v4082_v34, %v9503_v19 }
 0x3a2   :  { %15580 = vst [vmem:[#allocation24_spill] sm:$0xff] %v11328_v51  ;;  %v11336_v46 = vadd.f32 %v15582_v11, %v15581_v55  ;;  %v4090_v3 = vmul.f32 0.33333334, %v10591_v2  ;;  %v4091_v52 = vmul.f32 0.33333334, %v10596_v59  ;;  %15584 = vst [vmem:[#allocation102_spill] sm:$0xff] %v11345_v1  ;;  %v11357_v59 = vadd.f32 %v4083_v10, %v9509_v50 }
 0x3a3   :  { %v4092_v24 = vmul.f32 0.33333334, %v10601_v36  ;;  %v4093_v23 = vmul.f32 0.33333334, %v10606_v42  ;;  %v4094_v29 = vmul.f32 0.33333334, %v10611_v9 }
 0x3a4   :  { %15583 = vst [vmem:[#allocation101_spill] sm:$0xff] %v11336_v46  ;;  %15585 = vst [vmem:[#allocation103_spill] sm:$0xff] %v11351_v18  ;;  %v4095_v60 = vmul.f32 0.33333334, %v10616_v26  ;;  %v4096_v57 = vmul.f32 0.33333334, %v10621_v54 }
 0x3a5   :  { %v4097_v44 = vmul.f32 0.33333334, %v10626_v28  ;;  %15586 = vst [vmem:[#allocation104_spill] sm:$0xff] %v11357_v59  ;;  %v4098_v16 = vmul.f32 0.33333334, %v10631_v25  ;;  %v15587_v2 = vld [vmem:[#allocation172_spill] sm:$0xff] }
 0x3a6   :  { %v4099_v36 = vmul.f32 0.33333334, %v10636_v48  ;;  %v11362_v42 = vmul.f32 0.33333334, %v10641_v12  ;;  %v11365_v9 = vadd.f32 %v4084_v8, %v15587_v2  ;;  %v11368_v19 = vmul.f32 0.33333334, %v10646_v45 }
 0x3a7   :  { %v11371_v26 = vmul.f32 0.33333334, %v10651_v7  ;;  %v11374_v54 = vmul.f32 0.33333334, %v10656_v40  ;;  %v15589_v50 = vld [vmem:[#allocation173_spill] sm:$0xff]  ;;  %v15591_v45 = vld [vmem:[#allocation174_spill] sm:$0xff] }
 0x3a8   :  { %15588 = vst [vmem:[#allocation25_spill] sm:$0xff] %v11365_v9  ;;  %v11377_v28 = vadd.f32 %v4085_v17, %v15589_v50  ;;  %v11380_v25 = vmul.f32 0.33333334, %v10661_v15  ;;  %v11383_v48 = vmul.f32 0.33333334, %v10666_v31  ;;  %v11389_v32 = vadd.f32 %v4086_v58, %v15591_v45  ;;  %v15593_v40 = vld [vmem:[#allocation315_spill] sm:$0xff] }
 0x3a9   :  { %v11386_v12 = vmul.f32 0.33333334, %v10671_v63  ;;  %v11392_v7 = vmul.f32 0.33333334, %v10676_v20  ;;  %v11395_v34 = vmul.f32 0.33333334, %v15593_v40 }
 0x3aa   :  { %15590 = vst [vmem:[#allocation26_spill] sm:$0xff] %v11377_v28  ;;  %15592 = vst [vmem:[#allocation27_spill] sm:$0xff] %v11389_v32  ;;  %v11398_v10 = vmul.f32 0.33333334, %v15594_v35  ;;  %v15595_v15 = vld [vmem:[#allocation175_spill] sm:$0xff]  ;;  %v15597_v31 = vld [vmem:[#allocation49_spill] sm:$0xff] }
 0x3ab   :  { %v11401_v8 = vadd.f32 %v4087_v53, %v15595_v15  ;;  %v11404_v17 = vmul.f32 0.33333334, %v15597_v31  ;;  %v15598_v63 = vld [vmem:[#allocation50_spill] sm:$0xff]  ;;  %v15599_v11 = vld [vmem:[#allocation316_spill] sm:$0xff]  ;;  %v15602_v50 = vld [vmem:[#allocation317_spill] sm:$0xff] }
 0x3ac   :  { %v11407_v55 = vmul.f32 0.33333334, %v15598_v63  ;;  %v11410_v58 = vmul.f32 0.33333334, %v15599_v11  ;;  %v15600_v20 = vld [vmem:[#allocation176_spill] sm:$0xff]  ;;  %v15603_v40 = vld [vmem:[#allocation318_spill] sm:$0xff] }
 0x3ad   :  { %15596 = vst [vmem:[#allocation28_spill] sm:$0xff] %v11401_v8  ;;  %v11413_v2 = vadd.f32 %v4088_v27, %v15600_v20  ;;  %v11416_v45 = vmul.f32 0.33333334, %v15602_v50  ;;  %v11419_v35 = vmul.f32 0.33333334, %v15603_v40  ;;  %v15604_v53 = vld [vmem:[#allocation319_spill] sm:$0xff] }
 0x3ae   :  { %v11422_v15 = vmul.f32 0.33333334, %v15604_v53  ;;  %v15605_v31 = vld [vmem:[#allocation177_spill] sm:$0xff]  ;;  %v15607_v63 = vld [vmem:[#allocation320_spill] sm:$0xff]  ;;  %v15608_v11 = vld [vmem:[#allocation150_spill] sm:$0xff] }
 0x3af   :  { %15601 = vst [vmem:[#allocation105_spill] sm:$0xff] %v11413_v2  ;;  %v11425_v8 = vadd.f32 %v4089_v56, %v15605_v31  ;;  %v11428_v32 = vmul.f32 0.33333334, %v15607_v63  ;;  %v11431_v28 = vmul.f32 0.33333334, %v15608_v11  ;;  %v15609_v27 = vld [vmem:[#allocation321_spill] sm:$0xff] }
 0x3b0   :  { %v11434_v20 = vmul.f32 0.33333334, %v15609_v27  ;;  %v15610_v50 = vld [vmem:[#allocation178_spill] sm:$0xff]  ;;  %v15613_v53 = vld [vmem:[#allocation323_spill] sm:$0xff]  ;;  %v15614_v56 = vld [vmem:[#allocation324_spill] sm:$0xff] }
 0x3b1   :  { %15606 = vst [vmem:[#allocation106_spill] sm:$0xff] %v11425_v8  ;;  %v11437_v2 = vadd.f32 %v4090_v3, %v15610_v50  ;;  %v15612_v40 = vld [vmem:[#allocation322_spill] sm:$0xff]  ;;  %v11443_v59 = vmul.f32 0.33333334, %v15613_v53  ;;  %v11446_v31 = vmul.f32 0.33333334, %v15614_v56 }
 0x3b2   :  { %v11440_v9 = vmul.f32 0.33333334, %v15612_v40  ;;  %v15615_v63 = vld [vmem:[#allocation156_spill] sm:$0xff]  ;;  %v15617_v11 = vld [vmem:[#allocation325_spill] sm:$0xff]  ;;  %v15618_v27 = vld [vmem:[#allocation326_spill] sm:$0xff] }
 0x3b3   :  { %15611 = vst [vmem:[#allocation107_spill] sm:$0xff] %v11437_v2  ;;  %v11449_v8 = vadd.f32 %v4091_v52, %v15615_v63  ;;  %v11452_v18 = vmul.f32 0.33333334, %v15617_v11  ;;  %v11455_v1 = vmul.f32 0.33333334, %v15618_v27  ;;  %v15619_v3 = vld [vmem:[#allocation327_spill] sm:$0xff] }
 0x3b4   :  { %v11458_v50 = vmul.f32 0.33333334, %v15619_v3  ;;  %v15620_v40 = vld [vmem:[#allocation157_spill] sm:$0xff]  ;;  %v15622_v53 = vld [vmem:[#allocation328_spill] sm:$0xff]  ;;  %v15624_v52 = vld [vmem:[#allocation330_spill] sm:$0xff] }
 0x3b5   :  { %15616 = vst [vmem:[#allocation108_spill] sm:$0xff] %v11449_v8  ;;  %v11461_v2 = vadd.f32 %v4092_v24, %v15620_v40  ;;  %v11464_v46 = vmul.f32 0.33333334, %v15622_v53  ;;  %v15623_v56 = vld [vmem:[#allocation329_spill] sm:$0xff]  ;;  %v11470_v63 = vmul.f32 0.33333334, %v15624_v52 }
 0x3b6   :  { %v11467_v51 = vmul.f32 0.33333334, %v15623_v56  ;;  %v15625_v11 = vld [vmem:[#allocation158_spill] sm:$0xff]  ;;  %v15628_v3 = vld [vmem:[#allocation167_spill] sm:$0xff]  ;;  %v15630_v24 = vld [vmem:[#allocation168_spill] sm:$0xff] }
 0x3b7   :  { %15621 = vst [vmem:[#allocation29_spill] sm:$0xff] %v11461_v2  ;;  %v11473_v8 = vadd.f32 %v4093_v23, %v15625_v11  ;;  %v15627_v27 = vld [vmem:[#allocation166_spill] sm:$0xff]  ;;  %v11479_v30 = vmul.f32 0.33333334, %v15628_v3  ;;  %v11482_v40 = vmul.f32 0.33333334, %v15630_v24 }
 0x3b8   :  { %v11476_v49 = vmul.f32 0.33333334, %v15627_v27  ;;  %v15632_v53 = vld [vmem:[#allocation179_spill] sm:$0xff]  ;;  %v15634_v56 = vld [vmem:[#allocation17_spill] sm:$0xff]  ;;  %v15637_v23 = vld [vmem:[#allocation170_spill] sm:$0xff] }
 0x3b9   :  { %15626 = vst [vmem:[#allocation30_spill] sm:$0xff] %v11473_v8  ;;  %15629 = vst [vmem:[#allocation31_spill] sm:$0xff] %v11479_v30  ;;  %v11485_v2 = vadd.f32 %v4094_v29, %v15632_v53  ;;  %v11488_v41 = vmul.f32 0.33333334, %v15634_v56  ;;  %v15635_v52 = vld [vmem:[#allocation169_spill] sm:$0xff]  ;;  %v15639_v27 = vld [vmem:[#allocation159_spill] sm:$0xff] }
 0x3ba   :  { %15631 = vst [vmem:[#allocation32_spill] sm:$0xff] %v11482_v40  ;;  %v11491_v47 = vmul.f32 0.33333334, %v15635_v52  ;;  %v11494_v11 = vmul.f32 0.33333334, %v15637_v23  ;;  %v11497_v8 = vadd.f32 %v4095_v60, %v15639_v27  ;;  %v15641_v3 = vld [vmem:[#allocation171_spill] sm:$0xff] }
 0x3bb   :  { %15633 = vst [vmem:[#allocation109_spill] sm:$0xff] %v11485_v2  ;;  %v11500_v30 = vmul.f32 0.33333334, %v15641_v3  ;;  %v15642_v24 = vld [vmem:[#allocation190_spill] sm:$0xff]  ;;  %v15644_v29 = vld [vmem:[#allocation191_spill] sm:$0xff]  ;;  %v15646_v56 = vld [vmem:[#allocation160_spill] sm:$0xff] }
 0x3bc   :  { %15636 = vst [vmem:[#allocation110_spill] sm:$0xff] %v11491_v47  ;;  %15638 = vst [vmem:[#allocation111_spill] sm:$0xff] %v11494_v11  ;;  %v11503_v40 = vmul.f32 0.33333334, %v15642_v24  ;;  %v11506_v53 = vmul.f32 0.33333334, %v15644_v29  ;;  %v11509_v2 = vadd.f32 %v4096_v57, %v15646_v56 }
 0x3bd   :  { %15640 = vst [vmem:[#allocation112_spill] sm:$0xff] %v11497_v8  ;;  %v15648_v52 = vld [vmem:[#allocation192_spill] sm:$0xff]  ;;  %v15649_v23 = vld [vmem:[#allocation193_spill] sm:$0xff]  ;;  %v15658_v57 = vld [vmem:[#allocation182_spill] sm:$0xff] }
 0x3be   :  { %15643 = vst [vmem:[#allocation33_spill] sm:$0xff] %v11503_v40  ;;  %15645 = vst [vmem:[#allocation34_spill] sm:$0xff] %v11506_v53  ;;  %v11512_v47 = vmul.f32 0.33333334, %v15648_v52  ;;  %v11515_v11 = vmul.f32 0.33333334, %v15649_v23 }
 0x3bf   :  { %15647 = vst [vmem:[#allocation340_spill] sm:$0xff] %v11509_v2  ;;  %v15651_v60 = vld [vmem:[#allocation180_spill] sm:$0xff]  ;;  %v15656_v29 = vld [vmem:[#allocation181_spill] sm:$0xff]  ;;  %v11530_v56 = vmul.f32 0.33333334, %v15658_v57  ;;  %v15660_v52 = vld [vmem:[#allocation195_spill] sm:$0xff] }
 0x3c0   :  { %15650 = vst [vmem:[#allocation36_spill] sm:$0xff] %v11515_v11  ;;  %v11518_v27 = vmul.f32 0.33333334, %v15651_v60  ;;  %v15653_v3 = vld [vmem:[#allocation8_spill] sm:$0xff]  ;;  %v11527_v53 = vmul.f32 0.33333334, %v15656_v29  ;;  %v11533_v2 = vadd.f32 %v4098_v16, %v15660_v52 }
 0x3c1   :  { %v11521_v8 = vadd.f32 %v4097_v44, %v15653_v3  ;;  %v15655_v24 = vld [vmem:[#allocation188_spill] sm:$0xff]  ;;  %15659 = vst [vmem:[#allocation116_spill] sm:$0xff] %v11530_v56  ;;  %v15662_v23 = vld [vmem:[#allocation183_spill] sm:$0xff]  ;;  %v15665_v44 = vld [vmem:[#allocation185_spill] sm:$0xff] }
 0x3c2   :  { %15652 = vst [vmem:[#allocation113_spill] sm:$0xff] %v11518_v27  ;;  %v11524_v40 = vmul.f32 0.33333334, %v15655_v24  ;;  %15657 = vst [vmem:[#allocation115_spill] sm:$0xff] %v11527_v53  ;;  %v11536_v11 = vmul.f32 0.33333334, %v15662_v23 }
 0x3c3   :  { %15654 = vst [vmem:[#allocation114_spill] sm:$0xff] %v11521_v8  ;;  %15661 = vst [vmem:[#allocation37_spill] sm:$0xff] %v11533_v2  ;;  %v15663_v60 = vld [vmem:[#allocation184_spill] sm:$0xff]  ;;  %v11542_v3 = vmul.f32 0.33333334, %v15665_v44  ;;  %v15668_v29 = vld [vmem:[#allocation186_spill] sm:$0xff] }
 0x3c4   :  { %v11539_v27 = vmul.f32 0.33333334, %v15663_v60  ;;  %v15666_v24 = vld [vmem:[#allocation196_spill] sm:$0xff]  ;;  %v11548_v53 = vmul.f32 0.33333334, %v15668_v29  ;;  %v15669_v57 = vld [vmem:[#allocation187_spill] sm:$0xff] }
 0x3c5   :  { %v11545_v8 = vadd.f32 %v4099_v36, %v15666_v24  ;;  %v11551_v56 = vmul.f32 0.33333334, %v15669_v57  ;;  %v15670_v16 = vld [vmem:[#allocation189_spill] sm:$0xff]  ;;  %v15673_v60 = vld [vmem:[#allocation194_spill] sm:$0xff]  ;;  %v11564_v44 = vmul.f32 0.33333334, %v10891_v39 }
 0x3c6   :  { %15664 = vst [vmem:[#allocation38_spill] sm:$0xff] %v11539_v27  ;;  %v11554_v52 = vmul.f32 0.33333334, %v15670_v16  ;;  %v15671_v23 = vld [vmem:[#allocation197_spill] sm:$0xff]  ;;  %v11561_v27 = vmul.f32 0.33333334, %v15673_v60 }
 0x3c7   :  { %15667 = vst [vmem:[#allocation39_spill] sm:$0xff] %v11545_v8  ;;  %v11558_v2 = vadd.f32 %v11362_v42, %v15671_v23  ;;  %v11567_v36 = vmul.f32 0.33333334, %v10896_v37  ;;  %v15674_v24 = vld [vmem:[#allocation198_spill] sm:$0xff]  ;;  %v11574_v57 = vmul.f32 0.33333334, %v10901_v0 }
 0x3c8   :  { %v11571_v29 = vadd.f32 %v11368_v19, %v15674_v24  ;;  %v11577_v16 = vmul.f32 0.33333334, %v10906_v6  ;;  %v11580_v42 = vmul.f32 0.33333334, %v10911_v43  ;;  %v15676_v23 = vld [vmem:[#allocation199_spill] sm:$0xff]  ;;  %v15678_v0 = vld [vmem:[#allocation200_spill] sm:$0xff] }
 0x3c9   :  { %15672 = vst [vmem:[#allocation40_spill] sm:$0xff] %v11558_v2  ;;  %v11584_v39 = vadd.f32 %v11371_v26, %v15676_v23  ;;  %v11587_v37 = vmul.f32 0.33333334, %v10916_v4  ;;  %v11590_v60 = vmul.f32 0.33333334, %v10921_v22  ;;  %v11597_v6 = vadd.f32 %v11374_v54, %v15678_v0  ;;  %v15680_v26 = vld [vmem:[#allocation58_spill] sm:$0xff] }
 0x3ca   :  { %15675 = vst [vmem:[#allocation341_spill] sm:$0xff] %v11571_v29  ;;  %v11593_v19 = vmul.f32 0.33333334, %v10926_v13  ;;  %v11600_v43 = vmul.f32 0.33333334, %v10931_v21  ;;  %v15682_v4 = vld [vmem:[#allocation201_spill] sm:$0xff] }
 0x3cb   :  { %15677 = vst [vmem:[#allocation342_spill] sm:$0xff] %v11584_v39  ;;  %15679 = vst [vmem:[#allocation343_spill] sm:$0xff] %v11597_v6  ;;  %v11603_v24 = vmul.f32 0.33333334, %v10936_v5  ;;  %v11606_v23 = vmul.f32 0.33333334, %v15680_v26  ;;  %v11610_v22 = vadd.f32 %v11380_v25, %v15682_v4 }
 0x3cc   :  { %v15684_v2 = vld [vmem:[#allocation59_spill] sm:$0xff]  ;;  %v15685_v8 = vld [vmem:[#allocation60_spill] sm:$0xff]  ;;  %v15687_v54 = vld [vmem:[#allocation61_spill] sm:$0xff] }
 0x3cd   :  { %15681 = vst [vmem:[#allocation120_spill] sm:$0xff] %v11606_v23  ;;  %15683 = vst [vmem:[#allocation41_spill] sm:$0xff] %v11610_v22  ;;  %v11613_v13 = vmul.f32 0.33333334, %v15684_v2  ;;  %v11616_v39 = vmul.f32 0.33333334, %v15685_v8 }
 0x3ce   :  { %v11619_v0 = vmul.f32 0.33333334, %v15687_v54  ;;  %v15689_v21 = vld [vmem:[#allocation53_spill] sm:$0xff]  ;;  %v15691_v6 = vld [vmem:[#allocation131_spill] sm:$0xff]  ;;  %v15692_v29 = vld [vmem:[#allocation132_spill] sm:$0xff] }
 0x3cf   :  { %15686 = vst [vmem:[#allocation42_spill] sm:$0xff] %v11616_v39  ;;  %v11623_v5 = vadd.f32 %v11383_v48, %v15689_v21  ;;  %v11626_v26 = vmul.f32 0.33333334, %v15691_v6  ;;  %v11629_v23 = vmul.f32 0.33333334, %v15692_v29  ;;  %v15694_v25 = vld [vmem:[#allocation62_spill] sm:$0xff] }
 0x3d0   :  { %15688 = vst [vmem:[#allocation43_spill] sm:$0xff] %v11619_v0  ;;  %v11632_v4 = vmul.f32 0.33333334, %v15694_v25  ;;  %v15696_v2 = vld [vmem:[#allocation202_spill] sm:$0xff]  ;;  %v15698_v22 = vld [vmem:[#allocation63_spill] sm:$0xff]  ;;  %v15699_v0 = vld [vmem:[#allocation64_spill] sm:$0xff] }
 0x3d1   :  { %15690 = vst [vmem:[#allocation44_spill] sm:$0xff] %v11623_v5  ;;  %15693 = vst [vmem:[#allocation121_spill] sm:$0xff] %v11629_v23  ;;  %v11636_v8 = vadd.f32 %v11386_v12, %v15696_v2  ;;  %v11639_v54 = vmul.f32 0.33333334, %v15698_v22  ;;  %v11642_v39 = vmul.f32 0.33333334, %v15699_v0 }
 0x3d2   :  { %15695 = vst [vmem:[#allocation344_spill] sm:$0xff] %v11632_v4  ;;  %v15701_v48 = vld [vmem:[#allocation133_spill] sm:$0xff]  ;;  %v15703_v6 = vld [vmem:[#allocation54_spill] sm:$0xff]  ;;  %v15706_v4 = vld [vmem:[#allocation135_spill] sm:$0xff] }
 0x3d3   :  { %15697 = vst [vmem:[#allocation345_spill] sm:$0xff] %v11636_v8  ;;  %15700 = vst [vmem:[#allocation346_spill] sm:$0xff] %v11642_v39  ;;  %v11645_v21 = vmul.f32 0.33333334, %v15701_v48  ;;  %v11649_v29 = vadd.f32 %v11392_v7, %v15703_v6  ;;  %v15705_v5 = vld [vmem:[#allocation134_spill] sm:$0xff]  ;;  %v15708_v12 = vld [vmem:[#allocation136_spill] sm:$0xff] }
 0x3d4   :  { %v11652_v25 = vmul.f32 0.33333334, %v15705_v5  ;;  %v11655_v23 = vmul.f32 0.33333334, %v15706_v4  ;;  %v11658_v2 = vmul.f32 0.33333334, %v15708_v12 }
 0x3d5   :  { %15702 = vst [vmem:[#allocation347_spill] sm:$0xff] %v11645_v21  ;;  %15704 = vst [vmem:[#allocation149_spill] sm:$0xff] %v11649_v29  ;;  %v15710_v22 = vld [vmem:[#allocation203_spill] sm:$0xff]  ;;  %v15712_v8 = vld [vmem:[#allocation137_spill] sm:$0xff] }
 0x3d6   :  { %15707 = vst [vmem:[#allocation46_spill] sm:$0xff] %v11655_v23  ;;  %15709 = vst [vmem:[#allocation47_spill] sm:$0xff] %v11658_v2  ;;  %v11662_v0 = vadd.f32 %v11395_v34, %v15710_v22  ;;  %v11665_v48 = vmul.f32 0.33333334, %v15712_v8  ;;  %v15713_v21 = vld [vmem:[#allocation65_spill] sm:$0xff]  ;;  %v15715_v7 = vld [vmem:[#allocation66_spill] sm:$0xff] }
 0x3d7   :  { %v11668_v39 = vmul.f32 0.33333334, %v15713_v21  ;;  %v11671_v6 = vmul.f32 0.33333334, %v15715_v7  ;;  %v15717_v5 = vld [vmem:[#allocation55_spill] sm:$0xff]  ;;  %v15720_v2 = vld [vmem:[#allocation138_spill] sm:$0xff] }
 0x3d8   :  { %15711 = vst [vmem:[#allocation48_spill] sm:$0xff] %v11662_v0  ;;  %v11675_v4 = vadd.f32 %v11398_v10, %v15717_v5  ;;  %v15719_v29 = vld [vmem:[#allocation67_spill] sm:$0xff]  ;;  %v11681_v23 = vmul.f32 0.33333334, %v15720_v2  ;;  %v15724_v8 = vld [vmem:[#allocation204_spill] sm:$0xff]  ;;  %v15729_v10 = vld [vmem:[#allocation141_spill] sm:$0xff] }
 0x3d9   :  { %15714 = vst [vmem:[#allocation125_spill] sm:$0xff] %v11668_v39  ;;  %15716 = vst [vmem:[#allocation126_spill] sm:$0xff] %v11671_v6  ;;  %v11678_v12 = vmul.f32 0.33333334, %v15719_v29  ;;  %v15722_v34 = vld [vmem:[#allocation139_spill] sm:$0xff]  ;;  %v11688_v21 = vadd.f32 %v11404_v17, %v15724_v8  ;;  %v15726_v0 = vld [vmem:[#allocation68_spill] sm:$0xff] }
 0x3da   :  { %15718 = vst [vmem:[#allocation348_spill] sm:$0xff] %v11675_v4  ;;  %15721 = vst [vmem:[#allocation349_spill] sm:$0xff] %v11681_v23  ;;  %v11684_v22 = vmul.f32 0.33333334, %v15722_v34  ;;  %v11691_v7 = vmul.f32 0.33333334, %v15726_v0 }
 0x3db   :  { %15725 = vst [vmem:[#allocation51_spill] sm:$0xff] %v11688_v21  ;;  %v15727_v6 = vld [vmem:[#allocation140_spill] sm:$0xff]  ;;  %v11697_v5 = vmul.f32 0.33333334, %v15729_v10  ;;  %v15731_v29 = vld [vmem:[#allocation215_spill] sm:$0xff]  ;;  %v15733_v4 = vld [vmem:[#allocation69_spill] sm:$0xff] }
 0x3dc   :  { %15723 = vst [vmem:[#allocation350_spill] sm:$0xff] %v11684_v22  ;;  %v11694_v39 = vmul.f32 0.33333334, %v15727_v6  ;;  %v11701_v2 = vadd.f32 %v11407_v55, %v15731_v29  ;;  %v11704_v34 = vmul.f32 0.33333334, %v15733_v4  ;;  %v15734_v22 = vld [vmem:[#allocation70_spill] sm:$0xff] }
 0x3dd   :  { %15730 = vst [vmem:[#allocation128_spill] sm:$0xff] %v11697_v5  ;;  %v11707_v23 = vmul.f32 0.33333334, %v15734_v22  ;;  %v15736_v17 = vld [vmem:[#allocation71_spill] sm:$0xff]  ;;  %v15738_v0 = vld [vmem:[#allocation56_spill] sm:$0xff]  ;;  %v15741_v5 = vld [vmem:[#allocation142_spill] sm:$0xff] }
 0x3de   :  { %15728 = vst [vmem:[#allocation52_spill] sm:$0xff] %v11694_v39  ;;  %15732 = vst [vmem:[#allocation129_spill] sm:$0xff] %v11701_v2  ;;  %v11710_v8 = vmul.f32 0.33333334, %v15736_v17  ;;  %v11714_v6 = vadd.f32 %v11410_v58, %v15738_v0  ;;  %v15740_v21 = vld [vmem:[#allocation72_spill] sm:$0xff]  ;;  %v15743_v55 = vld [vmem:[#allocation143_spill] sm:$0xff] }
 0x3df   :  { %15735 = vst [vmem:[#allocation130_spill] sm:$0xff] %v11707_v23  ;;  %v11717_v10 = vmul.f32 0.33333334, %v15740_v21  ;;  %v11720_v39 = vmul.f32 0.33333334, %v15741_v5  ;;  %v15745_v4 = vld [vmem:[#allocation57_spill] sm:$0xff] }
 0x3e0   :  { %15737 = vst [vmem:[#allocation351_spill] sm:$0xff] %v11710_v8  ;;  %15739 = vst [vmem:[#allocation151_spill] sm:$0xff] %v11714_v6  ;;  %v11723_v29 = vmul.f32 0.33333334, %v15743_v55  ;;  %v11727_v22 = vadd.f32 %v11416_v45, %v15745_v4  ;;  %v15747_v2 = vld [vmem:[#allocation144_spill] sm:$0xff]  ;;  %v15748_v8 = vld [vmem:[#allocation145_spill] sm:$0xff] }
 0x3e1   :  { %15742 = vst [vmem:[#allocation152_spill] sm:$0xff] %v11720_v39  ;;  %v11730_v17 = vmul.f32 0.33333334, %v15747_v2  ;;  %v11733_v23 = vmul.f32 0.33333334, %v15748_v8  ;;  %v15750_v58 = vld [vmem:[#allocation73_spill] sm:$0xff] }
 0x3e2   :  { %15744 = vst [vmem:[#allocation153_spill] sm:$0xff] %v11723_v29  ;;  %15746 = vst [vmem:[#allocation154_spill] sm:$0xff] %v11727_v22  ;;  %v11736_v0 = vmul.f32 0.33333334, %v15750_v58  ;;  %v15752_v21 = vld [vmem:[#allocation216_spill] sm:$0xff]  ;;  %v15754_v6 = vld [vmem:[#allocation74_spill] sm:$0xff] }
 0x3e3   :  { %15749 = vst [vmem:[#allocation155_spill] sm:$0xff] %v11733_v23  ;;  %v11740_v5 = vadd.f32 %v11419_v35, %v15752_v21  ;;  %v11743_v55 = vmul.f32 0.33333334, %v15754_v6  ;;  %v15755_v29 = vld [vmem:[#allocation75_spill] sm:$0xff]  ;;  %v15757_v45 = vld [vmem:[#allocation76_spill] sm:$0xff]  ;;  %v15759_v2 = vld [vmem:[#allocation217_spill] sm:$0xff] }
 0x3e4   :  { %15751 = vst [vmem:[#allocation161_spill] sm:$0xff] %v11736_v0  ;;  %v11746_v39 = vmul.f32 0.33333334, %v15755_v29  ;;  %v11749_v4 = vmul.f32 0.33333334, %v15757_v45  ;;  %v11753_v8 = vadd.f32 %v11422_v15, %v15759_v2  ;;  %v15761_v22 = vld [vmem:[#allocation146_spill] sm:$0xff] }
 0x3e5   :  { %15753 = vst [vmem:[#allocation162_spill] sm:$0xff] %v11740_v5  ;;  %v11756_v58 = vmul.f32 0.33333334, %v15761_v22  ;;  %v15762_v0 = vld [vmem:[#allocation147_spill] sm:$0xff]  ;;  %v15764_v35 = vld [vmem:[#allocation148_spill] sm:$0xff]  ;;  %v15766_v6 = vld [vmem:[#allocation218_spill] sm:$0xff] }
 0x3e6   :  { %15756 = vst [vmem:[#allocation163_spill] sm:$0xff] %v11746_v39  ;;  %15758 = vst [vmem:[#allocation164_spill] sm:$0xff] %v11749_v4  ;;  %v11759_v23 = vmul.f32 0.33333334, %v15762_v0  ;;  %v11762_v21 = vmul.f32 0.33333334, %v15764_v35  ;;  %v11766_v29 = vadd.f32 %v11428_v32, %v15766_v6 }
 0x3e7   :  { %15760 = vst [vmem:[#allocation165_spill] sm:$0xff] %v11753_v8  ;;  %v15768_v5 = vld [vmem:[#allocation77_spill] sm:$0xff]  ;;  %v15769_v4 = vld [vmem:[#allocation78_spill] sm:$0xff]  ;;  %v15771_v15 = vld [vmem:[#allocation79_spill] sm:$0xff] }
 0x3e8   :  { %15763 = vst [vmem:[#allocation172_spill] sm:$0xff] %v11759_v23  ;;  %15765 = vst [vmem:[#allocation173_spill] sm:$0xff] %v11762_v21  ;;  %v11769_v45 = vmul.f32 0.33333334, %v15768_v5  ;;  %v11772_v39 = vmul.f32 0.33333334, %v15769_v4 }
 0x3e9   :  { %15767 = vst [vmem:[#allocation174_spill] sm:$0xff] %v11766_v29  ;;  %v11775_v2 = vmul.f32 0.33333334, %v15771_v15  ;;  %v15773_v22 = vld [vmem:[#allocation219_spill] sm:$0xff]  ;;  %v15775_v8 = vld [vmem:[#allocation80_spill] sm:$0xff]  ;;  %v15776_v21 = vld [vmem:[#allocation81_spill] sm:$0xff] }
 0x3ea   :  { %15770 = vst [vmem:[#allocation315_spill] sm:$0xff] %v11772_v39  ;;  %v11779_v0 = vadd.f32 %v11431_v28, %v15773_v22  ;;  %v11782_v35 = vmul.f32 0.33333334, %v15775_v8  ;;  %v11785_v23 = vmul.f32 0.33333334, %v15776_v21  ;;  %v15778_v32 = vld [vmem:[#allocation82_spill] sm:$0xff] }
 0x3eb   :  { %15772 = vst [vmem:[#allocation127_spill] sm:$0xff] %v11775_v2  ;;  %v11788_v6 = vmul.f32 0.33333334, %v15778_v32  ;;  %v15780_v5 = vld [vmem:[#allocation220_spill] sm:$0xff]  ;;  %v15782_v29 = vld [vmem:[#allocation83_spill] sm:$0xff]  ;;  %v15785_v28 = vld [vmem:[#allocation85_spill] sm:$0xff] }
 0x3ec   :  { %15774 = vst [vmem:[#allocation175_spill] sm:$0xff] %v11779_v0  ;;  %15777 = vst [vmem:[#allocation49_spill] sm:$0xff] %v11785_v23  ;;  %v11792_v4 = vadd.f32 %v11434_v20, %v15780_v5  ;;  %v11795_v15 = vmul.f32 0.33333334, %v15782_v29  ;;  %v15783_v2 = vld [vmem:[#allocation84_spill] sm:$0xff]  ;;  %v15787_v8 = vld [vmem:[#allocation221_spill] sm:$0xff] }
 0x3ed   :  { %15779 = vst [vmem:[#allocation50_spill] sm:$0xff] %v11788_v6  ;;  %v11798_v39 = vmul.f32 0.33333334, %v15783_v2  ;;  %v11801_v22 = vmul.f32 0.33333334, %v15785_v28  ;;  %v11805_v21 = vadd.f32 %v11440_v9, %v15787_v8  ;;  %v15789_v0 = vld [vmem:[#allocation86_spill] sm:$0xff] }
 0x3ee   :  { %15781 = vst [vmem:[#allocation316_spill] sm:$0xff] %v11792_v4  ;;  %v11808_v32 = vmul.f32 0.33333334, %v15789_v0  ;;  %v15790_v6 = vld [vmem:[#allocation87_spill] sm:$0xff]  ;;  %v15792_v20 = vld [vmem:[#allocation88_spill] sm:$0xff]  ;;  %v15794_v29 = vld [vmem:[#allocation222_spill] sm:$0xff] }
 0x3ef   :  { %15784 = vst [vmem:[#allocation176_spill] sm:$0xff] %v11798_v39  ;;  %15786 = vst [vmem:[#allocation317_spill] sm:$0xff] %v11801_v22  ;;  %v11811_v23 = vmul.f32 0.33333334, %v15790_v6  ;;  %v11814_v5 = vmul.f32 0.33333334, %v15792_v20  ;;  %v11818_v2 = vadd.f32 %v11443_v59, %v15794_v29 }
 0x3f0   :  { %15788 = vst [vmem:[#allocation318_spill] sm:$0xff] %v11805_v21  ;;  %v15796_v4 = vld [vmem:[#allocation9_spill] sm:$0xff]  ;;  %v15797_v22 = vld [vmem:[#allocation10_spill] sm:$0xff]  ;;  %v15799_v9 = vld [vmem:[#allocation11_spill] sm:$0xff] }
 0x3f1   :  { %15791 = vst [vmem:[#allocation319_spill] sm:$0xff] %v11811_v23  ;;  %15793 = vst [vmem:[#allocation177_spill] sm:$0xff] %v11814_v5  ;;  %v11821_v28 = vmul.f32 0.33333334, %v15796_v4  ;;  %v11824_v39 = vmul.f32 0.33333334, %v15797_v22 }
 0x3f2   :  { %15795 = vst [vmem:[#allocation320_spill] sm:$0xff] %v11818_v2  ;;  %v11827_v8 = vmul.f32 0.33333334, %v15799_v9  ;;  %v15801_v0 = vld [vmem:[#allocation223_spill] sm:$0xff]  ;;  %v15803_v21 = vld [vmem:[#allocation12_spill] sm:$0xff]  ;;  %v15804_v5 = vld [vmem:[#allocation89_spill] sm:$0xff] }
 0x3f3   :  { %15798 = vst [vmem:[#allocation150_spill] sm:$0xff] %v11824_v39  ;;  %v11831_v6 = vadd.f32 %v11446_v31, %v15801_v0  ;;  %v11834_v20 = vmul.f32 0.33333334, %v15803_v21  ;;  %v11837_v23 = vmul.f32 0.33333334, %v15804_v5  ;;  %v15806_v59 = vld [vmem:[#allocation90_spill] sm:$0xff] }
 0x3f4   :  { %15800 = vst [vmem:[#allocation321_spill] sm:$0xff] %v11827_v8  ;;  %v11840_v29 = vmul.f32 0.33333334, %v15806_v59  ;;  %v15808_v4 = vld [vmem:[#allocation224_spill] sm:$0xff]  ;;  %v15810_v2 = vld [vmem:[#allocation91_spill] sm:$0xff]  ;;  %v15815_v21 = vld [vmem:[#allocation225_spill] sm:$0xff] }
 0x3f5   :  { %15802 = vst [vmem:[#allocation178_spill] sm:$0xff] %v11831_v6  ;;  %15805 = vst [vmem:[#allocation322_spill] sm:$0xff] %v11837_v23  ;;  %v11844_v22 = vadd.f32 %v11452_v18, %v15808_v4  ;;  %v11847_v9 = vmul.f32 0.33333334, %v15810_v2  ;;  %v15811_v8 = vld [vmem:[#allocation331_spill] sm:$0xff]  ;;  %v15813_v31 = vld [vmem:[#allocation332_spill] sm:$0xff]  ;;  %v11857_v5 = vadd.f32 %v11455_v1, %v15815_v21 }
 0x3f6   :  { %15807 = vst [vmem:[#allocation323_spill] sm:$0xff] %v11840_v29  ;;  %v11850_v39 = vmul.f32 0.33333334, %v15811_v8  ;;  %v11853_v0 = vmul.f32 0.33333334, %v15813_v31  ;;  %v15817_v6 = vld [vmem:[#allocation333_spill] sm:$0xff] }
 0x3f7   :  { %15809 = vst [vmem:[#allocation324_spill] sm:$0xff] %v11844_v22  ;;  %15816 = vst [vmem:[#allocation326_spill] sm:$0xff] %v11857_v5  ;;  %v11860_v59 = vmul.f32 0.33333334, %v15817_v6  ;;  %v15818_v29 = vld [vmem:[#allocation334_spill] sm:$0xff]  ;;  %v15820_v18 = vld [vmem:[#allocation335_spill] sm:$0xff] }
 0x3f8   :  { %15812 = vst [vmem:[#allocation156_spill] sm:$0xff] %v11850_v39  ;;  %15814 = vst [vmem:[#allocation325_spill] sm:$0xff] %v11853_v0  ;;  %v11863_v23 = vmul.f32 0.33333334, %v15818_v29  ;;  %v11866_v4 = vmul.f32 0.33333334, %v15820_v18 }
 0x3f9   :  { %v15822_v2 = vld [vmem:[#allocation226_spill] sm:$0xff]  ;;  %v15824_v22 = vld [vmem:[#allocation336_spill] sm:$0xff]  ;;  %v15825_v0 = vld [vmem:[#allocation337_spill] sm:$0xff] }
 0x3fa   :  { %15819 = vst [vmem:[#allocation327_spill] sm:$0xff] %v11863_v23  ;;  %15821 = vst [vmem:[#allocation157_spill] sm:$0xff] %v11866_v4  ;;  %v11870_v8 = vadd.f32 %v11458_v50, %v15822_v2  ;;  %v11873_v31 = vmul.f32 0.33333334, %v15824_v22  ;;  %v11876_v39 = vmul.f32 0.33333334, %v15825_v0 }
 0x3fb   :  { %v15827_v1 = vld [vmem:[#allocation338_spill] sm:$0xff]  ;;  %v15829_v6 = vld [vmem:[#allocation227_spill] sm:$0xff]  ;;  %v15833_v50 = vld [vmem:[#allocation20_spill] sm:$0xff] }
 0x3fc   :  { %15823 = vst [vmem:[#allocation328_spill] sm:$0xff] %v11870_v8  ;;  %15826 = vst [vmem:[#allocation329_spill] sm:$0xff] %v11876_v39  ;;  %v11879_v21 = vmul.f32 0.33333334, %v15827_v1  ;;  %v11883_v29 = vadd.f32 %v11464_v46, %v15829_v6  ;;  %v15831_v5 = vld [vmem:[#allocation18_spill] sm:$0xff]  ;;  %v15832_v4 = vld [vmem:[#allocation19_spill] sm:$0xff] }
 0x3fd   :  { %v11886_v18 = vmul.f32 0.33333334, %v15831_v5  ;;  %v11889_v23 = vmul.f32 0.33333334, %v15832_v4  ;;  %v11892_v2 = vmul.f32 0.33333334, %v15833_v50 }
 0x3fe   :  { %15828 = vst [vmem:[#allocation330_spill] sm:$0xff] %v11879_v21  ;;  %15830 = vst [vmem:[#allocation158_spill] sm:$0xff] %v11883_v29  ;;  %v15834_v22 = vld [vmem:[#allocation228_spill] sm:$0xff]  ;;  %v15836_v8 = vld [vmem:[#allocation97_spill] sm:$0xff]  ;;  %v11912_v50 = vmul.f32 0.33333334, %v11281_v38 }
 0x3ff   :  { %v11896_v0 = vadd.f32 %v11467_v51, %v15834_v22  ;;  %v11899_v1 = vmul.f32 0.33333334, %v15836_v8  ;;  %v15837_v21 = vld [vmem:[#allocation98_spill] sm:$0xff]  ;;  %v15838_v46 = vld [vmem:[#allocation339_spill] sm:$0xff]  ;;  %v15839_v5 = vld [vmem:[#allocation229_spill] sm:$0xff] }
 0x400   :  { %v11902_v39 = vmul.f32 0.33333334, %v15837_v21  ;;  %v11905_v6 = vmul.f32 0.33333334, %v15838_v46  ;;  %v11909_v4 = vadd.f32 %v11470_v63, %v15839_v5  ;;  %v11915_v29 = vmul.f32 0.33333334, %v11286_v62 }
 0x401   :  { %15835 = vst [vmem:[#allocation166_spill] sm:$0xff] %v11896_v0  ;;  %v11918_v51 = vmul.f32 0.33333334, %v11291_v14  ;;  %v15843_v8 = vld [vmem:[#allocation230_spill] sm:$0xff]  ;;  %v11925_v22 = vmul.f32 0.33333334, %v11296_v33 }
 0x402   :  { %15840 = vst [vmem:[#allocation167_spill] sm:$0xff] %v11909_v4  ;;  %15841 = vst [vmem:[#allocation168_spill] sm:$0xff] %v11915_v29  ;;  %v11922_v21 = vadd.f32 %v11476_v49, %v15843_v8  ;;  %v11928_v46 = vmul.f32 0.33333334, %v11301_v61  ;;  %v15847_v63 = vld [vmem:[#allocation100_spill] sm:$0xff]  ;;  %v15849_v38 = vld [vmem:[#allocation231_spill] sm:$0xff] }
 0x403   :  { %15842 = vst [vmem:[#allocation179_spill] sm:$0xff] %v11918_v51  ;;  %15845 = vst [vmem:[#allocation169_spill] sm:$0xff] %v11925_v22  ;;  %v11931_v5 = vmul.f32 0.33333334, %v15847_v63  ;;  %v15850_v4 = vld [vmem:[#allocation31_spill] sm:$0xff]  ;;  %v15852_v0 = vld [vmem:[#allocation21_spill] sm:$0xff] }
 0x404   :  { %15844 = vst [vmem:[#allocation17_spill] sm:$0xff] %v11922_v21  ;;  %15846 = vst [vmem:[#allocation170_spill] sm:$0xff] %v11928_v46  ;;  %v11935_v62 = vadd.f32 %v15850_v4, %v15849_v38  ;;  %v11938_v14 = vmul.f32 0.33333334, %v15852_v0  ;;  %v15853_v51 = vld [vmem:[#allocation22_spill] sm:$0xff]  ;;  %v15855_v49 = vld [vmem:[#allocation23_spill] sm:$0xff] }
 0x405   :  { %15848 = vst [vmem:[#allocation159_spill] sm:$0xff] %v11931_v5  ;;  %v11941_v29 = vmul.f32 0.33333334, %v15853_v51  ;;  %v11944_v8 = vmul.f32 0.33333334, %v15855_v49  ;;  %v15857_v33 = vld [vmem:[#allocation232_spill] sm:$0xff] }
 0x406   :  { %15851 = vst [vmem:[#allocation171_spill] sm:$0xff] %v11935_v62  ;;  %v15858_v21 = vld [vmem:[#allocation32_spill] sm:$0xff]  ;;  %v15862_v5 = vld [vmem:[#allocation101_spill] sm:$0xff]  ;;  %v15865_v38 = vld [vmem:[#allocation234_spill] sm:$0xff] }
 0x407   :  { %15854 = vst [vmem:[#allocation190_spill] sm:$0xff] %v11941_v29  ;;  %15856 = vst [vmem:[#allocation191_spill] sm:$0xff] %v11944_v8  ;;  %v11948_v61 = vadd.f32 %v15858_v21, %v15857_v33  ;;  %v15860_v46 = vld [vmem:[#allocation24_spill] sm:$0xff]  ;;  %v11954_v22 = vmul.f32 0.33333334, %v15862_v5  ;;  %v15864_v4 = vld [vmem:[#allocation233_spill] sm:$0xff] }
 0x408   :  { %v11951_v63 = vmul.f32 0.33333334, %v15860_v46  ;;  %v11958_v0 = vadd.f32 %v11488_v41, %v15864_v4  ;;  %v15866_v51 = vld [vmem:[#allocation110_spill] sm:$0xff]  ;;  %v15868_v49 = vld [vmem:[#allocation235_spill] sm:$0xff]  ;;  %v15871_v21 = vld [vmem:[#allocation236_spill] sm:$0xff] }
 0x409   :  { %15859 = vst [vmem:[#allocation160_spill] sm:$0xff] %v11948_v61  ;;  %15863 = vst [vmem:[#allocation193_spill] sm:$0xff] %v11954_v22  ;;  %v11962_v62 = vadd.f32 %v15866_v51, %v15865_v38  ;;  %v15869_v8 = vld [vmem:[#allocation111_spill] sm:$0xff]  ;;  %v11970_v33 = vadd.f32 %v11500_v30, %v15871_v21  ;;  %v15872_v46 = vld [vmem:[#allocation237_spill] sm:$0xff] }
 0x40a   :  { %15861 = vst [vmem:[#allocation192_spill] sm:$0xff] %v11951_v63  ;;  %v11966_v29 = vadd.f32 %v15869_v8, %v15868_v49  ;;  %v15873_v61 = vld [vmem:[#allocation33_spill] sm:$0xff]  ;;  %v15875_v22 = vld [vmem:[#allocation238_spill] sm:$0xff]  ;;  %v15878_v4 = vld [vmem:[#allocation239_spill] sm:$0xff] }
 0x40b   :  { %15867 = vst [vmem:[#allocation180_spill] sm:$0xff] %v11962_v62  ;;  %v11974_v5 = vadd.f32 %v15873_v61, %v15872_v46  ;;  %v15876_v63 = vld [vmem:[#allocation34_spill] sm:$0xff]  ;;  %v11982_v38 = vadd.f32 %v11512_v47, %v15878_v4  ;;  %v15879_v51 = vld [vmem:[#allocation240_spill] sm:$0xff]  ;;  %v15882_v49 = vld [vmem:[#allocation241_spill] sm:$0xff] }
 0x40c   :  { %15870 = vst [vmem:[#allocation8_spill] sm:$0xff] %v11966_v29  ;;  %v11978_v41 = vadd.f32 %v15876_v63, %v15875_v22  ;;  %v15880_v62 = vld [vmem:[#allocation36_spill] sm:$0xff]  ;;  %v15883_v29 = vld [vmem:[#allocation113_spill] sm:$0xff]  ;;  %v15884_v21 = vld [vmem:[#allocation242_spill] sm:$0xff] }
 0x40d   :  { %15874 = vst [vmem:[#allocation188_spill] sm:$0xff] %v11974_v5  ;;  %v11986_v8 = vadd.f32 %v15880_v62, %v15879_v51  ;;  %v11990_v30 = vadd.f32 %v15883_v29, %v15882_v49  ;;  %v11994_v61 = vadd.f32 %v11524_v40, %v15884_v21  ;;  %v15886_v46 = vld [vmem:[#allocation243_spill] sm:$0xff]  ;;  %v15888_v63 = vld [vmem:[#allocation244_spill] sm:$0xff]  ;;  %v15890_v4 = vld [vmem:[#allocation245_spill] sm:$0xff] }
 0x40e   :  { %15877 = vst [vmem:[#allocation181_spill] sm:$0xff] %v11978_v41  ;;  %v15887_v5 = vld [vmem:[#allocation115_spill] sm:$0xff]  ;;  %v15889_v41 = vld [vmem:[#allocation116_spill] sm:$0xff]  ;;  %v12006_v62 = vadd.f32 %v11536_v11, %v15890_v4  ;;  %v15891_v51 = vld [vmem:[#allocation246_spill] sm:$0xff] }
 0x40f   :  { %15881 = vst [vmem:[#allocation182_spill] sm:$0xff] %v11986_v8  ;;  %15885 = vst [vmem:[#allocation195_spill] sm:$0xff] %v11994_v61  ;;  %v11998_v22 = vadd.f32 %v15887_v5, %v15886_v46  ;;  %v12002_v47 = vadd.f32 %v15889_v41, %v15888_v63  ;;  %v15892_v8 = vld [vmem:[#allocation38_spill] sm:$0xff]  ;;  %v15893_v49 = vld [vmem:[#allocation247_spill] sm:$0xff] }
 0x410   :  { %v12010_v29 = vadd.f32 %v15892_v8, %v15891_v51  ;;  %v12014_v40 = vadd.f32 %v11542_v3, %v15893_v49  ;;  %v15894_v21 = vld [vmem:[#allocation248_spill] sm:$0xff]  ;;  %v15895_v46 = vld [vmem:[#allocation249_spill] sm:$0xff]  ;;  %v15896_v63 = vld [vmem:[#allocation250_spill] sm:$0xff] }
 0x411   :  { %v12018_v5 = vadd.f32 %v11548_v53, %v15894_v21  ;;  %v12022_v41 = vadd.f32 %v11551_v56, %v15895_v46  ;;  %v12026_v11 = vadd.f32 %v11554_v52, %v15896_v63  ;;  %v15897_v4 = vld [vmem:[#allocation251_spill] sm:$0xff]  ;;  %v15899_v51 = vld [vmem:[#allocation252_spill] sm:$0xff]  ;;  %v15901_v49 = vld [vmem:[#allocation253_spill] sm:$0xff] }
 0x412   :  { %v12030_v8 = vadd.f32 %v11561_v27, %v15897_v4  ;;  %v12034_v3 = vadd.f32 %v11564_v44, %v15899_v51  ;;  %v12038_v53 = vadd.f32 %v11567_v36, %v15901_v49  ;;  %v15902_v21 = vld [vmem:[#allocation254_spill] sm:$0xff]  ;;  %v15903_v46 = vld [vmem:[#allocation255_spill] sm:$0xff]  ;;  %v15904_v63 = vld [vmem:[#allocation256_spill] sm:$0xff] }
 0x413   :  { %v12042_v56 = vadd.f32 %v11574_v57, %v15902_v21  ;;  %v12046_v52 = vadd.f32 %v11577_v16, %v15903_v46  ;;  %v12050_v27 = vadd.f32 %v11580_v42, %v15904_v63  ;;  %v15905_v4 = vld [vmem:[#allocation257_spill] sm:$0xff]  ;;  %v15906_v51 = vld [vmem:[#allocation258_spill] sm:$0xff]  ;;  %v15907_v49 = vld [vmem:[#allocation259_spill] sm:$0xff] }
 0x414   :  { %15898 = vst [vmem:[#allocation183_spill] sm:$0xff] %v12030_v8  ;;  %15900 = vst [vmem:[#allocation184_spill] sm:$0xff] %v12034_v3  ;;  %v12054_v44 = vadd.f32 %v11587_v37, %v15905_v4  ;;  %v12058_v36 = vadd.f32 %v11590_v60, %v15906_v51  ;;  %v12062_v57 = vadd.f32 %v11593_v19, %v15907_v49  ;;  %v15908_v21 = vld [vmem:[#allocation260_spill] sm:$0xff]  ;;  %v15909_v46 = vld [vmem:[#allocation261_spill] sm:$0xff] }
 0x415   :  { %v12066_v16 = vadd.f32 %v11600_v43, %v15908_v21  ;;  %v12070_v42 = vadd.f32 %v11603_v24, %v15909_v46  ;;  %v15911_v63 = vld [vmem:[#allocation262_spill] sm:$0xff]  ;;  %v15912_v3 = vld [vmem:[#allocation120_spill] sm:$0xff]  ;;  %v15914_v4 = vld [vmem:[#allocation263_spill] sm:$0xff] }
 0x416   :  { %v12074_v37 = vadd.f32 %v15912_v3, %v15911_v63  ;;  %v12078_v60 = vadd.f32 %v11613_v13, %v15914_v4  ;;  %v15915_v51 = vld [vmem:[#allocation264_spill] sm:$0xff]  ;;  %v15916_v61 = vld [vmem:[#allocation42_spill] sm:$0xff]  ;;  %v15918_v49 = vld [vmem:[#allocation265_spill] sm:$0xff] }
 0x417   :  { %15910 = vst [vmem:[#allocation185_spill] sm:$0xff] %v12070_v42  ;;  %v12082_v19 = vadd.f32 %v15916_v61, %v15915_v51  ;;  %v15919_v8 = vld [vmem:[#allocation43_spill] sm:$0xff]  ;;  %v15921_v21 = vld [vmem:[#allocation266_spill] sm:$0xff]  ;;  %v15924_v42 = vld [vmem:[#allocation121_spill] sm:$0xff] }
 0x418   :  { %15913 = vst [vmem:[#allocation196_spill] sm:$0xff] %v12074_v37  ;;  %v12086_v43 = vadd.f32 %v15919_v8, %v15918_v49  ;;  %v12090_v24 = vadd.f32 %v11626_v26, %v15921_v21  ;;  %v15923_v46 = vld [vmem:[#allocation267_spill] sm:$0xff]  ;;  %v15926_v63 = vld [vmem:[#allocation268_spill] sm:$0xff]  ;;  %v15929_v4 = vld [vmem:[#allocation269_spill] sm:$0xff] }
 0x419   :  { %15917 = vst [vmem:[#allocation186_spill] sm:$0xff] %v12082_v19  ;;  %v12094_v3 = vadd.f32 %v15924_v42, %v15923_v46  ;;  %v15927_v37 = vld [vmem:[#allocation344_spill] sm:$0xff]  ;;  %v12102_v61 = vadd.f32 %v11639_v54, %v15929_v4  ;;  %v15931_v51 = vld [vmem:[#allocation270_spill] sm:$0xff]  ;;  %v15934_v49 = vld [vmem:[#allocation271_spill] sm:$0xff] }
 0x41a   :  { %15920 = vst [vmem:[#allocation187_spill] sm:$0xff] %v12086_v43  ;;  %15922 = vst [vmem:[#allocation189_spill] sm:$0xff] %v12090_v24  ;;  %v12098_v13 = vadd.f32 %v15927_v37, %v15926_v63  ;;  %v15932_v19 = vld [vmem:[#allocation346_spill] sm:$0xff]  ;;  %v15935_v43 = vld [vmem:[#allocation347_spill] sm:$0xff] }
 0x41b   :  { %15925 = vst [vmem:[#allocation197_spill] sm:$0xff] %v12094_v3  ;;  %15930 = vst [vmem:[#allocation198_spill] sm:$0xff] %v12102_v61  ;;  %v12106_v8 = vadd.f32 %v15932_v19, %v15931_v51  ;;  %v12110_v26 = vadd.f32 %v15935_v43, %v15934_v49  ;;  %v15937_v21 = vld [vmem:[#allocation92_spill] sm:$0xff]  ;;  %v15939_v46 = vld [vmem:[#allocation13_spill] sm:$0xff] }
 0x41c   :  { %15928 = vst [vmem:[#allocation194_spill] sm:$0xff] %v12098_v13  ;;  %v12114_v42 = vadd.f32 %v11652_v25, %v15937_v21  ;;  %v15940_v3 = vld [vmem:[#allocation46_spill] sm:$0xff]  ;;  %v15942_v13 = vld [vmem:[#allocation47_spill] sm:$0xff]  ;;  %v15944_v51 = vld [vmem:[#allocation16_spill] sm:$0xff] }
 0x41d   :  { %15933 = vst [vmem:[#allocation199_spill] sm:$0xff] %v12106_v8  ;;  %15936 = vst [vmem:[#allocation200_spill] sm:$0xff] %v12110_v26  ;;  %v12118_v37 = vadd.f32 %v15940_v3, %v15939_v46  ;;  %v15941_v63 = vld [vmem:[#allocation14_spill] sm:$0xff]  ;;  %v15943_v4 = vld [vmem:[#allocation15_spill] sm:$0xff] }
 0x41e   :  { %15938 = vst [vmem:[#allocation58_spill] sm:$0xff] %v12114_v42  ;;  %v12122_v54 = vadd.f32 %v15942_v13, %v15941_v63  ;;  %v12126_v19 = vadd.f32 %v11665_v48, %v15943_v4  ;;  %v15945_v8 = vld [vmem:[#allocation125_spill] sm:$0xff]  ;;  %v15947_v26 = vld [vmem:[#allocation126_spill] sm:$0xff]  ;;  %v15951_v46 = vld [vmem:[#allocation95_spill] sm:$0xff] }
 0x41f   :  { %v12130_v43 = vadd.f32 %v15945_v8, %v15944_v51  ;;  %v15946_v49 = vld [vmem:[#allocation93_spill] sm:$0xff]  ;;  %v15949_v21 = vld [vmem:[#allocation94_spill] sm:$0xff]  ;;  %v15954_v63 = vld [vmem:[#allocation96_spill] sm:$0xff] }
 0x420   :  { %v12134_v25 = vadd.f32 %v15947_v26, %v15946_v49  ;;  %v12138_v3 = vadd.f32 %v11678_v12, %v15949_v21  ;;  %v15952_v42 = vld [vmem:[#allocation349_spill] sm:$0xff]  ;;  %v15955_v61 = vld [vmem:[#allocation350_spill] sm:$0xff]  ;;  %v15957_v4 = vld [vmem:[#allocation272_spill] sm:$0xff] }
 0x421   :  { %v12142_v13 = vadd.f32 %v15952_v42, %v15951_v46  ;;  %v12146_v48 = vadd.f32 %v15955_v61, %v15954_v63  ;;  %v12150_v8 = vadd.f32 %v11691_v7, %v15957_v4  ;;  %v15959_v51 = vld [vmem:[#allocation273_spill] sm:$0xff]  ;;  %v15960_v24 = vld [vmem:[#allocation52_spill] sm:$0xff]  ;;  %v15964_v21 = vld [vmem:[#allocation206_spill] sm:$0xff] }
 0x422   :  { %15948 = vst [vmem:[#allocation201_spill] sm:$0xff] %v12134_v25  ;;  %15950 = vst [vmem:[#allocation59_spill] sm:$0xff] %v12138_v3  ;;  %v12154_v26 = vadd.f32 %v15960_v24, %v15959_v51  ;;  %v15962_v49 = vld [vmem:[#allocation205_spill] sm:$0xff]  ;;  %v15963_v25 = vld [vmem:[#allocation128_spill] sm:$0xff]  ;;  %v12162_v42 = vadd.f32 %v11704_v34, %v15964_v21 }
 0x423   :  { %15953 = vst [vmem:[#allocation60_spill] sm:$0xff] %v12142_v13  ;;  %15956 = vst [vmem:[#allocation61_spill] sm:$0xff] %v12146_v48  ;;  %v12158_v12 = vadd.f32 %v15963_v25, %v15962_v49  ;;  %v15965_v46 = vld [vmem:[#allocation207_spill] sm:$0xff]  ;;  %v15966_v13 = vld [vmem:[#allocation130_spill] sm:$0xff] }
 0x424   :  { %15958 = vst [vmem:[#allocation53_spill] sm:$0xff] %v12150_v8  ;;  %15961 = vst [vmem:[#allocation131_spill] sm:$0xff] %v12154_v26  ;;  %v12166_v61 = vadd.f32 %v15966_v13, %v15965_v46  ;;  %v15967_v63 = vld [vmem:[#allocation208_spill] sm:$0xff]  ;;  %v15968_v48 = vld [vmem:[#allocation351_spill] sm:$0xff] }
 0x425   :  { %v12170_v7 = vadd.f32 %v15968_v48, %v15967_v63  ;;  %v15970_v4 = vld [vmem:[#allocation209_spill] sm:$0xff]  ;;  %v15972_v51 = vld [vmem:[#allocation210_spill] sm:$0xff]  ;;  %v15973_v26 = vld [vmem:[#allocation152_spill] sm:$0xff] }
 0x426   :  { %v12174_v24 = vadd.f32 %v11717_v10, %v15970_v4  ;;  %v12178_v25 = vadd.f32 %v15973_v26, %v15972_v51  ;;  %v15975_v49 = vld [vmem:[#allocation211_spill] sm:$0xff]  ;;  %v15976_v8 = vld [vmem:[#allocation153_spill] sm:$0xff]  ;;  %v15978_v21 = vld [vmem:[#allocation212_spill] sm:$0xff] }
 0x427   :  { %15969 = vst [vmem:[#allocation132_spill] sm:$0xff] %v12170_v7  ;;  %v12182_v34 = vadd.f32 %v15976_v8, %v15975_v49  ;;  %v12186_v13 = vadd.f32 %v11730_v17, %v15978_v21  ;;  %v15980_v46 = vld [vmem:[#allocation213_spill] sm:$0xff]  ;;  %v15981_v3 = vld [vmem:[#allocation155_spill] sm:$0xff]  ;;  %v15983_v63 = vld [vmem:[#allocation214_spill] sm:$0xff] }
 0x428   :  { %15971 = vst [vmem:[#allocation62_spill] sm:$0xff] %v12174_v24  ;;  %15974 = vst [vmem:[#allocation202_spill] sm:$0xff] %v12178_v25  ;;  %v12190_v48 = vadd.f32 %v15981_v3, %v15980_v46  ;;  %v15984_v7 = vld [vmem:[#allocation161_spill] sm:$0xff]  ;;  %v15986_v4 = vld [vmem:[#allocation99_spill] sm:$0xff] }
 0x429   :  { %15977 = vst [vmem:[#allocation63_spill] sm:$0xff] %v12182_v34  ;;  %15979 = vst [vmem:[#allocation64_spill] sm:$0xff] %v12186_v13  ;;  %v12194_v10 = vadd.f32 %v15984_v7, %v15983_v63  ;;  %v12198_v26 = vadd.f32 %v11743_v55, %v15986_v4  ;;  %v15987_v51 = vld [vmem:[#allocation274_spill] sm:$0xff]  ;;  %v15988_v25 = vld [vmem:[#allocation163_spill] sm:$0xff] }
 0x42a   :  { %15982 = vst [vmem:[#allocation133_spill] sm:$0xff] %v12190_v48  ;;  %v12202_v8 = vadd.f32 %v15988_v25, %v15987_v51  ;;  %v15989_v49 = vld [vmem:[#allocation275_spill] sm:$0xff]  ;;  %v15990_v34 = vld [vmem:[#allocation164_spill] sm:$0xff]  ;;  %v15993_v46 = vld [vmem:[#allocation277_spill] sm:$0xff] }
 0x42b   :  { %15985 = vst [vmem:[#allocation54_spill] sm:$0xff] %v12194_v10  ;;  %v12206_v17 = vadd.f32 %v15990_v34, %v15989_v49  ;;  %v15991_v21 = vld [vmem:[#allocation276_spill] sm:$0xff]  ;;  %v15996_v63 = vld [vmem:[#allocation278_spill] sm:$0xff]  ;;  %v15997_v10 = vld [vmem:[#allocation173_spill] sm:$0xff] }
 0x42c   :  { %v12210_v3 = vadd.f32 %v11756_v58, %v15991_v21  ;;  %v15994_v48 = vld [vmem:[#allocation172_spill] sm:$0xff]  ;;  %v12218_v55 = vadd.f32 %v15997_v10, %v15996_v63  ;;  %v15999_v4 = vld [vmem:[#allocation279_spill] sm:$0xff]  ;;  %v16004_v49 = vld [vmem:[#allocation281_spill] sm:$0xff] }
 0x42d   :  { %v12214_v7 = vadd.f32 %v15994_v48, %v15993_v46  ;;  %v12222_v25 = vadd.f32 %v11769_v45, %v15999_v4  ;;  %v16001_v51 = vld [vmem:[#allocation280_spill] sm:$0xff]  ;;  %v16002_v13 = vld [vmem:[#allocation315_spill] sm:$0xff]  ;;  %v16007_v21 = vld [vmem:[#allocation282_spill] sm:$0xff] }
 0x42e   :  { %15992 = vst [vmem:[#allocation134_spill] sm:$0xff] %v12210_v3  ;;  %15998 = vst [vmem:[#allocation136_spill] sm:$0xff] %v12218_v55  ;;  %v12226_v34 = vadd.f32 %v16002_v13, %v16001_v51  ;;  %v16005_v24 = vld [vmem:[#allocation127_spill] sm:$0xff]  ;;  %v12234_v48 = vadd.f32 %v11782_v35, %v16007_v21  ;;  %v16011_v63 = vld [vmem:[#allocation284_spill] sm:$0xff] }
 0x42f   :  { %15995 = vst [vmem:[#allocation135_spill] sm:$0xff] %v12214_v7  ;;  %16000 = vst [vmem:[#allocation203_spill] sm:$0xff] %v12222_v25  ;;  %v12230_v58 = vadd.f32 %v16005_v24, %v16004_v49  ;;  %v16009_v46 = vld [vmem:[#allocation283_spill] sm:$0xff]  ;;  %v16010_v7 = vld [vmem:[#allocation49_spill] sm:$0xff] }
 0x430   :  { %16003 = vst [vmem:[#allocation137_spill] sm:$0xff] %v12226_v34  ;;  %16008 = vst [vmem:[#allocation66_spill] sm:$0xff] %v12234_v48  ;;  %v12238_v10 = vadd.f32 %v16010_v7, %v16009_v46  ;;  %v16012_v55 = vld [vmem:[#allocation50_spill] sm:$0xff]  ;;  %v16013_v4 = vld [vmem:[#allocation285_spill] sm:$0xff] }
 0x431   :  { %16006 = vst [vmem:[#allocation65_spill] sm:$0xff] %v12230_v58  ;;  %v12242_v45 = vadd.f32 %v16012_v55, %v16011_v63  ;;  %v12246_v13 = vadd.f32 %v11795_v15, %v16013_v4  ;;  %v16014_v51 = vld [vmem:[#allocation286_spill] sm:$0xff]  ;;  %v16015_v34 = vld [vmem:[#allocation176_spill] sm:$0xff]  ;;  %v16017_v49 = vld [vmem:[#allocation287_spill] sm:$0xff] }
 0x432   :  { %v12250_v24 = vadd.f32 %v16015_v34, %v16014_v51  ;;  %v16018_v58 = vld [vmem:[#allocation317_spill] sm:$0xff]  ;;  %v16020_v21 = vld [vmem:[#allocation288_spill] sm:$0xff]  ;;  %v16023_v48 = vld [vmem:[#allocation319_spill] sm:$0xff] }
 0x433   :  { %v12254_v35 = vadd.f32 %v16018_v58, %v16017_v49  ;;  %v12258_v7 = vadd.f32 %v11808_v32, %v16020_v21  ;;  %v16022_v46 = vld [vmem:[#allocation289_spill] sm:$0xff]  ;;  %v16025_v63 = vld [vmem:[#allocation290_spill] sm:$0xff]  ;;  %v16028_v4 = vld [vmem:[#allocation291_spill] sm:$0xff] }
 0x434   :  { %16016 = vst [vmem:[#allocation55_spill] sm:$0xff] %v12250_v24  ;;  %v12262_v55 = vadd.f32 %v16023_v48, %v16022_v46  ;;  %v16026_v25 = vld [vmem:[#allocation177_spill] sm:$0xff]  ;;  %v12270_v34 = vadd.f32 %v11821_v28, %v16028_v4  ;;  %v16030_v51 = vld [vmem:[#allocation292_spill] sm:$0xff]  ;;  %v16031_v24 = vld [vmem:[#allocation150_spill] sm:$0xff] }
 0x435   :  { %16019 = vst [vmem:[#allocation67_spill] sm:$0xff] %v12254_v35  ;;  %16021 = vst [vmem:[#allocation138_spill] sm:$0xff] %v12258_v7  ;;  %v12266_v15 = vadd.f32 %v16026_v25, %v16025_v63  ;;  %v12274_v58 = vadd.f32 %v16031_v24, %v16030_v51  ;;  %v16033_v49 = vld [vmem:[#allocation293_spill] sm:$0xff]  ;;  %v16035_v21 = vld [vmem:[#allocation294_spill] sm:$0xff] }
 0x436   :  { %16024 = vst [vmem:[#allocation139_spill] sm:$0xff] %v12262_v55  ;;  %16029 = vst [vmem:[#allocation68_spill] sm:$0xff] %v12270_v34  ;;  %v16034_v35 = vld [vmem:[#allocation321_spill] sm:$0xff]  ;;  %v12282_v48 = vadd.f32 %v11834_v20, %v16035_v21  ;;  %v16036_v46 = vld [vmem:[#allocation35_spill] sm:$0xff] }
 0x437   :  { %16027 = vst [vmem:[#allocation204_spill] sm:$0xff] %v12266_v15  ;;  %16032 = vst [vmem:[#allocation140_spill] sm:$0xff] %v12274_v58  ;;  %v12278_v32 = vadd.f32 %v16034_v35, %v16033_v49  ;;  %v16037_v55 = vld [vmem:[#allocation322_spill] sm:$0xff]  ;;  %v16038_v63 = vld [vmem:[#allocation295_spill] sm:$0xff] }
 0x438   :  { %v12286_v25 = vadd.f32 %v16037_v55, %v16036_v46  ;;  %v16039_v15 = vld [vmem:[#allocation323_spill] sm:$0xff]  ;;  %v16041_v4 = vld [vmem:[#allocation296_spill] sm:$0xff]  ;;  %v16043_v51 = vld [vmem:[#allocation297_spill] sm:$0xff] }
 0x439   :  { %v12290_v28 = vadd.f32 %v16039_v15, %v16038_v63  ;;  %v12294_v24 = vadd.f32 %v11847_v9, %v16041_v4  ;;  %v16044_v58 = vld [vmem:[#allocation156_spill] sm:$0xff]  ;;  %v16046_v49 = vld [vmem:[#allocation298_spill] sm:$0xff]  ;;  %v16047_v34 = vld [vmem:[#allocation325_spill] sm:$0xff] }
 0x43a   :  { %v12298_v35 = vadd.f32 %v16044_v58, %v16043_v51  ;;  %v12302_v20 = vadd.f32 %v16047_v34, %v16046_v49  ;;  %v16049_v21 = vld [vmem:[#allocation299_spill] sm:$0xff]  ;;  %v16051_v46 = vld [vmem:[#allocation300_spill] sm:$0xff]  ;;  %v16054_v63 = vld [vmem:[#allocation301_spill] sm:$0xff] }
 0x43b   :  { %16040 = vst [vmem:[#allocation141_spill] sm:$0xff] %v12290_v28  ;;  %16042 = vst [vmem:[#allocation215_spill] sm:$0xff] %v12294_v24  ;;  %v12306_v55 = vadd.f32 %v11860_v59, %v16049_v21  ;;  %v16052_v7 = vld [vmem:[#allocation327_spill] sm:$0xff]  ;;  %v16055_v28 = vld [vmem:[#allocation157_spill] sm:$0xff] }
 0x43c   :  { %16045 = vst [vmem:[#allocation69_spill] sm:$0xff] %v12298_v35  ;;  %16048 = vst [vmem:[#allocation70_spill] sm:$0xff] %v12302_v20  ;;  %v12310_v15 = vadd.f32 %v16052_v7, %v16051_v46  ;;  %v12314_v9 = vadd.f32 %v16055_v28, %v16054_v63  ;;  %v16057_v4 = vld [vmem:[#allocation302_spill] sm:$0xff]  ;;  %v16058_v51 = vld [vmem:[#allocation303_spill] sm:$0xff] }
 0x43d   :  { %16050 = vst [vmem:[#allocation71_spill] sm:$0xff] %v12306_v55  ;;  %v12318_v58 = vadd.f32 %v11873_v31, %v16057_v4  ;;  %v16059_v35 = vld [vmem:[#allocation329_spill] sm:$0xff]  ;;  %v16061_v20 = vld [vmem:[#allocation330_spill] sm:$0xff]  ;;  %v16064_v46 = vld [vmem:[#allocation119_spill] sm:$0xff] }
 0x43e   :  { %16053 = vst [vmem:[#allocation56_spill] sm:$0xff] %v12310_v15  ;;  %16056 = vst [vmem:[#allocation72_spill] sm:$0xff] %v12314_v9  ;;  %v12322_v34 = vadd.f32 %v16059_v35, %v16058_v51  ;;  %v16060_v49 = vld [vmem:[#allocation117_spill] sm:$0xff]  ;;  %v16062_v21 = vld [vmem:[#allocation118_spill] sm:$0xff]  ;;  %v12334_v28 = vadd.f32 %v11889_v23, %v16064_v46 }
 0x43f   :  { %v12326_v59 = vadd.f32 %v16061_v20, %v16060_v49  ;;  %v12330_v7 = vadd.f32 %v11886_v18, %v16062_v21  ;;  %v16066_v63 = vld [vmem:[#allocation304_spill] sm:$0xff]  ;;  %v16068_v4 = vld [vmem:[#allocation305_spill] sm:$0xff]  ;;  %v16070_v51 = vld [vmem:[#allocation306_spill] sm:$0xff] }
 0x440   :  { %16065 = vst [vmem:[#allocation143_spill] sm:$0xff] %v12334_v28  ;;  %v12338_v31 = vadd.f32 %v11892_v2, %v16066_v63  ;;  %v12342_v35 = vadd.f32 %v11899_v1, %v16068_v4  ;;  %v12346_v20 = vadd.f32 %v11902_v39, %v16070_v51  ;;  %v16072_v49 = vld [vmem:[#allocation307_spill] sm:$0xff]  ;;  %v16074_v21 = vld [vmem:[#allocation308_spill] sm:$0xff]  ;;  %v16076_v46 = vld [vmem:[#allocation309_spill] sm:$0xff] }
 0x441   :  { %16063 = vst [vmem:[#allocation142_spill] sm:$0xff] %v12330_v7  ;;  %v12350_v18 = vadd.f32 %v11905_v6, %v16072_v49  ;;  %v12354_v23 = vadd.f32 %v11912_v50, %v16074_v21  ;;  %v16077_v9 = vld [vmem:[#allocation168_spill] sm:$0xff]  ;;  %v16078_v63 = vld [vmem:[#allocation122_spill] sm:$0xff]  ;;  %v16079_v15 = vld [vmem:[#allocation179_spill] sm:$0xff] }
 0x442   :  { %16067 = vst [vmem:[#allocation57_spill] sm:$0xff] %v12338_v31  ;;  %16069 = vst [vmem:[#allocation144_spill] sm:$0xff] %v12342_v35  ;;  %v12358_v2 = vadd.f32 %v16077_v9, %v16076_v46  ;;  %v12362_v1 = vadd.f32 %v16079_v15, %v16078_v63  ;;  %v16080_v4 = vld [vmem:[#allocation123_spill] sm:$0xff]  ;;  %v16081_v55 = vld [vmem:[#allocation169_spill] sm:$0xff] }
 0x443   :  { %16071 = vst [vmem:[#allocation145_spill] sm:$0xff] %v12346_v20  ;;  %16073 = vst [vmem:[#allocation73_spill] sm:$0xff] %v12350_v18  ;;  %v12366_v39 = vadd.f32 %v16081_v55, %v16080_v4  ;;  %v16082_v51 = vld [vmem:[#allocation124_spill] sm:$0xff]  ;;  %v16083_v20 = vld [vmem:[#allocation170_spill] sm:$0xff] }
 0x444   :  { %16075 = vst [vmem:[#allocation216_spill] sm:$0xff] %v12354_v23  ;;  %v12370_v6 = vadd.f32 %v16083_v20, %v16082_v51  ;;  %v16085_v49 = vld [vmem:[#allocation45_spill] sm:$0xff]  ;;  %v16086_v18 = vld [vmem:[#allocation159_spill] sm:$0xff]  ;;  %v16088_v21 = vld [vmem:[#allocation310_spill] sm:$0xff] }
 0x445   :  { %v12374_v50 = vadd.f32 %v16086_v18, %v16085_v49  ;;  %v12378_v9 = vadd.f32 %v11938_v14, %v16088_v21  ;;  %v16090_v46 = vld [vmem:[#allocation311_spill] sm:$0xff]  ;;  %v16091_v23 = vld [vmem:[#allocation190_spill] sm:$0xff]  ;;  %v16093_v63 = vld [vmem:[#allocation312_spill] sm:$0xff] }
 0x446   :  { %16084 = vst [vmem:[#allocation74_spill] sm:$0xff] %v12370_v6  ;;  %v12382_v15 = vadd.f32 %v16091_v23, %v16090_v46  ;;  %v16094_v35 = vld [vmem:[#allocation191_spill] sm:$0xff]  ;;  %v16096_v4 = vld [vmem:[#allocation108_spill] sm:$0xff]  ;;  %v16097_v20 = vld [vmem:[#allocation341_spill] sm:$0xff] }
 0x447   :  { %16087 = vst [vmem:[#allocation75_spill] sm:$0xff] %v12374_v50  ;;  %16089 = vst [vmem:[#allocation76_spill] sm:$0xff] %v12378_v9  ;;  %v12386_v55 = vadd.f32 %v16094_v35, %v16093_v63  ;;  %v4561_v31 = vrot.slane %v16096_v4, 7  ;;  %v4563_v51 = vrot.slane %v16097_v20, 6  ;;  %v16098_v28 = vld [vmem:[#allocation313_spill] sm:$0xff]  ;;  %v16099_v24 = vld [vmem:[#allocation192_spill] sm:$0xff] }
 0x448   :  { %16092 = vst [vmem:[#allocation217_spill] sm:$0xff] %v12382_v15  ;;  %v12392_v18 = vadd.f32 %v16099_v24, %v16098_v28  ;;  %v16101_v49 = vld [vmem:[#allocation314_spill] sm:$0xff]  ;;  %v16102_v50 = vld [vmem:[#allocation193_spill] sm:$0xff]  ;;  %v4569_v63 = vrot.slane %v11958_v0, 3  ;;  %v4571_v28 = vrot.slane %v11998_v22, 2  ;;  %v16112_v0 = vld [vmem:[#allocation180_spill] sm:$0xff] }
 0x449   :  { %16095 = vst [vmem:[#allocation146_spill] sm:$0xff] %v12386_v55  ;;  %v12396_v14 = vadd.f32 %v16102_v50, %v16101_v49  ;;  %v16104_v21 = vld [vmem:[#allocation129_spill] sm:$0xff]  ;;  %v16105_v23 = vld [vmem:[#allocation178_spill] sm:$0xff]  ;;  %v4573_v50 = vrot.slane %v12038_v53, 1  ;;  %v16109_v49 = vld [vmem:[#allocation151_spill] sm:$0xff]  ;;  %v4583_v7 = vrot.slane %v16112_v0, 3 }
 0x44a   :  { %16100 = vst [vmem:[#allocation147_spill] sm:$0xff] %v12392_v18  ;;  %v4565_v9 = vrot.slane %v16104_v21, 5  ;;  %v4567_v46 = vrot.slane %v16105_v23, 4  ;;  %v16106_v15 = vld [vmem:[#allocation102_spill] sm:$0xff]  ;;  %v16107_v4 = vld [vmem:[#allocation29_spill] sm:$0xff]  ;;  %v16110_v23 = vld [vmem:[#allocation103_spill] sm:$0xff] }
 0x44b   :  { %16103 = vst [vmem:[#allocation148_spill] sm:$0xff] %v12396_v14  ;;  %v4562_v35 = vsel %vm1790_vm7, %v4561_v31, %v16106_v15  ;;  %v4575_v55 = vrot.slane %v16107_v4, 7  ;;  %v16108_v20 = vld [vmem:[#allocation342_spill] sm:$0xff]  ;;  %v4579_v14 = vrot.slane %v16109_v49, 5  ;;  %v16111_v31 = vld [vmem:[#allocation324_spill] sm:$0xff]  ;;  %v16114_v22 = vld [vmem:[#allocation343_spill] sm:$0xff] }
 0x44c   :  { %v4577_v6 = vrot.slane %v16108_v20, 6  ;;  %v4564_v24 = vsel %vm1792_vm8, %v4563_v51, %v4562_v35  ;;  %v4581_v15 = vrot.slane %v16111_v31, 4  ;;  %v16113_v51 = vld [vmem:[#allocation30_spill] sm:$0xff]  ;;  %v4591_v3 = vrot.slane %v16114_v22, 6  ;;  %v16115_v31 = vld [vmem:[#allocation104_spill] sm:$0xff] }
 0x44d   :  { %v4566_v21 = vsel %vm1794_vm9, %v4565_v9, %v4564_v24  ;;  %v4576_v18 = vsel %vm1790_vm7, %v4575_v55, %v16110_v23  ;;  %v4589_v35 = vrot.slane %v16113_v51, 7  ;;  %v4585_v9 = vrot.slane %v12002_v47, 2 }
 0x44e   :  { %v4568_v4 = vsel %vm1796_vm10, %v4567_v46, %v4566_v21  ;;  %v4578_v20 = vsel %vm1792_vm8, %v4577_v6, %v4576_v18  ;;  %v4587_v55 = vrot.slane %v12042_v56, 1  ;;  %v16116_v6 = vld [vmem:[#allocation154_spill] sm:$0xff] }
 0x44f   :  { %v4570_v53 = vsel %vm1798_vm11, %v4569_v63, %v4568_v4  ;;  %v4580_v49 = vsel %vm1794_vm9, %v4579_v14, %v4578_v20  ;;  %v4590_v46 = vsel %vm1790_vm7, %v4589_v35, %v16115_v31  ;;  %v4593_v18 = vrot.slane %v16116_v6, 5  ;;  %v16117_v14 = vld [vmem:[#allocation326_spill] sm:$0xff]  ;;  %v16123_v6 = vld [vmem:[#allocation328_spill] sm:$0xff] }
 0x450   :  { %v4572_v24 = vsel %vm1800_vm12, %v4571_v28, %v4570_v53  ;;  %v4582_v23 = vsel %vm1796_vm10, %v4581_v15, %v4580_v49  ;;  %v4592_v63 = vsel %vm1792_vm8, %v4591_v3, %v4590_v46  ;;  %v4595_v4 = vrot.slane %v16117_v14, 4  ;;  %v16118_v28 = vld [vmem:[#allocation8_spill] sm:$0xff]  ;;  %v16119_v15 = vld [vmem:[#allocation109_spill] sm:$0xff] }
 0x451   :  { %v4574_v21 = vsel %vm1802_vm13, %v4573_v50, %v4572_v24  ;;  %v4584_v0 = vsel %vm1798_vm11, %v4583_v7, %v4582_v23  ;;  %v4594_v56 = vsel %vm1794_vm9, %v4593_v18, %v4592_v63  ;;  %v4597_v20 = vrot.slane %v16118_v28, 3  ;;  %v16120_v7 = vld [vmem:[#allocation41_spill] sm:$0xff]  ;;  %v16122_v23 = vld [vmem:[#allocation162_spill] sm:$0xff]  ;;  %v16124_v63 = vld [vmem:[#allocation112_spill] sm:$0xff] }
 0x452   :  { %v4586_v47 = vsel %vm1800_vm12, %v4585_v9, %v4584_v0  ;;  %v4603_v51 = vrot.slane %v16119_v15, 7  ;;  %4861 = vst [vmem:[#allocation5] sm:$0xff] %v4574_v21  ;;  %v4596_v22 = vsel %vm1796_vm10, %v4595_v4, %v4594_v56  ;;  %v4599_v50 = vrot.slane %v12006_v62, 2  ;;  %v16121_v9 = vld [vmem:[#allocation25_spill] sm:$0xff]  ;;  %v16125_v14 = vld [vmem:[#allocation44_spill] sm:$0xff] }
 0x453   :  { %v4588_v35 = vsel %vm1802_vm13, %v4587_v55, %v4586_v47  ;;  %v4605_v53 = vrot.slane %v16120_v7, 6  ;;  %v4598_v3 = vsel %vm1798_vm11, %v4597_v20, %v4596_v22  ;;  %v4601_v49 = vrot.slane %v12046_v52, 1  ;;  %v16126_v20 = vld [vmem:[#allocation165_spill] sm:$0xff]  ;;  %v16128_v22 = vld [vmem:[#allocation158_spill] sm:$0xff]  ;;  %v16129_v7 = vld [vmem:[#allocation188_spill] sm:$0xff] }
 0x454   :  { %v4604_v24 = vsel %vm1790_vm7, %v4603_v51, %v16121_v9  ;;  %v4607_v31 = vrot.slane %v16122_v23, 5  ;;  %4862 = vst [vmem:[#allocation5 + $0x8] sm:$0xff] %v4588_v35  ;;  %v4600_v46 = vsel %vm1800_vm12, %v4599_v50, %v4598_v3  ;;  %v4609_v18 = vrot.slane %v16123_v6, 4  ;;  %v16130_v9 = vld [vmem:[#allocation340_spill] sm:$0xff] }
 0x455   :  { %v4606_v55 = vsel %vm1792_vm8, %v4605_v53, %v4604_v24  ;;  %v4611_v62 = vrot.slane %v11970_v33, 3  ;;  %v4602_v21 = vsel %vm1802_vm13, %v4601_v49, %v4600_v46  ;;  %v4617_v52 = vrot.slane %v16124_v63, 7  ;;  %v16127_v33 = vld [vmem:[#allocation26_spill] sm:$0xff]  ;;  %v16131_v24 = vld [vmem:[#allocation345_spill] sm:$0xff] }
 0x456   :  { %v4608_v0 = vsel %vm1794_vm9, %v4607_v31, %v4606_v55  ;;  %v4619_v4 = vrot.slane %v16125_v14, 6  ;;  %v4613_v56 = vrot.slane %v12010_v29, 2  ;;  %v4615_v28 = vrot.slane %v12050_v27, 1  ;;  %4863 = vst [vmem:[#allocation5 + $0x10] sm:$0xff] %v4602_v21  ;;  %v16133_v21 = vld [vmem:[#allocation174_spill] sm:$0xff] }
 0x457   :  { %v4610_v47 = vsel %vm1796_vm10, %v4609_v18, %v4608_v0  ;;  %v4621_v15 = vrot.slane %v16126_v20, 5  ;;  %v4618_v35 = vsel %vm1790_vm7, %v4617_v52, %v16127_v33  ;;  %v4623_v50 = vrot.slane %v16128_v22, 4  ;;  %v16132_v18 = vld [vmem:[#allocation27_spill] sm:$0xff]  ;;  %v16134_v63 = vld [vmem:[#allocation166_spill] sm:$0xff] }
 0x458   :  { %v4612_v51 = vsel %vm1798_vm11, %v4611_v62, %v4610_v47  ;;  %v4625_v53 = vrot.slane %v16129_v7, 3  ;;  %v4620_v49 = vsel %vm1792_vm8, %v4619_v4, %v4618_v35  ;;  %v4631_v29 = vrot.slane %v16130_v9, 7  ;;  %v16135_v47 = vld [vmem:[#allocation181_spill] sm:$0xff] }
 0x459   :  { %v4614_v3 = vsel %vm1800_vm12, %v4613_v56, %v4612_v51  ;;  %v4633_v27 = vrot.slane %v16131_v24, 6  ;;  %v4622_v31 = vsel %vm1794_vm9, %v4621_v15, %v4620_v49  ;;  %v4627_v46 = vrot.slane %v12014_v40, 2  ;;  %v16137_v51 = vld [vmem:[#allocation149_spill] sm:$0xff]  ;;  %v16140_v24 = vld [vmem:[#allocation167_spill] sm:$0xff] }
 0x45a   :  { %v4616_v23 = vsel %vm1802_vm13, %v4615_v28, %v4614_v3  ;;  %v4629_v55 = vrot.slane %v12054_v44, 1  ;;  %v4624_v6 = vsel %vm1796_vm10, %v4623_v50, %v4622_v31  ;;  %v4632_v62 = vsel %vm1790_vm7, %v4631_v29, %v16132_v18  ;;  %v16136_v28 = vld [vmem:[#allocation114_spill] sm:$0xff]  ;;  %v16138_v50 = vld [vmem:[#allocation28_spill] sm:$0xff] }
 0x45b   :  { %v4635_v0 = vrot.slane %v16133_v21, 5  ;;  %v4637_v52 = vrot.slane %v16134_v63, 4  ;;  %4864 = vst [vmem:[#allocation5 + $0x18] sm:$0xff] %v4616_v23  ;;  %v4626_v14 = vsel %vm1798_vm11, %v4625_v53, %v4624_v6  ;;  %v4634_v4 = vsel %vm1792_vm8, %v4633_v27, %v4632_v62  ;;  %v16139_v53 = vld [vmem:[#allocation175_spill] sm:$0xff] }
 0x45c   :  { %v4639_v56 = vrot.slane %v16135_v47, 3  ;;  %v4645_v40 = vrot.slane %v16136_v28, 7  ;;  %v4628_v44 = vsel %vm1800_vm12, %v4627_v46, %v4626_v14  ;;  %v4641_v15 = vrot.slane %v12018_v5, 2  ;;  %v16141_v46 = vld [vmem:[#allocation37_spill] sm:$0xff] }
 0x45d   :  { %v4636_v20 = vsel %vm1794_vm9, %v4635_v0, %v4634_v4  ;;  %v4647_v33 = vrot.slane %v16137_v51, 6  ;;  %v4630_v35 = vsel %vm1802_vm13, %v4629_v55, %v4628_v44  ;;  %v4649_v3 = vrot.slane %v16139_v53, 5  ;;  %v16144_v4 = vld [vmem:[#allocation316_spill] sm:$0xff]  ;;  %v16145_v28 = vld [vmem:[#allocation17_spill] sm:$0xff]  ;;  %v16146_v44 = vld [vmem:[#allocation182_spill] sm:$0xff] }
 0x45e   :  { %v4638_v22 = vsel %vm1796_vm10, %v4637_v52, %v4636_v20  ;;  %v4646_v7 = vsel %vm1790_vm7, %v4645_v40, %v16138_v50  ;;  %v4643_v9 = vrot.slane %v12058_v36, 1  ;;  %v4651_v27 = vrot.slane %v16140_v24, 4  ;;  %4865 = vst [vmem:[#allocation5 + $0x20] sm:$0xff] %v4630_v35  ;;  %v16142_v36 = vld [vmem:[#allocation48_spill] sm:$0xff]  ;;  %v16143_v52 = vld [vmem:[#allocation105_spill] sm:$0xff]  ;;  %v16147_v51 = vld [vmem:[#allocation39_spill] sm:$0xff] }
 0x45f   :  { %v4640_v49 = vsel %vm1798_vm11, %v4639_v56, %v4638_v22  ;;  %v4648_v29 = vsel %vm1792_vm8, %v4647_v33, %v4646_v7  ;;  %v4653_v31 = vrot.slane %v11982_v38, 3  ;;  %v4659_v55 = vrot.slane %v16141_v46, 7  ;;  %v16148_v33 = vld [vmem:[#allocation348_spill] sm:$0xff]  ;;  %v16149_v53 = vld [vmem:[#allocation318_spill] sm:$0xff]  ;;  %v16151_v24 = vld [vmem:[#allocation171_spill] sm:$0xff] }
 0x460   :  { %v4642_v5 = vsel %vm1800_vm12, %v4641_v15, %v4640_v49  ;;  %v4650_v23 = vsel %vm1794_vm9, %v4649_v3, %v4648_v29  ;;  %v4655_v62 = vrot.slane %v12022_v41, 2  ;;  %v4661_v21 = vrot.slane %v16142_v36, 6  ;;  %v16152_v46 = vld [vmem:[#allocation40_spill] sm:$0xff] }
 0x461   :  { %v4644_v6 = vsel %vm1802_vm13, %v4643_v9, %v4642_v5  ;;  %v4652_v18 = vsel %vm1796_vm10, %v4651_v27, %v4650_v23  ;;  %v4657_v63 = vrot.slane %v12062_v57, 1  ;;  %v4660_v14 = vsel %vm1790_vm7, %v4659_v55, %v16143_v52  ;;  %v16150_v9 = vld [vmem:[#allocation106_spill] sm:$0xff]  ;;  %v16153_v55 = vld [vmem:[#allocation51_spill] sm:$0xff] }
 0x462   :  { %v4654_v0 = vsel %vm1798_vm11, %v4653_v31, %v4652_v18  ;;  %v4663_v47 = vrot.slane %v16144_v4, 5  ;;  %4866 = vst [vmem:[#allocation5 + $0x28] sm:$0xff] %v4644_v6  ;;  %v4662_v56 = vsel %vm1792_vm8, %v4661_v21, %v4660_v14  ;;  %v4665_v40 = vrot.slane %v16145_v28, 4  ;;  %v16155_v21 = vld [vmem:[#allocation185_spill] sm:$0xff]  ;;  %v16156_v52 = vld [vmem:[#allocation107_spill] sm:$0xff]  ;;  %v16157_v14 = vld [vmem:[#allocation320_spill] sm:$0xff] }
 0x463   :  { %v4656_v38 = vsel %vm1800_vm12, %v4655_v62, %v4654_v0  ;;  %v4667_v41 = vrot.slane %v16146_v44, 3  ;;  %v4673_v57 = vrot.slane %v16147_v51, 7  ;;  %v4675_v35 = vrot.slane %v16148_v33, 6  ;;  %v16154_v62 = vld [vmem:[#allocation183_spill] sm:$0xff]  ;;  %v16160_v51 = vld [vmem:[#allocation184_spill] sm:$0xff] }
 0x464   :  { %v4658_v20 = vsel %vm1802_vm13, %v4657_v63, %v4656_v38  ;;  %v4664_v15 = vsel %vm1794_vm9, %v4663_v47, %v4662_v56  ;;  %v4669_v50 = vrot.slane %v12026_v11, 2  ;;  %v4671_v7 = vrot.slane %v12066_v16, 1  ;;  %v16158_v47 = vld [vmem:[#allocation160_spill] sm:$0xff] }
 0x465   :  { %v4666_v22 = vsel %vm1796_vm10, %v4665_v40, %v4664_v15  ;;  %v4677_v3 = vrot.slane %v16149_v53, 5  ;;  %4867 = vst [vmem:[#allocation5 + $0x30] sm:$0xff] %v4658_v20  ;;  %v4674_v29 = vsel %vm1790_vm7, %v4673_v57, %v16150_v9  ;;  %v4679_v27 = vrot.slane %v16151_v24, 4  ;;  %v16159_v40 = vld [vmem:[#allocation195_spill] sm:$0xff] }
 0x466   :  { %v4668_v49 = vsel %vm1798_vm11, %v4667_v41, %v4666_v22  ;;  %v4681_v5 = vrot.slane %v11990_v30, 3  ;;  %v4676_v31 = vsel %vm1792_vm8, %v4675_v35, %v4674_v29  ;;  %v4687_v11 = vrot.slane %v16152_v46, 7  ;;  %v16162_v46 = vld [vmem:[#allocation186_spill] sm:$0xff] }
 0x467   :  { %v4670_v23 = vsel %vm1800_vm12, %v4669_v50, %v4668_v49  ;;  %v4689_v16 = vrot.slane %v16153_v55, 6  ;;  %v4678_v18 = vsel %vm1794_vm9, %v4677_v3, %v4676_v31  ;;  %v4683_v36 = vrot.slane %v16154_v62, 2 }
 0x468   :  { %v4672_v6 = vsel %vm1802_vm13, %v4671_v7, %v4670_v23  ;;  %v4685_v0 = vrot.slane %v16155_v21, 1  ;;  %v4680_v63 = vsel %vm1796_vm10, %v4679_v27, %v4678_v18  ;;  %v4688_v30 = vsel %vm1790_vm7, %v4687_v11, %v16156_v52 }
 0x469   :  { %v4691_v4 = vrot.slane %v16157_v14, 5  ;;  %v4693_v38 = vrot.slane %v16158_v47, 4  ;;  %4868 = vst [vmem:[#allocation5 + $0x38] sm:$0xff] %v4672_v6  ;;  %v4682_v56 = vsel %vm1798_vm11, %v4681_v5, %v4680_v63  ;;  %v4690_v28 = vsel %vm1792_vm8, %v4689_v16, %v4688_v30  ;;  %v16164_v30 = vld [vmem:[#allocation132_spill] sm:$0xff] }
 0x46a   :  { %v4695_v44 = vrot.slane %v16159_v40, 3  ;;  %v4701_v41 = vrot.slane %v12118_v37, 7  ;;  %v4684_v20 = vsel %vm1800_vm12, %v4683_v36, %v4682_v56  ;;  %v4697_v57 = vrot.slane %v16160_v51, 2  ;;  %v16161_v37 = vld [vmem:[#allocation196_spill] sm:$0xff]  ;;  %v16166_v56 = vld [vmem:[#allocation134_spill] sm:$0xff]  ;;  %v16167_v40 = vld [vmem:[#allocation55_spill] sm:$0xff] }
 0x46b   :  { %v4692_v15 = vsel %vm1794_vm9, %v4691_v4, %v4690_v28  ;;  %v4703_v33 = vrot.slane %v12158_v12, 6  ;;  %v4686_v35 = vsel %vm1802_vm13, %v4685_v0, %v4684_v20  ;;  %v4705_v7 = vrot.slane %v12198_v26, 5  ;;  %v16168_v20 = vld [vmem:[#allocation141_spill] sm:$0xff] }
 0x46c   :  { %v4694_v22 = vsel %vm1796_vm10, %v4693_v38, %v4692_v15  ;;  %v4702_v50 = vsel %vm1790_vm7, %v4701_v41, %v12078_v60  ;;  %v4699_v3 = vrot.slane %v16161_v37, 1  ;;  %v4707_v9 = vrot.slane %v12238_v10, 4  ;;  %4869 = vst [vmem:[#allocation5 + $0x40] sm:$0xff] %v4686_v35  ;;  %v16165_v38 = vld [vmem:[#allocation189_spill] sm:$0xff] }
 0x46d   :  { %v4696_v53 = vsel %vm1798_vm11, %v4695_v44, %v4694_v22  ;;  %v4704_v49 = vsel %vm1792_vm8, %v4703_v33, %v4702_v50  ;;  %v4709_v24 = vrot.slane %v12278_v32, 3  ;;  %v4715_v27 = vrot.slane %v12122_v54, 7  ;;  %v16169_v51 = vld [vmem:[#allocation201_spill] sm:$0xff]  ;;  %v16170_v33 = vld [vmem:[#allocation142_spill] sm:$0xff] }
 0x46e   :  { %v4698_v12 = vsel %vm1800_vm12, %v4697_v57, %v4696_v53  ;;  %v4706_v29 = vsel %vm1794_vm9, %v4705_v7, %v4704_v49  ;;  %v4711_v5 = vrot.slane %v12318_v58, 2  ;;  %v4717_v23 = vrot.slane %v12162_v42, 6  ;;  %v16171_v22 = vld [vmem:[#allocation62_spill] sm:$0xff]  ;;  %v16172_v37 = vld [vmem:[#allocation197_spill] sm:$0xff]  ;;  %v16173_v49 = vld [vmem:[#allocation135_spill] sm:$0xff] }
 0x46f   :  { %v4700_v60 = vsel %vm1802_vm13, %v4699_v3, %v4698_v12  ;;  %v4708_v26 = vsel %vm1796_vm10, %v4707_v9, %v4706_v29  ;;  %v4713_v10 = vrot.slane %v12358_v2, 1  ;;  %v4716_v11 = vsel %vm1790_vm7, %v4715_v27, %v16162_v46  ;;  %v16174_v29 = vld [vmem:[#allocation74_spill] sm:$0xff]  ;;  %v16177_v46 = vld [vmem:[#allocation59_spill] sm:$0xff] }
 0x470   :  { %v4710_v31 = vsel %vm1798_vm11, %v4709_v24, %v4708_v26  ;;  %v4719_v55 = vrot.slane %v12202_v8, 5  ;;  %4870 = vst [vmem:[#allocation5 + $0x48] sm:$0xff] %v4700_v60  ;;  %v4718_v32 = vsel %vm1792_vm8, %v4717_v23, %v4716_v11  ;;  %v4721_v16 = vrot.slane %v12242_v45, 4  ;;  %v16175_v60 = vld [vmem:[#allocation67_spill] sm:$0xff] }
 0x471   :  { %v4712_v54 = vsel %vm1800_vm12, %v4711_v5, %v4710_v31  ;;  %v4723_v58 = vrot.slane %v12282_v48, 3  ;;  %v4729_v2 = vrot.slane %v12126_v19, 7  ;;  %v4731_v18 = vrot.slane %v12166_v61, 6  ;;  %v16163_v48 = vld [vmem:[#allocation187_spill] sm:$0xff] }
 0x472   :  { %v4714_v42 = vsel %vm1802_vm13, %v4713_v10, %v4712_v54  ;;  %v4720_v6 = vsel %vm1794_vm9, %v4719_v55, %v4718_v32  ;;  %v4725_v8 = vrot.slane %v12322_v34, 2  ;;  %v4727_v36 = vrot.slane %v12362_v1, 1  ;;  %v16176_v31 = vld [vmem:[#allocation215_spill] sm:$0xff] }
 0x473   :  { %v4722_v62 = vsel %vm1796_vm10, %v4721_v16, %v4720_v6  ;;  %v4733_v21 = vrot.slane %v12206_v17, 5  ;;  %4871 = vst [vmem:[#allocation5 + $0x50] sm:$0xff] %v4714_v42  ;;  %v4730_v0 = vsel %vm1790_vm7, %v4729_v2, %v16163_v48  ;;  %v4735_v63 = vrot.slane %v12246_v13, 4  ;;  %v16178_v32 = vld [vmem:[#allocation143_spill] sm:$0xff] }
 0x474   :  { %v4724_v45 = vsel %vm1798_vm11, %v4723_v58, %v4722_v62  ;;  %v4737_v19 = vrot.slane %v12286_v25, 3  ;;  %v4732_v52 = vsel %vm1792_vm8, %v4731_v18, %v4730_v0  ;;  %v4743_v34 = vrot.slane %v12130_v43, 7  ;;  %v16179_v58 = vld [vmem:[#allocation202_spill] sm:$0xff]  ;;  %v16180_v2 = vld [vmem:[#allocation75_spill] sm:$0xff] }
 0x475   :  { %v4726_v61 = vsel %vm1800_vm12, %v4725_v8, %v4724_v45  ;;  %v4745_v1 = vrot.slane %v16164_v30, 6  ;;  %v4734_v14 = vsel %vm1794_vm9, %v4733_v21, %v4732_v52  ;;  %v4739_v4 = vrot.slane %v12326_v59, 2  ;;  %v16181_v62 = vld [vmem:[#allocation194_spill] sm:$0xff]  ;;  %v16185_v30 = vld [vmem:[#allocation60_spill] sm:$0xff] }
 0x476   :  { %v4728_v17 = vsel %vm1802_vm13, %v4727_v36, %v4726_v61  ;;  %v4741_v47 = vrot.slane %v12366_v39, 1  ;;  %v4736_v13 = vsel %vm1796_vm10, %v4735_v63, %v4734_v14  ;;  %v4744_v25 = vsel %vm1790_vm7, %v4743_v34, %v16165_v38  ;;  %v16182_v36 = vld [vmem:[#allocation136_spill] sm:$0xff]  ;;  %v16183_v0 = vld [vmem:[#allocation138_spill] sm:$0xff] }
 0x477   :  { %v4747_v28 = vrot.slane %v16166_v56, 5  ;;  %v4749_v44 = vrot.slane %v16167_v40, 4  ;;  %4872 = vst [vmem:[#allocation5 + $0x58] sm:$0xff] %v4728_v17  ;;  %v4738_v43 = vsel %vm1798_vm11, %v4737_v19, %v4736_v13  ;;  %v4746_v41 = vsel %vm1792_vm8, %v4745_v1, %v4744_v25  ;;  %v16184_v19 = vld [vmem:[#allocation69_spill] sm:$0xff]  ;;  %v16186_v17 = vld [vmem:[#allocation63_spill] sm:$0xff]  ;;  %v16188_v38 = vld [vmem:[#allocation76_spill] sm:$0xff] }
 0x478   :  { %v4751_v15 = vrot.slane %v16168_v20, 3  ;;  %v4757_v59 = vrot.slane %v16169_v51, 7  ;;  %v4740_v39 = vsel %vm1800_vm12, %v4739_v4, %v4738_v43  ;;  %v4753_v35 = vrot.slane %v16170_v33, 2  ;;  %v16189_v56 = vld [vmem:[#allocation203_spill] sm:$0xff] }
 0x479   :  { %v4748_v57 = vsel %vm1794_vm9, %v4747_v28, %v4746_v41  ;;  %v4759_v50 = vrot.slane %v16171_v22, 6  ;;  %v4742_v7 = vsel %vm1802_vm13, %v4741_v47, %v4740_v39  ;;  %v4761_v9 = vrot.slane %v16173_v49, 5  ;;  %v16187_v47 = vld [vmem:[#allocation57_spill] sm:$0xff]  ;;  %v16191_v41 = vld [vmem:[#allocation139_spill] sm:$0xff] }
 0x47a   :  { %v4750_v53 = vsel %vm1796_vm10, %v4749_v44, %v4748_v57  ;;  %v4758_v3 = vsel %vm1790_vm7, %v4757_v59, %v16172_v37  ;;  %v4755_v24 = vrot.slane %v16174_v29, 1  ;;  %v4763_v26 = vrot.slane %v16175_v60, 4  ;;  %4873 = vst [vmem:[#allocation5 + $0x60] sm:$0xff] %v4742_v7  ;;  %v16190_v44 = vld [vmem:[#allocation198_spill] sm:$0xff]  ;;  %v16193_v57 = vld [vmem:[#allocation61_spill] sm:$0xff]  ;;  %v16199_v60 = vld [vmem:[#allocation204_spill] sm:$0xff] }
 0x47b   :  { %v4752_v12 = vsel %vm1798_vm11, %v4751_v15, %v4750_v53  ;;  %v4760_v27 = vsel %vm1792_vm8, %v4759_v50, %v4758_v3  ;;  %v4765_v10 = vrot.slane %v16176_v31, 3  ;;  %v4771_v11 = vrot.slane %v16177_v46, 7  ;;  %v16192_v15 = vld [vmem:[#allocation70_spill] sm:$0xff]  ;;  %v16195_v53 = vld [vmem:[#allocation144_spill] sm:$0xff]  ;;  %v16196_v3 = vld [vmem:[#allocation217_spill] sm:$0xff] }
 0x47c   :  { %v4754_v5 = vsel %vm1800_vm12, %v4753_v35, %v4752_v12  ;;  %v4762_v23 = vsel %vm1794_vm9, %v4761_v9, %v4760_v27  ;;  %v4767_v16 = vrot.slane %v16178_v32, 2  ;;  %v4773_v42 = vrot.slane %v16179_v58, 6  ;;  %v16194_v35 = vld [vmem:[#allocation64_spill] sm:$0xff]  ;;  %v16197_v12 = vld [vmem:[#allocation199_spill] sm:$0xff]  ;;  %v16201_v46 = vld [vmem:[#allocation53_spill] sm:$0xff] }
 0x47d   :  { %v4756_v55 = vsel %vm1802_vm13, %v4755_v24, %v4754_v5  ;;  %v4764_v54 = vsel %vm1796_vm10, %v4763_v26, %v4762_v23  ;;  %v4769_v18 = vrot.slane %v16180_v2, 1  ;;  %v4772_v8 = vsel %vm1790_vm7, %v4771_v11, %v16181_v62  ;;  %v16198_v24 = vld [vmem:[#allocation137_spill] sm:$0xff]  ;;  %v16200_v31 = vld [vmem:[#allocation71_spill] sm:$0xff] }
 0x47e   :  { %v4766_v6 = vsel %vm1798_vm11, %v4765_v10, %v4764_v54  ;;  %v4775_v21 = vrot.slane %v16182_v36, 5  ;;  %4874 = vst [vmem:[#allocation5 + $0x68] sm:$0xff] %v4756_v55  ;;  %v4774_v48 = vsel %vm1792_vm8, %v4773_v42, %v4772_v8  ;;  %v4777_v63 = vrot.slane %v16183_v0, 4  ;;  %v16202_v32 = vld [vmem:[#allocation145_spill] sm:$0xff] }
 0x47f   :  { %v4768_v45 = vsel %vm1800_vm12, %v4767_v16, %v4766_v6  ;;  %v4779_v61 = vrot.slane %v16184_v19, 3  ;;  %v4785_v1 = vrot.slane %v16185_v30, 7  ;;  %v4787_v14 = vrot.slane %v16186_v17, 6  ;;  %v16203_v58 = vld [vmem:[#allocation133_spill] sm:$0xff] }
 0x480   :  { %v4770_v52 = vsel %vm1802_vm13, %v4769_v18, %v4768_v45  ;;  %v4776_v34 = vsel %vm1794_vm9, %v4775_v21, %v4774_v48  ;;  %v4781_v13 = vrot.slane %v16187_v47, 2  ;;  %v4783_v25 = vrot.slane %v16188_v38, 1  ;;  %v16204_v18 = vld [vmem:[#allocation200_spill] sm:$0xff]  ;;  %v16205_v8 = vld [vmem:[#allocation65_spill] sm:$0xff]  ;;  %v16206_v45 = vld [vmem:[#allocation146_spill] sm:$0xff] }
 0x481   :  { %v4778_v4 = vsel %vm1796_vm10, %v4777_v63, %v4776_v34  ;;  %v4789_v28 = vrot.slane %v16189_v56, 5  ;;  %4875 = vst [vmem:[#allocation5 + $0x70] sm:$0xff] %v4770_v52  ;;  %v4786_v43 = vsel %vm1790_vm7, %v4785_v1, %v16190_v44  ;;  %v4791_v20 = vrot.slane %v16191_v41, 4  ;;  %v16207_v63 = vld [vmem:[#allocation68_spill] sm:$0xff]  ;;  %v16209_v1 = vld [vmem:[#allocation131_spill] sm:$0xff]  ;;  %v16210_v47 = vld [vmem:[#allocation73_spill] sm:$0xff] }
 0x482   :  { %v4780_v40 = vsel %vm1798_vm11, %v4779_v61, %v4778_v4  ;;  %v4793_v51 = vrot.slane %v16192_v15, 3  ;;  %v4788_v39 = vsel %vm1792_vm8, %v4787_v14, %v4786_v43  ;;  %v4799_v33 = vrot.slane %v16193_v57, 7  ;;  %v16208_v34 = vld [vmem:[#allocation56_spill] sm:$0xff]  ;;  %v16211_v38 = vld [vmem:[#allocation54_spill] sm:$0xff] }
 0x483   :  { %v4782_v59 = vsel %vm1800_vm12, %v4781_v13, %v4780_v40  ;;  %v4801_v22 = vrot.slane %v16194_v35, 6  ;;  %v4790_v7 = vsel %vm1794_vm9, %v4789_v28, %v4788_v39  ;;  %v4795_v37 = vrot.slane %v16195_v53, 2  ;;  %v16212_v28 = vld [vmem:[#allocation147_spill] sm:$0xff]  ;;  %v16213_v44 = vld [vmem:[#allocation58_spill] sm:$0xff]  ;;  %v16216_v35 = vld [vmem:[#allocation72_spill] sm:$0xff] }
 0x484   :  { %v4784_v50 = vsel %vm1802_vm13, %v4783_v25, %v4782_v59  ;;  %v4797_v49 = vrot.slane %v16196_v3, 1  ;;  %v4792_v9 = vsel %vm1796_vm10, %v4791_v20, %v4790_v7  ;;  %v4800_v29 = vsel %vm1790_vm7, %v4799_v33, %v16197_v12  ;;  %v16214_v41 = vld [vmem:[#allocation66_spill] sm:$0xff]  ;;  %v16215_v59 = vld [vmem:[#allocation140_spill] sm:$0xff] }
 0x485   :  { %v4803_v27 = vrot.slane %v16198_v24, 5  ;;  %v4805_v26 = vrot.slane %v16199_v60, 4  ;;  %4876 = vst [vmem:[#allocation5 + $0x78] sm:$0xff] %v4784_v50  ;;  %v4794_v5 = vsel %vm1798_vm11, %v4793_v51, %v4792_v9  ;;  %v4802_v23 = vsel %vm1792_vm8, %v4801_v22, %v4800_v29  ;;  %v16217_v7 = vld [vmem:[#allocation216_spill] sm:$0xff] }
 0x486   :  { %v4807_v10 = vrot.slane %v16200_v31, 3  ;;  %v4813_v11 = vrot.slane %v16201_v46, 7  ;;  %v4796_v55 = vsel %vm1800_vm12, %v4795_v37, %v4794_v5  ;;  %v4809_v16 = vrot.slane %v16202_v32, 2  ;;  %v16218_v3 = vld [vmem:[#allocation148_spill] sm:$0xff] }
 0x487   :  { %v4804_v54 = vsel %vm1794_vm9, %v4803_v27, %v4802_v23  ;;  %v4815_v42 = vrot.slane %v16203_v58, 6  ;;  %v4798_v6 = vsel %vm1802_vm13, %v4797_v49, %v4796_v55  ;;  %v4817_v36 = vrot.slane %v16205_v8, 5 }
 0x488   :  { %v4806_v2 = vsel %vm1796_vm10, %v4805_v26, %v4804_v54  ;;  %v4814_v62 = vsel %vm1790_vm7, %v4813_v11, %v16204_v18  ;;  %v4811_v48 = vrot.slane %v16206_v45, 1  ;;  %v4819_v19 = vrot.slane %v16207_v63, 4  ;;  %4877 = vst [vmem:[#allocation5 + $0x80] sm:$0xff] %v4798_v6 }
 0x489   :  { %v4808_v21 = vsel %vm1798_vm11, %v4807_v10, %v4806_v2  ;;  %v4816_v0 = vsel %vm1792_vm8, %v4815_v42, %v4814_v62  ;;  %v4821_v30 = vrot.slane %v16208_v34, 3  ;;  %v4827_v17 = vrot.slane %v16209_v1, 7 }
 0x48a   :  { %v4810_v61 = vsel %vm1800_vm12, %v4809_v16, %v4808_v21  ;;  %v4818_v52 = vsel %vm1794_vm9, %v4817_v36, %v4816_v0  ;;  %v4823_v13 = vrot.slane %v16210_v47, 2  ;;  %v4829_v25 = vrot.slane %v16211_v38, 6 }
 0x48b   :  { %v4812_v14 = vsel %vm1802_vm13, %v4811_v48, %v4810_v61  ;;  %v4820_v4 = vsel %vm1796_vm10, %v4819_v19, %v4818_v52  ;;  %v4825_v40 = vrot.slane %v16212_v28, 1  ;;  %v4828_v43 = vsel %vm1790_vm7, %v4827_v17, %v16213_v44 }
 0x48c   :  { %v4822_v56 = vsel %vm1798_vm11, %v4821_v30, %v4820_v4  ;;  %v4831_v20 = vrot.slane %v16214_v41, 5  ;;  %4878 = vst [vmem:[#allocation5 + $0x88] sm:$0xff] %v4812_v14  ;;  %v4830_v51 = vsel %vm1792_vm8, %v4829_v25, %v4828_v43  ;;  %v4833_v39 = vrot.slane %v16215_v59, 4 }
 0x48d   :  { %v4824_v15 = vsel %vm1800_vm12, %v4823_v13, %v4822_v56  ;;  %v4835_v22 = vrot.slane %v16216_v35, 3  ;;  %v4837_v53 = vrot.slane %v16217_v7, 2  ;;  %v4839_v49 = vrot.slane %v16218_v3, 1 }
 0x48e   :  { %v4826_v57 = vsel %vm1802_vm13, %v4825_v40, %v4824_v15  ;;  %v4832_v33 = vsel %vm1794_vm9, %v4831_v20, %v4830_v51 }
 0x48f   :  { %v4834_v50 = vsel %vm1796_vm10, %v4833_v39, %v4832_v33  ;;  %4879 = vst [vmem:[#allocation5 + $0x90] sm:$0xff] %v4826_v57 }
 0x490   :  { %v4836_v37 = vsel %vm1798_vm11, %v4835_v22, %v4834_v50 }
 0x491   :  { %v4838_v9 = vsel %vm1800_vm12, %v4837_v53, %v4836_v37 }
 0x492   :  { %v4840_v12 = vsel %vm1802_vm13, %v4839_v49, %v4838_v9 }
 0x493   :  { %4880 = vst [vmem:[#allocation5 + $0x98] sm:$0xff] %v4840_v12 }
 0x494   :  { %5070 = shalt.err (!%p5067_p12)
}
 0x495   :  { %s5071_s30 = scalar_lea.hbm %s12710_s2, 2560 }
 0x496   :  { %p5072_p13 = scmp.ne.s32.totalorder %s12710_s2, %s5071_s30  ;;  %p5075_p0 = scmp.lt.u32.totalorder %s5071_s30, %s12710_s2 }
 0x498   :  { %p5077_p1 = pnand %p5075_p0, %p5072_p13 }
 0x49a   :  { %5080 = shalt.err (!%p5077_p1)
}
 0x49b   :  { %s5090_s7 = smov 1280   ;;  %s5091_s8 = smov 80  }
 0x49c   :  { %4892 = dma.vmem_to_hbm [thread:$0]  %s4887_s1, 2560, %s12710_s2, [#allocation4], %s5090_s7, %s5090_s7, %s5091_s8  }
 0x49d   :  { %5083 = dma.done.wait [#allocation4], 2560  }
 0x49e   :  { %5084 = vsyncadd [#allocation4], 4294964736 }
 0x49f   :  { %4896 = vsyncpa [#allocation3], 1 }
 0x4a0   :  { %4897 = vsyncpa [#allocation4], 1 }

</bundles_post_ra>
